<compile_context>
chip_gen: v5e
topology: v5e:2x2
jax: 0.10.0
libtpu: 0.0.40
codegen_flags: <defaults>
</compile_context>

<pallas_src>
import functools

import jax
import jax.numpy as jnp
from jax.experimental import pallas as pl
from jax.experimental.pallas import tpu as pltpu

# ----------------------------- config ---------------------------------------
N = 2                       # batch
CIN = 64                    # stand-in for 1024 channels of the real head
H = W = 8                   # stand-in for the 14x14 darknet feature map
S = 4                       # grid size (stand-in for 7); 8x8 --stride2--> 4x4
B_BOX = 2
NUM_CLASSES = 20
OUT_PER_CELL = B_BOX * 5 + NUM_CLASSES          # 30
HIDDEN = 256                # stand-in for 4096
FLAT = S * S * CIN          # 4*4*64 = 1024  (== 7*7*1024 in the real model)
OUT_DIM = S * S * OUT_PER_CELL                  # 480
OUT_PAD = ((OUT_DIM + 127) // 128) * 128        # 512: lane-dense fc2 output
NEG_SLOPE = 0.1
BN_EPS = 1e-5


# ------------------------- Pallas kernels -----------------------------------
def _conv_bn_lrelu_kernel(x_ref, w_ref, scale_ref, shift_ref, o_ref, *scratch,
                          nb, hin, win, hout, wout, cin, stride):
    """3x3 / pad=1 / stride={1,2} conv + folded BatchNorm + LeakyReLU, whole batch block.

    x_ref:    (nb, hin, win, cin)      bf16  NHWC input block
    w_ref:    (9*cin, cout_t)          bf16  tap-major weight block (t = ky*3 + kx)
    scale_ref/shift_ref: (1, cout_t)   f32   folded BN scale / (BN shift + conv bias)
    o_ref:    (nb, hout, wout, cout_t) bf16
    scratch:  xpad (nb, hin+2, win+2, cin) f32, [rows (nb, hout, win+2, cin) f32],
              patch (nb, hout, wout, 9*cin) bf16 (im2col)
    """
    if stride == 1:
        xpad_ref, patch_ref = scratch
        rows_ref = None
    else:
        xpad_ref, rows_ref, patch_ref = scratch
    m = nb * hout * wout
    cout_t = o_ref.shape[-1]

    # Zero-pad (padding=1) in VMEM -- no jnp.pad / extra HBM pass over the activation.
    xpad_ref[...] = jnp.zeros_like(xpad_ref)
    xpad_ref[:, 1:hin + 1, 1:win + 1, :] = x_ref[...].astype(jnp.float32)

    # im2col: patch[n, oy, ox, t*cin + c] = xpad[n, stride*oy + ky, stride*ox + kx, c].
    for ky in range(3):
        if stride == 1:
            for kx in range(3):
                t = ky * 3 + kx
                tap = xpad_ref[:, ky:ky + hout, kx:kx + wout, :]
                patch_ref[:, :, :, t * cin:(t + 1) * cin] = tap.astype(jnp.bfloat16)
        else:
            # Gather the strided rows (leading dim -> static copies) ...
            for oy in range(hout):
                rows_ref[:, oy, :, :] = xpad_ref[:, stride * oy + ky, :, :]
            # ... then subsample the w (sublane) axis with static per-column reads.
            for kx in range(3):
                t = ky * 3 + kx
                for ox in range(wout):
                    col = rows_ref[:, :, stride * ox + kx, :]          # (nb, hout, cin)
                    patch_ref[:, :, ox, t * cin:(t + 1) * cin] = col.astype(jnp.bfloat16)

    # Single big-K matmul on the MXU (bf16 inputs, fp32 accumulation).
    patch2d = patch_ref[...].reshape(m, 9 * cin)
    acc = jnp.dot(patch2d, w_ref[...], preferred_element_type=jnp.float32)

    # Folded BatchNorm (+ conv bias) and LeakyReLU(0.1) epilogue.
    y = acc * scale_ref[...] + shift_ref[...]
    y = jnp.maximum(y, NEG_SLOPE * y)
    o_ref[...] = y.reshape(nb, hout, wout, cout_t).astype(o_ref.dtype)


def _head_fc_kernel(x_ref, w1_ref, b1_ref, w2_ref, b2_ref, o_ref, acc_ref):
    """Flatten -> Linear (K-tiled) -> LeakyReLU -> (Dropout=identity, eval)
       -> Linear -> Sigmoid, fused into the finalize step."""
    k = pl.program_id(0)

    @pl.when(k == 0)
    def _init():
        acc_ref[...] = jnp.zeros_like(acc_ref)

    acc_ref[...] += jnp.dot(x_ref[...], w1_ref[...],
                            preferred_element_type=jnp.float32)

    @pl.when(k == pl.num_programs(0) - 1)
    def _finalize():
        h = acc_ref[...] + b1_ref[...]                       # (N, HIDDEN) f32
        h = jnp.maximum(h, NEG_SLOPE * h)                    # LeakyReLU(0.1)
        # nn.Dropout(0.5): identity in inference mode.
        o = jnp.dot(h.astype(w2_ref.dtype), w2_ref[...],
                    preferred_element_type=jnp.float32) + b2_ref[...]
        o_ref[...] = jax.nn.sigmoid(o)                       # lane-dense (N, OUT_PAD)


# --------------------------- wrappers ----------------------------------------
def conv_bn_lrelu(x_nhwc, w9, scale, shift, *, stride):
    n, hin, win, cin = x_nhwc.shape
    cout = w9.shape[-1]
    hout = (hin + 2 - 3) // stride + 1
    wout = (win + 2 - 3) // stride + 1
    nb = n                                  # whole batch per grid step -> M = nb*hout*wout
    tcout = min(cout, 256)                  # tile output channels (VMEM headroom at real size)
    assert cout % tcout == 0

    scratch = [pltpu.VMEM((nb, hin + 2, win + 2, cin), jnp.float32)]       # padded input
    if stride != 1:
        scratch.append(pltpu.VMEM((nb, hout, win + 2, cin), jnp.float32))  # strided rows
    scratch.append(pltpu.VMEM((nb, hout, wout, 9 * cin), jnp.bfloat16))    # im2col patch

    kernel = functools.partial(
        _conv_bn_lrelu_kernel, nb=nb, hin=hin, win=win, hout=hout, wout=wout,
        cin=cin, stride=stride)

    return pl.pallas_call(
        kernel,
        out_shape=jax.ShapeDtypeStruct((n, hout, wout, cout), jnp.bfloat16),
        grid_spec=pltpu.PrefetchScalarGridSpec(
            num_scalar_prefetch=0,
            grid=(n // nb, cout // tcout),
            in_specs=[
                pl.BlockSpec((nb, hin, win, cin), lambda b, j: (b, 0, 0, 0)),
                pl.BlockSpec((9 * cin, tcout), lambda b, j: (0, j)),
                pl.BlockSpec((1, tcout), lambda b, j: (0, j)),
                pl.BlockSpec((1, tcout), lambda b, j: (0, j)),
            ],
            out_specs=pl.BlockSpec((nb, hout, wout, tcout),
                                   lambda b, j: (b, 0, 0, j)),
            scratch_shapes=scratch,
        ),
        compiler_params=pltpu.CompilerParams(
            dimension_semantics=("parallel", "parallel")),
    )(x_nhwc, w9, scale, shift)


def head_fc(x_flat, w1, b1, w2, b2):
    n, flat = x_flat.shape
    hidden = w1.shape[1]
    out_pad = w2.shape[1]
    tk = 256 if flat % 256 == 0 else flat       # K-tile: stream fc1_w, never fully resident
    return pl.pallas_call(
        _head_fc_kernel,
        out_shape=jax.ShapeDtypeStruct((n, out_pad), jnp.float32),
        grid_spec=pltpu.PrefetchScalarGridSpec(
            num_scalar_prefetch=0,
            grid=(flat // tk,),
            in_specs=[
                pl.BlockSpec((n, tk), lambda k: (0, k)),
                pl.BlockSpec((tk, hidden), lambda k: (k, 0)),
                pl.BlockSpec((1, hidden), lambda k: (0, 0)),
                pl.BlockSpec((hidden, out_pad), lambda k: (0, 0)),
                pl.BlockSpec((1, out_pad), lambda k: (0, 0)),
            ],
            out_specs=pl.BlockSpec((n, out_pad), lambda k: (0, 0)),
            scratch_shapes=[pltpu.VMEM((n, hidden), jnp.float32)],
        ),
        compiler_params=pltpu.CompilerParams(dimension_semantics=("arbitrary",)),
    )(x_flat, w1, b1, w2, b2)


def yolo_v1_forward(x_nchw, params):
    # TODO(synk): the Darknet backbone class is not defined in the provided source (and
    # its fc is replaced by nn.Identity); it is treated as identity here, so the input is
    # the backbone feature map of shape [b, CIN, H, W] (NCHW like PyTorch).
    x = jnp.transpose(x_nchw, (0, 2, 3, 1)).astype(jnp.bfloat16)          # NCHW -> NHWC

    # Shared BatchNorm2d folded to per-channel scale/shift (inference semantics: running
    # statistics).  Each conv's bias is folded into the shift.
    bn_scale = params["bn_gamma"] / jnp.sqrt(params["bn_var"] + BN_EPS)   # (1, C) f32
    bn_shift = params["bn_beta"] - params["bn_mean"] * bn_scale

    def shift_for(i):
        return params[f"conv{i}_b"] * bn_scale + bn_shift

    x = conv_bn_lrelu(x, params["conv1_w"], bn_scale, shift_for(1), stride=1)  # (N,8,8,C)
    x = conv_bn_lrelu(x, params["conv2_w"], bn_scale, shift_for(2), stride=2)  # (N,4,4,C)
    x = conv_bn_lrelu(x, params["conv3_w"], bn_scale, shift_for(3), stride=1)
    x = conv_bn_lrelu(x, params["conv4_w"], bn_scale, shift_for(4), stride=1)

    # fc1_w rows are stored in NHWC-flatten order (permuted once at init), so a plain
    # contiguous reshape suffices here -- no NCHW transpose / extra HBM roundtrip.
    x_flat = x.reshape(x.shape[0], -1)                                     # (N, FLAT) bf16

    out = head_fc(x_flat, params["fc1_w"], params["fc1_b"],
                  params["fc2_w"], params["fc2_b"])                        # (N, OUT_PAD)
    return out[:, :OUT_DIM].reshape(-1, S, S, OUT_PER_CELL)


# ------------------------- deterministic params ------------------------------
def init_params(key):
    ks = jax.random.split(key, 16)

    def nrm(k, shape, scale=0.05):
        return scale * jax.random.normal(k, shape, dtype=jnp.float32)

    p = {}
    for i in range(4):
        # Conv weights stored tap-major (ky, kx, cin, cout) -> (9*cin, cout), bf16, once
        # at init (from a PyTorch checkpoint: w_pt.transpose(2, 3, 1, 0).reshape(9*cin, cout)).
        w = nrm(ks[2 * i], (3, 3, CIN, CIN))
        p[f"conv{i + 1}_w"] = w.reshape(9 * CIN, CIN).astype(jnp.bfloat16)
        p[f"conv{i + 1}_b"] = nrm(ks[2 * i + 1], (1, CIN))
    p["bn_gamma"] = 1.0 + nrm(ks[8], (1, CIN))
    p["bn_beta"] = nrm(ks[9], (1, CIN))
    p["bn_mean"] = nrm(ks[10], (1, CIN))
    p["bn_var"] = 1.0 + 0.2 * jnp.abs(jax.random.normal(ks[11], (1, CIN),
                                                        dtype=jnp.float32))
    # fc1_w rows in NHWC-flatten order ((y, x, c) major->minor); a PyTorch checkpoint
    # (rows in (c, y, x) order) would be row-permuted once here at init.
    p["fc1_w"] = nrm(ks[12], (FLAT, HIDDEN), 0.02).astype(jnp.bfloat16)
    p["fc1_b"] = nrm(ks[13], (1, HIDDEN))
    # fc2 output padded to OUT_PAD lanes (zeros) for a lane-dense final store.
    w2 = nrm(ks[14], (HIDDEN, OUT_DIM), 0.02)
    p["fc2_w"] = jnp.pad(w2, ((0, 0), (0, OUT_PAD - OUT_DIM))).astype(jnp.bfloat16)
    p["fc2_b"] = jnp.pad(nrm(ks[15], (1, OUT_DIM)), ((0, 0), (0, OUT_PAD - OUT_DIM)))
    return p


# --------------------------------- main ---------------------------------------
if __name__ == "__main__":
    key = jax.random.PRNGKey(0)
    pkey, xkey = jax.random.split(key)
    params = init_params(pkey)
    x = jax.random.normal(xkey, (N, CIN, H, W), dtype=jnp.float32)   # NCHW input

    fwd = jax.jit(yolo_v1_forward)
    out = fwd(x, params)
    jax.block_until_ready(out)

    assert out.shape == (N, S, S, OUT_PER_CELL), out.shape
    assert out.dtype == jnp.float32
    assert bool(jnp.all((out >= 0.0) & (out <= 1.0)))                # sigmoid range
    print("KERNEL_OK")
</pallas_src>

<mosaic_0001>
module attributes {stable_mosaic.version = 11 : i64} {
  func.func @_conv_bn_lrelu_kernel(%arg0: i32, %arg1: i32, %arg2: memref<2x8x8x64xbf16, #tpu.memory_space<vmem>>, %arg3: memref<576x64xbf16, #tpu.memory_space<vmem>>, %arg4: memref<1x64xf32, #tpu.memory_space<vmem>>, %arg5: memref<1x64xf32, #tpu.memory_space<vmem>>, %arg6: memref<2x8x8x64xbf16, #tpu.memory_space<vmem>>, %arg7: memref<2x10x10x64xf32, #tpu.memory_space<vmem>>, %arg8: memref<2x8x8x576xbf16, #tpu.memory_space<vmem>>) attributes {dimension_semantics = [#tpu.dimension_semantics<parallel>, #tpu.dimension_semantics<parallel>], iteration_bounds = array<i64: 1, 1>, scalar_prefetch = 0 : i64, scratch_operands = 2 : i64, tpu.core_type = #tpu.core_type<tc>, window_params = [{transform_indices = @transform_0, window_bounds = array<i64: 2, 8, 8, 64>}, {transform_indices = @transform_1, window_bounds = array<i64: 576, 64>}, {transform_indices = @transform_2, window_bounds = array<i64: 1, 64>}, {transform_indices = @transform_3, window_bounds = array<i64: 1, 64>}, {transform_indices = @transform_4, window_bounds = array<i64: 2, 8, 8, 64>}]} {
    %cst = arith.constant 0.000000e+00 : f32
    %0 = vector.broadcast %cst : f32 to vector<2x10x10x64xf32>
    %c0 = arith.constant 0 : index
    %c0_0 = arith.constant 0 : index
    %c0_1 = arith.constant 0 : index
    %c0_2 = arith.constant 0 : index
    %1 = vector.load %arg7[%c0, %c0_0, %c0_1, %c0_2] : memref<2x10x10x64xf32, #tpu.memory_space<vmem>>, vector<2x10x10x64xf32>
    tpu.vector_store %arg7[%c0, %c0_0, %c0_1, %c0_2], %0 {strides = array<i32>} : memref<2x10x10x64xf32, #tpu.memory_space<vmem>>, vector<2x10x10x64xf32>,
    %c0_3 = arith.constant 0 : index
    %c0_4 = arith.constant 0 : index
    %c0_5 = arith.constant 0 : index
    %c0_6 = arith.constant 0 : index
    %2 = vector.load %arg2[%c0_3, %c0_4, %c0_5, %c0_6] : memref<2x8x8x64xbf16, #tpu.memory_space<vmem>>, vector<2x8x8x64xbf16>
    %3 = arith.extf %2 : vector<2x8x8x64xbf16> to vector<2x8x8x64xf32>
    %c0_7 = arith.constant 0 : index
    %c1 = arith.constant 1 : index
    %c1_8 = arith.constant 1 : index
    %c0_9 = arith.constant 0 : index
    %4 = vector.load %arg7[%c0_7, %c1, %c1_8, %c0_9] : memref<2x10x10x64xf32, #tpu.memory_space<vmem>>, vector<2x8x8x64xf32>
    tpu.vector_store %arg7[%c0_7, %c1, %c1_8, %c0_9], %3 {strides = array<i32>} : memref<2x10x10x64xf32, #tpu.memory_space<vmem>>, vector<2x8x8x64xf32>,
    %c0_10 = arith.constant 0 : index
    %c0_11 = arith.constant 0 : index
    %c0_12 = arith.constant 0 : index
    %c0_13 = arith.constant 0 : index
    %5 = vector.load %arg7[%c0_10, %c0_11, %c0_12, %c0_13] : memref<2x10x10x64xf32, #tpu.memory_space<vmem>>, vector<2x8x8x64xf32>
    %6 = arith.truncf %5 : vector<2x8x8x64xf32> to vector<2x8x8x64xbf16>
    %c0_14 = arith.constant 0 : index
    %c0_15 = arith.constant 0 : index
    %c0_16 = arith.constant 0 : index
    %c0_17 = arith.constant 0 : index
    %7 = vector.load %arg8[%c0_14, %c0_15, %c0_16, %c0_17] : memref<2x8x8x576xbf16, #tpu.memory_space<vmem>>, vector<2x8x8x64xbf16>
    tpu.vector_store %arg8[%c0_14, %c0_15, %c0_16, %c0_17], %6 {strides = array<i32>} : memref<2x8x8x576xbf16, #tpu.memory_space<vmem>>, vector<2x8x8x64xbf16>,
    %c0_18 = arith.constant 0 : index
    %c0_19 = arith.constant 0 : index
    %c1_20 = arith.constant 1 : index
    %c0_21 = arith.constant 0 : index
    %8 = vector.load %arg7[%c0_18, %c0_19, %c1_20, %c0_21] : memref<2x10x10x64xf32, #tpu.memory_space<vmem>>, vector<2x8x8x64xf32>
    %9 = arith.truncf %8 : vector<2x8x8x64xf32> to vector<2x8x8x64xbf16>
    %c0_22 = arith.constant 0 : index
    %c0_23 = arith.constant 0 : index
    %c0_24 = arith.constant 0 : index
    %c64 = arith.constant 64 : index
    %10 = vector.load %arg8[%c0_22, %c0_23, %c0_24, %c64] : memref<2x8x8x576xbf16, #tpu.memory_space<vmem>>, vector<2x8x8x64xbf16>
    tpu.vector_store %arg8[%c0_22, %c0_23, %c0_24, %c64], %9 {strides = array<i32>} : memref<2x8x8x576xbf16, #tpu.memory_space<vmem>>, vector<2x8x8x64xbf16>,
    %c0_25 = arith.constant 0 : index
    %c0_26 = arith.constant 0 : index
    %c2 = arith.constant 2 : index
    %c0_27 = arith.constant 0 : index
    %11 = vector.load %arg7[%c0_25, %c0_26, %c2, %c0_27] : memref<2x10x10x64xf32, #tpu.memory_space<vmem>>, vector<2x8x8x64xf32>
    %12 = arith.truncf %11 : vector<2x8x8x64xf32> to vector<2x8x8x64xbf16>
    %c0_28 = arith.constant 0 : index
    %c0_29 = arith.constant 0 : index
    %c0_30 = arith.constant 0 : index
    %c128 = arith.constant 128 : index
    %13 = vector.load %arg8[%c0_28, %c0_29, %c0_30, %c128] : memref<2x8x8x576xbf16, #tpu.memory_space<vmem>>, vector<2x8x8x64xbf16>
    tpu.vector_store %arg8[%c0_28, %c0_29, %c0_30, %c128], %12 {strides = array<i32>} : memref<2x8x8x576xbf16, #tpu.memory_space<vmem>>, vector<2x8x8x64xbf16>,
    %c0_31 = arith.constant 0 : index
    %c1_32 = arith.constant 1 : index
    %c0_33 = arith.constant 0 : index
    %c0_34 = arith.constant 0 : index
    %14 = vector.load %arg7[%c0_31, %c1_32, %c0_33, %c0_34] : memref<2x10x10x64xf32, #tpu.memory_space<vmem>>, vector<2x8x8x64xf32>
    %15 = arith.truncf %14 : vector<2x8x8x64xf32> to vector<2x8x8x64xbf16>
    %c0_35 = arith.constant 0 : index
    %c0_36 = arith.constant 0 : index
    %c0_37 = arith.constant 0 : index
    %c192 = arith.constant 192 : index
    %16 = vector.load %arg8[%c0_35, %c0_36, %c0_37, %c192] : memref<2x8x8x576xbf16, #tpu.memory_space<vmem>>, vector<2x8x8x64xbf16>
    tpu.vector_store %arg8[%c0_35, %c0_36, %c0_37, %c192], %15 {strides = array<i32>} : memref<2x8x8x576xbf16, #tpu.memory_space<vmem>>, vector<2x8x8x64xbf16>,
    %c0_38 = arith.constant 0 : index
    %c1_39 = arith.constant 1 : index
    %c1_40 = arith.constant 1 : index
    %c0_41 = arith.constant 0 : index
    %17 = vector.load %arg7[%c0_38, %c1_39, %c1_40, %c0_41] : memref<2x10x10x64xf32, #tpu.memory_space<vmem>>, vector<2x8x8x64xf32>
    %18 = arith.truncf %17 : vector<2x8x8x64xf32> to vector<2x8x8x64xbf16>
    %c0_42 = arith.constant 0 : index
    %c0_43 = arith.constant 0 : index
    %c0_44 = arith.constant 0 : index
    %c256 = arith.constant 256 : index
    %19 = vector.load %arg8[%c0_42, %c0_43, %c0_44, %c256] : memref<2x8x8x576xbf16, #tpu.memory_space<vmem>>, vector<2x8x8x64xbf16>
    tpu.vector_store %arg8[%c0_42, %c0_43, %c0_44, %c256], %18 {strides = array<i32>} : memref<2x8x8x576xbf16, #tpu.memory_space<vmem>>, vector<2x8x8x64xbf16>,
    %c0_45 = arith.constant 0 : index
    %c1_46 = arith.constant 1 : index
    %c2_47 = arith.constant 2 : index
    %c0_48 = arith.constant 0 : index
    %20 = vector.load %arg7[%c0_45, %c1_46, %c2_47, %c0_48] : memref<2x10x10x64xf32, #tpu.memory_space<vmem>>, vector<2x8x8x64xf32>
    %21 = arith.truncf %20 : vector<2x8x8x64xf32> to vector<2x8x8x64xbf16>
    %c0_49 = arith.constant 0 : index
    %c0_50 = arith.constant 0 : index
    %c0_51 = arith.constant 0 : index
    %c320 = arith.constant 320 : index
    %22 = vector.load %arg8[%c0_49, %c0_50, %c0_51, %c320] : memref<2x8x8x576xbf16, #tpu.memory_space<vmem>>, vector<2x8x8x64xbf16>
    tpu.vector_store %arg8[%c0_49, %c0_50, %c0_51, %c320], %21 {strides = array<i32>} : memref<2x8x8x576xbf16, #tpu.memory_space<vmem>>, vector<2x8x8x64xbf16>,
    %c0_52 = arith.constant 0 : index
    %c2_53 = arith.constant 2 : index
    %c0_54 = arith.constant 0 : index
    %c0_55 = arith.constant 0 : index
    %23 = vector.load %arg7[%c0_52, %c2_53, %c0_54, %c0_55] : memref<2x10x10x64xf32, #tpu.memory_space<vmem>>, vector<2x8x8x64xf32>
    %24 = arith.truncf %23 : vector<2x8x8x64xf32> to vector<2x8x8x64xbf16>
    %c0_56 = arith.constant 0 : index
    %c0_57 = arith.constant 0 : index
    %c0_58 = arith.constant 0 : index
    %c384 = arith.constant 384 : index
    %25 = vector.load %arg8[%c0_56, %c0_57, %c0_58, %c384] : memref<2x8x8x576xbf16, #tpu.memory_space<vmem>>, vector<2x8x8x64xbf16>
    tpu.vector_store %arg8[%c0_56, %c0_57, %c0_58, %c384], %24 {strides = array<i32>} : memref<2x8x8x576xbf16, #tpu.memory_space<vmem>>, vector<2x8x8x64xbf16>,
    %c0_59 = arith.constant 0 : index
    %c2_60 = arith.constant 2 : index
    %c1_61 = arith.constant 1 : index
    %c0_62 = arith.constant 0 : index
    %26 = vector.load %arg7[%c0_59, %c2_60, %c1_61, %c0_62] : memref<2x10x10x64xf32, #tpu.memory_space<vmem>>, vector<2x8x8x64xf32>
    %27 = arith.truncf %26 : vector<2x8x8x64xf32> to vector<2x8x8x64xbf16>
    %c0_63 = arith.constant 0 : index
    %c0_64 = arith.constant 0 : index
    %c0_65 = arith.constant 0 : index
    %c448 = arith.constant 448 : index
    %28 = vector.load %arg8[%c0_63, %c0_64, %c0_65, %c448] : memref<2x8x8x576xbf16, #tpu.memory_space<vmem>>, vector<2x8x8x64xbf16>
    tpu.vector_store %arg8[%c0_63, %c0_64, %c0_65, %c448], %27 {strides = array<i32>} : memref<2x8x8x576xbf16, #tpu.memory_space<vmem>>, vector<2x8x8x64xbf16>,
    %c0_66 = arith.constant 0 : index
    %c2_67 = arith.constant 2 : index
    %c2_68 = arith.constant 2 : index
    %c0_69 = arith.constant 0 : index
    %29 = vector.load %arg7[%c0_66, %c2_67, %c2_68, %c0_69] : memref<2x10x10x64xf32, #tpu.memory_space<vmem>>, vector<2x8x8x64xf32>
    %30 = arith.truncf %29 : vector<2x8x8x64xf32> to vector<2x8x8x64xbf16>
    %c0_70 = arith.constant 0 : index
    %c0_71 = arith.constant 0 : index
    %c0_72 = arith.constant 0 : index
    %c512 = arith.constant 512 : index
    %31 = vector.load %arg8[%c0_70, %c0_71, %c0_72, %c512] : memref<2x8x8x576xbf16, #tpu.memory_space<vmem>>, vector<2x8x8x64xbf16>
    tpu.vector_store %arg8[%c0_70, %c0_71, %c0_72, %c512], %30 {strides = array<i32>} : memref<2x8x8x576xbf16, #tpu.memory_space<vmem>>, vector<2x8x8x64xbf16>,
    %c0_73 = arith.constant 0 : index
    %c0_74 = arith.constant 0 : index
    %c0_75 = arith.constant 0 : index
    %c0_76 = arith.constant 0 : index
    %32 = vector.load %arg8[%c0_73, %c0_74, %c0_75, %c0_76] : memref<2x8x8x576xbf16, #tpu.memory_space<vmem>>, vector<2x8x8x576xbf16>
    %33 = vector.shape_cast %32 : vector<2x8x8x576xbf16> to vector<128x576xbf16>
    %c0_77 = arith.constant 0 : index
    %c0_78 = arith.constant 0 : index
    %34 = vector.load %arg3[%c0_77, %c0_78] : memref<576x64xbf16, #tpu.memory_space<vmem>>, vector<576x64xbf16>
    %cst_79 = arith.constant dense<0.000000e+00> : vector<128x64xf32>
    %35 = tpu.matmul %33, %34, %cst_79 {dimension_numbers = #tpu.dot_dimension_numbers<[1], [0], [0], [1], [0, 0, 1, 1], [], []>} : vector<128x576xbf16>, vector<576x64xbf16>, vector<128x64xf32> -> vector<128x64xf32>
    %c0_80 = arith.constant 0 : index
    %c0_81 = arith.constant 0 : index
    %36 = vector.load %arg4[%c0_80, %c0_81] : memref<1x64xf32, #tpu.memory_space<vmem>>, vector<1x64xf32>
    %37 = vector.broadcast %36 : vector<1x64xf32> to vector<128x64xf32>
    %38 = arith.mulf %35, %37 : vector<128x64xf32>
    %c0_82 = arith.constant 0 : index
    %c0_83 = arith.constant 0 : index
    %39 = vector.load %arg5[%c0_82, %c0_83] : memref<1x64xf32, #tpu.memory_space<vmem>>, vector<1x64xf32>
    %40 = vector.broadcast %39 : vector<1x64xf32> to vector<128x64xf32>
    %41 = arith.addf %38, %40 : vector<128x64xf32>
    %cst_84 = arith.constant 1.000000e-01 : f32
    %42 = vector.broadcast %cst_84 : f32 to vector<128x64xf32>
    %43 = arith.mulf %42, %41 : vector<128x64xf32>
    %44 = arith.maximumf %41, %43 : vector<128x64xf32>
    %45 = vector.shape_cast %44 : vector<128x64xf32> to vector<2x8x8x64xf32>
    %46 = arith.truncf %45 : vector<2x8x8x64xf32> to vector<2x8x8x64xbf16>
    %c0_85 = arith.constant 0 : index
    %c0_86 = arith.constant 0 : index
    %c0_87 = arith.constant 0 : index
    %c0_88 = arith.constant 0 : index
    %47 = vector.load %arg6[%c0_85, %c0_86, %c0_87, %c0_88] : memref<2x8x8x64xbf16, #tpu.memory_space<vmem>>, vector<2x8x8x64xbf16>
    tpu.vector_store %arg6[%c0_85, %c0_86, %c0_87, %c0_88], %46 {strides = array<i32>} : memref<2x8x8x64xbf16, #tpu.memory_space<vmem>>, vector<2x8x8x64xbf16>,
    return
  }
  func.func @transform_0(%arg0: i32, %arg1: i32) -> (i32, i32, i32, i32) {
    %c0_i32 = arith.constant 0 : i32
    %c0_i32_0 = arith.constant 0 : i32
    %c0_i32_1 = arith.constant 0 : i32
    %c0_i32_2 = arith.constant 0 : i32
    return %arg0, %c0_i32, %c0_i32_0, %c0_i32_1 : i32, i32, i32, i32
  }
  func.func @transform_1(%arg0: i32, %arg1: i32) -> (i32, i32) {
    %c0_i32 = arith.constant 0 : i32
    %c0_i32_0 = arith.constant 0 : i32
    return %c0_i32, %arg1 : i32, i32
  }
  func.func @transform_2(%arg0: i32, %arg1: i32) -> (i32, i32) {
    %c0_i32 = arith.constant 0 : i32
    %c0_i32_0 = arith.constant 0 : i32
    return %c0_i32, %arg1 : i32, i32
  }
  func.func @transform_3(%arg0: i32, %arg1: i32) -> (i32, i32) {
    %c0_i32 = arith.constant 0 : i32
    %c0_i32_0 = arith.constant 0 : i32
    return %c0_i32, %arg1 : i32, i32
  }
  func.func @transform_4(%arg0: i32, %arg1: i32) -> (i32, i32, i32, i32) {
    %c0_i32 = arith.constant 0 : i32
    %c0_i32_0 = arith.constant 0 : i32
    %c0_i32_1 = arith.constant 0 : i32
    return %arg0, %c0_i32, %c0_i32_0, %arg1 : i32, i32, i32, i32
  }
}

module attributes {stable_mosaic.version = 11 : i64} {
  func.func @_conv_bn_lrelu_kernel(%arg0: i32, %arg1: i32, %arg2: memref<2x4x4x64xbf16, #tpu.memory_space<vmem>>, %arg3: memref<576x64xbf16, #tpu.memory_space<vmem>>, %arg4: memref<1x64xf32, #tpu.memory_space<vmem>>, %arg5: memref<1x64xf32, #tpu.memory_space<vmem>>, %arg6: memref<2x4x4x64xbf16, #tpu.memory_space<vmem>>, %arg7: memref<2x6x6x64xf32, #tpu.memory_space<vmem>>, %arg8: memref<2x4x4x576xbf16, #tpu.memory_space<vmem>>) attributes {dimension_semantics = [#tpu.dimension_semantics<parallel>, #tpu.dimension_semantics<parallel>], iteration_bounds = array<i64: 1, 1>, scalar_prefetch = 0 : i64, scratch_operands = 2 : i64, tpu.core_type = #tpu.core_type<tc>, window_params = [{transform_indices = @transform_0, window_bounds = array<i64: 2, 4, 4, 64>}, {transform_indices = @transform_1, window_bounds = array<i64: 576, 64>}, {transform_indices = @transform_2, window_bounds = array<i64: 1, 64>}, {transform_indices = @transform_3, window_bounds = array<i64: 1, 64>}, {transform_indices = @transform_4, window_bounds = array<i64: 2, 4, 4, 64>}]} {
    %cst = arith.constant 0.000000e+00 : f32
    %0 = vector.broadcast %cst : f32 to vector<2x6x6x64xf32>
    %c0 = arith.constant 0 : index
    %c0_0 = arith.constant 0 : index
    %c0_1 = arith.constant 0 : index
    %c0_2 = arith.constant 0 : index
    %1 = vector.load %arg7[%c0, %c0_0, %c0_1, %c0_2] : memref<2x6x6x64xf32, #tpu.memory_space<vmem>>, vector<2x6x6x64xf32>
    tpu.vector_store %arg7[%c0, %c0_0, %c0_1, %c0_2], %0 {strides = array<i32>} : memref<2x6x6x64xf32, #tpu.memory_space<vmem>>, vector<2x6x6x64xf32>,
    %c0_3 = arith.constant 0 : index
    %c0_4 = arith.constant 0 : index
    %c0_5 = arith.constant 0 : index
    %c0_6 = arith.constant 0 : index
    %2 = vector.load %arg2[%c0_3, %c0_4, %c0_5, %c0_6] : memref<2x4x4x64xbf16, #tpu.memory_space<vmem>>, vector<2x4x4x64xbf16>
    %3 = arith.extf %2 : vector<2x4x4x64xbf16> to vector<2x4x4x64xf32>
    %c0_7 = arith.constant 0 : index
    %c1 = arith.constant 1 : index
    %c1_8 = arith.constant 1 : index
    %c0_9 = arith.constant 0 : index
    %4 = vector.load %arg7[%c0_7, %c1, %c1_8, %c0_9] : memref<2x6x6x64xf32, #tpu.memory_space<vmem>>, vector<2x4x4x64xf32>
    tpu.vector_store %arg7[%c0_7, %c1, %c1_8, %c0_9], %3 {strides = array<i32>} : memref<2x6x6x64xf32, #tpu.memory_space<vmem>>, vector<2x4x4x64xf32>,
    %c0_10 = arith.constant 0 : index
    %c0_11 = arith.constant 0 : index
    %c0_12 = arith.constant 0 : index
    %c0_13 = arith.constant 0 : index
    %5 = vector.load %arg7[%c0_10, %c0_11, %c0_12, %c0_13] : memref<2x6x6x64xf32, #tpu.memory_space<vmem>>, vector<2x4x4x64xf32>
    %6 = arith.truncf %5 : vector<2x4x4x64xf32> to vector<2x4x4x64xbf16>
    %c0_14 = arith.constant 0 : index
    %c0_15 = arith.constant 0 : index
    %c0_16 = arith.constant 0 : index
    %c0_17 = arith.constant 0 : index
    %7 = vector.load %arg8[%c0_14, %c0_15, %c0_16, %c0_17] : memref<2x4x4x576xbf16, #tpu.memory_space<vmem>>, vector<2x4x4x64xbf16>
    tpu.vector_store %arg8[%c0_14, %c0_15, %c0_16, %c0_17], %6 {strides = array<i32>} : memref<2x4x4x576xbf16, #tpu.memory_space<vmem>>, vector<2x4x4x64xbf16>,
    %c0_18 = arith.constant 0 : index
    %c0_19 = arith.constant 0 : index
    %c1_20 = arith.constant 1 : index
    %c0_21 = arith.constant 0 : index
    %8 = vector.load %arg7[%c0_18, %c0_19, %c1_20, %c0_21] : memref<2x6x6x64xf32, #tpu.memory_space<vmem>>, vector<2x4x4x64xf32>
    %9 = arith.truncf %8 : vector<2x4x4x64xf32> to vector<2x4x4x64xbf16>
    %c0_22 = arith.constant 0 : index
    %c0_23 = arith.constant 0 : index
    %c0_24 = arith.constant 0 : index
    %c64 = arith.constant 64 : index
    %10 = vector.load %arg8[%c0_22, %c0_23, %c0_24, %c64] : memref<2x4x4x576xbf16, #tpu.memory_space<vmem>>, vector<2x4x4x64xbf16>
    tpu.vector_store %arg8[%c0_22, %c0_23, %c0_24, %c64], %9 {strides = array<i32>} : memref<2x4x4x576xbf16, #tpu.memory_space<vmem>>, vector<2x4x4x64xbf16>,
    %c0_25 = arith.constant 0 : index
    %c0_26 = arith.constant 0 : index
    %c2 = arith.constant 2 : index
    %c0_27 = arith.constant 0 : index
    %11 = vector.load %arg7[%c0_25, %c0_26, %c2, %c0_27] : memref<2x6x6x64xf32, #tpu.memory_space<vmem>>, vector<2x4x4x64xf32>
    %12 = arith.truncf %11 : vector<2x4x4x64xf32> to vector<2x4x4x64xbf16>
    %c0_28 = arith.constant 0 : index
    %c0_29 = arith.constant 0 : index
    %c0_30 = arith.constant 0 : index
    %c128 = arith.constant 128 : index
    %13 = vector.load %arg8[%c0_28, %c0_29, %c0_30, %c128] : memref<2x4x4x576xbf16, #tpu.memory_space<vmem>>, vector<2x4x4x64xbf16>
    tpu.vector_store %arg8[%c0_28, %c0_29, %c0_30, %c128], %12 {strides = array<i32>} : memref<2x4x4x576xbf16, #tpu.memory_space<vmem>>, vector<2x4x4x64xbf16>,
    %c0_31 = arith.constant 0 : index
    %c1_32 = arith.constant 1 : index
    %c0_33 = arith.constant 0 : index
    %c0_34 = arith.constant 0 : index
    %14 = vector.load %arg7[%c0_31, %c1_32, %c0_33, %c0_34] : memref<2x6x6x64xf32, #tpu.memory_space<vmem>>, vector<2x4x4x64xf32>
    %15 = arith.truncf %14 : vector<2x4x4x64xf32> to vector<2x4x4x64xbf16>
    %c0_35 = arith.constant 0 : index
    %c0_36 = arith.constant 0 : index
    %c0_37 = arith.constant 0 : index
    %c192 = arith.constant 192 : index
    %16 = vector.load %arg8[%c0_35, %c0_36, %c0_37, %c192] : memref<2x4x4x576xbf16, #tpu.memory_space<vmem>>, vector<2x4x4x64xbf16>
    tpu.vector_store %arg8[%c0_35, %c0_36, %c0_37, %c192], %15 {strides = array<i32>} : memref<2x4x4x576xbf16, #tpu.memory_space<vmem>>, vector<2x4x4x64xbf16>,
    %c0_38 = arith.constant 0 : index
    %c1_39 = arith.constant 1 : index
    %c1_40 = arith.constant 1 : index
    %c0_41 = arith.constant 0 : index
    %17 = vector.load %arg7[%c0_38, %c1_39, %c1_40, %c0_41] : memref<2x6x6x64xf32, #tpu.memory_space<vmem>>, vector<2x4x4x64xf32>
    %18 = arith.truncf %17 : vector<2x4x4x64xf32> to vector<2x4x4x64xbf16>
    %c0_42 = arith.constant 0 : index
    %c0_43 = arith.constant 0 : index
    %c0_44 = arith.constant 0 : index
    %c256 = arith.constant 256 : index
    %19 = vector.load %arg8[%c0_42, %c0_43, %c0_44, %c256] : memref<2x4x4x576xbf16, #tpu.memory_space<vmem>>, vector<2x4x4x64xbf16>
    tpu.vector_store %arg8[%c0_42, %c0_43, %c0_44, %c256], %18 {strides = array<i32>} : memref<2x4x4x576xbf16, #tpu.memory_space<vmem>>, vector<2x4x4x64xbf16>,
    %c0_45 = arith.constant 0 : index
    %c1_46 = arith.constant 1 : index
    %c2_47 = arith.constant 2 : index
    %c0_48 = arith.constant 0 : index
    %20 = vector.load %arg7[%c0_45, %c1_46, %c2_47, %c0_48] : memref<2x6x6x64xf32, #tpu.memory_space<vmem>>, vector<2x4x4x64xf32>
    %21 = arith.truncf %20 : vector<2x4x4x64xf32> to vector<2x4x4x64xbf16>
    %c0_49 = arith.constant 0 : index
    %c0_50 = arith.constant 0 : index
    %c0_51 = arith.constant 0 : index
    %c320 = arith.constant 320 : index
    %22 = vector.load %arg8[%c0_49, %c0_50, %c0_51, %c320] : memref<2x4x4x576xbf16, #tpu.memory_space<vmem>>, vector<2x4x4x64xbf16>
    tpu.vector_store %arg8[%c0_49, %c0_50, %c0_51, %c320], %21 {strides = array<i32>} : memref<2x4x4x576xbf16, #tpu.memory_space<vmem>>, vector<2x4x4x64xbf16>,
    %c0_52 = arith.constant 0 : index
    %c2_53 = arith.constant 2 : index
    %c0_54 = arith.constant 0 : index
    %c0_55 = arith.constant 0 : index
    %23 = vector.load %arg7[%c0_52, %c2_53, %c0_54, %c0_55] : memref<2x6x6x64xf32, #tpu.memory_space<vmem>>, vector<2x4x4x64xf32>
    %24 = arith.truncf %23 : vector<2x4x4x64xf32> to vector<2x4x4x64xbf16>
    %c0_56 = arith.constant 0 : index
    %c0_57 = arith.constant 0 : index
    %c0_58 = arith.constant 0 : index
    %c384 = arith.constant 384 : index
    %25 = vector.load %arg8[%c0_56, %c0_57, %c0_58, %c384] : memref<2x4x4x576xbf16, #tpu.memory_space<vmem>>, vector<2x4x4x64xbf16>
    tpu.vector_store %arg8[%c0_56, %c0_57, %c0_58, %c384], %24 {strides = array<i32>} : memref<2x4x4x576xbf16, #tpu.memory_space<vmem>>, vector<2x4x4x64xbf16>,
    %c0_59 = arith.constant 0 : index
    %c2_60 = arith.constant 2 : index
    %c1_61 = arith.constant 1 : index
    %c0_62 = arith.constant 0 : index
    %26 = vector.load %arg7[%c0_59, %c2_60, %c1_61, %c0_62] : memref<2x6x6x64xf32, #tpu.memory_space<vmem>>, vector<2x4x4x64xf32>
    %27 = arith.truncf %26 : vector<2x4x4x64xf32> to vector<2x4x4x64xbf16>
    %c0_63 = arith.constant 0 : index
    %c0_64 = arith.constant 0 : index
    %c0_65 = arith.constant 0 : index
    %c448 = arith.constant 448 : index
    %28 = vector.load %arg8[%c0_63, %c0_64, %c0_65, %c448] : memref<2x4x4x576xbf16, #tpu.memory_space<vmem>>, vector<2x4x4x64xbf16>
    tpu.vector_store %arg8[%c0_63, %c0_64, %c0_65, %c448], %27 {strides = array<i32>} : memref<2x4x4x576xbf16, #tpu.memory_space<vmem>>, vector<2x4x4x64xbf16>,
    %c0_66 = arith.constant 0 : index
    %c2_67 = arith.constant 2 : index
    %c2_68 = arith.constant 2 : index
    %c0_69 = arith.constant 0 : index
    %29 = vector.load %arg7[%c0_66, %c2_67, %c2_68, %c0_69] : memref<2x6x6x64xf32, #tpu.memory_space<vmem>>, vector<2x4x4x64xf32>
    %30 = arith.truncf %29 : vector<2x4x4x64xf32> to vector<2x4x4x64xbf16>
    %c0_70 = arith.constant 0 : index
    %c0_71 = arith.constant 0 : index
    %c0_72 = arith.constant 0 : index
    %c512 = arith.constant 512 : index
    %31 = vector.load %arg8[%c0_70, %c0_71, %c0_72, %c512] : memref<2x4x4x576xbf16, #tpu.memory_space<vmem>>, vector<2x4x4x64xbf16>
    tpu.vector_store %arg8[%c0_70, %c0_71, %c0_72, %c512], %30 {strides = array<i32>} : memref<2x4x4x576xbf16, #tpu.memory_space<vmem>>, vector<2x4x4x64xbf16>,
    %c0_73 = arith.constant 0 : index
    %c0_74 = arith.constant 0 : index
    %c0_75 = arith.constant 0 : index
    %c0_76 = arith.constant 0 : index
    %32 = vector.load %arg8[%c0_73, %c0_74, %c0_75, %c0_76] : memref<2x4x4x576xbf16, #tpu.memory_space<vmem>>, vector<2x4x4x576xbf16>
    %33 = vector.shape_cast %32 : vector<2x4x4x576xbf16> to vector<32x576xbf16>
    %c0_77 = arith.constant 0 : index
    %c0_78 = arith.constant 0 : index
    %34 = vector.load %arg3[%c0_77, %c0_78] : memref<576x64xbf16, #tpu.memory_space<vmem>>, vector<576x64xbf16>
    %cst_79 = arith.constant dense<0.000000e+00> : vector<32x64xf32>
    %35 = tpu.matmul %33, %34, %cst_79 {dimension_numbers = #tpu.dot_dimension_numbers<[1], [0], [0], [1], [0, 0, 1, 1], [], []>} : vector<32x576xbf16>, vector<576x64xbf16>, vector<32x64xf32> -> vector<32x64xf32>
    %c0_80 = arith.constant 0 : index
    %c0_81 = arith.constant 0 : index
    %36 = vector.load %arg4[%c0_80, %c0_81] : memref<1x64xf32, #tpu.memory_space<vmem>>, vector<1x64xf32>
    %37 = vector.broadcast %36 : vector<1x64xf32> to vector<32x64xf32>
    %38 = arith.mulf %35, %37 : vector<32x64xf32>
    %c0_82 = arith.constant 0 : index
    %c0_83 = arith.constant 0 : index
    %39 = vector.load %arg5[%c0_82, %c0_83] : memref<1x64xf32, #tpu.memory_space<vmem>>, vector<1x64xf32>
    %40 = vector.broadcast %39 : vector<1x64xf32> to vector<32x64xf32>
    %41 = arith.addf %38, %40 : vector<32x64xf32>
    %cst_84 = arith.constant 1.000000e-01 : f32
    %42 = vector.broadcast %cst_84 : f32 to vector<32x64xf32>
    %43 = arith.mulf %42, %41 : vector<32x64xf32>
    %44 = arith.maximumf %41, %43 : vector<32x64xf32>
    %45 = vector.shape_cast %44 : vector<32x64xf32> to vector<2x4x4x64xf32>
    %46 = arith.truncf %45 : vector<2x4x4x64xf32> to vector<2x4x4x64xbf16>
    %c0_85 = arith.constant 0 : index
    %c0_86 = arith.constant 0 : index
    %c0_87 = arith.constant 0 : index
    %c0_88 = arith.constant 0 : index
    %47 = vector.load %arg6[%c0_85, %c0_86, %c0_87, %c0_88] : memref<2x4x4x64xbf16, #tpu.memory_space<vmem>>, vector<2x4x4x64xbf16>
    tpu.vector_store %arg6[%c0_85, %c0_86, %c0_87, %c0_88], %46 {strides = array<i32>} : memref<2x4x4x64xbf16, #tpu.memory_space<vmem>>, vector<2x4x4x64xbf16>,
    return
  }
  func.func @transform_0(%arg0: i32, %arg1: i32) -> (i32, i32, i32, i32) {
    %c0_i32 = arith.constant 0 : i32
    %c0_i32_0 = arith.constant 0 : i32
    %c0_i32_1 = arith.constant 0 : i32
    %c0_i32_2 = arith.constant 0 : i32
    return %arg0, %c0_i32, %c0_i32_0, %c0_i32_1 : i32, i32, i32, i32
  }
  func.func @transform_1(%arg0: i32, %arg1: i32) -> (i32, i32) {
    %c0_i32 = arith.constant 0 : i32
    %c0_i32_0 = arith.constant 0 : i32
    return %c0_i32, %arg1 : i32, i32
  }
  func.func @transform_2(%arg0: i32, %arg1: i32) -> (i32, i32) {
    %c0_i32 = arith.constant 0 : i32
    %c0_i32_0 = arith.constant 0 : i32
    return %c0_i32, %arg1 : i32, i32
  }
  func.func @transform_3(%arg0: i32, %arg1: i32) -> (i32, i32) {
    %c0_i32 = arith.constant 0 : i32
    %c0_i32_0 = arith.constant 0 : i32
    return %c0_i32, %arg1 : i32, i32
  }
  func.func @transform_4(%arg0: i32, %arg1: i32) -> (i32, i32, i32, i32) {
    %c0_i32 = arith.constant 0 : i32
    %c0_i32_0 = arith.constant 0 : i32
    %c0_i32_1 = arith.constant 0 : i32
    return %arg0, %c0_i32, %c0_i32_0, %arg1 : i32, i32, i32, i32
  }
}

module attributes {stable_mosaic.version = 11 : i64} {
  func.func @_conv_bn_lrelu_kernel(%arg0: i32, %arg1: i32, %arg2: memref<2x8x8x64xbf16, #tpu.memory_space<vmem>>, %arg3: memref<576x64xbf16, #tpu.memory_space<vmem>>, %arg4: memref<1x64xf32, #tpu.memory_space<vmem>>, %arg5: memref<1x64xf32, #tpu.memory_space<vmem>>, %arg6: memref<2x4x4x64xbf16, #tpu.memory_space<vmem>>, %arg7: memref<2x10x10x64xf32, #tpu.memory_space<vmem>>, %arg8: memref<2x4x10x64xf32, #tpu.memory_space<vmem>>, %arg9: memref<2x4x4x576xbf16, #tpu.memory_space<vmem>>) attributes {dimension_semantics = [#tpu.dimension_semantics<parallel>, #tpu.dimension_semantics<parallel>], iteration_bounds = array<i64: 1, 1>, scalar_prefetch = 0 : i64, scratch_operands = 3 : i64, tpu.core_type = #tpu.core_type<tc>, window_params = [{transform_indices = @transform_0, window_bounds = array<i64: 2, 8, 8, 64>}, {transform_indices = @transform_1, window_bounds = array<i64: 576, 64>}, {transform_indices = @transform_2, window_bounds = array<i64: 1, 64>}, {transform_indices = @transform_3, window_bounds = array<i64: 1, 64>}, {transform_indices = @transform_4, window_bounds = array<i64: 2, 4, 4, 64>}]} {
    %cst = arith.constant 0.000000e+00 : f32
    %0 = vector.broadcast %cst : f32 to vector<2x10x10x64xf32>
    %c0 = arith.constant 0 : index
    %c0_0 = arith.constant 0 : index
    %c0_1 = arith.constant 0 : index
    %c0_2 = arith.constant 0 : index
    %1 = vector.load %arg7[%c0, %c0_0, %c0_1, %c0_2] : memref<2x10x10x64xf32, #tpu.memory_space<vmem>>, vector<2x10x10x64xf32>
    tpu.vector_store %arg7[%c0, %c0_0, %c0_1, %c0_2], %0 {strides = array<i32>} : memref<2x10x10x64xf32, #tpu.memory_space<vmem>>, vector<2x10x10x64xf32>,
    %c0_3 = arith.constant 0 : index
    %c0_4 = arith.constant 0 : index
    %c0_5 = arith.constant 0 : index
    %c0_6 = arith.constant 0 : index
    %2 = vector.load %arg2[%c0_3, %c0_4, %c0_5, %c0_6] : memref<2x8x8x64xbf16, #tpu.memory_space<vmem>>, vector<2x8x8x64xbf16>
    %3 = arith.extf %2 : vector<2x8x8x64xbf16> to vector<2x8x8x64xf32>
    %c0_7 = arith.constant 0 : index
    %c1 = arith.constant 1 : index
    %c1_8 = arith.constant 1 : index
    %c0_9 = arith.constant 0 : index
    %4 = vector.load %arg7[%c0_7, %c1, %c1_8, %c0_9] : memref<2x10x10x64xf32, #tpu.memory_space<vmem>>, vector<2x8x8x64xf32>
    tpu.vector_store %arg7[%c0_7, %c1, %c1_8, %c0_9], %3 {strides = array<i32>} : memref<2x10x10x64xf32, #tpu.memory_space<vmem>>, vector<2x8x8x64xf32>,
    %c0_10 = arith.constant 0 : index
    %c0_11 = arith.constant 0 : index
    %c0_12 = arith.constant 0 : index
    %c0_13 = arith.constant 0 : index
    %5 = vector.load %arg7[%c0_10, %c0_11, %c0_12, %c0_13] : memref<2x10x10x64xf32, #tpu.memory_space<vmem>>, vector<2x1x10x64xf32>
    %6 = vector.shape_cast %5 : vector<2x1x10x64xf32> to vector<2x10x64xf32>
    %c0_14 = arith.constant 0 : index
    %c0_15 = arith.constant 0 : index
    %c0_16 = arith.constant 0 : index
    %c0_17 = arith.constant 0 : index
    %7 = vector.load %arg8[%c0_14, %c0_15, %c0_16, %c0_17] : memref<2x4x10x64xf32, #tpu.memory_space<vmem>>, vector<2x1x10x64xf32>
    %8 = vector.shape_cast %7 : vector<2x1x10x64xf32> to vector<2x10x64xf32>
    %9 = vector.shape_cast %6 : vector<2x10x64xf32> to vector<2x1x10x64xf32>
    tpu.vector_store %arg8[%c0_14, %c0_15, %c0_16, %c0_17], %9 {strides = array<i32>} : memref<2x4x10x64xf32, #tpu.memory_space<vmem>>, vector<2x1x10x64xf32>,
    %c0_18 = arith.constant 0 : index
    %c2 = arith.constant 2 : index
    %c0_19 = arith.constant 0 : index
    %c0_20 = arith.constant 0 : index
    %10 = vector.load %arg7[%c0_18, %c2, %c0_19, %c0_20] : memref<2x10x10x64xf32, #tpu.memory_space<vmem>>, vector<2x1x10x64xf32>
    %11 = vector.shape_cast %10 : vector<2x1x10x64xf32> to vector<2x10x64xf32>
    %c0_21 = arith.constant 0 : index
    %c1_22 = arith.constant 1 : index
    %c0_23 = arith.constant 0 : index
    %c0_24 = arith.constant 0 : index
    %12 = vector.load %arg8[%c0_21, %c1_22, %c0_23, %c0_24] : memref<2x4x10x64xf32, #tpu.memory_space<vmem>>, vector<2x1x10x64xf32>
    %13 = vector.shape_cast %12 : vector<2x1x10x64xf32> to vector<2x10x64xf32>
    %14 = vector.shape_cast %11 : vector<2x10x64xf32> to vector<2x1x10x64xf32>
    tpu.vector_store %arg8[%c0_21, %c1_22, %c0_23, %c0_24], %14 {strides = array<i32>} : memref<2x4x10x64xf32, #tpu.memory_space<vmem>>, vector<2x1x10x64xf32>,
    %c0_25 = arith.constant 0 : index
    %c4 = arith.constant 4 : index
    %c0_26 = arith.constant 0 : index
    %c0_27 = arith.constant 0 : index
    %15 = vector.load %arg7[%c0_25, %c4, %c0_26, %c0_27] : memref<2x10x10x64xf32, #tpu.memory_space<vmem>>, vector<2x1x10x64xf32>
    %16 = vector.shape_cast %15 : vector<2x1x10x64xf32> to vector<2x10x64xf32>
    %c0_28 = arith.constant 0 : index
    %c2_29 = arith.constant 2 : index
    %c0_30 = arith.constant 0 : index
    %c0_31 = arith.constant 0 : index
    %17 = vector.load %arg8[%c0_28, %c2_29, %c0_30, %c0_31] : memref<2x4x10x64xf32, #tpu.memory_space<vmem>>, vector<2x1x10x64xf32>
    %18 = vector.shape_cast %17 : vector<2x1x10x64xf32> to vector<2x10x64xf32>
    %19 = vector.shape_cast %16 : vector<2x10x64xf32> to vector<2x1x10x64xf32>
    tpu.vector_store %arg8[%c0_28, %c2_29, %c0_30, %c0_31], %19 {strides = array<i32>} : memref<2x4x10x64xf32, #tpu.memory_space<vmem>>, vector<2x1x10x64xf32>,
    %c0_32 = arith.constant 0 : index
    %c6 = arith.constant 6 : index
    %c0_33 = arith.constant 0 : index
    %c0_34 = arith.constant 0 : index
    %20 = vector.load %arg7[%c0_32, %c6, %c0_33, %c0_34] : memref<2x10x10x64xf32, #tpu.memory_space<vmem>>, vector<2x1x10x64xf32>
    %21 = vector.shape_cast %20 : vector<2x1x10x64xf32> to vector<2x10x64xf32>
    %c0_35 = arith.constant 0 : index
    %c3 = arith.constant 3 : index
    %c0_36 = arith.constant 0 : index
    %c0_37 = arith.constant 0 : index
    %22 = vector.load %arg8[%c0_35, %c3, %c0_36, %c0_37] : memref<2x4x10x64xf32, #tpu.memory_space<vmem>>, vector<2x1x10x64xf32>
    %23 = vector.shape_cast %22 : vector<2x1x10x64xf32> to vector<2x10x64xf32>
    %24 = vector.shape_cast %21 : vector<2x10x64xf32> to vector<2x1x10x64xf32>
    tpu.vector_store %arg8[%c0_35, %c3, %c0_36, %c0_37], %24 {strides = array<i32>} : memref<2x4x10x64xf32, #tpu.memory_space<vmem>>, vector<2x1x10x64xf32>,
    %c0_38 = arith.constant 0 : index
    %c0_39 = arith.constant 0 : index
    %c0_40 = arith.constant 0 : index
    %c0_41 = arith.constant 0 : index
    %25 = vector.load %arg8[%c0_38, %c0_39, %c0_40, %c0_41] : memref<2x4x10x64xf32, #tpu.memory_space<vmem>>, vector<2x4x1x64xf32>
    %26 = vector.shape_cast %25 : vector<2x4x1x64xf32> to vector<2x4x64xf32>
    %27 = arith.truncf %26 : vector<2x4x64xf32> to vector<2x4x64xbf16>
    %c0_42 = arith.constant 0 : index
    %c0_43 = arith.constant 0 : index
    %c0_44 = arith.constant 0 : index
    %c0_45 = arith.constant 0 : index
    %28 = vector.load %arg9[%c0_42, %c0_43, %c0_44, %c0_45] : memref<2x4x4x576xbf16, #tpu.memory_space<vmem>>, vector<2x4x1x64xbf16>
    %29 = vector.shape_cast %28 : vector<2x4x1x64xbf16> to vector<2x4x64xbf16>
    %30 = vector.shape_cast %27 : vector<2x4x64xbf16> to vector<2x4x1x64xbf16>
    tpu.vector_store %arg9[%c0_42, %c0_43, %c0_44, %c0_45], %30 {strides = array<i32>} : memref<2x4x4x576xbf16, #tpu.memory_space<vmem>>, vector<2x4x1x64xbf16>,
    %c0_46 = arith.constant 0 : index
    %c0_47 = arith.constant 0 : index
    %c2_48 = arith.constant 2 : index
    %c0_49 = arith.constant 0 : index
    %31 = vector.load %arg8[%c0_46, %c0_47, %c2_48, %c0_49] : memref<2x4x10x64xf32, #tpu.memory_space<vmem>>, vector<2x4x1x64xf32>
    %32 = vector.shape_cast %31 : vector<2x4x1x64xf32> to vector<2x4x64xf32>
    %33 = arith.truncf %32 : vector<2x4x64xf32> to vector<2x4x64xbf16>
    %c0_50 = arith.constant 0 : index
    %c0_51 = arith.constant 0 : index
    %c1_52 = arith.constant 1 : index
    %c0_53 = arith.constant 0 : index
    %34 = vector.load %arg9[%c0_50, %c0_51, %c1_52, %c0_53] : memref<2x4x4x576xbf16, #tpu.memory_space<vmem>>, vector<2x4x1x64xbf16>
    %35 = vector.shape_cast %34 : vector<2x4x1x64xbf16> to vector<2x4x64xbf16>
    %36 = vector.shape_cast %33 : vector<2x4x64xbf16> to vector<2x4x1x64xbf16>
    tpu.vector_store %arg9[%c0_50, %c0_51, %c1_52, %c0_53], %36 {strides = array<i32>} : memref<2x4x4x576xbf16, #tpu.memory_space<vmem>>, vector<2x4x1x64xbf16>,
    %c0_54 = arith.constant 0 : index
    %c0_55 = arith.constant 0 : index
    %c4_56 = arith.constant 4 : index
    %c0_57 = arith.constant 0 : index
    %37 = vector.load %arg8[%c0_54, %c0_55, %c4_56, %c0_57] : memref<2x4x10x64xf32, #tpu.memory_space<vmem>>, vector<2x4x1x64xf32>
    %38 = vector.shape_cast %37 : vector<2x4x1x64xf32> to vector<2x4x64xf32>
    %39 = arith.truncf %38 : vector<2x4x64xf32> to vector<2x4x64xbf16>
    %c0_58 = arith.constant 0 : index
    %c0_59 = arith.constant 0 : index
    %c2_60 = arith.constant 2 : index
    %c0_61 = arith.constant 0 : index
    %40 = vector.load %arg9[%c0_58, %c0_59, %c2_60, %c0_61] : memref<2x4x4x576xbf16, #tpu.memory_space<vmem>>, vector<2x4x1x64xbf16>
    %41 = vector.shape_cast %40 : vector<2x4x1x64xbf16> to vector<2x4x64xbf16>
    %42 = vector.shape_cast %39 : vector<2x4x64xbf16> to vector<2x4x1x64xbf16>
    tpu.vector_store %arg9[%c0_58, %c0_59, %c2_60, %c0_61], %42 {strides = array<i32>} : memref<2x4x4x576xbf16, #tpu.memory_space<vmem>>, vector<2x4x1x64xbf16>,
    %c0_62 = arith.constant 0 : index
    %c0_63 = arith.constant 0 : index
    %c6_64 = arith.constant 6 : index
    %c0_65 = arith.constant 0 : index
    %43 = vector.load %arg8[%c0_62, %c0_63, %c6_64, %c0_65] : memref<2x4x10x64xf32, #tpu.memory_space<vmem>>, vector<2x4x1x64xf32>
    %44 = vector.shape_cast %43 : vector<2x4x1x64xf32> to vector<2x4x64xf32>
    %45 = arith.truncf %44 : vector<2x4x64xf32> to vector<2x4x64xbf16>
    %c0_66 = arith.constant 0 : index
    %c0_67 = arith.constant 0 : index
    %c3_68 = arith.constant 3 : index
    %c0_69 = arith.constant 0 : index
    %46 = vector.load %arg9[%c0_66, %c0_67, %c3_68, %c0_69] : memref<2x4x4x576xbf16, #tpu.memory_space<vmem>>, vector<2x4x1x64xbf16>
    %47 = vector.shape_cast %46 : vector<2x4x1x64xbf16> to vector<2x4x64xbf16>
    %48 = vector.shape_cast %45 : vector<2x4x64xbf16> to vector<2x4x1x64xbf16>
    tpu.vector_store %arg9[%c0_66, %c0_67, %c3_68, %c0_69], %48 {strides = array<i32>} : memref<2x4x4x576xbf16, #tpu.memory_space<vmem>>, vector<2x4x1x64xbf16>,
    %c0_70 = arith.constant 0 : index
    %c0_71 = arith.constant 0 : index
    %c1_72 = arith.constant 1 : index
    %c0_73 = arith.constant 0 : index
    %49 = vector.load %arg8[%c0_70, %c0_71, %c1_72, %c0_73] : memref<2x4x10x64xf32, #tpu.memory_space<vmem>>, vector<2x4x1x64xf32>
    %50 = vector.shape_cast %49 : vector<2x4x1x64xf32> to vector<2x4x64xf32>
    %51 = arith.truncf %50 : vector<2x4x64xf32> to vector<2x4x64xbf16>
    %c0_74 = arith.constant 0 : index
    %c0_75 = arith.constant 0 : index
    %c0_76 = arith.constant 0 : index
    %c64 = arith.constant 64 : index
    %52 = vector.load %arg9[%c0_74, %c0_75, %c0_76, %c64] : memref<2x4x4x576xbf16, #tpu.memory_space<vmem>>, vector<2x4x1x64xbf16>
    %53 = vector.shape_cast %52 : vector<2x4x1x64xbf16> to vector<2x4x64xbf16>
    %54 = vector.shape_cast %51 : vector<2x4x64xbf16> to vector<2x4x1x64xbf16>
    tpu.vector_store %arg9[%c0_74, %c0_75, %c0_76, %c64], %54 {strides = array<i32>} : memref<2x4x4x576xbf16, #tpu.memory_space<vmem>>, vector<2x4x1x64xbf16>,
    %c0_77 = arith.constant 0 : index
    %c0_78 = arith.constant 0 : index
    %c3_79 = arith.constant 3 : index
    %c0_80 = arith.constant 0 : index
    %55 = vector.load %arg8[%c0_77, %c0_78, %c3_79, %c0_80] : memref<2x4x10x64xf32, #tpu.memory_space<vmem>>, vector<2x4x1x64xf32>
    %56 = vector.shape_cast %55 : vector<2x4x1x64xf32> to vector<2x4x64xf32>
    %57 = arith.truncf %56 : vector<2x4x64xf32> to vector<2x4x64xbf16>
    %c0_81 = arith.constant 0 : index
    %c0_82 = arith.constant 0 : index
    %c1_83 = arith.constant 1 : index
    %c64_84 = arith.constant 64 : index
    %58 = vector.load %arg9[%c0_81, %c0_82, %c1_83, %c64_84] : memref<2x4x4x576xbf16, #tpu.memory_space<vmem>>, vector<2x4x1x64xbf16>
    %59 = vector.shape_cast %58 : vector<2x4x1x64xbf16> to vector<2x4x64xbf16>
    %60 = vector.shape_cast %57 : vector<2x4x64xbf16> to vector<2x4x1x64xbf16>
    tpu.vector_store %arg9[%c0_81, %c0_82, %c1_83, %c64_84], %60 {strides = array<i32>} : memref<2x4x4x576xbf16, #tpu.memory_space<vmem>>, vector<2x4x1x64xbf16>,
    %c0_85 = arith.constant 0 : index
    %c0_86 = arith.constant 0 : index
    %c5 = arith.constant 5 : index
    %c0_87 = arith.constant 0 : index
    %61 = vector.load %arg8[%c0_85, %c0_86, %c5, %c0_87] : memref<2x4x10x64xf32, #tpu.memory_space<vmem>>, vector<2x4x1x64xf32>
    %62 = vector.shape_cast %61 : vector<2x4x1x64xf32> to vector<2x4x64xf32>
    %63 = arith.truncf %62 : vector<2x4x64xf32> to vector<2x4x64xbf16>
    %c0_88 = arith.constant 0 : index
    %c0_89 = arith.constant 0 : index
    %c2_90 = arith.constant 2 : index
    %c64_91 = arith.constant 64 : index
    %64 = vector.load %arg9[%c0_88, %c0_89, %c2_90, %c64_91] : memref<2x4x4x576xbf16, #tpu.memory_space<vmem>>, vector<2x4x1x64xbf16>
    %65 = vector.shape_cast %64 : vector<2x4x1x64xbf16> to vector<2x4x64xbf16>
    %66 = vector.shape_cast %63 : vector<2x4x64xbf16> to vector<2x4x1x64xbf16>
    tpu.vector_store %arg9[%c0_88, %c0_89, %c2_90, %c64_91], %66 {strides = array<i32>} : memref<2x4x4x576xbf16, #tpu.memory_space<vmem>>, vector<2x4x1x64xbf16>,
    %c0_92 = arith.constant 0 : index
    %c0_93 = arith.constant 0 : index
    %c7 = arith.constant 7 : index
    %c0_94 = arith.constant 0 : index
    %67 = vector.load %arg8[%c0_92, %c0_93, %c7, %c0_94] : memref<2x4x10x64xf32, #tpu.memory_space<vmem>>, vector<2x4x1x64xf32>
    %68 = vector.shape_cast %67 : vector<2x4x1x64xf32> to vector<2x4x64xf32>
    %69 = arith.truncf %68 : vector<2x4x64xf32> to vector<2x4x64xbf16>
    %c0_95 = arith.constant 0 : index
    %c0_96 = arith.constant 0 : index
    %c3_97 = arith.constant 3 : index
    %c64_98 = arith.constant 64 : index
    %70 = vector.load %arg9[%c0_95, %c0_96, %c3_97, %c64_98] : memref<2x4x4x576xbf16, #tpu.memory_space<vmem>>, vector<2x4x1x64xbf16>
    %71 = vector.shape_cast %70 : vector<2x4x1x64xbf16> to vector<2x4x64xbf16>
    %72 = vector.shape_cast %69 : vector<2x4x64xbf16> to vector<2x4x1x64xbf16>
    tpu.vector_store %arg9[%c0_95, %c0_96, %c3_97, %c64_98], %72 {strides = array<i32>} : memref<2x4x4x576xbf16, #tpu.memory_space<vmem>>, vector<2x4x1x64xbf16>,
    %c0_99 = arith.constant 0 : index
    %c0_100 = arith.constant 0 : index
    %c2_101 = arith.constant 2 : index
    %c0_102 = arith.constant 0 : index
    %73 = vector.load %arg8[%c0_99, %c0_100, %c2_101, %c0_102] : memref<2x4x10x64xf32, #tpu.memory_space<vmem>>, vector<2x4x1x64xf32>
    %74 = vector.shape_cast %73 : vector<2x4x1x64xf32> to vector<2x4x64xf32>
    %75 = arith.truncf %74 : vector<2x4x64xf32> to vector<2x4x64xbf16>
    %c0_103 = arith.constant 0 : index
    %c0_104 = arith.constant 0 : index
    %c0_105 = arith.constant 0 : index
    %c128 = arith.constant 128 : index
    %76 = vector.load %arg9[%c0_103, %c0_104, %c0_105, %c128] : memref<2x4x4x576xbf16, #tpu.memory_space<vmem>>, vector<2x4x1x64xbf16>
    %77 = vector.shape_cast %76 : vector<2x4x1x64xbf16> to vector<2x4x64xbf16>
    %78 = vector.shape_cast %75 : vector<2x4x64xbf16> to vector<2x4x1x64xbf16>
    tpu.vector_store %arg9[%c0_103, %c0_104, %c0_105, %c128], %78 {strides = array<i32>} : memref<2x4x4x576xbf16, #tpu.memory_space<vmem>>, vector<2x4x1x64xbf16>,
    %c0_106 = arith.constant 0 : index
    %c0_107 = arith.constant 0 : index
    %c4_108 = arith.constant 4 : index
    %c0_109 = arith.constant 0 : index
    %79 = vector.load %arg8[%c0_106, %c0_107, %c4_108, %c0_109] : memref<2x4x10x64xf32, #tpu.memory_space<vmem>>, vector<2x4x1x64xf32>
    %80 = vector.shape_cast %79 : vector<2x4x1x64xf32> to vector<2x4x64xf32>
    %81 = arith.truncf %80 : vector<2x4x64xf32> to vector<2x4x64xbf16>
    %c0_110 = arith.constant 0 : index
    %c0_111 = arith.constant 0 : index
    %c1_112 = arith.constant 1 : index
    %c128_113 = arith.constant 128 : index
    %82 = vector.load %arg9[%c0_110, %c0_111, %c1_112, %c128_113] : memref<2x4x4x576xbf16, #tpu.memory_space<vmem>>, vector<2x4x1x64xbf16>
    %83 = vector.shape_cast %82 : vector<2x4x1x64xbf16> to vector<2x4x64xbf16>
    %84 = vector.shape_cast %81 : vector<2x4x64xbf16> to vector<2x4x1x64xbf16>
    tpu.vector_store %arg9[%c0_110, %c0_111, %c1_112, %c128_113], %84 {strides = array<i32>} : memref<2x4x4x576xbf16, #tpu.memory_space<vmem>>, vector<2x4x1x64xbf16>,
    %c0_114 = arith.constant 0 : index
    %c0_115 = arith.constant 0 : index
    %c6_116 = arith.constant 6 : index
    %c0_117 = arith.constant 0 : index
    %85 = vector.load %arg8[%c0_114, %c0_115, %c6_116, %c0_117] : memref<2x4x10x64xf32, #tpu.memory_space<vmem>>, vector<2x4x1x64xf32>
    %86 = vector.shape_cast %85 : vector<2x4x1x64xf32> to vector<2x4x64xf32>
    %87 = arith.truncf %86 : vector<2x4x64xf32> to vector<2x4x64xbf16>
    %c0_118 = arith.constant 0 : index
    %c0_119 = arith.constant 0 : index
    %c2_120 = arith.constant 2 : index
    %c128_121 = arith.constant 128 : index
    %88 = vector.load %arg9[%c0_118, %c0_119, %c2_120, %c128_121] : memref<2x4x4x576xbf16, #tpu.memory_space<vmem>>, vector<2x4x1x64xbf16>
    %89 = vector.shape_cast %88 : vector<2x4x1x64xbf16> to vector<2x4x64xbf16>
    %90 = vector.shape_cast %87 : vector<2x4x64xbf16> to vector<2x4x1x64xbf16>
    tpu.vector_store %arg9[%c0_118, %c0_119, %c2_120, %c128_121], %90 {strides = array<i32>} : memref<2x4x4x576xbf16, #tpu.memory_space<vmem>>, vector<2x4x1x64xbf16>,
    %c0_122 = arith.constant 0 : index
    %c0_123 = arith.constant 0 : index
    %c8 = arith.constant 8 : index
    %c0_124 = arith.constant 0 : index
    %91 = vector.load %arg8[%c0_122, %c0_123, %c8, %c0_124] : memref<2x4x10x64xf32, #tpu.memory_space<vmem>>, vector<2x4x1x64xf32>
    %92 = vector.shape_cast %91 : vector<2x4x1x64xf32> to vector<2x4x64xf32>
    %93 = arith.truncf %92 : vector<2x4x64xf32> to vector<2x4x64xbf16>
    %c0_125 = arith.constant 0 : index
    %c0_126 = arith.constant 0 : index
    %c3_127 = arith.constant 3 : index
    %c128_128 = arith.constant 128 : index
    %94 = vector.load %arg9[%c0_125, %c0_126, %c3_127, %c128_128] : memref<2x4x4x576xbf16, #tpu.memory_space<vmem>>, vector<2x4x1x64xbf16>
    %95 = vector.shape_cast %94 : vector<2x4x1x64xbf16> to vector<2x4x64xbf16>
    %96 = vector.shape_cast %93 : vector<2x4x64xbf16> to vector<2x4x1x64xbf16>
    tpu.vector_store %arg9[%c0_125, %c0_126, %c3_127, %c128_128], %96 {strides = array<i32>} : memref<2x4x4x576xbf16, #tpu.memory_space<vmem>>, vector<2x4x1x64xbf16>,
    %c0_129 = arith.constant 0 : index
    %c1_130 = arith.constant 1 : index
    %c0_131 = arith.constant 0 : index
    %c0_132 = arith.constant 0 : index
    %97 = vector.load %arg7[%c0_129, %c1_130, %c0_131, %c0_132] : memref<2x10x10x64xf32, #tpu.memory_space<vmem>>, vector<2x1x10x64xf32>
    %98 = vector.shape_cast %97 : vector<2x1x10x64xf32> to vector<2x10x64xf32>
    %c0_133 = arith.constant 0 : index
    %c0_134 = arith.constant 0 : index
    %c0_135 = arith.constant 0 : index
    %c0_136 = arith.constant 0 : index
    %99 = vector.load %arg8[%c0_133, %c0_134, %c0_135, %c0_136] : memref<2x4x10x64xf32, #tpu.memory_space<vmem>>, vector<2x1x10x64xf32>
    %100 = vector.shape_cast %99 : vector<2x1x10x64xf32> to vector<2x10x64xf32>
    %101 = vector.shape_cast %98 : vector<2x10x64xf32> to vector<2x1x10x64xf32>
    tpu.vector_store %arg8[%c0_133, %c0_134, %c0_135, %c0_136], %101 {strides = array<i32>} : memref<2x4x10x64xf32, #tpu.memory_space<vmem>>, vector<2x1x10x64xf32>,
    %c0_137 = arith.constant 0 : index
    %c3_138 = arith.constant 3 : index
    %c0_139 = arith.constant 0 : index
    %c0_140 = arith.constant 0 : index
    %102 = vector.load %arg7[%c0_137, %c3_138, %c0_139, %c0_140] : memref<2x10x10x64xf32, #tpu.memory_space<vmem>>, vector<2x1x10x64xf32>
    %103 = vector.shape_cast %102 : vector<2x1x10x64xf32> to vector<2x10x64xf32>
    %c0_141 = arith.constant 0 : index
    %c1_142 = arith.constant 1 : index
    %c0_143 = arith.constant 0 : index
    %c0_144 = arith.constant 0 : index
    %104 = vector.load %arg8[%c0_141, %c1_142, %c0_143, %c0_144] : memref<2x4x10x64xf32, #tpu.memory_space<vmem>>, vector<2x1x10x64xf32>
    %105 = vector.shape_cast %104 : vector<2x1x10x64xf32> to vector<2x10x64xf32>
    %106 = vector.shape_cast %103 : vector<2x10x64xf32> to vector<2x1x10x64xf32>
    tpu.vector_store %arg8[%c0_141, %c1_142, %c0_143, %c0_144], %106 {strides = array<i32>} : memref<2x4x10x64xf32, #tpu.memory_space<vmem>>, vector<2x1x10x64xf32>,
    %c0_145 = arith.constant 0 : index
    %c5_146 = arith.constant 5 : index
    %c0_147 = arith.constant 0 : index
    %c0_148 = arith.constant 0 : index
    %107 = vector.load %arg7[%c0_145, %c5_146, %c0_147, %c0_148] : memref<2x10x10x64xf32, #tpu.memory_space<vmem>>, vector<2x1x10x64xf32>
    %108 = vector.shape_cast %107 : vector<2x1x10x64xf32> to vector<2x10x64xf32>
    %c0_149 = arith.constant 0 : index
    %c2_150 = arith.constant 2 : index
    %c0_151 = arith.constant 0 : index
    %c0_152 = arith.constant 0 : index
    %109 = vector.load %arg8[%c0_149, %c2_150, %c0_151, %c0_152] : memref<2x4x10x64xf32, #tpu.memory_space<vmem>>, vector<2x1x10x64xf32>
    %110 = vector.shape_cast %109 : vector<2x1x10x64xf32> to vector<2x10x64xf32>
    %111 = vector.shape_cast %108 : vector<2x10x64xf32> to vector<2x1x10x64xf32>
    tpu.vector_store %arg8[%c0_149, %c2_150, %c0_151, %c0_152], %111 {strides = array<i32>} : memref<2x4x10x64xf32, #tpu.memory_space<vmem>>, vector<2x1x10x64xf32>,
    %c0_153 = arith.constant 0 : index
    %c7_154 = arith.constant 7 : index
    %c0_155 = arith.constant 0 : index
    %c0_156 = arith.constant 0 : index
    %112 = vector.load %arg7[%c0_153, %c7_154, %c0_155, %c0_156] : memref<2x10x10x64xf32, #tpu.memory_space<vmem>>, vector<2x1x10x64xf32>
    %113 = vector.shape_cast %112 : vector<2x1x10x64xf32> to vector<2x10x64xf32>
    %c0_157 = arith.constant 0 : index
    %c3_158 = arith.constant 3 : index
    %c0_159 = arith.constant 0 : index
    %c0_160 = arith.constant 0 : index
    %114 = vector.load %arg8[%c0_157, %c3_158, %c0_159, %c0_160] : memref<2x4x10x64xf32, #tpu.memory_space<vmem>>, vector<2x1x10x64xf32>
    %115 = vector.shape_cast %114 : vector<2x1x10x64xf32> to vector<2x10x64xf32>
    %116 = vector.shape_cast %113 : vector<2x10x64xf32> to vector<2x1x10x64xf32>
    tpu.vector_store %arg8[%c0_157, %c3_158, %c0_159, %c0_160], %116 {strides = array<i32>} : memref<2x4x10x64xf32, #tpu.memory_space<vmem>>, vector<2x1x10x64xf32>,
    %c0_161 = arith.constant 0 : index
    %c0_162 = arith.constant 0 : index
    %c0_163 = arith.constant 0 : index
    %c0_164 = arith.constant 0 : index
    %117 = vector.load %arg8[%c0_161, %c0_162, %c0_163, %c0_164] : memref<2x4x10x64xf32, #tpu.memory_space<vmem>>, vector<2x4x1x64xf32>
    %118 = vector.shape_cast %117 : vector<2x4x1x64xf32> to vector<2x4x64xf32>
    %119 = arith.truncf %118 : vector<2x4x64xf32> to vector<2x4x64xbf16>
    %c0_165 = arith.constant 0 : index
    %c0_166 = arith.constant 0 : index
    %c0_167 = arith.constant 0 : index
    %c192 = arith.constant 192 : index
    %120 = vector.load %arg9[%c0_165, %c0_166, %c0_167, %c192] : memref<2x4x4x576xbf16, #tpu.memory_space<vmem>>, vector<2x4x1x64xbf16>
    %121 = vector.shape_cast %120 : vector<2x4x1x64xbf16> to vector<2x4x64xbf16>
    %122 = vector.shape_cast %119 : vector<2x4x64xbf16> to vector<2x4x1x64xbf16>
    tpu.vector_store %arg9[%c0_165, %c0_166, %c0_167, %c192], %122 {strides = array<i32>} : memref<2x4x4x576xbf16, #tpu.memory_space<vmem>>, vector<2x4x1x64xbf16>,
    %c0_168 = arith.constant 0 : index
    %c0_169 = arith.constant 0 : index
    %c2_170 = arith.constant 2 : index
    %c0_171 = arith.constant 0 : index
    %123 = vector.load %arg8[%c0_168, %c0_169, %c2_170, %c0_171] : memref<2x4x10x64xf32, #tpu.memory_space<vmem>>, vector<2x4x1x64xf32>
    %124 = vector.shape_cast %123 : vector<2x4x1x64xf32> to vector<2x4x64xf32>
    %125 = arith.truncf %124 : vector<2x4x64xf32> to vector<2x4x64xbf16>
    %c0_172 = arith.constant 0 : index
    %c0_173 = arith.constant 0 : index
    %c1_174 = arith.constant 1 : index
    %c192_175 = arith.constant 192 : index
    %126 = vector.load %arg9[%c0_172, %c0_173, %c1_174, %c192_175] : memref<2x4x4x576xbf16, #tpu.memory_space<vmem>>, vector<2x4x1x64xbf16>
    %127 = vector.shape_cast %126 : vector<2x4x1x64xbf16> to vector<2x4x64xbf16>
    %128 = vector.shape_cast %125 : vector<2x4x64xbf16> to vector<2x4x1x64xbf16>
    tpu.vector_store %arg9[%c0_172, %c0_173, %c1_174, %c192_175], %128 {strides = array<i32>} : memref<2x4x4x576xbf16, #tpu.memory_space<vmem>>, vector<2x4x1x64xbf16>,
    %c0_176 = arith.constant 0 : index
    %c0_177 = arith.constant 0 : index
    %c4_178 = arith.constant 4 : index
    %c0_179 = arith.constant 0 : index
    %129 = vector.load %arg8[%c0_176, %c0_177, %c4_178, %c0_179] : memref<2x4x10x64xf32, #tpu.memory_space<vmem>>, vector<2x4x1x64xf32>
    %130 = vector.shape_cast %129 : vector<2x4x1x64xf32> to vector<2x4x64xf32>
    %131 = arith.truncf %130 : vector<2x4x64xf32> to vector<2x4x64xbf16>
    %c0_180 = arith.constant 0 : index
    %c0_181 = arith.constant 0 : index
    %c2_182 = arith.constant 2 : index
    %c192_183 = arith.constant 192 : index
    %132 = vector.load %arg9[%c0_180, %c0_181, %c2_182, %c192_183] : memref<2x4x4x576xbf16, #tpu.memory_space<vmem>>, vector<2x4x1x64xbf16>
    %133 = vector.shape_cast %132 : vector<2x4x1x64xbf16> to vector<2x4x64xbf16>
    %134 = vector.shape_cast %131 : vector<2x4x64xbf16> to vector<2x4x1x64xbf16>
    tpu.vector_store %arg9[%c0_180, %c0_181, %c2_182, %c192_183], %134 {strides = array<i32>} : memref<2x4x4x576xbf16, #tpu.memory_space<vmem>>, vector<2x4x1x64xbf16>,
    %c0_184 = arith.constant 0 : index
    %c0_185 = arith.constant 0 : index
    %c6_186 = arith.constant 6 : index
    %c0_187 = arith.constant 0 : index
    %135 = vector.load %arg8[%c0_184, %c0_185, %c6_186, %c0_187] : memref<2x4x10x64xf32, #tpu.memory_space<vmem>>, vector<2x4x1x64xf32>
    %136 = vector.shape_cast %135 : vector<2x4x1x64xf32> to vector<2x4x64xf32>
    %137 = arith.truncf %136 : vector<2x4x64xf32> to vector<2x4x64xbf16>
    %c0_188 = arith.constant 0 : index
    %c0_189 = arith.constant 0 : index
    %c3_190 = arith.constant 3 : index
    %c192_191 = arith.constant 192 : index
    %138 = vector.load %arg9[%c0_188, %c0_189, %c3_190, %c192_191] : memref<2x4x4x576xbf16, #tpu.memory_space<vmem>>, vector<2x4x1x64xbf16>
    %139 = vector.shape_cast %138 : vector<2x4x1x64xbf16> to vector<2x4x64xbf16>
    %140 = vector.shape_cast %137 : vector<2x4x64xbf16> to vector<2x4x1x64xbf16>
    tpu.vector_store %arg9[%c0_188, %c0_189, %c3_190, %c192_191], %140 {strides = array<i32>} : memref<2x4x4x576xbf16, #tpu.memory_space<vmem>>, vector<2x4x1x64xbf16>,
    %c0_192 = arith.constant 0 : index
    %c0_193 = arith.constant 0 : index
    %c1_194 = arith.constant 1 : index
    %c0_195 = arith.constant 0 : index
    %141 = vector.load %arg8[%c0_192, %c0_193, %c1_194, %c0_195] : memref<2x4x10x64xf32, #tpu.memory_space<vmem>>, vector<2x4x1x64xf32>
    %142 = vector.shape_cast %141 : vector<2x4x1x64xf32> to vector<2x4x64xf32>
    %143 = arith.truncf %142 : vector<2x4x64xf32> to vector<2x4x64xbf16>
    %c0_196 = arith.constant 0 : index
    %c0_197 = arith.constant 0 : index
    %c0_198 = arith.constant 0 : index
    %c256 = arith.constant 256 : index
    %144 = vector.load %arg9[%c0_196, %c0_197, %c0_198, %c256] : memref<2x4x4x576xbf16, #tpu.memory_space<vmem>>, vector<2x4x1x64xbf16>
    %145 = vector.shape_cast %144 : vector<2x4x1x64xbf16> to vector<2x4x64xbf16>
    %146 = vector.shape_cast %143 : vector<2x4x64xbf16> to vector<2x4x1x64xbf16>
    tpu.vector_store %arg9[%c0_196, %c0_197, %c0_198, %c256], %146 {strides = array<i32>} : memref<2x4x4x576xbf16, #tpu.memory_space<vmem>>, vector<2x4x1x64xbf16>,
    %c0_199 = arith.constant 0 : index
    %c0_200 = arith.constant 0 : index
    %c3_201 = arith.constant 3 : index
    %c0_202 = arith.constant 0 : index
    %147 = vector.load %arg8[%c0_199, %c0_200, %c3_201, %c0_202] : memref<2x4x10x64xf32, #tpu.memory_space<vmem>>, vector<2x4x1x64xf32>
    %148 = vector.shape_cast %147 : vector<2x4x1x64xf32> to vector<2x4x64xf32>
    %149 = arith.truncf %148 : vector<2x4x64xf32> to vector<2x4x64xbf16>
    %c0_203 = arith.constant 0 : index
    %c0_204 = arith.constant 0 : index
    %c1_205 = arith.constant 1 : index
    %c256_206 = arith.constant 256 : index
    %150 = vector.load %arg9[%c0_203, %c0_204, %c1_205, %c256_206] : memref<2x4x4x576xbf16, #tpu.memory_space<vmem>>, vector<2x4x1x64xbf16>
    %151 = vector.shape_cast %150 : vector<2x4x1x64xbf16> to vector<2x4x64xbf16>
    %152 = vector.shape_cast %149 : vector<2x4x64xbf16> to vector<2x4x1x64xbf16>
    tpu.vector_store %arg9[%c0_203, %c0_204, %c1_205, %c256_206], %152 {strides = array<i32>} : memref<2x4x4x576xbf16, #tpu.memory_space<vmem>>, vector<2x4x1x64xbf16>,
    %c0_207 = arith.constant 0 : index
    %c0_208 = arith.constant 0 : index
    %c5_209 = arith.constant 5 : index
    %c0_210 = arith.constant 0 : index
    %153 = vector.load %arg8[%c0_207, %c0_208, %c5_209, %c0_210] : memref<2x4x10x64xf32, #tpu.memory_space<vmem>>, vector<2x4x1x64xf32>
    %154 = vector.shape_cast %153 : vector<2x4x1x64xf32> to vector<2x4x64xf32>
    %155 = arith.truncf %154 : vector<2x4x64xf32> to vector<2x4x64xbf16>
    %c0_211 = arith.constant 0 : index
    %c0_212 = arith.constant 0 : index
    %c2_213 = arith.constant 2 : index
    %c256_214 = arith.constant 256 : index
    %156 = vector.load %arg9[%c0_211, %c0_212, %c2_213, %c256_214] : memref<2x4x4x576xbf16, #tpu.memory_space<vmem>>, vector<2x4x1x64xbf16>
    %157 = vector.shape_cast %156 : vector<2x4x1x64xbf16> to vector<2x4x64xbf16>
    %158 = vector.shape_cast %155 : vector<2x4x64xbf16> to vector<2x4x1x64xbf16>
    tpu.vector_store %arg9[%c0_211, %c0_212, %c2_213, %c256_214], %158 {strides = array<i32>} : memref<2x4x4x576xbf16, #tpu.memory_space<vmem>>, vector<2x4x1x64xbf16>,
    %c0_215 = arith.constant 0 : index
    %c0_216 = arith.constant 0 : index
    %c7_217 = arith.constant 7 : index
    %c0_218 = arith.constant 0 : index
    %159 = vector.load %arg8[%c0_215, %c0_216, %c7_217, %c0_218] : memref<2x4x10x64xf32, #tpu.memory_space<vmem>>, vector<2x4x1x64xf32>
    %160 = vector.shape_cast %159 : vector<2x4x1x64xf32> to vector<2x4x64xf32>
    %161 = arith.truncf %160 : vector<2x4x64xf32> to vector<2x4x64xbf16>
    %c0_219 = arith.constant 0 : index
    %c0_220 = arith.constant 0 : index
    %c3_221 = arith.constant 3 : index
    %c256_222 = arith.constant 256 : index
    %162 = vector.load %arg9[%c0_219, %c0_220, %c3_221, %c256_222] : memref<2x4x4x576xbf16, #tpu.memory_space<vmem>>, vector<2x4x1x64xbf16>
    %163 = vector.shape_cast %162 : vector<2x4x1x64xbf16> to vector<2x4x64xbf16>
    %164 = vector.shape_cast %161 : vector<2x4x64xbf16> to vector<2x4x1x64xbf16>
    tpu.vector_store %arg9[%c0_219, %c0_220, %c3_221, %c256_222], %164 {strides = array<i32>} : memref<2x4x4x576xbf16, #tpu.memory_space<vmem>>, vector<2x4x1x64xbf16>,
    %c0_223 = arith.constant 0 : index
    %c0_224 = arith.constant 0 : index
    %c2_225 = arith.constant 2 : index
    %c0_226 = arith.constant 0 : index
    %165 = vector.load %arg8[%c0_223, %c0_224, %c2_225, %c0_226] : memref<2x4x10x64xf32, #tpu.memory_space<vmem>>, vector<2x4x1x64xf32>
    %166 = vector.shape_cast %165 : vector<2x4x1x64xf32> to vector<2x4x64xf32>
    %167 = arith.truncf %166 : vector<2x4x64xf32> to vector<2x4x64xbf16>
    %c0_227 = arith.constant 0 : index
    %c0_228 = arith.constant 0 : index
    %c0_229 = arith.constant 0 : index
    %c320 = arith.constant 320 : index
    %168 = vector.load %arg9[%c0_227, %c0_228, %c0_229, %c320] : memref<2x4x4x576xbf16, #tpu.memory_space<vmem>>, vector<2x4x1x64xbf16>
    %169 = vector.shape_cast %168 : vector<2x4x1x64xbf16> to vector<2x4x64xbf16>
    %170 = vector.shape_cast %167 : vector<2x4x64xbf16> to vector<2x4x1x64xbf16>
    tpu.vector_store %arg9[%c0_227, %c0_228, %c0_229, %c320], %170 {strides = array<i32>} : memref<2x4x4x576xbf16, #tpu.memory_space<vmem>>, vector<2x4x1x64xbf16>,
    %c0_230 = arith.constant 0 : index
    %c0_231 = arith.constant 0 : index
    %c4_232 = arith.constant 4 : index
    %c0_233 = arith.constant 0 : index
    %171 = vector.load %arg8[%c0_230, %c0_231, %c4_232, %c0_233] : memref<2x4x10x64xf32, #tpu.memory_space<vmem>>, vector<2x4x1x64xf32>
    %172 = vector.shape_cast %171 : vector<2x4x1x64xf32> to vector<2x4x64xf32>
    %173 = arith.truncf %172 : vector<2x4x64xf32> to vector<2x4x64xbf16>
    %c0_234 = arith.constant 0 : index
    %c0_235 = arith.constant 0 : index
    %c1_236 = arith.constant 1 : index
    %c320_237 = arith.constant 320 : index
    %174 = vector.load %arg9[%c0_234, %c0_235, %c1_236, %c320_237] : memref<2x4x4x576xbf16, #tpu.memory_space<vmem>>, vector<2x4x1x64xbf16>
    %175 = vector.shape_cast %174 : vector<2x4x1x64xbf16> to vector<2x4x64xbf16>
    %176 = vector.shape_cast %173 : vector<2x4x64xbf16> to vector<2x4x1x64xbf16>
    tpu.vector_store %arg9[%c0_234, %c0_235, %c1_236, %c320_237], %176 {strides = array<i32>} : memref<2x4x4x576xbf16, #tpu.memory_space<vmem>>, vector<2x4x1x64xbf16>,
    %c0_238 = arith.constant 0 : index
    %c0_239 = arith.constant 0 : index
    %c6_240 = arith.constant 6 : index
    %c0_241 = arith.constant 0 : index
    %177 = vector.load %arg8[%c0_238, %c0_239, %c6_240, %c0_241] : memref<2x4x10x64xf32, #tpu.memory_space<vmem>>, vector<2x4x1x64xf32>
    %178 = vector.shape_cast %177 : vector<2x4x1x64xf32> to vector<2x4x64xf32>
    %179 = arith.truncf %178 : vector<2x4x64xf32> to vector<2x4x64xbf16>
    %c0_242 = arith.constant 0 : index
    %c0_243 = arith.constant 0 : index
    %c2_244 = arith.constant 2 : index
    %c320_245 = arith.constant 320 : index
    %180 = vector.load %arg9[%c0_242, %c0_243, %c2_244, %c320_245] : memref<2x4x4x576xbf16, #tpu.memory_space<vmem>>, vector<2x4x1x64xbf16>
    %181 = vector.shape_cast %180 : vector<2x4x1x64xbf16> to vector<2x4x64xbf16>
    %182 = vector.shape_cast %179 : vector<2x4x64xbf16> to vector<2x4x1x64xbf16>
    tpu.vector_store %arg9[%c0_242, %c0_243, %c2_244, %c320_245], %182 {strides = array<i32>} : memref<2x4x4x576xbf16, #tpu.memory_space<vmem>>, vector<2x4x1x64xbf16>,
    %c0_246 = arith.constant 0 : index
    %c0_247 = arith.constant 0 : index
    %c8_248 = arith.constant 8 : index
    %c0_249 = arith.constant 0 : index
    %183 = vector.load %arg8[%c0_246, %c0_247, %c8_248, %c0_249] : memref<2x4x10x64xf32, #tpu.memory_space<vmem>>, vector<2x4x1x64xf32>
    %184 = vector.shape_cast %183 : vector<2x4x1x64xf32> to vector<2x4x64xf32>
    %185 = arith.truncf %184 : vector<2x4x64xf32> to vector<2x4x64xbf16>
    %c0_250 = arith.constant 0 : index
    %c0_251 = arith.constant 0 : index
    %c3_252 = arith.constant 3 : index
    %c320_253 = arith.constant 320 : index
    %186 = vector.load %arg9[%c0_250, %c0_251, %c3_252, %c320_253] : memref<2x4x4x576xbf16, #tpu.memory_space<vmem>>, vector<2x4x1x64xbf16>
    %187 = vector.shape_cast %186 : vector<2x4x1x64xbf16> to vector<2x4x64xbf16>
    %188 = vector.shape_cast %185 : vector<2x4x64xbf16> to vector<2x4x1x64xbf16>
    tpu.vector_store %arg9[%c0_250, %c0_251, %c3_252, %c320_253], %188 {strides = array<i32>} : memref<2x4x4x576xbf16, #tpu.memory_space<vmem>>, vector<2x4x1x64xbf16>,
    %c0_254 = arith.constant 0 : index
    %c2_255 = arith.constant 2 : index
    %c0_256 = arith.constant 0 : index
    %c0_257 = arith.constant 0 : index
    %189 = vector.load %arg7[%c0_254, %c2_255, %c0_256, %c0_257] : memref<2x10x10x64xf32, #tpu.memory_space<vmem>>, vector<2x1x10x64xf32>
    %190 = vector.shape_cast %189 : vector<2x1x10x64xf32> to vector<2x10x64xf32>
    %c0_258 = arith.constant 0 : index
    %c0_259 = arith.constant 0 : index
    %c0_260 = arith.constant 0 : index
    %c0_261 = arith.constant 0 : index
    %191 = vector.load %arg8[%c0_258, %c0_259, %c0_260, %c0_261] : memref<2x4x10x64xf32, #tpu.memory_space<vmem>>, vector<2x1x10x64xf32>
    %192 = vector.shape_cast %191 : vector<2x1x10x64xf32> to vector<2x10x64xf32>
    %193 = vector.shape_cast %190 : vector<2x10x64xf32> to vector<2x1x10x64xf32>
    tpu.vector_store %arg8[%c0_258, %c0_259, %c0_260, %c0_261], %193 {strides = array<i32>} : memref<2x4x10x64xf32, #tpu.memory_space<vmem>>, vector<2x1x10x64xf32>,
    %c0_262 = arith.constant 0 : index
    %c4_263 = arith.constant 4 : index
    %c0_264 = arith.constant 0 : index
    %c0_265 = arith.constant 0 : index
    %194 = vector.load %arg7[%c0_262, %c4_263, %c0_264, %c0_265] : memref<2x10x10x64xf32, #tpu.memory_space<vmem>>, vector<2x1x10x64xf32>
    %195 = vector.shape_cast %194 : vector<2x1x10x64xf32> to vector<2x10x64xf32>
    %c0_266 = arith.constant 0 : index
    %c1_267 = arith.constant 1 : index
    %c0_268 = arith.constant 0 : index
    %c0_269 = arith.constant 0 : index
    %196 = vector.load %arg8[%c0_266, %c1_267, %c0_268, %c0_269] : memref<2x4x10x64xf32, #tpu.memory_space<vmem>>, vector<2x1x10x64xf32>
    %197 = vector.shape_cast %196 : vector<2x1x10x64xf32> to vector<2x10x64xf32>
    %198 = vector.shape_cast %195 : vector<2x10x64xf32> to vector<2x1x10x64xf32>
    tpu.vector_store %arg8[%c0_266, %c1_267, %c0_268, %c0_269], %198 {strides = array<i32>} : memref<2x4x10x64xf32, #tpu.memory_space<vmem>>, vector<2x1x10x64xf32>,
    %c0_270 = arith.constant 0 : index
    %c6_271 = arith.constant 6 : index
    %c0_272 = arith.constant 0 : index
    %c0_273 = arith.constant 0 : index
    %199 = vector.load %arg7[%c0_270, %c6_271, %c0_272, %c0_273] : memref<2x10x10x64xf32, #tpu.memory_space<vmem>>, vector<2x1x10x64xf32>
    %200 = vector.shape_cast %199 : vector<2x1x10x64xf32> to vector<2x10x64xf32>
    %c0_274 = arith.constant 0 : index
    %c2_275 = arith.constant 2 : index
    %c0_276 = arith.constant 0 : index
    %c0_277 = arith.constant 0 : index
    %201 = vector.load %arg8[%c0_274, %c2_275, %c0_276, %c0_277] : memref<2x4x10x64xf32, #tpu.memory_space<vmem>>, vector<2x1x10x64xf32>
    %202 = vector.shape_cast %201 : vector<2x1x10x64xf32> to vector<2x10x64xf32>
    %203 = vector.shape_cast %200 : vector<2x10x64xf32> to vector<2x1x10x64xf32>
    tpu.vector_store %arg8[%c0_274, %c2_275, %c0_276, %c0_277], %203 {strides = array<i32>} : memref<2x4x10x64xf32, #tpu.memory_space<vmem>>, vector<2x1x10x64xf32>,
    %c0_278 = arith.constant 0 : index
    %c8_279 = arith.constant 8 : index
    %c0_280 = arith.constant 0 : index
    %c0_281 = arith.constant 0 : index
    %204 = vector.load %arg7[%c0_278, %c8_279, %c0_280, %c0_281] : memref<2x10x10x64xf32, #tpu.memory_space<vmem>>, vector<2x1x10x64xf32>
    %205 = vector.shape_cast %204 : vector<2x1x10x64xf32> to vector<2x10x64xf32>
    %c0_282 = arith.constant 0 : index
    %c3_283 = arith.constant 3 : index
    %c0_284 = arith.constant 0 : index
    %c0_285 = arith.constant 0 : index
    %206 = vector.load %arg8[%c0_282, %c3_283, %c0_284, %c0_285] : memref<2x4x10x64xf32, #tpu.memory_space<vmem>>, vector<2x1x10x64xf32>
    %207 = vector.shape_cast %206 : vector<2x1x10x64xf32> to vector<2x10x64xf32>
    %208 = vector.shape_cast %205 : vector<2x10x64xf32> to vector<2x1x10x64xf32>
    tpu.vector_store %arg8[%c0_282, %c3_283, %c0_284, %c0_285], %208 {strides = array<i32>} : memref<2x4x10x64xf32, #tpu.memory_space<vmem>>, vector<2x1x10x64xf32>,
    %c0_286 = arith.constant 0 : index
    %c0_287 = arith.constant 0 : index
    %c0_288 = arith.constant 0 : index
    %c0_289 = arith.constant 0 : index
    %209 = vector.load %arg8[%c0_286, %c0_287, %c0_288, %c0_289] : memref<2x4x10x64xf32, #tpu.memory_space<vmem>>, vector<2x4x1x64xf32>
    %210 = vector.shape_cast %209 : vector<2x4x1x64xf32> to vector<2x4x64xf32>
    %211 = arith.truncf %210 : vector<2x4x64xf32> to vector<2x4x64xbf16>
    %c0_290 = arith.constant 0 : index
    %c0_291 = arith.constant 0 : index
    %c0_292 = arith.constant 0 : index
    %c384 = arith.constant 384 : index
    %212 = vector.load %arg9[%c0_290, %c0_291, %c0_292, %c384] : memref<2x4x4x576xbf16, #tpu.memory_space<vmem>>, vector<2x4x1x64xbf16>
    %213 = vector.shape_cast %212 : vector<2x4x1x64xbf16> to vector<2x4x64xbf16>
    %214 = vector.shape_cast %211 : vector<2x4x64xbf16> to vector<2x4x1x64xbf16>
    tpu.vector_store %arg9[%c0_290, %c0_291, %c0_292, %c384], %214 {strides = array<i32>} : memref<2x4x4x576xbf16, #tpu.memory_space<vmem>>, vector<2x4x1x64xbf16>,
    %c0_293 = arith.constant 0 : index
    %c0_294 = arith.constant 0 : index
    %c2_295 = arith.constant 2 : index
    %c0_296 = arith.constant 0 : index
    %215 = vector.load %arg8[%c0_293, %c0_294, %c2_295, %c0_296] : memref<2x4x10x64xf32, #tpu.memory_space<vmem>>, vector<2x4x1x64xf32>
    %216 = vector.shape_cast %215 : vector<2x4x1x64xf32> to vector<2x4x64xf32>
    %217 = arith.truncf %216 : vector<2x4x64xf32> to vector<2x4x64xbf16>
    %c0_297 = arith.constant 0 : index
    %c0_298 = arith.constant 0 : index
    %c1_299 = arith.constant 1 : index
    %c384_300 = arith.constant 384 : index
    %218 = vector.load %arg9[%c0_297, %c0_298, %c1_299, %c384_300] : memref<2x4x4x576xbf16, #tpu.memory_space<vmem>>, vector<2x4x1x64xbf16>
    %219 = vector.shape_cast %218 : vector<2x4x1x64xbf16> to vector<2x4x64xbf16>
    %220 = vector.shape_cast %217 : vector<2x4x64xbf16> to vector<2x4x1x64xbf16>
    tpu.vector_store %arg9[%c0_297, %c0_298, %c1_299, %c384_300], %220 {strides = array<i32>} : memref<2x4x4x576xbf16, #tpu.memory_space<vmem>>, vector<2x4x1x64xbf16>,
    %c0_301 = arith.constant 0 : index
    %c0_302 = arith.constant 0 : index
    %c4_303 = arith.constant 4 : index
    %c0_304 = arith.constant 0 : index
    %221 = vector.load %arg8[%c0_301, %c0_302, %c4_303, %c0_304] : memref<2x4x10x64xf32, #tpu.memory_space<vmem>>, vector<2x4x1x64xf32>
    %222 = vector.shape_cast %221 : vector<2x4x1x64xf32> to vector<2x4x64xf32>
    %223 = arith.truncf %222 : vector<2x4x64xf32> to vector<2x4x64xbf16>
    %c0_305 = arith.constant 0 : index
    %c0_306 = arith.constant 0 : index
    %c2_307 = arith.constant 2 : index
    %c384_308 = arith.constant 384 : index
    %224 = vector.load %arg9[%c0_305, %c0_306, %c2_307, %c384_308] : memref<2x4x4x576xbf16, #tpu.memory_space<vmem>>, vector<2x4x1x64xbf16>
    %225 = vector.shape_cast %224 : vector<2x4x1x64xbf16> to vector<2x4x64xbf16>
    %226 = vector.shape_cast %223 : vector<2x4x64xbf16> to vector<2x4x1x64xbf16>
    tpu.vector_store %arg9[%c0_305, %c0_306, %c2_307, %c384_308], %226 {strides = array<i32>} : memref<2x4x4x576xbf16, #tpu.memory_space<vmem>>, vector<2x4x1x64xbf16>,
    %c0_309 = arith.constant 0 : index
    %c0_310 = arith.constant 0 : index
    %c6_311 = arith.constant 6 : index
    %c0_312 = arith.constant 0 : index
    %227 = vector.load %arg8[%c0_309, %c0_310, %c6_311, %c0_312] : memref<2x4x10x64xf32, #tpu.memory_space<vmem>>, vector<2x4x1x64xf32>
    %228 = vector.shape_cast %227 : vector<2x4x1x64xf32> to vector<2x4x64xf32>
    %229 = arith.truncf %228 : vector<2x4x64xf32> to vector<2x4x64xbf16>
    %c0_313 = arith.constant 0 : index
    %c0_314 = arith.constant 0 : index
    %c3_315 = arith.constant 3 : index
    %c384_316 = arith.constant 384 : index
    %230 = vector.load %arg9[%c0_313, %c0_314, %c3_315, %c384_316] : memref<2x4x4x576xbf16, #tpu.memory_space<vmem>>, vector<2x4x1x64xbf16>
    %231 = vector.shape_cast %230 : vector<2x4x1x64xbf16> to vector<2x4x64xbf16>
    %232 = vector.shape_cast %229 : vector<2x4x64xbf16> to vector<2x4x1x64xbf16>
    tpu.vector_store %arg9[%c0_313, %c0_314, %c3_315, %c384_316], %232 {strides = array<i32>} : memref<2x4x4x576xbf16, #tpu.memory_space<vmem>>, vector<2x4x1x64xbf16>,
    %c0_317 = arith.constant 0 : index
    %c0_318 = arith.constant 0 : index
    %c1_319 = arith.constant 1 : index
    %c0_320 = arith.constant 0 : index
    %233 = vector.load %arg8[%c0_317, %c0_318, %c1_319, %c0_320] : memref<2x4x10x64xf32, #tpu.memory_space<vmem>>, vector<2x4x1x64xf32>
    %234 = vector.shape_cast %233 : vector<2x4x1x64xf32> to vector<2x4x64xf32>
    %235 = arith.truncf %234 : vector<2x4x64xf32> to vector<2x4x64xbf16>
    %c0_321 = arith.constant 0 : index
    %c0_322 = arith.constant 0 : index
    %c0_323 = arith.constant 0 : index
    %c448 = arith.constant 448 : index
    %236 = vector.load %arg9[%c0_321, %c0_322, %c0_323, %c448] : memref<2x4x4x576xbf16, #tpu.memory_space<vmem>>, vector<2x4x1x64xbf16>
    %237 = vector.shape_cast %236 : vector<2x4x1x64xbf16> to vector<2x4x64xbf16>
    %238 = vector.shape_cast %235 : vector<2x4x64xbf16> to vector<2x4x1x64xbf16>
    tpu.vector_store %arg9[%c0_321, %c0_322, %c0_323, %c448], %238 {strides = array<i32>} : memref<2x4x4x576xbf16, #tpu.memory_space<vmem>>, vector<2x4x1x64xbf16>,
    %c0_324 = arith.constant 0 : index
    %c0_325 = arith.constant 0 : index
    %c3_326 = arith.constant 3 : index
    %c0_327 = arith.constant 0 : index
    %239 = vector.load %arg8[%c0_324, %c0_325, %c3_326, %c0_327] : memref<2x4x10x64xf32, #tpu.memory_space<vmem>>, vector<2x4x1x64xf32>
    %240 = vector.shape_cast %239 : vector<2x4x1x64xf32> to vector<2x4x64xf32>
    %241 = arith.truncf %240 : vector<2x4x64xf32> to vector<2x4x64xbf16>
    %c0_328 = arith.constant 0 : index
    %c0_329 = arith.constant 0 : index
    %c1_330 = arith.constant 1 : index
    %c448_331 = arith.constant 448 : index
    %242 = vector.load %arg9[%c0_328, %c0_329, %c1_330, %c448_331] : memref<2x4x4x576xbf16, #tpu.memory_space<vmem>>, vector<2x4x1x64xbf16>
    %243 = vector.shape_cast %242 : vector<2x4x1x64xbf16> to vector<2x4x64xbf16>
    %244 = vector.shape_cast %241 : vector<2x4x64xbf16> to vector<2x4x1x64xbf16>
    tpu.vector_store %arg9[%c0_328, %c0_329, %c1_330, %c448_331], %244 {strides = array<i32>} : memref<2x4x4x576xbf16, #tpu.memory_space<vmem>>, vector<2x4x1x64xbf16>,
    %c0_332 = arith.constant 0 : index
    %c0_333 = arith.constant 0 : index
    %c5_334 = arith.constant 5 : index
    %c0_335 = arith.constant 0 : index
    %245 = vector.load %arg8[%c0_332, %c0_333, %c5_334, %c0_335] : memref<2x4x10x64xf32, #tpu.memory_space<vmem>>, vector<2x4x1x64xf32>
    %246 = vector.shape_cast %245 : vector<2x4x1x64xf32> to vector<2x4x64xf32>
    %247 = arith.truncf %246 : vector<2x4x64xf32> to vector<2x4x64xbf16>
    %c0_336 = arith.constant 0 : index
    %c0_337 = arith.constant 0 : index
    %c2_338 = arith.constant 2 : index
    %c448_339 = arith.constant 448 : index
    %248 = vector.load %arg9[%c0_336, %c0_337, %c2_338, %c448_339] : memref<2x4x4x576xbf16, #tpu.memory_space<vmem>>, vector<2x4x1x64xbf16>
    %249 = vector.shape_cast %248 : vector<2x4x1x64xbf16> to vector<2x4x64xbf16>
    %250 = vector.shape_cast %247 : vector<2x4x64xbf16> to vector<2x4x1x64xbf16>
    tpu.vector_store %arg9[%c0_336, %c0_337, %c2_338, %c448_339], %250 {strides = array<i32>} : memref<2x4x4x576xbf16, #tpu.memory_space<vmem>>, vector<2x4x1x64xbf16>,
    %c0_340 = arith.constant 0 : index
    %c0_341 = arith.constant 0 : index
    %c7_342 = arith.constant 7 : index
    %c0_343 = arith.constant 0 : index
    %251 = vector.load %arg8[%c0_340, %c0_341, %c7_342, %c0_343] : memref<2x4x10x64xf32, #tpu.memory_space<vmem>>, vector<2x4x1x64xf32>
    %252 = vector.shape_cast %251 : vector<2x4x1x64xf32> to vector<2x4x64xf32>
    %253 = arith.truncf %252 : vector<2x4x64xf32> to vector<2x4x64xbf16>
    %c0_344 = arith.constant 0 : index
    %c0_345 = arith.constant 0 : index
    %c3_346 = arith.constant 3 : index
    %c448_347 = arith.constant 448 : index
    %254 = vector.load %arg9[%c0_344, %c0_345, %c3_346, %c448_347] : memref<2x4x4x576xbf16, #tpu.memory_space<vmem>>, vector<2x4x1x64xbf16>
    %255 = vector.shape_cast %254 : vector<2x4x1x64xbf16> to vector<2x4x64xbf16>
    %256 = vector.shape_cast %253 : vector<2x4x64xbf16> to vector<2x4x1x64xbf16>
    tpu.vector_store %arg9[%c0_344, %c0_345, %c3_346, %c448_347], %256 {strides = array<i32>} : memref<2x4x4x576xbf16, #tpu.memory_space<vmem>>, vector<2x4x1x64xbf16>,
    %c0_348 = arith.constant 0 : index
    %c0_349 = arith.constant 0 : index
    %c2_350 = arith.constant 2 : index
    %c0_351 = arith.constant 0 : index
    %257 = vector.load %arg8[%c0_348, %c0_349, %c2_350, %c0_351] : memref<2x4x10x64xf32, #tpu.memory_space<vmem>>, vector<2x4x1x64xf32>
    %258 = vector.shape_cast %257 : vector<2x4x1x64xf32> to vector<2x4x64xf32>
    %259 = arith.truncf %258 : vector<2x4x64xf32> to vector<2x4x64xbf16>
    %c0_352 = arith.constant 0 : index
    %c0_353 = arith.constant 0 : index
    %c0_354 = arith.constant 0 : index
    %c512 = arith.constant 512 : index
    %260 = vector.load %arg9[%c0_352, %c0_353, %c0_354, %c512] : memref<2x4x4x576xbf16, #tpu.memory_space<vmem>>, vector<2x4x1x64xbf16>
    %261 = vector.shape_cast %260 : vector<2x4x1x64xbf16> to vector<2x4x64xbf16>
    %262 = vector.shape_cast %259 : vector<2x4x64xbf16> to vector<2x4x1x64xbf16>
    tpu.vector_store %arg9[%c0_352, %c0_353, %c0_354, %c512], %262 {strides = array<i32>} : memref<2x4x4x576xbf16, #tpu.memory_space<vmem>>, vector<2x4x1x64xbf16>,
    %c0_355 = arith.constant 0 : index
    %c0_356 = arith.constant 0 : index
    %c4_357 = arith.constant 4 : index
    %c0_358 = arith.constant 0 : index
    %263 = vector.load %arg8[%c0_355, %c0_356, %c4_357, %c0_358] : memref<2x4x10x64xf32, #tpu.memory_space<vmem>>, vector<2x4x1x64xf32>
    %264 = vector.shape_cast %263 : vector<2x4x1x64xf32> to vector<2x4x64xf32>
    %265 = arith.truncf %264 : vector<2x4x64xf32> to vector<2x4x64xbf16>
    %c0_359 = arith.constant 0 : index
    %c0_360 = arith.constant 0 : index
    %c1_361 = arith.constant 1 : index
    %c512_362 = arith.constant 512 : index
    %266 = vector.load %arg9[%c0_359, %c0_360, %c1_361, %c512_362] : memref<2x4x4x576xbf16, #tpu.memory_space<vmem>>, vector<2x4x1x64xbf16>
    %267 = vector.shape_cast %266 : vector<2x4x1x64xbf16> to vector<2x4x64xbf16>
    %268 = vector.shape_cast %265 : vector<2x4x64xbf16> to vector<2x4x1x64xbf16>
    tpu.vector_store %arg9[%c0_359, %c0_360, %c1_361, %c512_362], %268 {strides = array<i32>} : memref<2x4x4x576xbf16, #tpu.memory_space<vmem>>, vector<2x4x1x64xbf16>,
    %c0_363 = arith.constant 0 : index
    %c0_364 = arith.constant 0 : index
    %c6_365 = arith.constant 6 : index
    %c0_366 = arith.constant 0 : index
    %269 = vector.load %arg8[%c0_363, %c0_364, %c6_365, %c0_366] : memref<2x4x10x64xf32, #tpu.memory_space<vmem>>, vector<2x4x1x64xf32>
    %270 = vector.shape_cast %269 : vector<2x4x1x64xf32> to vector<2x4x64xf32>
    %271 = arith.truncf %270 : vector<2x4x64xf32> to vector<2x4x64xbf16>
    %c0_367 = arith.constant 0 : index
    %c0_368 = arith.constant 0 : index
    %c2_369 = arith.constant 2 : index
    %c512_370 = arith.constant 512 : index
    %272 = vector.load %arg9[%c0_367, %c0_368, %c2_369, %c512_370] : memref<2x4x4x576xbf16, #tpu.memory_space<vmem>>, vector<2x4x1x64xbf16>
    %273 = vector.shape_cast %272 : vector<2x4x1x64xbf16> to vector<2x4x64xbf16>
    %274 = vector.shape_cast %271 : vector<2x4x64xbf16> to vector<2x4x1x64xbf16>
    tpu.vector_store %arg9[%c0_367, %c0_368, %c2_369, %c512_370], %274 {strides = array<i32>} : memref<2x4x4x576xbf16, #tpu.memory_space<vmem>>, vector<2x4x1x64xbf16>,
    %c0_371 = arith.constant 0 : index
    %c0_372 = arith.constant 0 : index
    %c8_373 = arith.constant 8 : index
    %c0_374 = arith.constant 0 : index
    %275 = vector.load %arg8[%c0_371, %c0_372, %c8_373, %c0_374] : memref<2x4x10x64xf32, #tpu.memory_space<vmem>>, vector<2x4x1x64xf32>
    %276 = vector.shape_cast %275 : vector<2x4x1x64xf32> to vector<2x4x64xf32>
    %277 = arith.truncf %276 : vector<2x4x64xf32> to vector<2x4x64xbf16>
    %c0_375 = arith.constant 0 : index
    %c0_376 = arith.constant 0 : index
    %c3_377 = arith.constant 3 : index
    %c512_378 = arith.constant 512 : index
    %278 = vector.load %arg9[%c0_375, %c0_376, %c3_377, %c512_378] : memref<2x4x4x576xbf16, #tpu.memory_space<vmem>>, vector<2x4x1x64xbf16>
    %279 = vector.shape_cast %278 : vector<2x4x1x64xbf16> to vector<2x4x64xbf16>
    %280 = vector.shape_cast %277 : vector<2x4x64xbf16> to vector<2x4x1x64xbf16>
    tpu.vector_store %arg9[%c0_375, %c0_376, %c3_377, %c512_378], %280 {strides = array<i32>} : memref<2x4x4x576xbf16, #tpu.memory_space<vmem>>, vector<2x4x1x64xbf16>,
    %c0_379 = arith.constant 0 : index
    %c0_380 = arith.constant 0 : index
    %c0_381 = arith.constant 0 : index
    %c0_382 = arith.constant 0 : index
    %281 = vector.load %arg9[%c0_379, %c0_380, %c0_381, %c0_382] : memref<2x4x4x576xbf16, #tpu.memory_space<vmem>>, vector<2x4x4x576xbf16>
    %282 = vector.shape_cast %281 : vector<2x4x4x576xbf16> to vector<32x576xbf16>
    %c0_383 = arith.constant 0 : index
    %c0_384 = arith.constant 0 : index
    %283 = vector.load %arg3[%c0_383, %c0_384] : memref<576x64xbf16, #tpu.memory_space<vmem>>, vector<576x64xbf16>
    %cst_385 = arith.constant dense<0.000000e+00> : vector<32x64xf32>
    %284 = tpu.matmul %282, %283, %cst_385 {dimension_numbers = #tpu.dot_dimension_numbers<[1], [0], [0], [1], [0, 0, 1, 1], [], []>} : vector<32x576xbf16>, vector<576x64xbf16>, vector<32x64xf32> -> vector<32x64xf32>
    %c0_386 = arith.constant 0 : index
    %c0_387 = arith.constant 0 : index
    %285 = vector.load %arg4[%c0_386, %c0_387] : memref<1x64xf32, #tpu.memory_space<vmem>>, vector<1x64xf32>
    %286 = vector.broadcast %285 : vector<1x64xf32> to vector<32x64xf32>
    %287 = arith.mulf %284, %286 : vector<32x64xf32>
    %c0_388 = arith.constant 0 : index
    %c0_389 = arith.constant 0 : index
    %288 = vector.load %arg5[%c0_388, %c0_389] : memref<1x64xf32, #tpu.memory_space<vmem>>, vector<1x64xf32>
    %289 = vector.broadcast %288 : vector<1x64xf32> to vector<32x64xf32>
    %290 = arith.addf %287, %289 : vector<32x64xf32>
    %cst_390 = arith.constant 1.000000e-01 : f32
    %291 = vector.broadcast %cst_390 : f32 to vector<32x64xf32>
    %292 = arith.mulf %291, %290 : vector<32x64xf32>
    %293 = arith.maximumf %290, %292 : vector<32x64xf32>
    %294 = vector.shape_cast %293 : vector<32x64xf32> to vector<2x4x4x64xf32>
    %295 = arith.truncf %294 : vector<2x4x4x64xf32> to vector<2x4x4x64xbf16>
    %c0_391 = arith.constant 0 : index
    %c0_392 = arith.constant 0 : index
    %c0_393 = arith.constant 0 : index
    %c0_394 = arith.constant 0 : index
    %296 = vector.load %arg6[%c0_391, %c0_392, %c0_393, %c0_394] : memref<2x4x4x64xbf16, #tpu.memory_space<vmem>>, vector<2x4x4x64xbf16>
    tpu.vector_store %arg6[%c0_391, %c0_392, %c0_393, %c0_394], %295 {strides = array<i32>} : memref<2x4x4x64xbf16, #tpu.memory_space<vmem>>, vector<2x4x4x64xbf16>,
    return
  }
  func.func @transform_0(%arg0: i32, %arg1: i32) -> (i32, i32, i32, i32) {
    %c0_i32 = arith.constant 0 : i32
    %c0_i32_0 = arith.constant 0 : i32
    %c0_i32_1 = arith.constant 0 : i32
    %c0_i32_2 = arith.constant 0 : i32
    return %arg0, %c0_i32, %c0_i32_0, %c0_i32_1 : i32, i32, i32, i32
  }
  func.func @transform_1(%arg0: i32, %arg1: i32) -> (i32, i32) {
    %c0_i32 = arith.constant 0 : i32
    %c0_i32_0 = arith.constant 0 : i32
    return %c0_i32, %arg1 : i32, i32
  }
  func.func @transform_2(%arg0: i32, %arg1: i32) -> (i32, i32) {
    %c0_i32 = arith.constant 0 : i32
    %c0_i32_0 = arith.constant 0 : i32
    return %c0_i32, %arg1 : i32, i32
  }
  func.func @transform_3(%arg0: i32, %arg1: i32) -> (i32, i32) {
    %c0_i32 = arith.constant 0 : i32
    %c0_i32_0 = arith.constant 0 : i32
    return %c0_i32, %arg1 : i32, i32
  }
  func.func @transform_4(%arg0: i32, %arg1: i32) -> (i32, i32, i32, i32) {
    %c0_i32 = arith.constant 0 : i32
    %c0_i32_0 = arith.constant 0 : i32
    %c0_i32_1 = arith.constant 0 : i32
    return %arg0, %c0_i32, %c0_i32_0, %arg1 : i32, i32, i32, i32
  }
}

module attributes {stable_mosaic.version = 11 : i64} {
  func.func @_head_fc_kernel(%arg0: i32, %arg1: memref<2x256xbf16, #tpu.memory_space<vmem>>, %arg2: memref<256x256xbf16, #tpu.memory_space<vmem>>, %arg3: memref<1x256xf32, #tpu.memory_space<vmem>>, %arg4: memref<256x512xbf16, #tpu.memory_space<vmem>>, %arg5: memref<1x512xf32, #tpu.memory_space<vmem>>, %arg6: memref<2x512xf32, #tpu.memory_space<vmem>>, %arg7: memref<2x256xf32, #tpu.memory_space<vmem>>) attributes {dimension_semantics = [#tpu.dimension_semantics<arbitrary>], iteration_bounds = array<i64: 4>, scalar_prefetch = 0 : i64, scratch_operands = 1 : i64, tpu.core_type = #tpu.core_type<tc>, window_params = [{transform_indices = @transform_0, window_bounds = array<i64: 2, 256>}, {transform_indices = @transform_1, window_bounds = array<i64: 256, 256>}, {pipeline_mode = #tpu.pipeline_mode<synchronous>, transform_indices = @transform_2, window_bounds = array<i64: 1, 256>}, {pipeline_mode = #tpu.pipeline_mode<synchronous>, transform_indices = @transform_3, window_bounds = array<i64: 256, 512>}, {pipeline_mode = #tpu.pipeline_mode<synchronous>, transform_indices = @transform_4, window_bounds = array<i64: 1, 512>}, {pipeline_mode = #tpu.pipeline_mode<synchronous>, transform_indices = @transform_5, window_bounds = array<i64: 2, 512>}]} {
    %c0_i32 = arith.constant 0 : i32
    %0 = arith.cmpi eq, %arg0, %c0_i32 : i32
    %1 = arith.extui %0 : i1 to i32
    %c0_i32_0 = arith.constant 0 : i32
    %2 = arith.cmpi ne, %1, %c0_i32_0 : i32
    scf.if %2 {
      %cst_9 = arith.constant 0.000000e+00 : f32
      %12 = vector.broadcast %cst_9 : f32 to vector<2x256xf32>
      %c0_10 = arith.constant 0 : index
      %c0_11 = arith.constant 0 : index
      %13 = vector.load %arg7[%c0_10, %c0_11] : memref<2x256xf32, #tpu.memory_space<vmem>>, vector<2x256xf32>
      tpu.vector_store %arg7[%c0_10, %c0_11], %12 {strides = array<i32>} : memref<2x256xf32, #tpu.memory_space<vmem>>, vector<2x256xf32>,
    } else {
    }
    %c0 = arith.constant 0 : index
    %c0_1 = arith.constant 0 : index
    %3 = vector.load %arg7[%c0, %c0_1] : memref<2x256xf32, #tpu.memory_space<vmem>>, vector<2x256xf32>
    %c0_2 = arith.constant 0 : index
    %c0_3 = arith.constant 0 : index
    %4 = vector.load %arg1[%c0_2, %c0_3] : memref<2x256xbf16, #tpu.memory_space<vmem>>, vector<2x256xbf16>
    %c0_4 = arith.constant 0 : index
    %c0_5 = arith.constant 0 : index
    %5 = vector.load %arg2[%c0_4, %c0_5] : memref<256x256xbf16, #tpu.memory_space<vmem>>, vector<256x256xbf16>
    %cst = arith.constant dense<0.000000e+00> : vector<2x256xf32>
    %6 = tpu.matmul %4, %5, %cst {dimension_numbers = #tpu.dot_dimension_numbers<[1], [0], [0], [1], [0, 0, 1, 1], [], []>} : vector<2x256xbf16>, vector<256x256xbf16>, vector<2x256xf32> -> vector<2x256xf32>
    %7 = arith.addf %3, %6 : vector<2x256xf32>
    %c0_6 = arith.constant 0 : index
    %c0_7 = arith.constant 0 : index
    %8 = vector.load %arg7[%c0_6, %c0_7] : memref<2x256xf32, #tpu.memory_space<vmem>>, vector<2x256xf32>
    tpu.vector_store %arg7[%c0_6, %c0_7], %7 {strides = array<i32>} : memref<2x256xf32, #tpu.memory_space<vmem>>, vector<2x256xf32>,
    %c3_i32 = arith.constant 3 : i32
    %9 = arith.cmpi eq, %arg0, %c3_i32 : i32
    %10 = arith.extui %9 : i1 to i32
    %c0_i32_8 = arith.constant 0 : i32
    %11 = arith.cmpi ne, %10, %c0_i32_8 : i32
    scf.if %11 {
      %c0_9 = arith.constant 0 : index
      %c0_10 = arith.constant 0 : index
      %12 = vector.load %arg7[%c0_9, %c0_10] : memref<2x256xf32, #tpu.memory_space<vmem>>, vector<2x256xf32>
      %c0_11 = arith.constant 0 : index
      %c0_12 = arith.constant 0 : index
      %13 = vector.load %arg3[%c0_11, %c0_12] : memref<1x256xf32, #tpu.memory_space<vmem>>, vector<1x256xf32>
      %14 = vector.broadcast %13 : vector<1x256xf32> to vector<2x256xf32>
      %15 = arith.addf %12, %14 : vector<2x256xf32>
      %cst_13 = arith.constant 1.000000e-01 : f32
      %16 = vector.broadcast %cst_13 : f32 to vector<2x256xf32>
      %17 = arith.mulf %16, %15 : vector<2x256xf32>
      %18 = arith.maximumf %15, %17 : vector<2x256xf32>
      %19 = arith.truncf %18 : vector<2x256xf32> to vector<2x256xbf16>
      %c0_14 = arith.constant 0 : index
      %c0_15 = arith.constant 0 : index
      %20 = vector.load %arg4[%c0_14, %c0_15] : memref<256x512xbf16, #tpu.memory_space<vmem>>, vector<256x512xbf16>
      %cst_16 = arith.constant dense<0.000000e+00> : vector<2x512xf32>
      %21 = tpu.matmul %19, %20, %cst_16 {dimension_numbers = #tpu.dot_dimension_numbers<[1], [0], [0], [1], [0, 0, 1, 1], [], []>} : vector<2x256xbf16>, vector<256x512xbf16>, vector<2x512xf32> -> vector<2x512xf32>
      %c0_17 = arith.constant 0 : index
      %c0_18 = arith.constant 0 : index
      %22 = vector.load %arg5[%c0_17, %c0_18] : memref<1x512xf32, #tpu.memory_space<vmem>>, vector<1x512xf32>
      %23 = vector.broadcast %22 : vector<1x512xf32> to vector<2x512xf32>
      %24 = arith.addf %21, %23 : vector<2x512xf32>
      %25 = arith.negf %24 : vector<2x512xf32>
      %26 = math.exp %25 : vector<2x512xf32>
      %cst_19 = arith.constant 1.000000e+00 : f32
      %27 = vector.broadcast %cst_19 : f32 to vector<2x512xf32>
      %28 = arith.addf %27, %26 : vector<2x512xf32>
      %29 = arith.divf %27, %28 : vector<2x512xf32>
      %c0_20 = arith.constant 0 : index
      %c0_21 = arith.constant 0 : index
      %30 = vector.load %arg6[%c0_20, %c0_21] : memref<2x512xf32, #tpu.memory_space<vmem>>, vector<2x512xf32>
      tpu.vector_store %arg6[%c0_20, %c0_21], %29 {strides = array<i32>} : memref<2x512xf32, #tpu.memory_space<vmem>>, vector<2x512xf32>,
    } else {
    }
    return
  }
  func.func @transform_0(%arg0: i32) -> (i32, i32) {
    %c0_i32 = arith.constant 0 : i32
    %c0_i32_0 = arith.constant 0 : i32
    return %c0_i32, %arg0 : i32, i32
  }
  func.func @transform_1(%arg0: i32) -> (i32, i32) {
    %c0_i32 = arith.constant 0 : i32
    %c0_i32_0 = arith.constant 0 : i32
    return %arg0, %c0_i32 : i32, i32
  }
  func.func @transform_2(%arg0: i32) -> (i32, i32) {
    %c0_i32 = arith.constant 0 : i32
    %c0_i32_0 = arith.constant 0 : i32
    %c0_i32_1 = arith.constant 0 : i32
    return %c0_i32, %c0_i32_0 : i32, i32
  }
  func.func @transform_3(%arg0: i32) -> (i32, i32) {
    %c0_i32 = arith.constant 0 : i32
    %c0_i32_0 = arith.constant 0 : i32
    %c0_i32_1 = arith.constant 0 : i32
    return %c0_i32, %c0_i32_0 : i32, i32
  }
  func.func @transform_4(%arg0: i32) -> (i32, i32) {
    %c0_i32 = arith.constant 0 : i32
    %c0_i32_0 = arith.constant 0 : i32
    %c0_i32_1 = arith.constant 0 : i32
    return %c0_i32, %c0_i32_0 : i32, i32
  }
  func.func @transform_5(%arg0: i32) -> (i32, i32) {
    %c0_i32 = arith.constant 0 : i32
    %c0_i32_0 = arith.constant 0 : i32
    %c0_i32_1 = arith.constant 0 : i32
    return %c0_i32, %c0_i32_0 : i32, i32
  }
}

</mosaic_0001>

<bundles_post_ra>
// kernel: yolo_v1_forward.9
= control target key start
LH: loop header
LB: loop body
LE: loop exit
PB: predicated region body
PF: predicated region fallthrough
CT: control target
= control target key end

     0   :  { %10 = vsyncpa [#allocation4], 0  ;;  %s2439_s0 = inlined_call_operand.vmem [shape: bf16[2,1024], index: 0, kind: input, shape index: {}]   ;;  %s2440_s1 = inlined_call_operand.hbm [shape: bf16[1024,256], index: 1, kind: input, shape index: {}]   ;;  %s2441_s2 = inlined_call_operand.vmem [shape: f32[1,256], index: 2, kind: input, shape index: {}]   ;;  %s2442_s3 = inlined_call_operand.vmem [shape: bf16[256,512], index: 3, kind: input, shape index: {}]   ;;  %s2443_s4 = inlined_call_operand.vmem [shape: f32[1,512], index: 4, kind: input, shape index: {}]   ;;  %s2444_s5 = inlined_call_operand.vmem [shape: f32[2,512], index: 5, kind: output, shape index: {}]  }
   0x1   :  { %12 = vsyncpa [#allocation4 + $0x1], 0  ;;  %s1834_s18 = smov 0   ;;  %s1836_s19 = smov 0  }
   0x2   :  { %s1838_s20 = smov 0   ;;  %s1840_s21 = smov 0  }
   0x3 LB: > { %s1853_s22 = sadd.s32 4294967295, %s1799_s21   ;;  %s1856_s23 = sadd.s32 1, %s1799_s21   ;;  %s1799_s21 = sphi %s1840_s21, %s2455_s21   ;;  %s1795_s20 = sphi %s1838_s20, %s2454_s20   ;;  %s1791_s19 = sphi %s1836_s19, %s2453_s19   ;;  %s1787_s18 = sphi %s1834_s18, %s2452_s18  }
   0x4   : > { %s48_s24 = ssub.s32 %s1799_s21, %s1856_s23  ;;  %s51_s25 = sadd.s32 1, %s1795_s20 }
   0x5   : > { %p49_p0 = scmp.eq.s32.totalorder %s48_s24, 0  ;;  %p58_p1 = scmp.ne.s32.totalorder %s1795_s20, %s1791_s19 }
   0x6   : > { %p59_p2 = scmp.eq.s32.totalorder %s1799_s21, 0  ;;  %p64_p3 = scmp.ne.s32.totalorder %s1791_s19, %s1787_s18 }
   0x7   : > { %s1866_s26 = scalar_select %p49_p0, %s1795_s20, %s51_s25  }
   0x8   : > { %p1868_p4 = por %p59_p2, %p58_p1  ;;  %p65_p5 = scmp.eq.s32.totalorder %s1853_s22, 0 }
   0x9   : > { %p1683_p6 = scmp.lt.s32.totalorder %s1799_s21, 4  ;;  %s189_s29 = sand.u32 1, %s1795_s20  }
   0xa   : > { %p1874_p7 = por %p65_p5, %p64_p3  ;;  %s1180_s30 = sshll.u32 %s189_s29, 8 }
   0xb   : > { %s1580_s6 = sshll.u32 %s1799_s21, 8  ;;  %s193_s10 = scalar_lea.vmem [#allocation3], %s1180_s30 }
   0xc   : > { %s199_s9 = scalar_lea.hbm %s2440_s1, %s1580_s6  ;;  %s202_s11 = sshll.u32 %s193_s10, 4  ;;  %s203_s11 = int_to_ptr.vmem [resolvable:$true] %s202_s11 }
   0xd   : > { %s200_s12 = sshll.u32 %s199_s9, 4  ;;  %p1885_p8 = pnand %p1683_p6, %p1868_p4  ;;  %s201_s12 = int_to_ptr.hbm [resolvable:$true] %s200_s12 }
   0xe   : > { %p1184_p9 = scmp.ge.s32.totalorder %s1799_s21, 1  ;;  %s190_s14 = scalar_lea.sflag [#allocation4], %s189_s29 }
   0xf   : > { %s1735_s15 = sshra.s32 %s201_s12, 4  ;;  %p1739_p11 = pneg %p1885_p8  ;;  %s1736_s15 = int_to_ptr.hbm [resolvable:$true] %s1735_s15 }
  0x10   : > { %s1737_s16 = scalar_lea.hbm %s1736_s15, 256  ;;  %s1742_s24 = scalar_lea.hbm %s2440_s1, 1024 }
  0x11   : > { %p1738_p10 = scmp.ne.s32.totalorder %s1736_s15, %s1737_s16  ;;  %p1743_p0 = scmp.lt.s32.totalorder %s1736_s15, %s2440_s1 }
  0x12   : > { %p1744_p1 = scmp.lt.s32.totalorder %s1742_s24, %s1737_s16 }
  0x13   : > { %p1740_p12 = pnand %p1739_p11, %p1738_p10 }
  0x14   : > { %p1745_p2 = por %p1744_p1, %p1743_p0 }
  0x15   : > { %p1741_p13 = pneg %p1740_p12 }
  0x17   : > { %p1746_p3 = pnand %p1745_p2, %p1741_p13 }
  0x19   : > { %1749 = shalt.err (!%p1746_p3)
}
  0x1a   : > { %s1801_s29 = smov 128   ;;  %s1802_s30 = smov 8  }
  0x1b   : > { %1682 = dma.hbm_to_vmem [thread:$0]  (!%p1885_p8), %s201_s12, 4096, %s203_s11, %s190_s14, %s1801_s29, %s1801_s29, %s1802_s30  }
  0x1c   : > { %p210_p4 = scmp.lt.s32.totalorder %s1799_s21, 5 }
  0x1e   : > { %p211_p5 = pnand %p1184_p9, %p210_p4 }
  0x1f   : > { %s216_s6 = sand.u32 (!%p211_p5), 1, %s1791_s19  }
  0x20   : > { %214 = sbr.rel (%p211_p5) target bundleno = 459 (0x1cb), region = 40  ;;  %s1185_s7 = sshll.u32 (!%p211_p5), %s216_s6, 8 }
  0x21   : > { %s217_s8 = scalar_lea.sflag (!%p211_p5), [#allocation4], %s216_s6  ;;  %s1904_s9 = scalar_lea.vmem (!%p211_p5), [#allocation3], %s1185_s7 }
  0x25   : > { %1782 = dma.done.wait (%p1874_p7), %s217_s8, 4096  }
  0x26   : > { %1784 = vsyncadd (%p1874_p7), %s217_s8, 4294963200  ;;  %s1186_s10 = sshll.u32 %s1853_s22, 1  ;;  %p1187_p8 = scmp.ne.s32.totalorder %s1853_s22, 0 }
  0x27   : > { %p248_p6 = scmp.lt.s32.totalorder %s1186_s10, 7 }
  0x28   : > { %256 = sbr.rel (%p1187_p8) target bundleno = 47 (0x2f), region = 48 }
  0x29   : > { %s2457_s10 = smov (!%p248_p6, %s1186_s10), 7 }
  0x2a   : > { %s250_s12 = scalar_lea.vmem %s2439_s0, %s2457_s10 }
  0x2d   : > { %v1803_v0 = vmov 0.0  }
  0x2e   : > { %257 = vst [vmem:[#allocation2] sm:$0xf] %v1803_v0 }
  0x2f PF: > { %v1246_v1 = vld [vmem:[%s1904_s9 + $0x70] sm:$0xf]  ;;  %v1596_v2 = vld [vmem:[%s1904_s9 + $0x74] sm:$0xf0]  ;;  %v1595_v6 = vld [vmem:[%s1904_s9 + $0x74] sm:$0xf] }
  0x30   : > { %v1310_v3 = vld [vmem:[%s1904_s9 + $0xf0] sm:$0xf]  ;;  %v1247_v4 = vor.u32 %v1596_v2, %v1246_v1  ;;  %v1612_v5 = vld [vmem:[%s1904_s9 + $0xf4] sm:$0xf0]  ;;  %v1248_v7 = vld [vmem:[%s1904_s9 + $0x78] sm:$0xf0] }
  0x31   : > { %v1311_v8 = vor.u32 %v1612_v5, %v1310_v3  ;;  %v1251_v9 = vor.u32 %v1595_v6, %v1248_v7  ;;  %v1611_v10 = vld [vmem:[%s1904_s9 + $0xf4] sm:$0xf]  ;;  %v1312_v11 = vld [vmem:[%s1904_s9 + $0xf8] sm:$0xf0]  ;;  %v1238_v12 = vld [vmem:[%s1904_s9 + $0x60] sm:$0xf] }
  0x32   : > { %458 = vmatpush.bf16.msra.mxu0 %v1247_v4  ;;  %v1315_v13 = vor.u32 %v1611_v10, %v1312_v11  ;;  %v1594_v14 = vld [vmem:[%s1904_s9 + $0x64] sm:$0xf0]  ;;  %v1302_v15 = vld [vmem:[%s1904_s9 + $0xe0] sm:$0xf]  ;;  %v1593_v19 = vld [vmem:[%s1904_s9 + $0x64] sm:$0xf] }
  0x33   : > { %v1610_v16 = vld [vmem:[%s1904_s9 + $0xe4] sm:$0xf0]  ;;  %471 = vmatpush.bf16.msra.mxu1 %v1311_v8  ;;  %484 = vmatpush.bf16.msra.mxu2 %v1251_v9  ;;  %v1239_v17 = vor.u32 %v1594_v14, %v1238_v12  ;;  %v1240_v20 = vld [vmem:[%s1904_s9 + $0x68] sm:$0xf0]  ;;  %v1609_v21 = vld [vmem:[%s1904_s9 + $0xe4] sm:$0xf] }
  0x34   : > { %v1303_v18 = vor.u32 %v1610_v16, %v1302_v15  ;;  %497 = vmatpush.bf16.msra.mxu3 %v1315_v13  ;;  %v1243_v22 = vor.u32 %v1593_v19, %v1240_v20  ;;  %v1304_v23 = vld [vmem:[%s1904_s9 + $0xe8] sm:$0xf0]  ;;  %v1230_v24 = vld [vmem:[%s1904_s9 + $0x50] sm:$0xf]  ;;  %v1592_v25 = vld [vmem:[%s1904_s9 + $0x54] sm:$0xf0] }
  0x35   : > { %v1307_v26 = vor.u32 %v1609_v21, %v1304_v23  ;;  %v1294_v27 = vld [vmem:[%s1904_s9 + $0xd0] sm:$0xf]  ;;  %v1608_v28 = vld [vmem:[%s1904_s9 + $0xd4] sm:$0xf0]  ;;  %v1591_v29 = vld [vmem:[%s1904_s9 + $0x54] sm:$0xf]  ;;  %v1231_v30 = vor.u32 %v1592_v25, %v1230_v24 }
  0x36   : > { %459 = vmatpush.bf16.msra.mxu0 %v1239_v17  ;;  %v1232_v31 = vld [vmem:[%s1904_s9 + $0x58] sm:$0xf0]  ;;  %v1607_v32 = vld [vmem:[%s1904_s9 + $0xd4] sm:$0xf]  ;;  %v1295_v34 = vor.u32 %v1608_v28, %v1294_v27  ;;  %v1222_v36 = vld [vmem:[%s1904_s9 + $0x40] sm:$0xf] }
  0x37   : > { %v1296_v33 = vld [vmem:[%s1904_s9 + $0xd8] sm:$0xf0]  ;;  %472 = vmatpush.bf16.msra.mxu1 %v1303_v18  ;;  %485 = vmatpush.bf16.msra.mxu2 %v1243_v22  ;;  %v1235_v35 = vor.u32 %v1591_v29, %v1232_v31  ;;  %v1590_v37 = vld [vmem:[%s1904_s9 + $0x44] sm:$0xf0]  ;;  %v1286_v38 = vld [vmem:[%s1904_s9 + $0xc0] sm:$0xf] }
  0x38   : > { %498 = vmatpush.bf16.msra.mxu3 %v1307_v26  ;;  %v1299_v39 = vor.u32 %v1607_v32, %v1296_v33  ;;  %v1606_v40 = vld [vmem:[%s1904_s9 + $0xc4] sm:$0xf0]  ;;  %v1589_v41 = vld [vmem:[%s1904_s9 + $0x44] sm:$0xf]  ;;  %v1224_v42 = vld [vmem:[%s1904_s9 + $0x48] sm:$0xf0]  ;;  %v1223_v45 = vor.u32 %v1590_v37, %v1222_v36 }
  0x39   : > { %v1605_v43 = vld [vmem:[%s1904_s9 + $0xc4] sm:$0xf]  ;;  %v1288_v44 = vld [vmem:[%s1904_s9 + $0xc8] sm:$0xf0]  ;;  %v1287_v46 = vor.u32 %v1606_v40, %v1286_v38  ;;  %v1227_v47 = vor.u32 %v1589_v41, %v1224_v42  ;;  %v1214_v48 = vld [vmem:[%s1904_s9 + $0x30] sm:$0xf] }
  0x3a   : > { %460 = vmatpush.bf16.msra.mxu0 %v1231_v30  ;;  %v1588_v49 = vld [vmem:[%s1904_s9 + $0x34] sm:$0xf0]  ;;  %v1278_v50 = vld [vmem:[%s1904_s9 + $0xb0] sm:$0xf]  ;;  %v1291_v51 = vor.u32 %v1605_v43, %v1288_v44  ;;  %v1587_v53 = vld [vmem:[%s1904_s9 + $0x34] sm:$0xf] }
  0x3b   : > { %473 = vmatpush.bf16.msra.mxu1 %v1295_v34  ;;  %486 = vmatpush.bf16.msra.mxu2 %v1235_v35  ;;  %v1604_v52 = vld [vmem:[%s1904_s9 + $0xb4] sm:$0xf0]  ;;  %v1216_v54 = vld [vmem:[%s1904_s9 + $0x38] sm:$0xf0]  ;;  %v1603_v55 = vld [vmem:[%s1904_s9 + $0xb4] sm:$0xf]  ;;  %v1215_v57 = vor.u32 %v1588_v49, %v1214_v48 }
  0x3c   : > { %499 = vmatpush.bf16.msra.mxu3 %v1299_v39  ;;  %v1280_v56 = vld [vmem:[%s1904_s9 + $0xb8] sm:$0xf0]  ;;  %v1279_v58 = vor.u32 %v1604_v52, %v1278_v50  ;;  %v1219_v59 = vor.u32 %v1587_v53, %v1216_v54  ;;  %v1206_v60 = vld [vmem:[%s1904_s9 + $0x20] sm:$0xf]  ;;  %v1586_v61 = vld [vmem:[%s1904_s9 + $0x24] sm:$0xf0] }
  0x3d   : > { %v1270_v62 = vld [vmem:[%s1904_s9 + $0xa0] sm:$0xf]  ;;  %v1283_v63 = vor.u32 %v1603_v55, %v1280_v56  ;;  %v1602_v0 = vld [vmem:[%s1904_s9 + $0xa4] sm:$0xf0]  ;;  %v1585_v1 = vld [vmem:[%s1904_s9 + $0x24] sm:$0xf]  ;;  %v1207_v5 = vor.u32 %v1586_v61, %v1206_v60 }
  0x3e   : > { %461 = vmatpush.bf16.msra.mxu0 %v1223_v45  ;;  %v1208_v2 = vld [vmem:[%s1904_s9 + $0x28] sm:$0xf0]  ;;  %v1601_v3 = vld [vmem:[%s1904_s9 + $0xa4] sm:$0xf]  ;;  %v1198_v6 = vld [vmem:[%s1904_s9 + $0x10] sm:$0xf]  ;;  %v1271_v7 = vor.u32 %v1602_v0, %v1270_v62 }
  0x3f   : > { %474 = vmatpush.bf16.msra.mxu1 %v1287_v46  ;;  %487 = vmatpush.bf16.msra.mxu2 %v1227_v47  ;;  %v1272_v4 = vld [vmem:[%s1904_s9 + $0xa8] sm:$0xf0]  ;;  %v1211_v8 = vor.u32 %v1585_v1, %v1208_v2  ;;  %v1584_v9 = vld [vmem:[%s1904_s9 + $0x14] sm:$0xf0]  ;;  %v1262_v10 = vld [vmem:[%s1904_s9 + $0x90] sm:$0xf] }
  0x40   : > { %500 = vmatpush.bf16.msra.mxu3 %v1291_v51  ;;  %v1600_v11 = vld [vmem:[%s1904_s9 + $0x94] sm:$0xf0]  ;;  %v1275_v12 = vor.u32 %v1601_v3, %v1272_v4  ;;  %v1583_v13 = vld [vmem:[%s1904_s9 + $0x14] sm:$0xf]  ;;  %v1200_v14 = vld [vmem:[%s1904_s9 + $0x18] sm:$0xf0]  ;;  %v1199_v18 = vor.u32 %v1584_v9, %v1198_v6 }
  0x41   : > { %v259_v15 = vld [vmem:[%s250_s12] sm:$0x3]  ;;  %v1264_v17 = vld [vmem:[%s1904_s9 + $0x98] sm:$0xf0]  ;;  %v1263_v19 = vor.u32 %v1600_v11, %v1262_v10  ;;  %v1203_v20 = vor.u32 %v1583_v13, %v1200_v14  ;;  %v1190_v21 = vld [vmem:[%s1904_s9] sm:$0xf] }
  0x42   : > { %462 = vmatpush.bf16.msra.mxu0 %v1215_v57  ;;  %v1599_v16 = vld [vmem:[%s1904_s9 + $0x94] sm:$0xf]  ;;  %293 = vst [vmem:[#allocation1] ss:$9 sm:$0xff] %v259_v15  ;;  %v1582_v22 = vld [vmem:[%s1904_s9 + $0x4] sm:$0xf0] }
  0x43   : > { %475 = vmatpush.bf16.msra.mxu1 %v1279_v58  ;;  %488 = vmatpush.bf16.msra.mxu2 %v1219_v59  ;;  %v1254_v23 = vld [vmem:[%s1904_s9 + $0x80] sm:$0xf]  ;;  %v1267_v24 = vor.u32 %v1599_v16, %v1264_v17  ;;  %v1598_v25 = vld [vmem:[%s1904_s9 + $0x84] sm:$0xf0]  ;;  %v1581_v26 = vld [vmem:[%s1904_s9 + $0x4] sm:$0xf]  ;;  %v1191_v30 = vor.u32 %v1582_v22, %v1190_v21 }
  0x44   : > { %501 = vmatpush.bf16.msra.mxu3 %v1283_v63  ;;  %v1192_v27 = vld [vmem:[%s1904_s9 + $0x8] sm:$0xf0]  ;;  %v1597_v28 = vld [vmem:[%s1904_s9 + $0x84] sm:$0xf]  ;;  %v1255_v31 = vor.u32 %v1598_v25, %v1254_v23  ;;  %vm513_vm0 = vcmask 1041408   ;;  %p1316_p7 = scmp.ne.s32.totalorder %s1853_s22, 3 }
  0x45   : > { %v1256_v29 = vld [vmem:[%s1904_s9 + $0x88] sm:$0xf0]  ;;  %v1195_v32 = vor.u32 %v1581_v26, %v1192_v27  ;;  %v258_v44 = vld [vmem:[#allocation2] sm:$0xf] }
  0x46   : > { %463 = vmatpush.bf16.msra.mxu0 %v1207_v5  ;;  %v1259_v33 = vor.u32 %v1597_v28, %v1256_v29 }
  0x47   : > { %476 = vmatpush.bf16.msra.mxu1 %v1271_v7  ;;  %489 = vmatpush.bf16.msra.mxu2 %v1211_v8 }
  0x48   : > { %502 = vmatpush.bf16.msra.mxu3 %v1275_v12 }
  0x49   : > { %v294_v34 = vld [vmem:[#allocation1] sm:$0xff]  ;;  %v295_v35 = vld [vmem:[#allocation1 + $0x9] sm:$0xff] }
  0x4a   : > { %464 = vmatpush.bf16.msra.mxu0 %v1199_v18 }
  0x4b   : > { %477 = vmatpush.bf16.msra.mxu1 %v1263_v19  ;;  %490 = vmatpush.bf16.msra.mxu2 %v1203_v20 }
  0x4c   : > { %503 = vmatpush.bf16.msra.mxu3 %v1267_v24 }
  0x4e   : > { %465 = vmatpush.bf16.msra.mxu0 %v1191_v30 }
  0x4f   : > { %478 = vmatpush.bf16.msra.mxu1 %v1255_v31  ;;  %491 = vmatpush.bf16.msra.mxu2 %v1195_v32 }
  0x50   : > { %504 = vmatpush.bf16.msra.mxu3 %v1259_v33 }
  0x51   : > { %466 = vmatmul.bf16.vlgmr.msra.gmra.mxu0 %v294_v34 }
  0x52   : > { %479 = vmatmul.bf16.vlgmr.msra.gmra.mxu1 %v295_v35  ;;  %492 = vmatmul.bf16.vlgmr.msra.gmra.mxu2 %v294_v34 }
  0x53   : > { %505 = vmatmul.bf16.vlgmr.msra.gmra.mxu3 %v295_v35 }
  0xce   : > { %v467_v36 = vpop.f32.mrf.mxu0 }
  0xcf   : > { %v480_v37 = vpop.f32.mrf.mxu1 }
  0xd0   : > { %v481_v43 = vadd.f32 %v480_v37, %v467_v36 }
  0xd5   : > { %v493_v38 = vpop.f32.mrf.mxu2 }
  0xd6   : > { %v506_v39 = vpop.f32.mrf.mxu3  ;;  %v469_v40 = vpop.f32.mrf.mxu0 }
  0xd7   : > { %v507_v41 = vadd.f32 %v506_v39, %v493_v38  ;;  %v482_v42 = vpop.f32.mrf.mxu1 }
  0xd9   : > { %v512_v45 = vrot.slane %v507_v41, 6 }
  0xda   : > { %521 = sbr.rel (%p1316_p7) target bundleno = 459 (0x1cb), region = 52 }
  0xdb   : > { %v514_v46 = vsel %vm513_vm0, %v481_v43, %v512_v45 }
  0xdc   : > { %v516_v47 = vadd.f32 %v514_v46, %v258_v44 }
  0xdd   : > { %v495_v48 = vpop.f32.mrf.mxu2 }
  0xde   : > { %517 = vst [vmem:[#allocation2] sm:$0xf] %v516_v47  ;;  %v508_v49 = vpop.f32.mrf.mxu3 }
  0xdf   : > { %v1431_v50 = vld [vmem:[%s2442_s3 + $0xe0] sm:$0xf]  ;;  %v1643_v51 = vld [vmem:[%s2442_s3 + $0xec] sm:$0xf0]  ;;  %v1641_v55 = vld [vmem:[%s2442_s3 + $0xe4] sm:$0xf] }
  0xe0   : > { %v1559_v52 = vld [vmem:[%s2442_s3 + $0x1e0] sm:$0xf]  ;;  %v1432_v53 = vor.u32 %v1643_v51, %v1431_v50  ;;  %v1675_v54 = vld [vmem:[%s2442_s3 + $0x1ec] sm:$0xf0]  ;;  %v1433_v56 = vld [vmem:[%s2442_s3 + $0xf0] sm:$0xf0] }
  0xe1   : > { %v1560_v57 = vor.u32 %v1675_v54, %v1559_v52  ;;  %v1436_v58 = vor.u32 %v1641_v55, %v1433_v56  ;;  %v1673_v59 = vld [vmem:[%s2442_s3 + $0x1e4] sm:$0xf]  ;;  %v1561_v60 = vld [vmem:[%s2442_s3 + $0x1f0] sm:$0xf0]  ;;  %v1415_v61 = vld [vmem:[%s2442_s3 + $0xc0] sm:$0xf] }
  0xe2   : > { %935 = vmatpush.bf16.msra.mxu0 %v1432_v53  ;;  %v1564_v62 = vor.u32 %v1673_v59, %v1561_v60  ;;  %v1639_v63 = vld [vmem:[%s2442_s3 + $0xcc] sm:$0xf0]  ;;  %v1543_v0 = vld [vmem:[%s2442_s3 + $0x1c0] sm:$0xf]  ;;  %v1637_v4 = vld [vmem:[%s2442_s3 + $0xc4] sm:$0xf] }
  0xe3   : > { %v1671_v1 = vld [vmem:[%s2442_s3 + $0x1cc] sm:$0xf0]  ;;  %948 = vmatpush.bf16.msra.mxu1 %v1560_v57  ;;  %961 = vmatpush.bf16.msra.mxu2 %v1436_v58  ;;  %v1416_v2 = vor.u32 %v1639_v63, %v1415_v61  ;;  %v1417_v5 = vld [vmem:[%s2442_s3 + $0xd0] sm:$0xf0]  ;;  %v1669_v6 = vld [vmem:[%s2442_s3 + $0x1c4] sm:$0xf] }
  0xe4   : > { %v1544_v3 = vor.u32 %v1671_v1, %v1543_v0  ;;  %974 = vmatpush.bf16.msra.mxu3 %v1564_v62  ;;  %v1420_v7 = vor.u32 %v1637_v4, %v1417_v5  ;;  %v1545_v8 = vld [vmem:[%s2442_s3 + $0x1d0] sm:$0xf0]  ;;  %v1399_v9 = vld [vmem:[%s2442_s3 + $0xa0] sm:$0xf]  ;;  %v1635_v10 = vld [vmem:[%s2442_s3 + $0xac] sm:$0xf0] }
  0xe5   : > { %v1548_v11 = vor.u32 %v1669_v6, %v1545_v8  ;;  %v1527_v12 = vld [vmem:[%s2442_s3 + $0x1a0] sm:$0xf]  ;;  %v1667_v13 = vld [vmem:[%s2442_s3 + $0x1ac] sm:$0xf0]  ;;  %v1633_v14 = vld [vmem:[%s2442_s3 + $0xa4] sm:$0xf]  ;;  %v1400_v15 = vor.u32 %v1635_v10, %v1399_v9 }
  0xe6   : > { %936 = vmatpush.bf16.msra.mxu0 %v1416_v2  ;;  %v1401_v16 = vld [vmem:[%s2442_s3 + $0xb0] sm:$0xf0]  ;;  %v1665_v17 = vld [vmem:[%s2442_s3 + $0x1a4] sm:$0xf]  ;;  %v1528_v19 = vor.u32 %v1667_v13, %v1527_v12  ;;  %v1383_v21 = vld [vmem:[%s2442_s3 + $0x80] sm:$0xf] }
  0xe7   : > { %v1529_v18 = vld [vmem:[%s2442_s3 + $0x1b0] sm:$0xf0]  ;;  %949 = vmatpush.bf16.msra.mxu1 %v1544_v3  ;;  %962 = vmatpush.bf16.msra.mxu2 %v1420_v7  ;;  %v1404_v20 = vor.u32 %v1633_v14, %v1401_v16  ;;  %v1631_v22 = vld [vmem:[%s2442_s3 + $0x8c] sm:$0xf0]  ;;  %v1511_v23 = vld [vmem:[%s2442_s3 + $0x180] sm:$0xf] }
  0xe8   : > { %975 = vmatpush.bf16.msra.mxu3 %v1548_v11  ;;  %v1532_v24 = vor.u32 %v1665_v17, %v1529_v18  ;;  %v1663_v25 = vld [vmem:[%s2442_s3 + $0x18c] sm:$0xf0]  ;;  %v1629_v26 = vld [vmem:[%s2442_s3 + $0x84] sm:$0xf]  ;;  %v1385_v27 = vld [vmem:[%s2442_s3 + $0x90] sm:$0xf0]  ;;  %v1384_v30 = vor.u32 %v1631_v22, %v1383_v21 }
  0xe9   : > { %v1661_v28 = vld [vmem:[%s2442_s3 + $0x184] sm:$0xf]  ;;  %v1513_v29 = vld [vmem:[%s2442_s3 + $0x190] sm:$0xf0]  ;;  %v1512_v31 = vor.u32 %v1663_v25, %v1511_v23  ;;  %v1388_v32 = vor.u32 %v1629_v26, %v1385_v27  ;;  %v1367_v33 = vld [vmem:[%s2442_s3 + $0x60] sm:$0xf] }
  0xea   : > { %937 = vmatpush.bf16.msra.mxu0 %v1400_v15  ;;  %v1627_v34 = vld [vmem:[%s2442_s3 + $0x6c] sm:$0xf0]  ;;  %v1495_v35 = vld [vmem:[%s2442_s3 + $0x160] sm:$0xf]  ;;  %v1516_v36 = vor.u32 %v1661_v28, %v1513_v29  ;;  %v1625_v38 = vld [vmem:[%s2442_s3 + $0x64] sm:$0xf] }
  0xeb   : > { %950 = vmatpush.bf16.msra.mxu1 %v1528_v19  ;;  %963 = vmatpush.bf16.msra.mxu2 %v1404_v20  ;;  %v1659_v37 = vld [vmem:[%s2442_s3 + $0x16c] sm:$0xf0]  ;;  %v1369_v39 = vld [vmem:[%s2442_s3 + $0x70] sm:$0xf0]  ;;  %v1657_v40 = vld [vmem:[%s2442_s3 + $0x164] sm:$0xf]  ;;  %v1368_v42 = vor.u32 %v1627_v34, %v1367_v33 }
  0xec   : > { %976 = vmatpush.bf16.msra.mxu3 %v1532_v24  ;;  %v1497_v41 = vld [vmem:[%s2442_s3 + $0x170] sm:$0xf0]  ;;  %v1496_v43 = vor.u32 %v1659_v37, %v1495_v35  ;;  %v1372_v44 = vor.u32 %v1625_v38, %v1369_v39  ;;  %v1351_v45 = vld [vmem:[%s2442_s3 + $0x40] sm:$0xf]  ;;  %v1623_v46 = vld [vmem:[%s2442_s3 + $0x4c] sm:$0xf0] }
  0xed   : > { %v1479_v47 = vld [vmem:[%s2442_s3 + $0x140] sm:$0xf]  ;;  %v1500_v48 = vor.u32 %v1657_v40, %v1497_v41  ;;  %v1655_v49 = vld [vmem:[%s2442_s3 + $0x14c] sm:$0xf0]  ;;  %v1621_v50 = vld [vmem:[%s2442_s3 + $0x44] sm:$0xf]  ;;  %v1352_v54 = vor.u32 %v1623_v46, %v1351_v45 }
  0xee   : > { %938 = vmatpush.bf16.msra.mxu0 %v1384_v30  ;;  %v1353_v51 = vld [vmem:[%s2442_s3 + $0x50] sm:$0xf0]  ;;  %v1653_v52 = vld [vmem:[%s2442_s3 + $0x144] sm:$0xf]  ;;  %v1335_v55 = vld [vmem:[%s2442_s3 + $0x20] sm:$0xf]  ;;  %v1480_v56 = vor.u32 %v1655_v49, %v1479_v47 }
  0xef   : > { %951 = vmatpush.bf16.msra.mxu1 %v1512_v31  ;;  %964 = vmatpush.bf16.msra.mxu2 %v1388_v32  ;;  %v1481_v53 = vld [vmem:[%s2442_s3 + $0x150] sm:$0xf0]  ;;  %v1356_v57 = vor.u32 %v1621_v50, %v1353_v51  ;;  %v1619_v58 = vld [vmem:[%s2442_s3 + $0x2c] sm:$0xf0]  ;;  %v1463_v59 = vld [vmem:[%s2442_s3 + $0x120] sm:$0xf] }
  0xf0   : > { %977 = vmatpush.bf16.msra.mxu3 %v1516_v36  ;;  %v1651_v60 = vld [vmem:[%s2442_s3 + $0x12c] sm:$0xf0]  ;;  %v1484_v61 = vor.u32 %v1653_v52, %v1481_v53  ;;  %v1617_v62 = vld [vmem:[%s2442_s3 + $0x24] sm:$0xf]  ;;  %v1337_v63 = vld [vmem:[%s2442_s3 + $0x30] sm:$0xf0]  ;;  %v1336_v4 = vor.u32 %v1619_v58, %v1335_v55 }
  0xf1   : > { %v1649_v0 = vld [vmem:[%s2442_s3 + $0x124] sm:$0xf]  ;;  %v1465_v1 = vld [vmem:[%s2442_s3 + $0x130] sm:$0xf0]  ;;  %v1319_v2 = vld [vmem:[%s2442_s3] sm:$0xf]  ;;  %v1464_v9 = vor.u32 %v1651_v60, %v1463_v59  ;;  %v1340_v10 = vor.u32 %v1617_v62, %v1337_v63 }
  0xf2   : > { %939 = vmatpush.bf16.msra.mxu0 %v1368_v42  ;;  %v1615_v3 = vld [vmem:[%s2442_s3 + $0xc] sm:$0xf0]  ;;  %v1447_v5 = vld [vmem:[%s2442_s3 + $0x100] sm:$0xf]  ;;  %v1613_v7 = vld [vmem:[%s2442_s3 + $0x4] sm:$0xf]  ;;  %v1468_v14 = vor.u32 %v1649_v0, %v1465_v1 }
  0xf3   : > { %952 = vmatpush.bf16.msra.mxu1 %v1496_v43  ;;  %965 = vmatpush.bf16.msra.mxu2 %v1372_v44  ;;  %v1647_v6 = vld [vmem:[%s2442_s3 + $0x10c] sm:$0xf0]  ;;  %v1321_v8 = vld [vmem:[%s2442_s3 + $0x10] sm:$0xf0]  ;;  %v1645_v11 = vld [vmem:[%s2442_s3 + $0x104] sm:$0xf]  ;;  %v1320_v22 = vor.u32 %v1615_v3, %v1319_v2 }
  0xf4   : > { %978 = vmatpush.bf16.msra.mxu3 %v1500_v48  ;;  %v1449_v12 = vld [vmem:[%s2442_s3 + $0x110] sm:$0xf0]  ;;  %v523_v13 = vld [vmem:[%s2441_s2] sm:$0x3]  ;;  %v1439_v15 = vld [vmem:[%s2442_s3 + $0xe8] sm:$0xf]  ;;  %v1448_v26 = vor.u32 %v1647_v6, %v1447_v5  ;;  %v1324_v27 = vor.u32 %v1613_v7, %v1321_v8 }
  0xf5   : > { %v1644_v16 = vld [vmem:[%s2442_s3 + $0xf4] sm:$0xf0]  ;;  %v525_v17 = vperm.slane %v523_v13, 0  ;;  %v526_v18 = vperm.slane %v523_v13, 1  ;;  %v1567_v19 = vld [vmem:[%s2442_s3 + $0x1e8] sm:$0xf]  ;;  %v1452_v30 = vor.u32 %v1645_v11, %v1449_v12 }
  0xf6   : > { %940 = vmatpush.bf16.msra.mxu0 %v1352_v54  ;;  %v1676_v20 = vld [vmem:[%s2442_s3 + $0x1f4] sm:$0xf0]  ;;  %v1642_v21 = vld [vmem:[%s2442_s3 + $0xec] sm:$0xf]  ;;  %v1441_v23 = vld [vmem:[%s2442_s3 + $0xf8] sm:$0xf0]  ;;  %v1440_v31 = vor.u32 %v1644_v16, %v1439_v15 }
  0xf7   : > { %953 = vmatpush.bf16.msra.mxu1 %v1480_v56  ;;  %966 = vmatpush.bf16.msra.mxu2 %v1356_v57  ;;  %v522_v24 = vld [vmem:[#allocation2] sm:$0xf]  ;;  %v527_v25 = vrot.slane %v526_v18, 6  ;;  %v1674_v28 = vld [vmem:[%s2442_s3 + $0x1ec] sm:$0xf]  ;;  %v1568_v33 = vor.u32 %v1676_v20, %v1567_v19  ;;  %v1444_v34 = vor.u32 %v1642_v21, %v1441_v23 }
  0xf8   : > { %979 = vmatpush.bf16.msra.mxu3 %v1484_v61  ;;  %v1569_v29 = vld [vmem:[%s2442_s3 + $0x1f8] sm:$0xf0]  ;;  %v1423_v36 = vld [vmem:[%s2442_s3 + $0xc8] sm:$0xf]  ;;  %v1640_v37 = vld [vmem:[%s2442_s3 + $0xd4] sm:$0xf0] }
  0xf9   : > { %v528_v32 = vsel %vm513_vm0, %v525_v17, %v527_v25  ;;  %v1551_v38 = vld [vmem:[%s2442_s3 + $0x1c8] sm:$0xf]  ;;  %v1572_v39 = vor.u32 %v1674_v28, %v1569_v29  ;;  %v1672_v40 = vld [vmem:[%s2442_s3 + $0x1d4] sm:$0xf0]  ;;  %v1638_v41 = vld [vmem:[%s2442_s3 + $0xcc] sm:$0xf]  ;;  %v1424_v46 = vor.u32 %v1640_v37, %v1423_v36 }
  0xfa   : > { %941 = vmatpush.bf16.msra.mxu0 %v1336_v4  ;;  %v530_v35 = vadd.f32 %v528_v32, %v522_v24  ;;  %v1425_v42 = vld [vmem:[%s2442_s3 + $0xd8] sm:$0xf0]  ;;  %v1670_v44 = vld [vmem:[%s2442_s3 + $0x1cc] sm:$0xf]  ;;  %v1552_v48 = vor.u32 %v1672_v40, %v1551_v38  ;;  %v1407_v50 = vld [vmem:[%s2442_s3 + $0xa8] sm:$0xf] }
  0xfb   : > { %954 = vmatpush.bf16.msra.mxu1 %v1464_v9  ;;  %967 = vmatpush.bf16.msra.mxu2 %v1340_v10  ;;  %v1553_v45 = vld [vmem:[%s2442_s3 + $0x1d8] sm:$0xf0]  ;;  %v1428_v49 = vor.u32 %v1638_v41, %v1425_v42  ;;  %v1636_v51 = vld [vmem:[%s2442_s3 + $0xb4] sm:$0xf0]  ;;  %v1535_v52 = vld [vmem:[%s2442_s3 + $0x1a8] sm:$0xf] }
  0xfc   : > { %980 = vmatpush.bf16.msra.mxu3 %v1468_v14  ;;  %v531_v43 = vmul.f32 0.1, %v530_v35  ;;  %v1556_v53 = vor.u32 %v1670_v44, %v1553_v45  ;;  %v1668_v54 = vld [vmem:[%s2442_s3 + $0x1b4] sm:$0xf0]  ;;  %v1634_v55 = vld [vmem:[%s2442_s3 + $0xac] sm:$0xf]  ;;  %v1408_v59 = vor.u32 %v1636_v51, %v1407_v50 }
  0xfd   : > { %v1409_v56 = vld [vmem:[%s2442_s3 + $0xb8] sm:$0xf0]  ;;  %v1666_v57 = vld [vmem:[%s2442_s3 + $0x1ac] sm:$0xf]  ;;  %v1536_v60 = vor.u32 %v1668_v54, %v1535_v52  ;;  %v1391_v62 = vld [vmem:[%s2442_s3 + $0x88] sm:$0xf] }
  0xfe   : > { %942 = vmatpush.bf16.msra.mxu0 %v1320_v22  ;;  %v532_v47 = vmax.f32 %v530_v35, %v531_v43  ;;  %v1537_v58 = vld [vmem:[%s2442_s3 + $0x1b8] sm:$0xf0]  ;;  %v1412_v61 = vor.u32 %v1634_v55, %v1409_v56  ;;  %v1632_v63 = vld [vmem:[%s2442_s3 + $0x94] sm:$0xf0]  ;;  %v1519_v1 = vld [vmem:[%s2442_s3 + $0x188] sm:$0xf] }
  0xff   : > { %955 = vmatpush.bf16.msra.mxu1 %v1448_v26  ;;  %968 = vmatpush.bf16.msra.mxu2 %v1324_v27  ;;  %v1540_v0 = vor.u32 %v1666_v57, %v1537_v58  ;;  %v1664_v2 = vld [vmem:[%s2442_s3 + $0x194] sm:$0xf0]  ;;  %v1392_v3 = vor.u32 %v1632_v63, %v1391_v62  ;;  %v1630_v4 = vld [vmem:[%s2442_s3 + $0x8c] sm:$0xf]  ;;  %v1393_v5 = vld [vmem:[%s2442_s3 + $0x98] sm:$0xf0] }
 0x100   : > { %981 = vmatpush.bf16.msra.mxu3 %v1452_v30  ;;  %534 = vst [vmem:[#allocation1] ss:$4 sm:$0xff] %v532_v47  ;;  %v1662_v6 = vld [vmem:[%s2442_s3 + $0x18c] sm:$0xf]  ;;  %v1521_v7 = vld [vmem:[%s2442_s3 + $0x198] sm:$0xf0]  ;;  %v1520_v14 = vor.u32 %v1664_v2, %v1519_v1  ;;  %v1396_v15 = vor.u32 %v1630_v4, %v1393_v5 }
 0x101   : > { %v1375_v8 = vld [vmem:[%s2442_s3 + $0x68] sm:$0xf]  ;;  %v1628_v9 = vld [vmem:[%s2442_s3 + $0x74] sm:$0xf0]  ;;  %v1524_v18 = vor.u32 %v1662_v6, %v1521_v7  ;;  %v1626_v20 = vld [vmem:[%s2442_s3 + $0x6c] sm:$0xf] }
 0x102   : > { %987 = vmatpush.bf16.msrb.mxu0 %v1440_v31  ;;  %v1503_v16 = vld [vmem:[%s2442_s3 + $0x168] sm:$0xf]  ;;  %v1660_v17 = vld [vmem:[%s2442_s3 + $0x174] sm:$0xf0]  ;;  %v1376_v19 = vor.u32 %v1628_v9, %v1375_v8  ;;  %v1377_v21 = vld [vmem:[%s2442_s3 + $0x78] sm:$0xf0] }
 0x103   : > { %1000 = vmatpush.bf16.msrb.mxu1 %v1568_v33  ;;  %1013 = vmatpush.bf16.msrb.mxu2 %v1444_v34  ;;  %v1658_v22 = vld [vmem:[%s2442_s3 + $0x16c] sm:$0xf]  ;;  %v1505_v23 = vld [vmem:[%s2442_s3 + $0x178] sm:$0xf0]  ;;  %v1359_v24 = vld [vmem:[%s2442_s3 + $0x48] sm:$0xf]  ;;  %v1504_v26 = vor.u32 %v1660_v17, %v1503_v16  ;;  %v1380_v27 = vor.u32 %v1626_v20, %v1377_v21 }
 0x104   : > { %1026 = vmatpush.bf16.msrb.mxu3 %v1572_v39  ;;  %v1624_v25 = vld [vmem:[%s2442_s3 + $0x54] sm:$0xf0]  ;;  %v1487_v28 = vld [vmem:[%s2442_s3 + $0x148] sm:$0xf]  ;;  %v1508_v30 = vor.u32 %v1658_v22, %v1505_v23  ;;  %v1622_v32 = vld [vmem:[%s2442_s3 + $0x4c] sm:$0xf] }
 0x105   : > { %v1656_v29 = vld [vmem:[%s2442_s3 + $0x154] sm:$0xf0]  ;;  %v1360_v31 = vor.u32 %v1624_v25, %v1359_v24  ;;  %v1361_v33 = vld [vmem:[%s2442_s3 + $0x58] sm:$0xf0]  ;;  %v1654_v34 = vld [vmem:[%s2442_s3 + $0x14c] sm:$0xf] }
 0x106   : > { %988 = vmatpush.bf16.msrb.mxu0 %v1424_v46  ;;  %v1489_v35 = vld [vmem:[%s2442_s3 + $0x158] sm:$0xf0]  ;;  %v1343_v36 = vld [vmem:[%s2442_s3 + $0x28] sm:$0xf]  ;;  %v1620_v37 = vld [vmem:[%s2442_s3 + $0x34] sm:$0xf0]  ;;  %v1488_v38 = vor.u32 %v1656_v29, %v1487_v28  ;;  %v1364_v39 = vor.u32 %v1622_v32, %v1361_v33 }
 0x107   : > { %1001 = vmatpush.bf16.msrb.mxu1 %v1552_v48  ;;  %1014 = vmatpush.bf16.msrb.mxu2 %v1428_v49  ;;  %v535_v10 = vld.sshfl [vmem:[#allocation1] sm:$0xff pattern:$0x73625140]  ;;  %v536_v11 = vld.sshfl [vmem:[#allocation1 + $0x8] sm:$0xff pattern:$0x73625140]  ;;  %v1492_v42 = vor.u32 %v1654_v34, %v1489_v35  ;;  %v1344_v43 = vor.u32 %v1620_v37, %v1343_v36 }
 0x108   : > { %1027 = vmatpush.bf16.msrb.mxu3 %v1556_v53  ;;  %v2287_v12 = vpack.c.bf16 %v535_v10, %v535_v10  ;;  %v2289_v13 = vpack.c.bf16 %v536_v11, %v536_v11  ;;  %v1471_v40 = vld [vmem:[%s2442_s3 + $0x128] sm:$0xf]  ;;  %v1652_v41 = vld [vmem:[%s2442_s3 + $0x134] sm:$0xf0]  ;;  %v1618_v44 = vld [vmem:[%s2442_s3 + $0x2c] sm:$0xf] }
 0x109   : > { %v1345_v45 = vld [vmem:[%s2442_s3 + $0x38] sm:$0xf0]  ;;  %v1650_v46 = vld [vmem:[%s2442_s3 + $0x12c] sm:$0xf]  ;;  %v1327_v48 = vld [vmem:[%s2442_s3 + $0x8] sm:$0xf]  ;;  %v1472_v50 = vor.u32 %v1652_v41, %v1471_v40 }
 0x10a   : > { %989 = vmatpush.bf16.msrb.mxu0 %v1408_v59  ;;  %969 = vmatmul.bf16.vlgmr.msra.gmra.mxu2 %v2287_v12  ;;  %v1473_v47 = vld [vmem:[%s2442_s3 + $0x138] sm:$0xf0]  ;;  %v1616_v49 = vld [vmem:[%s2442_s3 + $0x14] sm:$0xf0]  ;;  %v1348_v51 = vor.u32 %v1618_v44, %v1345_v45  ;;  %v1455_v52 = vld [vmem:[%s2442_s3 + $0x108] sm:$0xf] }
 0x10b   : > { %1002 = vmatpush.bf16.msrb.mxu1 %v1536_v60  ;;  %1015 = vmatpush.bf16.msrb.mxu2 %v1412_v61  ;;  %v1476_v53 = vor.u32 %v1650_v46, %v1473_v47  ;;  %v1328_v54 = vor.u32 %v1616_v49, %v1327_v48  ;;  %v1648_v55 = vld [vmem:[%s2442_s3 + $0x114] sm:$0xf0]  ;;  %v1614_v56 = vld [vmem:[%s2442_s3 + $0xc] sm:$0xf]  ;;  %v1329_v57 = vld [vmem:[%s2442_s3 + $0x18] sm:$0xf0] }
 0x10c   : > { %1028 = vmatpush.bf16.msrb.mxu3 %v1540_v0  ;;  %943 = vmatmul.bf16.vlgmr.msra.gmra.mxu0 %v2287_v12  ;;  %v1646_v58 = vld [vmem:[%s2442_s3 + $0x10c] sm:$0xf]  ;;  %v1457_v59 = vld [vmem:[%s2442_s3 + $0x118] sm:$0xf0]  ;;  %v1456_v60 = vor.u32 %v1648_v55, %v1455_v52  ;;  %v1332_v61 = vor.u32 %v1614_v56, %v1329_v57  ;;  %v605_v63 = vld [vmem:[%s2443_s4] sm:$0xf] }
 0x10d   : > { %982 = vmatmul.bf16.vlgmr.msra.gmra.mxu3 %v2289_v13  ;;  %956 = vmatmul.bf16.vlgmr.msra.gmra.mxu1 %v2289_v13  ;;  %v1460_v62 = vor.u32 %v1646_v58, %v1457_v59  ;;  %v607_v2 = vperm.slane %v605_v63, 0  ;;  %v609_v16 = vperm.slane %v605_v63, 2  ;;  %v610_v23 = vperm.slane %v605_v63, 3 }
 0x10e   : > { %990 = vmatpush.bf16.msrb.mxu0 %v1392_v3  ;;  %v608_v3 = vperm.slane %v605_v63, 1 }
 0x10f   : > { %1003 = vmatpush.bf16.msrb.mxu1 %v1520_v14  ;;  %1016 = vmatpush.bf16.msrb.mxu2 %v1396_v15 }
 0x110   : > { %1029 = vmatpush.bf16.msrb.mxu3 %v1524_v18 }
 0x112   : > { %991 = vmatpush.bf16.msrb.mxu0 %v1376_v19 }
 0x113   : > { %1004 = vmatpush.bf16.msrb.mxu1 %v1504_v26  ;;  %1017 = vmatpush.bf16.msrb.mxu2 %v1380_v27 }
 0x114   : > { %1030 = vmatpush.bf16.msrb.mxu3 %v1508_v30 }
 0x116   : > { %992 = vmatpush.bf16.msrb.mxu0 %v1360_v31 }
 0x117   : > { %1005 = vmatpush.bf16.msrb.mxu1 %v1488_v38  ;;  %1018 = vmatpush.bf16.msrb.mxu2 %v1364_v39 }
 0x118   : > { %1031 = vmatpush.bf16.msrb.mxu3 %v1492_v42 }
 0x11a   : > { %993 = vmatpush.bf16.msrb.mxu0 %v1344_v43 }
 0x11b   : > { %1006 = vmatpush.bf16.msrb.mxu1 %v1472_v50  ;;  %1019 = vmatpush.bf16.msrb.mxu2 %v1348_v51 }
 0x11c   : > { %1032 = vmatpush.bf16.msrb.mxu3 %v1476_v53 }
 0x11e   : > { %994 = vmatpush.bf16.msrb.mxu0 %v1328_v54 }
 0x11f   : > { %1007 = vmatpush.bf16.msrb.mxu1 %v1456_v60  ;;  %1020 = vmatpush.bf16.msrb.mxu2 %v1332_v61 }
 0x120   : > { %1033 = vmatpush.bf16.msrb.mxu3 %v1460_v62 }
 0x121   : > { %995 = vmatmul.bf16.vlgmr.msrb.gmra.mxu0 %v2287_v12 }
 0x122   : > { %1008 = vmatmul.bf16.vlgmr.msrb.gmra.mxu1 %v2289_v13  ;;  %1021 = vmatmul.bf16.vlgmr.msrb.gmra.mxu2 %v2287_v12 }
 0x123   : > { %1034 = vmatmul.bf16.vlgmr.msrb.gmra.mxu3 %v2289_v13 }
 0x189   : > { %v944_v0 = vpop.f32.mrf.mxu0 }
 0x18a   : > { %v957_v1 = vpop.f32.mrf.mxu1  ;;  %v945_v6 = vadd.f32 %v944_v0, %v607_v2 }
 0x18c   : > { %v958_v11 = vadd.f32 %v957_v1, %v945_v6 }
 0x18d   : > { %v970_v4 = vpop.f32.mrf.mxu2 }
 0x18e   : > { %v971_v7 = vadd.f32 %v970_v4, %v608_v3  ;;  %v1573_v15 = vmul.f32 -1.442695, %v958_v11 }
 0x190   : > { %v983_v5 = vpop.f32.mrf.mxu3 }
 0x191   : > { %v984_v8 = vadd.f32 %v983_v5, %v971_v7  ;;  %v946_v9 = vpop.f32.mrf.mxu0 }
 0x192   : > { %v959_v10 = vpop.f32.mrf.mxu1 }
 0x193   : > { %v1574_v14 = vmul.f32 -1.442695, %v984_v8 }
 0x195   : > { %1719 = vpow2.f32 %v1574_v14  ;;  %v972_v12 = vpop.f32.mrf.mxu2 }
 0x196   : > { %1721 = vpow2.f32 %v1573_v15 }
 0x198   : > { %v985_v13 = vpop.f32.mrf.mxu3 }
 0x19b   : > { %v1720_v17 = vpop.eup %1719 }
 0x19c   : > { %v1052_v21 = vadd.f32 1.0, %v1720_v17  ;;  %v1722_v24 = vpop.eup %1721 }
 0x19d   : > { %v2392_v28 = vadd.f32 1.0, %v1722_v24 }
 0x19e   : > { %v996_v18 = vpop.f32.mrf.mxu0  ;;  %1723 = vrcp.f32 %v1052_v21  ;;  %vm1075_vm1 = vweird.f32 %v1052_v21  ;;  %v1081_v50 = vand.u32 2147483648, %v1052_v21  ;;  %v1079_v53 = vand.u32 2147483647, %v1052_v21 }
 0x19f   : > { %v997_v19 = vadd.f32 %v996_v18, %v609_v16  ;;  %v1009_v20 = vpop.f32.mrf.mxu1  ;;  %vm1060_vm6 = vweird.f32 %v2392_v28  ;;  %v1064_v1 = vand.u32 2147483647, %v2392_v28  ;;  %v1066_v2 = vand.u32 2147483648, %v2392_v28 }
 0x1a0   : > { %v1082_v59 = vor.u32 1.1754944e-38, %v1081_v50  ;;  %vm1080_vm8 = vcmp.eq.f32.partialorder %v1079_v53, 8.507059e+37 }
 0x1a1   : > { %v1010_v22 = vadd.f32 %v1009_v20, %v997_v19  ;;  %vm1065_vm14 = vcmp.eq.f32.partialorder %v1064_v1, 8.507059e+37  ;;  %v1067_v11 = vor.u32 1.1754944e-38, %v1066_v2 }
 0x1a3   : > { %v1575_v25 = vmul.f32 -1.442695, %v1010_v22 }
 0x1a4   : > { %v1724_v33 = vpop.eup %1723 }
 0x1a5   : > { %1725 = vpow2.f32 %v1575_v25  ;;  %v1022_v26 = vpop.f32.mrf.mxu2  ;;  %v1071_v38 = vmul.f32 %v1724_v33, %v1052_v21  ;;  %vm1076_vm2 = vweird.f32 %v1724_v33 }
 0x1a6   : > { %v998_v27 = vpop.f32.mrf.mxu0  ;;  %v1023_v29 = vadd.f32 %v1022_v26, %v610_v23  ;;  %v1035_v30 = vpop.f32.mrf.mxu3  ;;  %1727 = vrcp.f32 %v2392_v28  ;;  %vm2400_vm3 = vmor %vm1075_vm1, %vm1076_vm2  ;;  %vm1123_vm2 = vcmask 1045508  }
 0x1a7   : > { %v1011_v31 = vpop.f32.mrf.mxu1  ;;  %v1072_v42 = vsub.f32 1.0, %v1071_v38 }
 0x1a8   : > { %v1036_v32 = vadd.f32 %v1035_v30, %v1023_v29 }
 0x1a9   : > { %v1073_v47 = vmul.f32 %v1724_v33, %v1072_v42 }
 0x1aa   : > { %v1576_v34 = vmul.f32 -1.442695, %v1036_v32 }
 0x1ab   : > { %v1726_v35 = vpop.eup %1725  ;;  %v1074_v52 = vadd.f32 %v1724_v33, %v1073_v47 }
 0x1ac   : > { %v1053_v36 = vadd.f32 1.0, %v1726_v35  ;;  %1729 = vpow2.f32 %v1576_v34  ;;  %v2395_v40 = vpop.eup %1727 }
 0x1ad   : > { %v1024_v37 = vpop.f32.mrf.mxu2  ;;  %v1056_v43 = vmul.f32 %v2395_v40, %v2392_v28  ;;  %vm1061_vm7 = vweird.f32 %v2395_v40  ;;  %v1078_v61 = vsel %vm2400_vm3, %v1724_v33, %v1074_v52  ;;  %vm1125_vm3 = vcmask 1043456  }
 0x1ae   : > { %1731 = vrcp.f32 %v1053_v36  ;;  %v1037_v39 = vpop.f32.mrf.mxu3  ;;  %vm1090_vm4 = vweird.f32 %v1053_v36  ;;  %v1096_v60 = vand.u32 2147483648, %v1053_v36  ;;  %v1094_v62 = vand.u32 2147483647, %v1053_v36  ;;  %vm2415_vm11 = vmor %vm1060_vm6, %vm1061_vm7 }
 0x1af   : > { %v1057_v48 = vsub.f32 1.0, %v1056_v43  ;;  %v1083_v8 = vsel %vm1080_vm8, %v1082_v59, %v1078_v61 }
 0x1b0   : > { %v1097_v9 = vor.u32 1.1754944e-38, %v1096_v60  ;;  %vm1095_vm12 = vcmp.eq.f32.partialorder %v1094_v62, 8.507059e+37  ;;  %v1119_v15 = vrot.slane %v1083_v8, 6 }
 0x1b1   : > { %v1058_v55 = vmul.f32 %v2395_v40, %v1057_v48 }
 0x1b2   : > { %v1730_v41 = vpop.eup %1729 }
 0x1b3   : > { %v1054_v44 = vadd.f32 1.0, %v1730_v41  ;;  %v1059_v0 = vadd.f32 %v2395_v40, %v1058_v55 }
 0x1b4   : > { %v1732_v45 = vpop.eup %1731 }
 0x1b5   : > { %v1086_v46 = vmul.f32 %v1732_v45, %v1053_v36  ;;  %1733 = vrcp.f32 %v1054_v44  ;;  %vm1091_vm5 = vweird.f32 %v1732_v45  ;;  %v1111_v3 = vand.u32 2147483648, %v1054_v44 }
 0x1b6   : > { %vm1092_vm9 = vmor %vm1090_vm4, %vm1091_vm5  ;;  %v1109_v6 = vand.u32 2147483647, %v1054_v44  ;;  %vm1105_vm13 = vweird.f32 %v1054_v44  ;;  %v1063_v13 = vsel %vm2415_vm11, %v2395_v40, %v1059_v0 }
 0x1b7   : > { %v1087_v49 = vsub.f32 1.0, %v1086_v46  ;;  %v1112_v12 = vor.u32 1.1754944e-38, %v1111_v3  ;;  %v1068_v20 = vsel %vm1065_vm14, %v1067_v11, %v1063_v13 }
 0x1b8   : > { %vm1110_vm1 = vcmp.eq.f32.partialorder %v1109_v6, 8.507059e+37  ;;  %v1122_v21 = vsel %vm513_vm0, %v1068_v20, %v1119_v15 }
 0x1b9   : > { %v1088_v51 = vmul.f32 %v1732_v45, %v1087_v49 }
 0x1bb   : > { %v1734_v54 = vpop.eup %1733  ;;  %v1089_v57 = vadd.f32 %v1732_v45, %v1088_v51 }
 0x1bc   : > { %v1101_v58 = vmul.f32 %v1734_v54, %v1054_v44  ;;  %vm1106_vm10 = vweird.f32 %v1734_v54 }
 0x1bd   : > { %v1093_v4 = vsel %vm1092_vm9, %v1732_v45, %v1089_v57  ;;  %vm1107_vm15 = vmor %vm1105_vm13, %vm1106_vm10 }
 0x1be   : > { %v1102_v63 = vsub.f32 1.0, %v1101_v58  ;;  %v1098_v14 = vsel %vm1095_vm12, %v1097_v9, %v1093_v4 }
 0x1bf   : > { %v1120_v18 = vrot.slane %v1098_v14, 4 }
 0x1c0   : > { %v1103_v5 = vmul.f32 %v1734_v54, %v1102_v63 }
 0x1c2   : > { %v1104_v10 = vadd.f32 %v1734_v54, %v1103_v5 }
 0x1c4   : > { %v1108_v16 = vsel %vm1107_vm15, %v1734_v54, %v1104_v10 }
 0x1c5   : > { %v1113_v17 = vsel %vm1110_vm1, %v1112_v12, %v1108_v16 }
 0x1c6   : > { %v1121_v19 = vrot.slane %v1113_v17, 2 }
 0x1c8   : > { %v1124_v22 = vsel %vm1123_vm2, %v1120_v18, %v1121_v19 }
 0x1c9   : > { %v1126_v23 = vsel %vm1125_vm3, %v1122_v21, %v1124_v22 }
 0x1ca   : > { %1128 = vst [vmem:[%s2444_s5] sm:$0xff] %v1126_v23 }
 0x1cb PF: > { %p15_p9 = scmp.ge.s32.totalorder %s1856_s23, 6   ;;  %s2452_s18 = smov %s1791_s19 }
 0x1cc   : > { %s2453_s19 = smov %s1795_s20  ;;  %s2454_s20 = smov %s1866_s26 }
 0x1cd   : > { %s2455_s21 = smov %s1856_s23  ;;  %17 = sbr.rel (!%p15_p9) target bundleno = 3 (0x3), region = 87 }
 0x1d2   :  { %1140 = vsyncpa [#allocation4], 1 }
 0x1d3   :  { %1142 = vsyncpa [#allocation4 + $0x1], 1 }

// kernel: yolo_v1_forward.7
= control target key start
LH: loop header
LB: loop body
LE: loop exit
PB: predicated region body
PF: predicated region fallthrough
CT: control target
= control target key end

     0   :  { %vm18_vm0 = vcmask 521216   ;;  %v1272_v0 = vmov 0.0   ;;  %vm114_vm1 = vcmask 1041408   ;;  %vm48_vm2 = vcmask 519168   ;;  %s1273_s23 = smov 64   ;;  %s1625_s0 = inlined_call_operand.vmem [shape: bf16[2,4,4,64], index: 0, kind: input, shape index: {}]   ;;  %s1626_s1 = inlined_call_operand.vmem [shape: bf16[576,64], index: 1, kind: input, shape index: {}]   ;;  %s1627_s2 = inlined_call_operand.vmem [shape: f32[1,64], index: 2, kind: input, shape index: {}]   ;;  %s1628_s3 = inlined_call_operand.vmem [shape: f32[1,64], index: 3, kind: input, shape index: {}]   ;;  %s1629_s4 = inlined_call_operand.vmem [shape: bf16[2,4,4,64], index: 4, kind: output, shape index: {}]  }
   0x1   :  { %19 = vst.msk [vmem:[#allocation2] sm:$0x3f] %vm18_vm0, %v1272_v0  ;;  %v32_v1 = vld [vmem:[%s1625_s0 + $0x2] sm:$0x3]  ;;  %v31_v2 = vld [vmem:[%s1625_s0] sm:$0x3] }
   0x2   :  { %20 = vst.msk [vmem:[#allocation2 + $0x8] sm:$0x3f] %vm18_vm0, %v1272_v0  ;;  %v33_v4 = vld [vmem:[%s1625_s0 + $0x4] sm:$0x3]  ;;  %v40_v6 = vunpack.c.l.bf16 %v32_v1  ;;  %v34_v7 = vld [vmem:[%s1625_s0 + $0x6] sm:$0x3]  ;;  %v39_v8 = vunpack.c.l.bf16 %v31_v2 }
   0x3   :  { %21 = vst.msk [vmem:[#allocation2 + $0x10] sm:$0x3f] %vm18_vm0, %v1272_v0  ;;  %v41_v10 = vunpack.c.l.bf16 %v33_v4  ;;  %v42_v11 = vunpack.c.l.bf16 %v34_v7  ;;  %v36_v32 = vld [vmem:[%s1625_s0 + $0xa] sm:$0x3]  ;;  %v37_v36 = vld [vmem:[%s1625_s0 + $0xc] sm:$0x3] }
   0x4   :  { %22 = vst.msk [vmem:[#allocation2 + $0x18] sm:$0x3f] %vm18_vm0, %v1272_v0  ;;  %v44_v39 = vunpack.c.l.bf16 %v36_v32  ;;  %v45_v42 = vunpack.c.l.bf16 %v37_v36  ;;  %v35_v47 = vld [vmem:[%s1625_s0 + $0x8] sm:$0x3]  ;;  %vm73_vm3 = vcmask 517120   ;;  %vm171_vm4 = vcmask 1041920  }
   0x5   :  { %23 = vst.msk [vmem:[#allocation2 + $0x20] sm:$0x3f] %vm18_vm0, %v1272_v0  ;;  %v43_v49 = vunpack.c.l.bf16 %v35_v47  ;;  %vm926_vm5 = vcmask 523264  }
   0x6   :  { %24 = vst.msk [vmem:[#allocation2 + $0x28] sm:$0x3f] %vm18_vm0, %v1272_v0 }
   0x7   :  { %25 = vst.msk [vmem:[#allocation2 + $0x30] sm:$0x3f] %vm18_vm0, %v1272_v0 }
   0x8   :  { %v82_v3 = vld [vmem:[#allocation2 + $0x1] sm:$0xf]  ;;  %26 = vst.msk [vmem:[#allocation2 + $0x38] sm:$0x3f] %vm18_vm0, %v1272_v0 }
   0x9   :  { %v90_v5 = vpack.c.bf16 %v82_v3, %v82_v3  ;;  %27 = vst.msk [vmem:[#allocation2 + $0x40] sm:$0x3f] %vm18_vm0, %v1272_v0  ;;  %v180_v47 = vld [vmem:[#allocation2 + $0x2] sm:$0xf] }
   0xa   :  { %28 = vst.msk [vmem:[#allocation2 + $0x48] sm:$0x3f] %vm18_vm0, %v1272_v0 }
   0xb   :  { %v106_v9 = vrot.slane %v90_v5, 2  ;;  %29 = vst.msk [vmem:[#allocation2 + $0x50] sm:$0x3f] %vm18_vm0, %v1272_v0 }
   0xc   :  { %30 = vst.msk [vmem:[#allocation2 + $0x58] sm:$0x3f] %vm18_vm0, %v1272_v0 }
   0xd   :  { %v117_v12 = vsel %vm114_vm1, %v90_v5, %v106_v9  ;;  %50 = vst.msk [vmem:[#allocation2 + $0x11] sm:$0xf] %vm48_vm2, %v40_v6  ;;  %v448_v1 = vld [vmem:[#allocation2 + $0x29] sm:$0xf]  ;;  %v38_v6 = vld [vmem:[%s1625_s0 + $0xe] sm:$0x3] }
   0xe   :  { %147 = vrot.lane.b32.xlu0 %v117_v12, %s1273_s23  ;;  %49 = vst.msk [vmem:[#allocation2 + $0x9] sm:$0xf] %vm48_vm2, %v39_v8  ;;  %v456_v7 = vpack.c.bf16 %v448_v1, %v448_v1 }
   0xf   :  { %51 = vst.msk [vmem:[#allocation2 + $0x19] sm:$0xf] %vm48_vm2, %v41_v10  ;;  %v46_v10 = vunpack.c.l.bf16 %v38_v6 }
  0x10   :  { %52 = vst.msk [vmem:[#allocation2 + $0x21] sm:$0xf] %vm48_vm2, %v42_v11  ;;  %v472_v12 = vrot.slane %v456_v7, 2 }
  0x11   :  { %54 = vst.msk [vmem:[#allocation2 + $0x41] sm:$0xf] %vm48_vm2, %v44_v39 }
  0x12   :  { %55 = vst.msk [vmem:[#allocation2 + $0x49] sm:$0xf] %vm48_vm2, %v45_v42 }
  0x13   :  { %53 = vst.msk [vmem:[#allocation2 + $0x39] sm:$0xf] %vm48_vm2, %v43_v49  ;;  %v188_v49 = vpack.c.bf16 %v180_v47, %v180_v47 }
  0x14   :  { %v84_v13 = vld [vmem:[#allocation2 + $0x11] sm:$0xf]  ;;  %56 = vst.msk [vmem:[#allocation2 + $0x51] sm:$0xf] %vm48_vm2, %v46_v10 }
  0x15   :  { %v92_v14 = vpack.c.bf16 %v84_v13, %v84_v13  ;;  %v83_v15 = vld [vmem:[#allocation2 + $0x9] sm:$0xf]  ;;  %v205_v17 = vld [vmem:[#allocation2 + $0x10] sm:$0xf]  ;;  %196 = vst.msk [vmem:[#allocation3 + $0x2] sm:$0x3] %vm73_vm3, %v188_v49 }
  0x16   :  { %v204_v16 = vld [vmem:[#allocation2 + $0x8] sm:$0xf]  ;;  %v91_v18 = vpack.c.bf16 %v83_v15, %v83_v15  ;;  %v85_v19 = vld [vmem:[#allocation2 + $0x19] sm:$0xf]  ;;  %v213_v27 = vpack.c.bf16 %v205_v17, %v205_v17  ;;  %v325_v37 = vld [vmem:[#allocation2 + $0x12] sm:$0xf] }
  0x17   :  { %v206_v20 = vld [vmem:[#allocation2 + $0x18] sm:$0xf]  ;;  %v212_v21 = vpack.c.bf16 %v204_v16, %v204_v16  ;;  %v108_v22 = vrot.slane %v92_v14, 2  ;;  %v93_v23 = vpack.c.bf16 %v85_v19, %v85_v19  ;;  %v207_v34 = vld [vmem:[#allocation2 + $0x20] sm:$0xf]  ;;  %v333_v44 = vpack.c.bf16 %v325_v37, %v325_v37 }
  0x18   :  { %v107_v24 = vrot.slane %v91_v18, 2  ;;  %v214_v25 = vpack.c.bf16 %v206_v20, %v206_v20  ;;  %v229_v35 = vrot.slane %v213_v27, 2  ;;  %v324_v38 = vld [vmem:[#allocation2 + $0xa] sm:$0xf]  ;;  %v215_v41 = vpack.c.bf16 %v207_v34, %v207_v34  ;;  %v326_v51 = vld [vmem:[#allocation2 + $0x1a] sm:$0xf] }
  0x19   :  { %v228_v26 = vrot.slane %v212_v21, 2  ;;  %v125_v28 = vsel %vm114_vm1, %v92_v14, %v108_v22  ;;  %v109_v31 = vrot.slane %v93_v23, 2  ;;  %v332_v46 = vpack.c.bf16 %v324_v38, %v324_v38  ;;  %v445_v52 = vld [vmem:[#allocation2 + $0x11] sm:$0xf]  ;;  %v327_v54 = vld [vmem:[#allocation2 + $0x22] sm:$0xf] }
  0x1a   :  { %151 = vrot.lane.b32.xlu1 %v125_v28, %s1273_s23  ;;  %v121_v29 = vsel %vm114_vm1, %v91_v18, %v107_v24  ;;  %v230_v33 = vrot.slane %v214_v25, 2  ;;  %v242_v45 = vsel %vm114_vm1, %v213_v27, %v229_v35  ;;  %v231_v48 = vrot.slane %v215_v41, 2  ;;  %v446_v63 = vld [vmem:[#allocation2 + $0x19] sm:$0xf]  ;;  %v447_v2 = vld [vmem:[#allocation2 + $0x21] sm:$0xf] }
  0x1b   :  { %v238_v30 = vsel %vm114_vm1, %v212_v21, %v228_v26  ;;  %149 = vrot.lane.b32.xlu0 %v121_v29, %s1273_s23  ;;  %v129_v40 = vsel %vm114_vm1, %v93_v23, %v109_v31  ;;  %v349_v50 = vrot.slane %v333_v44, 2  ;;  %v348_v53 = vrot.slane %v332_v46, 2  ;;  %v86_v13 = vld [vmem:[#allocation2 + $0x31] sm:$0xf]  ;;  %v88_v15 = vld [vmem:[#allocation2 + $0x41] sm:$0xf] }
  0x1c   :  { %268 = vrot.lane.b32.xlu2 %v238_v30, %s1273_s23  ;;  %v246_v43 = vsel %vm114_vm1, %v214_v25, %v230_v33  ;;  %v250_v55 = vsel %vm114_vm1, %v215_v41, %v231_v48  ;;  %v334_v56 = vpack.c.bf16 %v326_v51, %v326_v51  ;;  %v453_v57 = vpack.c.bf16 %v445_v52, %v445_v52  ;;  %v87_v16 = vld [vmem:[#allocation2 + $0x39] sm:$0xf]  ;;  %v89_v25 = vld [vmem:[#allocation2 + $0x49] sm:$0xf]  ;;  %v209_v27 = vld [vmem:[#allocation2 + $0x40] sm:$0xf] }
  0x1d   :  { %v362_v58 = vsel %vm114_vm1, %v333_v44, %v349_v50  ;;  %v358_v59 = vsel %vm114_vm1, %v332_v46, %v348_v53  ;;  %v335_v60 = vpack.c.bf16 %v327_v54, %v327_v54  ;;  %v454_v5 = vpack.c.bf16 %v446_v63, %v446_v63  ;;  %v208_v28 = vld [vmem:[#allocation2 + $0x38] sm:$0xf]  ;;  %v210_v37 = vld [vmem:[#allocation2 + $0x48] sm:$0xf]  ;;  %v329_v51 = vld [vmem:[#allocation2 + $0x42] sm:$0xf] }
  0x1e   :  { %v350_v61 = vrot.slane %v334_v56, 2  ;;  %v469_v62 = vrot.slane %v453_v57, 2  ;;  %v455_v9 = vpack.c.bf16 %v447_v2, %v447_v2  ;;  %v94_v18 = vpack.c.bf16 %v86_v13, %v86_v13  ;;  %v328_v39 = vld [vmem:[#allocation2 + $0x3a] sm:$0xf]  ;;  %v331_v53 = vld [vmem:[#allocation2 + $0x52] sm:$0xf] }
  0x1f   :  { %v351_v0 = vrot.slane %v335_v60, 2  ;;  %v470_v11 = vrot.slane %v454_v5, 2  ;;  %v491_v19 = vsel %vm114_vm1, %v456_v7, %v472_v12  ;;  %v96_v20 = vpack.c.bf16 %v88_v15, %v88_v15  ;;  %v330_v54 = vld [vmem:[#allocation2 + $0x4a] sm:$0xf]  ;;  %v449_v63 = vld [vmem:[#allocation2 + $0x41] sm:$0xf] }
  0x20   :  { %v366_v3 = vsel %vm114_vm1, %v334_v56, %v350_v61  ;;  %v479_v4 = vsel %vm114_vm1, %v453_v57, %v469_v62  ;;  %v471_v14 = vrot.slane %v455_v9, 2  ;;  %v95_v22 = vpack.c.bf16 %v87_v16, %v87_v16  ;;  %v451_v1 = vld [vmem:[#allocation2 + $0x51] sm:$0xf]  ;;  %v450_v2 = vld [vmem:[#allocation2 + $0x49] sm:$0xf] }
  0x21   :  { %v370_v8 = vsel %vm114_vm1, %v335_v60, %v351_v0  ;;  %v483_v17 = vsel %vm114_vm1, %v454_v5, %v470_v11  ;;  %v110_v23 = vrot.slane %v94_v18, 2  ;;  %v112_v24 = vrot.slane %v96_v20, 2  ;;  %v452_v11 = vld [vmem:[#allocation2 + $0x59] sm:$0xf] }
  0x22   :  { %153 = vrot.lane.b32.xlu1 %v129_v40, %s1273_s23  ;;  %v487_v21 = vsel %vm114_vm1, %v455_v9, %v471_v14  ;;  %v111_v26 = vrot.slane %v95_v22, 2  ;;  %v97_v30 = vpack.c.bf16 %v89_v25, %v89_v25  ;;  %v217_v32 = vpack.c.bf16 %v209_v27, %v209_v27  ;;  %v211_v40 = vld [vmem:[#allocation2 + $0x50] sm:$0xf]  ;;  %v60_v27 = vld [vmem:[#allocation2 + $0x18] sm:$0xf] }
  0x23   :  { %272 = vrot.lane.b32.xlu0 %v246_v43, %s1273_s23  ;;  %v133_v29 = vsel %vm114_vm1, %v94_v18, %v110_v23  ;;  %v141_v31 = vsel %vm114_vm1, %v96_v20, %v112_v24  ;;  %v216_v34 = vpack.c.bf16 %v208_v28, %v208_v28  ;;  %v218_v42 = vpack.c.bf16 %v210_v37, %v210_v37  ;;  %v181_v23 = vld [vmem:[#allocation2 + $0xa] sm:$0xf]  ;;  %v303_v37 = vld [vmem:[#allocation2 + $0x21] sm:$0xf] }
  0x24   :  { %270 = vrot.lane.b32.xlu2 %v242_v45, %s1273_s23  ;;  %v137_v33 = vsel %vm114_vm1, %v95_v22, %v111_v26  ;;  %v113_v35 = vrot.slane %v97_v30, 2  ;;  %v233_v36 = vrot.slane %v217_v32, 2  ;;  %v336_v44 = vpack.c.bf16 %v328_v39, %v328_v39  ;;  %v58_v24 = vld [vmem:[#allocation2 + $0x8] sm:$0xf] }
  0x25   :  { %v232_v38 = vrot.slane %v216_v34, 2  ;;  %v219_v46 = vpack.c.bf16 %v211_v40, %v211_v40  ;;  %v234_v48 = vrot.slane %v218_v42, 2  ;;  %v337_v56 = vpack.c.bf16 %v329_v51, %v329_v51  ;;  %v1234_v51 = vld [vmem:[%s1626_s1 + $0x30] sm:$0xff] }
  0x26   :  { %v145_v41 = vsel %vm114_vm1, %v97_v30, %v113_v35  ;;  %v258_v43 = vsel %vm114_vm1, %v217_v32, %v233_v36  ;;  %v352_v50 = vrot.slane %v336_v44, 2  ;;  %v338_v60 = vpack.c.bf16 %v330_v54, %v330_v54  ;;  %v300_v30 = vld [vmem:[#allocation2 + $0x9] sm:$0xf] }
  0x27   :  { %v254_v45 = vsel %vm114_vm1, %v216_v34, %v232_v38  ;;  %v235_v52 = vrot.slane %v219_v46, 2  ;;  %v353_v61 = vrot.slane %v337_v56, 2  ;;  %v459_v6 = vpack.c.bf16 %v451_v1, %v451_v1  ;;  %v183_v34 = vld [vmem:[#allocation2 + $0x1a] sm:$0xf]  ;;  %v301_v38 = vld [vmem:[#allocation2 + $0x11] sm:$0xf] }
  0x28   :  { %v374_v57 = vsel %vm114_vm1, %v336_v44, %v352_v50  ;;  %v354_v0 = vrot.slane %v338_v60, 2  ;;  %v460_v14 = vpack.c.bf16 %v452_v11, %v452_v11  ;;  %v189_v25 = vpack.c.bf16 %v181_v23, %v181_v23  ;;  %v1259_v44 = vld [vmem:[%s1626_s1 + $0xf8] sm:$0xff]  ;;  %v1258_v54 = vld [vmem:[%s1626_s1 + $0xf0] sm:$0xff] }
  0x29   :  { %v475_v10 = vrot.slane %v459_v6, 2  ;;  %v66_v26 = vpack.c.bf16 %v58_v24, %v58_v24  ;;  %v68_v28 = vpack.c.bf16 %v60_v27, %v60_v27  ;;  %v308_v32 = vpack.c.bf16 %v300_v30, %v300_v30  ;;  %988 = vmatpush.bf16.msra.mxu3 %v1259_v44  ;;  %v1254_v23 = vld [vmem:[%s1626_s1 + $0xd0] sm:$0xff]  ;;  %v1237_v27 = vld [vmem:[%s1626_s1 + $0x48] sm:$0xff] }
  0x2a   :  { %274 = vrot.lane.b32.xlu1 %v250_v55, %s1273_s23  ;;  %v262_v55 = vsel %vm114_vm1, %v218_v42, %v234_v48  ;;  %v382_v7 = vsel %vm114_vm1, %v338_v60, %v354_v0  ;;  %197 = vst.msk [vmem:[#allocation3 + $0xc] sm:$0x3] %vm73_vm3, %v189_v25  ;;  %v191_v35 = vpack.c.bf16 %v183_v34, %v183_v34  ;;  %v1243_v42 = vld [vmem:[%s1626_s1 + $0x78] sm:$0xff]  ;;  %v423_v48 = vld [vmem:[#allocation2 + $0x20] sm:$0xf] }
  0x2b   :  { %390 = vrot.lane.b32.xlu0 %v362_v58, %s1273_s23  ;;  %v339_v58 = vpack.c.bf16 %v331_v53, %v331_v53  ;;  %v503_v15 = vsel %vm114_vm1, %v459_v6, %v475_v10  ;;  %75 = vst.msk [vmem:[#allocation3 + $0xa] sm:$0x3] %vm73_vm3, %v66_v26  ;;  %v311_v39 = vpack.c.bf16 %v303_v37, %v303_v37  ;;  %v1250_v53 = vld [vmem:[%s1626_s1 + $0xb0] sm:$0xff]  ;;  %v1257_v60 = vld [vmem:[%s1626_s1 + $0xe8] sm:$0xff]  ;;  %v1247_v10 = vld [vmem:[%s1626_s1 + $0x98] sm:$0xff] }
  0x2c   :  { %388 = vrot.lane.b32.xlu2 %v358_v59, %s1273_s23  ;;  %v266_v59 = vsel %vm114_vm1, %v219_v46, %v235_v52  ;;  %77 = vst.msk [vmem:[#allocation3 + $0x1e] sm:$0x3] %vm73_vm3, %v68_v28  ;;  %v309_v40 = vpack.c.bf16 %v301_v38, %v301_v38  ;;  %950 = vmatpush.bf16.msra.mxu1 %v1243_v42  ;;  %v1242_v52 = vld [vmem:[%s1626_s1 + $0x70] sm:$0xff]  ;;  %v63_v25 = vld [vmem:[#allocation2 + $0x40] sm:$0xf]  ;;  %v1228_v37 = vld [vmem:[%s1626_s1] sm:$0xff] }
  0x2d   :  { %v355_v62 = vrot.slane %v339_v58, 2  ;;  %316 = vst.msk [vmem:[#allocation3 + $0x4] sm:$0x3] %vm73_vm3, %v308_v32  ;;  %v431_v49 = vpack.c.bf16 %v423_v48, %v423_v48  ;;  %989 = vmatpush.bf16.msra.mxu3 %v1258_v54  ;;  %v424_v6 = vld [vmem:[#allocation2 + $0x28] sm:$0xf]  ;;  %v1229_v26 = vld [vmem:[%s1626_s1 + $0x8] sm:$0xff]  ;;  %v71_v28 = vpack.c.bf16 %v63_v25, %v63_v25 }
  0x2e   :  { %199 = vst.msk [vmem:[#allocation3 + $0x20] sm:$0x3] %vm73_vm3, %v191_v35  ;;  %v1253_v30 = vld [vmem:[%s1626_s1 + $0xc8] sm:$0xff]  ;;  %v1236_v38 = vld [vmem:[%s1626_s1 + $0x40] sm:$0xff] }
  0x2f   :  { %v386_v5 = vsel %vm114_vm1, %v339_v58, %v355_v62  ;;  %319 = vst.msk [vmem:[#allocation3 + $0x22] sm:$0x3] %vm73_vm3, %v311_v39  ;;  %v1241_v58 = vld [vmem:[%s1626_s1 + $0x68] sm:$0xff]  ;;  %v185_v42 = vld [vmem:[#allocation2 + $0x3a] sm:$0xf] }
  0x30   :  { %317 = vst.msk [vmem:[#allocation3 + $0xe] sm:$0x3] %vm73_vm3, %v309_v40  ;;  %951 = vmatpush.bf16.msra.mxu1 %v1242_v52  ;;  %v1244_v40 = vld [vmem:[%s1626_s1 + $0x80] sm:$0xff]  ;;  %v186_v44 = vld [vmem:[#allocation2 + $0x42] sm:$0xf] }
  0x31   :  { %439 = vst.msk [vmem:[#allocation3 + $0x1a] sm:$0x3] %vm73_vm3, %v431_v49  ;;  %990 = vmatpush.bf16.msra.mxu3 %v1257_v60  ;;  %v306_v49 = vld [vmem:[#allocation2 + $0x49] sm:$0xf] }
  0x32   :  { %392 = vrot.lane.b32.xlu1 %v366_v3, %s1273_s23  ;;  %v378_v3 = vsel %vm114_vm1, %v337_v56, %v353_v61  ;;  %v422_v61 = vld [vmem:[#allocation2 + $0x18] sm:$0xf]  ;;  %80 = vst.msk [vmem:[#allocation3 + $0x3c] sm:$0x3] %vm73_vm3, %v71_v28 }
  0x33   :  { %509 = vrot.lane.b32.xlu0 %v479_v4, %s1273_s23  ;;  %v457_v4 = vpack.c.bf16 %v449_v63, %v449_v63  ;;  %v430_v63 = vpack.c.bf16 %v422_v61, %v422_v61 }
  0x34   :  { %394 = vrot.lane.b32.xlu2 %v370_v8, %s1273_s23  ;;  %v458_v8 = vpack.c.bf16 %v450_v2, %v450_v2  ;;  %952 = vmatpush.bf16.msra.mxu1 %v1241_v58  ;;  %v1232_v2 = vld [vmem:[%s1626_s1 + $0x20] sm:$0xff] }
  0x35   :  { %v473_v9 = vrot.slane %v457_v4, 2  ;;  %438 = vst.msk [vmem:[#allocation3 + $0x10] sm:$0x3] %vm73_vm3, %v430_v63 }
  0x36   :  { %v474_v12 = vrot.slane %v458_v8, 2 }
  0x37   :  { %v495_v13 = vsel %vm114_vm1, %v457_v4, %v473_v9  ;;  %v1248_v4 = vld [vmem:[%s1626_s1 + $0xa0] sm:$0xff]  ;;  %v1239_v9 = vld [vmem:[%s1626_s1 + $0x58] sm:$0xff] }
  0x38   :  { %v499_v16 = vsel %vm114_vm1, %v458_v8, %v474_v12  ;;  %v1231_v8 = vld [vmem:[%s1626_s1 + $0x18] sm:$0xff] }
  0x39   :  { %v1255_v12 = vld [vmem:[%s1626_s1 + $0xd8] sm:$0xff] }
  0x3a   :  { %511 = vrot.lane.b32.xlu1 %v483_v17, %s1273_s23  ;;  %v57_v17 = vld [vmem:[#allocation2] sm:$0xf] }
  0x3b   :  { %515 = vrot.lane.b32.xlu0 %v491_v19, %s1273_s23  ;;  %v65_v18 = vpack.c.bf16 %v57_v17, %v57_v17  ;;  %v476_v19 = vrot.slane %v460_v14, 2  ;;  %v62_v17 = vld [vmem:[#allocation2 + $0x38] sm:$0xf] }
  0x3c   :  { %513 = vrot.lane.b32.xlu2 %v487_v21, %s1273_s23  ;;  %v59_v21 = vld [vmem:[#allocation2 + $0x10] sm:$0xf] }
  0x3d   :  { %74 = vst.msk [vmem:[#allocation3] sm:$0x3] %vm73_vm3, %v65_v18  ;;  %v507_v20 = vsel %vm114_vm1, %v460_v14, %v476_v19  ;;  %v67_v22 = vpack.c.bf16 %v59_v21, %v59_v21  ;;  %v1230_v18 = vld [vmem:[%s1626_s1 + $0x10] sm:$0xff]  ;;  %v184_v21 = vld [vmem:[#allocation2 + $0x32] sm:$0xf] }
  0x3e   :  { %v1238_v19 = vld [vmem:[%s1626_s1 + $0x50] sm:$0xff]  ;;  %v192_v24 = vpack.c.bf16 %v184_v21, %v184_v21  ;;  %v543_v21 = vld [vmem:[#allocation2 + $0x22] sm:$0xf] }
  0x3f   :  { %76 = vst.msk [vmem:[#allocation3 + $0x14] sm:$0x3] %vm73_vm3, %v67_v22  ;;  %v1246_v22 = vld [vmem:[%s1626_s1 + $0x90] sm:$0xff] }
  0x40   :  { %200 = vst.msk [vmem:[#allocation3 + $0x2a] sm:$0x3] %vm73_vm3, %v192_v24  ;;  %v544_v24 = vld [vmem:[#allocation2 + $0x2a] sm:$0xf] }
  0x41   :  { %v552_v28 = vpack.c.bf16 %v544_v24, %v544_v24 }
  0x42   :  { %155 = vrot.lane.b32.xlu1 %v133_v29, %s1273_s23 }
  0x43   :  { %159 = vrot.lane.b32.xlu0 %v141_v31, %s1273_s23  ;;  %v182_v31 = vld [vmem:[#allocation2 + $0x12] sm:$0xf]  ;;  %560 = vst.msk [vmem:[#allocation3 + $0x26] sm:$0x3] %vm73_vm3, %v552_v28 }
  0x44   :  { %157 = vrot.lane.b32.xlu2 %v137_v33, %s1273_s23  ;;  %v190_v33 = vpack.c.bf16 %v182_v31, %v182_v31  ;;  %v64_v31 = vld [vmem:[#allocation2 + $0x48] sm:$0xf] }
  0x46   :  { %198 = vst.msk [vmem:[#allocation3 + $0x16] sm:$0x3] %vm73_vm3, %v190_v33  ;;  %v72_v33 = vpack.c.bf16 %v64_v31, %v64_v31  ;;  %v545_v31 = vld [vmem:[#allocation2 + $0x42] sm:$0xf] }
  0x48   :  { %81 = vst.msk [vmem:[#allocation3 + $0x46] sm:$0x3] %vm73_vm3, %v72_v33  ;;  %v547_v33 = vld [vmem:[#allocation2 + $0x52] sm:$0xf] }
  0x4a   :  { %161 = vrot.lane.b32.xlu1 %v145_v41, %s1273_s23  ;;  %v1235_v41 = vld [vmem:[%s1626_s1 + $0x38] sm:$0xff] }
  0x4b   :  { %278 = vrot.lane.b32.xlu0 %v258_v43, %s1273_s23  ;;  %v1251_v43 = vld [vmem:[%s1626_s1 + $0xb8] sm:$0xff]  ;;  %931 = vmatpush.bf16.msra.mxu0 %v1235_v41  ;;  %v1252_v41 = vld [vmem:[%s1626_s1 + $0xc0] sm:$0xff] }
  0x4c   :  { %276 = vrot.lane.b32.xlu2 %v254_v45, %s1273_s23  ;;  %v302_v45 = vld [vmem:[#allocation2 + $0x19] sm:$0xf]  ;;  %969 = vmatpush.bf16.msra.mxu2 %v1251_v43  ;;  %v193_v43 = vpack.c.bf16 %v185_v42, %v185_v42 }
  0x4d   :  { %v310_v47 = vpack.c.bf16 %v302_v45, %v302_v45  ;;  %v194_v45 = vpack.c.bf16 %v186_v44, %v186_v44 }
  0x4e   :  { %201 = vst.msk [vmem:[#allocation3 + $0x34] sm:$0x3] %vm73_vm3, %v193_v43 }
  0x4f   :  { %318 = vst.msk [vmem:[#allocation3 + $0x18] sm:$0x3] %vm73_vm3, %v310_v47  ;;  %932 = vmatpush.bf16.msra.mxu0 %v1234_v51  ;;  %v314_v51 = vpack.c.bf16 %v306_v49, %v306_v49 }
  0x50   :  { %970 = vmatpush.bf16.msra.mxu2 %v1250_v53  ;;  %202 = vst.msk [vmem:[#allocation3 + $0x3e] sm:$0x3] %vm73_vm3, %v194_v45  ;;  %v305_v53 = vld [vmem:[#allocation2 + $0x41] sm:$0xf] }
  0x51   :  { %v313_v54 = vpack.c.bf16 %v305_v53, %v305_v53  ;;  %322 = vst.msk [vmem:[#allocation3 + $0x40] sm:$0x3] %vm73_vm3, %v314_v51 }
  0x52   :  { %280 = vrot.lane.b32.xlu1 %v262_v55, %s1273_s23  ;;  %v421_v55 = vld [vmem:[#allocation2 + $0x10] sm:$0xf] }
  0x53   :  { %396 = vrot.lane.b32.xlu0 %v374_v57, %s1273_s23  ;;  %v429_v56 = vpack.c.bf16 %v421_v55, %v421_v55  ;;  %v1233_v57 = vld [vmem:[%s1626_s1 + $0x28] sm:$0xff]  ;;  %321 = vst.msk [vmem:[#allocation3 + $0x36] sm:$0x3] %vm73_vm3, %v313_v54  ;;  %v426_v55 = vld [vmem:[#allocation2 + $0x48] sm:$0xf] }
  0x54   :  { %282 = vrot.lane.b32.xlu2 %v266_v59, %s1273_s23  ;;  %v1249_v59 = vld [vmem:[%s1626_s1 + $0xa8] sm:$0xff]  ;;  %933 = vmatpush.bf16.msra.mxu0 %v1233_v57  ;;  %v434_v61 = vpack.c.bf16 %v426_v55, %v426_v55 }
  0x55   :  { %437 = vst.msk [vmem:[#allocation3 + $0x6] sm:$0x3] %vm73_vm3, %v429_v56  ;;  %971 = vmatpush.bf16.msra.mxu2 %v1249_v59 }
  0x56   :  { %442 = vst.msk [vmem:[#allocation3 + $0x38] sm:$0x3] %vm73_vm3, %v434_v61 }
  0x58   :  { %934 = vmatpush.bf16.msra.mxu0 %v1232_v2 }
  0x59   :  { %972 = vmatpush.bf16.msra.mxu2 %v1248_v4 }
  0x5a   :  { %398 = vrot.lane.b32.xlu1 %v378_v3, %s1273_s23  ;;  %v1240_v3 = vld [vmem:[%s1626_s1 + $0x60] sm:$0xff] }
  0x5b   :  { %402 = vrot.lane.b32.xlu0 %v386_v5, %s1273_s23  ;;  %v1256_v5 = vld [vmem:[%s1626_s1 + $0xe0] sm:$0xff]  ;;  %953 = vmatpush.bf16.msra.mxu1 %v1240_v3 }
  0x5c   :  { %400 = vrot.lane.b32.xlu2 %v382_v7, %s1273_s23  ;;  %v432_v7 = vpack.c.bf16 %v424_v6, %v424_v6  ;;  %991 = vmatpush.bf16.msra.mxu3 %v1256_v5 }
  0x5d   :  { %935 = vmatpush.bf16.msra.mxu0 %v1231_v8  ;;  %973 = vmatpush.bf16.msra.mxu2 %v1247_v10 }
  0x5e   :  { %440 = vst.msk [vmem:[#allocation3 + $0x24] sm:$0x3] %vm73_vm3, %v432_v7  ;;  %v427_v7 = vld [vmem:[#allocation2 + $0x50] sm:$0xf] }
  0x5f   :  { %954 = vmatpush.bf16.msra.mxu1 %v1239_v9  ;;  %v435_v8 = vpack.c.bf16 %v427_v7, %v427_v7  ;;  %v428_v9 = vld [vmem:[#allocation2 + $0x58] sm:$0xf] }
  0x60   :  { %992 = vmatpush.bf16.msra.mxu3 %v1255_v12 }
  0x61   :  { %936 = vmatpush.bf16.msra.mxu0 %v1230_v18  ;;  %974 = vmatpush.bf16.msra.mxu2 %v1246_v22  ;;  %443 = vst.msk [vmem:[#allocation3 + $0x42] sm:$0x3] %vm73_vm3, %v435_v8 }
  0x62   :  { %517 = vrot.lane.b32.xlu1 %v495_v13, %s1273_s23  ;;  %v61_v13 = vld [vmem:[#allocation2 + $0x30] sm:$0xf] }
  0x63   :  { %521 = vrot.lane.b32.xlu0 %v503_v15, %s1273_s23  ;;  %955 = vmatpush.bf16.msra.mxu1 %v1238_v19  ;;  %v541_v19 = vld [vmem:[#allocation2 + $0x12] sm:$0xf] }
  0x64   :  { %519 = vrot.lane.b32.xlu2 %v499_v16, %s1273_s23  ;;  %v69_v16 = vpack.c.bf16 %v61_v13, %v61_v13  ;;  %993 = vmatpush.bf16.msra.mxu3 %v1254_v23  ;;  %v436_v13 = vpack.c.bf16 %v428_v9, %v428_v9  ;;  %v1263_v23 = vld [vmem:[%s1626_s1 + $0x118] sm:$0xff]  ;;  %v549_v25 = vpack.c.bf16 %v541_v19, %v541_v19 }
  0x65   :  { %937 = vmatpush.bf16.msra.mxu0 %v1229_v26 }
  0x66   :  { %78 = vst.msk [vmem:[#allocation3 + $0x28] sm:$0x3] %vm73_vm3, %v69_v16 }
  0x67   :  { %956 = vmatpush.bf16.msra.mxu1 %v1237_v27  ;;  %444 = vst.msk [vmem:[#allocation3 + $0x4c] sm:$0x3] %vm73_vm3, %v436_v13  ;;  %v551_v27 = vpack.c.bf16 %v543_v21, %v543_v21 }
  0x68   :  { %994 = vmatpush.bf16.msra.mxu3 %v1253_v30  ;;  %557 = vst.msk [vmem:[#allocation3 + $0x8] sm:$0x3] %vm73_vm3, %v549_v25 }
  0x69   :  { %938 = vmatpush.bf16.msra.mxu0 %v1228_v37  ;;  %559 = vst.msk [vmem:[#allocation3 + $0x1c] sm:$0x3] %vm73_vm3, %v551_v27 }
  0x6a   :  { %523 = vrot.lane.b32.xlu1 %v507_v20, %s1273_s23  ;;  %v70_v20 = vpack.c.bf16 %v62_v17, %v62_v17 }
  0x6b   :  { %957 = vmatpush.bf16.msra.mxu1 %v1236_v38  ;;  %v555_v38 = vpack.c.bf16 %v547_v33, %v547_v33 }
  0x6c   :  { %79 = vst.msk [vmem:[#allocation3 + $0x32] sm:$0x3] %vm73_vm3, %v70_v20  ;;  %995 = vmatpush.bf16.msra.mxu3 %v1252_v41  ;;  %v542_v20 = vld [vmem:[#allocation2 + $0x1a] sm:$0xf] }
  0x6d   :  { %v550_v26 = vpack.c.bf16 %v542_v20, %v542_v20  ;;  %1011 = vmatpush.bf16.msrb.mxu0 %v1263_v23  ;;  %v1260_v41 = vld [vmem:[%s1626_s1 + $0x100] sm:$0xff]  ;;  %563 = vst.msk [vmem:[#allocation3 + $0x44] sm:$0x3] %vm73_vm3, %v555_v38 }
  0x6e   :  { %v1270_v20 = vld [vmem:[%s1627_s2] ss:$0 sm:$0xff] }
  0x6f   :  { %1264 = vmatpush.bf16.msrb.mxu1 %v1263_v23  ;;  %558 = vst.msk [vmem:[#allocation3 + $0x12] sm:$0x3] %vm73_vm3, %v550_v26  ;;  %v566_v42 = vld [vmem:[#allocation3 + $0x8] sm:$0x3]  ;;  %v1271_v26 = vld [vmem:[%s1628_s3] ss:$0 sm:$0xff] }
  0x70   :  { %666 = vst [vmem:[#allocation1 + $0x20] ss:$4 sm:$0xff] %v566_v42 }
  0x74   :  { %v578_v54 = vld [vmem:[#allocation3 + $0x44] sm:$0x3] }
  0x76   :  { %v269_v29 = vpop.permute.xlu2 %268  ;;  %v568_v43 = vld [vmem:[#allocation3 + $0x12] sm:$0x3] }
  0x77   :  { %292 = vst.msk [vmem:[#allocation3 + $0x2] sm:$0x3] %vm171_vm4, %v269_v29  ;;  %v1245_v29 = vld [vmem:[%s1626_s1 + $0x88] sm:$0xff] }
  0x78   :  { %975 = vmatpush.bf16.msra.mxu2 %v1245_v29  ;;  %v1262_v29 = vld [vmem:[%s1626_s1 + $0x110] sm:$0xff]  ;;  %669 = vst [vmem:[#allocation1 + $0x21] ss:$4 sm:$0xff] %v568_v43 }
  0x79   :  { %1012 = vmatpush.bf16.msrb.mxu0 %v1262_v29  ;;  %1265 = vmatpush.bf16.msrb.mxu1 %v1262_v29 }
  0x7c   :  { %976 = vmatpush.bf16.msra.mxu2 %v1244_v40 }
  0x7e   :  { %v271_v36 = vpop.permute.xlu2 %270 }
  0x7f   :  { %293 = vst.msk [vmem:[#allocation3 + $0xc] sm:$0x3] %vm171_vm4, %v271_v36  ;;  %v187_v36 = vld [vmem:[#allocation2 + $0x4a] sm:$0xf] }
  0x80   :  { %v148_v46 = vpop.permute.xlu0 %147  ;;  %v195_v39 = vpack.c.bf16 %v187_v36, %v187_v36  ;;  %v553_v36 = vpack.c.bf16 %v545_v31, %v545_v31 }
  0x81   :  { %172 = vst.msk [vmem:[#allocation3] sm:$0x3] %vm171_vm4, %v148_v46 }
  0x82   :  { %203 = vst.msk [vmem:[#allocation3 + $0x48] sm:$0x3] %vm73_vm3, %v195_v39  ;;  %v1261_v39 = vld [vmem:[%s1626_s1 + $0x108] sm:$0xff] }
  0x83   :  { %561 = vst.msk [vmem:[#allocation3 + $0x30] sm:$0x3] %vm73_vm3, %v553_v36  ;;  %1013 = vmatpush.bf16.msrb.mxu0 %v1261_v39  ;;  %1266 = vmatpush.bf16.msrb.mxu1 %v1261_v39 }
  0x86   :  { %v389_v50 = vpop.permute.xlu2 %388 }
  0x87   :  { %412 = vst.msk [vmem:[#allocation3 + $0x4] sm:$0x3] %vm171_vm4, %v389_v50  ;;  %v304_v50 = vld [vmem:[#allocation2 + $0x39] sm:$0xf]  ;;  %1014 = vmatpush.bf16.msrb.mxu0 %v1260_v41  ;;  %1267 = vmatpush.bf16.msrb.mxu1 %v1260_v41 }
  0x88   :  { %v312_v52 = vpack.c.bf16 %v304_v50, %v304_v50 }
  0x8a   :  { %320 = vst.msk [vmem:[#allocation3 + $0x2c] sm:$0x3] %vm73_vm3, %v312_v52  ;;  %v574_v52 = vld [vmem:[#allocation3 + $0x30] sm:$0x3] }
  0x8c   :  { %v152_v62 = vpop.permute.xlu1 %151 }
  0x8d   :  { %174 = vst.msk [vmem:[#allocation3 + $0x14] sm:$0x3] %vm171_vm4, %v152_v62  ;;  %v150_v0 = vpop.permute.xlu0 %149  ;;  %v307_v62 = vld [vmem:[#allocation2 + $0x51] sm:$0xf] }
  0x8e   :  { %v395_v1 = vpop.permute.xlu2 %394  ;;  %173 = vst.msk [vmem:[#allocation3 + $0xa] sm:$0x3] %vm171_vm4, %v150_v0  ;;  %v425_v0 = vld [vmem:[#allocation2 + $0x40] sm:$0xf]  ;;  %v315_v4 = vpack.c.bf16 %v307_v62, %v307_v62 }
  0x8f   :  { %415 = vst.msk [vmem:[#allocation3 + $0x22] sm:$0x3] %vm171_vm4, %v395_v1  ;;  %v433_v6 = vpack.c.bf16 %v425_v0, %v425_v0 }
  0x90   :  { %323 = vst.msk [vmem:[#allocation3 + $0x4a] sm:$0x3] %vm73_vm3, %v315_v4 }
  0x91   :  { %441 = vst.msk [vmem:[#allocation3 + $0x2e] sm:$0x3] %vm73_vm3, %v433_v6 }
  0x94   :  { %v154_v11 = vpop.permute.xlu1 %153 }
  0x95   :  { %175 = vst.msk [vmem:[#allocation3 + $0x1e] sm:$0x3] %vm171_vm4, %v154_v11  ;;  %v273_v14 = vpop.permute.xlu0 %272 }
  0x96   :  { %v514_v15 = vpop.permute.xlu2 %513  ;;  %294 = vst.msk [vmem:[#allocation3 + $0x16] sm:$0x3] %vm171_vm4, %v273_v14 }
  0x97   :  { %535 = vst.msk [vmem:[#allocation3 + $0x1a] sm:$0x3] %vm171_vm4, %v514_v15 }
  0x9c   :  { %v275_v32 = vpop.permute.xlu1 %274 }
  0x9d   :  { %295 = vst.msk [vmem:[#allocation3 + $0x20] sm:$0x3] %vm171_vm4, %v275_v32  ;;  %v391_v34 = vpop.permute.xlu0 %390  ;;  %v546_v32 = vld [vmem:[#allocation2 + $0x4a] sm:$0xf] }
  0x9e   :  { %v158_v35 = vpop.permute.xlu2 %157  ;;  %413 = vst.msk [vmem:[#allocation3 + $0xe] sm:$0x3] %vm171_vm4, %v391_v34  ;;  %v554_v37 = vpack.c.bf16 %v546_v32, %v546_v32 }
  0x9f   :  { %177 = vst.msk [vmem:[#allocation3 + $0x32] sm:$0x3] %vm171_vm4, %v158_v35  ;;  %v548_v35 = vld [vmem:[#allocation2 + $0x5a] sm:$0xf] }
  0xa0   :  { %v556_v40 = vpack.c.bf16 %v548_v35, %v548_v35  ;;  %562 = vst.msk [vmem:[#allocation3 + $0x3a] sm:$0x3] %vm73_vm3, %v554_v37 }
  0xa2   :  { %564 = vst.msk [vmem:[#allocation3 + $0x4e] sm:$0x3] %vm73_vm3, %v556_v40 }
  0xa4   :  { %v393_v46 = vpop.permute.xlu1 %392 }
  0xa5   :  { %414 = vst.msk [vmem:[#allocation3 + $0x18] sm:$0x3] %vm171_vm4, %v393_v46  ;;  %v510_v47 = vpop.permute.xlu0 %509 }
  0xa6   :  { %v277_v48 = vpop.permute.xlu2 %276  ;;  %533 = vst.msk [vmem:[#allocation3 + $0x6] sm:$0x3] %vm171_vm4, %v510_v47  ;;  %v570_v47 = vld [vmem:[#allocation3 + $0x1c] sm:$0x3] }
  0xa7   :  { %296 = vst.msk [vmem:[#allocation3 + $0x2a] sm:$0x3] %vm171_vm4, %v277_v48  ;;  %v572_v48 = vld [vmem:[#allocation3 + $0x26] sm:$0x3]  ;;  %v576_v53 = vld [vmem:[#allocation3 + $0x3a] sm:$0x3] }
  0xa8   :  { %672 = vst [vmem:[#allocation1 + $0x22] ss:$4 sm:$0xff] %v570_v47 }
  0xa9   :  { %675 = vst [vmem:[#allocation1 + $0x23] ss:$4 sm:$0xff] %v572_v48 }
  0xac   :  { %v569_v56 = vld [vmem:[#allocation3 + $0x14] sm:$0xff]  ;;  %v512_v57 = vpop.permute.xlu1 %511 }
  0xad   :  { %660 = vst [vmem:[#allocation1 + $0x2] ss:$4 sm:$0xff] %v569_v56  ;;  %v565_v58 = vld [vmem:[#allocation3] sm:$0xff]  ;;  %v516_v59 = vpop.permute.xlu0 %515  ;;  %v580_v56 = vld [vmem:[#allocation3 + $0x4e] sm:$0x3] }
  0xae   :  { %v283_v60 = vpop.permute.xlu2 %282  ;;  %654 = vst [vmem:[#allocation1] ss:$4 sm:$0xff] %v565_v58 }
  0xaf   :  { %534 = vst.msk [vmem:[#allocation3 + $0x10] sm:$0x3] %vm171_vm4, %v512_v57 }
  0xb0   :  { %536 = vst.msk [vmem:[#allocation3 + $0x24] sm:$0x3] %vm171_vm4, %v516_v59  ;;  %v680_v55 = vld.sshfl [vmem:[#allocation1 + $0x20] sm:$0xff pattern:$0x73625140] }
  0xb1   :  { %299 = vst.msk [vmem:[#allocation3 + $0x48] sm:$0x3] %vm171_vm4, %v283_v60 }
  0xb2   :  { %690 = vst [vmem:[#allocation1 + $0x20] ss:$4 sm:$0xff] %v574_v52 }
  0xb3   :  { %692 = vst [vmem:[#allocation1 + $0x21] ss:$4 sm:$0xff] %v576_v53 }
  0xb4   :  { %v156_v63 = vpop.permute.xlu1 %155  ;;  %694 = vst [vmem:[#allocation1 + $0x22] ss:$4 sm:$0xff] %v578_v54 }
  0xb5   :  { %176 = vst.msk [vmem:[#allocation3 + $0x28] sm:$0x3] %vm171_vm4, %v156_v63  ;;  %v160_v1 = vpop.permute.xlu0 %159 }
  0xb6   :  { %v401_v2 = vpop.permute.xlu2 %400  ;;  %v567_v3 = vld [vmem:[#allocation3 + $0xa] sm:$0xff]  ;;  %178 = vst.msk [vmem:[#allocation3 + $0x3c] sm:$0x3] %vm171_vm4, %v160_v1 }
  0xb7   :  { %657 = vst [vmem:[#allocation1 + $0x1] ss:$4 sm:$0xff] %v567_v3  ;;  %v571_v5 = vld [vmem:[#allocation3 + $0x1e] sm:$0xff] }
  0xb8   :  { %663 = vst [vmem:[#allocation1 + $0x3] ss:$4 sm:$0xff] %v571_v5 }
  0xb9   :  { %418 = vst.msk [vmem:[#allocation3 + $0x40] sm:$0x3] %vm171_vm4, %v401_v2 }
  0xba   :  { %696 = vst [vmem:[#allocation1 + $0x23] ss:$4 sm:$0xff] %v580_v56 }
  0xbc   :  { %v162_v10 = vpop.permute.xlu1 %161 }
  0xbd   :  { %179 = vst.msk [vmem:[#allocation3 + $0x46] sm:$0x3] %vm171_vm4, %v162_v10  ;;  %v279_v11 = vpop.permute.xlu0 %278 }
  0xbe   :  { %297 = vst.msk [vmem:[#allocation3 + $0x34] sm:$0x3] %vm171_vm4, %v279_v11  ;;  %v520_v12 = vpop.permute.xlu2 %519 }
  0xbf   :  { %v676_v14 = vld.sshfl [vmem:[#allocation1] sm:$0xff pattern:$0x73625140]  ;;  %v677_v15 = vld.sshfl [vmem:[#allocation1 + $0x8] sm:$0xff pattern:$0x73625140] }
  0xc0   :  { %939 = vmatmul.bf16.vlgmr.msra.gmra.mxu0 %v676_v14  ;;  %958 = vmatmul.bf16.vlgmr.msra.gmra.mxu1 %v677_v15  ;;  %v678_v16 = vld.sshfl [vmem:[#allocation1 + $0x10] sm:$0xff pattern:$0x73625140]  ;;  %v679_v17 = vld.sshfl [vmem:[#allocation1 + $0x18] sm:$0xff pattern:$0x73625140] }
  0xc1   :  { %977 = vmatmul.bf16.vlgmr.msra.gmra.mxu2 %v678_v16  ;;  %996 = vmatmul.bf16.vlgmr.msra.gmra.mxu3 %v679_v17  ;;  %538 = vst.msk [vmem:[#allocation3 + $0x38] sm:$0x3] %vm171_vm4, %v520_v12  ;;  %v701_v62 = vld.sshfl [vmem:[#allocation1 + $0x20] sm:$0xff pattern:$0x73625140] }
  0xc4   :  { %v281_v18 = vpop.permute.xlu1 %280 }
  0xc5   :  { %298 = vst.msk [vmem:[#allocation3 + $0x3e] sm:$0x3] %vm171_vm4, %v281_v18  ;;  %v397_v22 = vpop.permute.xlu0 %396 }
  0xc6   :  { %416 = vst.msk [vmem:[#allocation3 + $0x2c] sm:$0x3] %vm171_vm4, %v397_v22 }
  0xcc   :  { %v399_v30 = vpop.permute.xlu1 %398 }
  0xcd   :  { %417 = vst.msk [vmem:[#allocation3 + $0x36] sm:$0x3] %vm171_vm4, %v399_v30  ;;  %v403_v34 = vpop.permute.xlu0 %402 }
  0xce   :  { %419 = vst.msk [vmem:[#allocation3 + $0x4a] sm:$0x3] %vm171_vm4, %v403_v34 }
  0xd4   :  { %v575_v44 = vld [vmem:[#allocation3 + $0x32] sm:$0xff]  ;;  %v518_v45 = vpop.permute.xlu1 %517 }
  0xd5   :  { %684 = vst [vmem:[#allocation1 + $0x1] ss:$4 sm:$0xff] %v575_v44  ;;  %v522_v46 = vpop.permute.xlu0 %521 }
  0xd6   :  { %537 = vst.msk [vmem:[#allocation3 + $0x2e] sm:$0x3] %vm171_vm4, %v518_v45 }
  0xd7   :  { %539 = vst.msk [vmem:[#allocation3 + $0x42] sm:$0x3] %vm171_vm4, %v522_v46 }
  0xdc   :  { %v524_v49 = vpop.permute.xlu1 %523 }
  0xdd   :  { %v573_v50 = vld [vmem:[#allocation3 + $0x28] sm:$0xff]  ;;  %540 = vst.msk [vmem:[#allocation3 + $0x4c] sm:$0x3] %vm171_vm4, %v524_v49 }
  0xde   :  { %682 = vst [vmem:[#allocation1] ss:$4 sm:$0xff] %v573_v50  ;;  %v577_v51 = vld [vmem:[#allocation3 + $0x3c] sm:$0xff] }
  0xdf   :  { %686 = vst [vmem:[#allocation1 + $0x2] ss:$4 sm:$0xff] %v577_v51 }
  0xe4   :  { %v579_v57 = vld [vmem:[#allocation3 + $0x46] sm:$0xff] }
  0xe5   :  { %688 = vst [vmem:[#allocation1 + $0x3] ss:$4 sm:$0xff] %v579_v57 }
  0xec   :  { %v697_v58 = vld.sshfl [vmem:[#allocation1] sm:$0xff pattern:$0x73625140]  ;;  %v698_v59 = vld.sshfl [vmem:[#allocation1 + $0x8] sm:$0xff pattern:$0x73625140] }
  0xed   :  { %944 = vmatmul.bf16.gmra.mxu0 %v697_v58  ;;  %963 = vmatmul.bf16.gmra.mxu1 %v698_v59  ;;  %v699_v60 = vld.sshfl [vmem:[#allocation1 + $0x10] sm:$0xff pattern:$0x73625140]  ;;  %v700_v61 = vld.sshfl [vmem:[#allocation1 + $0x18] sm:$0xff pattern:$0x73625140] }
  0xee   :  { %982 = vmatmul.bf16.gmra.mxu2 %v699_v60  ;;  %1001 = vmatmul.bf16.gmra.mxu3 %v700_v61 }
  0xfd   :  { %1226 = vmatmul.msk.bf16.vlgmr.msrb.gmra.mxu0 %vm926_vm5, %v680_v55  ;;  %1227 = vmatmul.msk.bf16.vlgmr.msrb.gmra.mxu1 %vm926_vm5, %v701_v62 }
 0x13d   :  { %v940_v63 = vpop.f32.mrf.mxu0  ;;  %v959_v0 = vpop.f32.mrf.mxu1 }
 0x13e   :  { %v960_v12 = vadd.f32 %v959_v0, %v940_v63 }
 0x144   :  { %v978_v1 = vpop.f32.mrf.mxu2  ;;  %v997_v4 = vpop.f32.mrf.mxu3 }
 0x145   :  { %v942_v2 = vpop.f32.mrf.mxu0  ;;  %v961_v3 = vpop.f32.mrf.mxu1  ;;  %v979_v14 = vadd.f32 %v978_v1, %v960_v12 }
 0x146   :  { %v962_v23 = vadd.f32 %v961_v3, %v942_v2 }
 0x147   :  { %v998_v17 = vadd.f32 %v997_v4, %v979_v14 }
 0x14c   :  { %v980_v5 = vpop.f32.mrf.mxu2  ;;  %v999_v8 = vpop.f32.mrf.mxu3 }
 0x14d   :  { %v981_v28 = vadd.f32 %v980_v5, %v962_v23 }
 0x14f   :  { %v1000_v35 = vadd.f32 %v999_v8, %v981_v28 }
 0x16a   :  { %v945_v6 = vpop.f32.mrf.mxu0  ;;  %v964_v7 = vpop.f32.mrf.mxu1 }
 0x16b   :  { %v965_v13 = vadd.f32 %v964_v7, %v945_v6 }
 0x171   :  { %v983_v9 = vpop.f32.mrf.mxu2  ;;  %v1002_v16 = vpop.f32.mrf.mxu3 }
 0x172   :  { %v947_v10 = vpop.f32.mrf.mxu0  ;;  %v966_v11 = vpop.f32.mrf.mxu1  ;;  %v984_v15 = vadd.f32 %v983_v9, %v965_v13 }
 0x173   :  { %v967_v24 = vadd.f32 %v966_v11, %v947_v10 }
 0x174   :  { %v1003_v18 = vadd.f32 %v1002_v16, %v984_v15 }
 0x179   :  { %v985_v19 = vpop.f32.mrf.mxu2  ;;  %v1004_v34 = vpop.f32.mrf.mxu3 }
 0x17a   :  { %v1016_v21 = vpop.f32.mrf.mxu0  ;;  %v1021_v22 = vpop.f32.mrf.mxu1  ;;  %v986_v29 = vadd.f32 %v985_v19, %v967_v24 }
 0x17b   :  { %v1017_v25 = vadd.f32 %v1016_v21, %v998_v17  ;;  %v1022_v27 = vadd.f32 %v1021_v22, %v1003_v18 }
 0x17c   :  { %v1005_v36 = vadd.f32 %v1004_v34, %v986_v29 }
 0x17d   :  { %v1030_v30 = vmul.f32 %v1270_v20, %v1017_v25  ;;  %v1032_v31 = vmul.f32 %v1270_v20, %v1022_v27 }
 0x17f   :  { %v1038_v32 = vadd.f32 %v1271_v26, %v1030_v30  ;;  %v1040_v33 = vadd.f32 %v1271_v26, %v1032_v31 }
 0x181   :  { %v1042_v37 = vmul.f32 0.1, %v1038_v32  ;;  %v1044_v38 = vmul.f32 0.1, %v1040_v33 }
 0x182   :  { %v1018_v39 = vpop.f32.mrf.mxu0  ;;  %v1023_v40 = vpop.f32.mrf.mxu1 }
 0x183   :  { %v1046_v41 = vmax.f32 %v1038_v32, %v1042_v37  ;;  %v1048_v42 = vmax.f32 %v1040_v33, %v1044_v38  ;;  %v1019_v43 = vadd.f32 %v1018_v39, %v1000_v35  ;;  %v1024_v44 = vadd.f32 %v1023_v40, %v1005_v36 }
 0x185   :  { %v1054_v45 = vrot.slane %v1046_v41, 4  ;;  %v1062_v46 = vpack.c.bf16 %v1046_v41, %v1046_v41  ;;  %v1056_v47 = vrot.slane %v1048_v42, 4  ;;  %v1066_v48 = vpack.c.bf16 %v1048_v42, %v1048_v42 }
 0x186   :  { %v1031_v49 = vmul.f32 %v1270_v20, %v1019_v43  ;;  %v1033_v50 = vmul.f32 %v1270_v20, %v1024_v44 }
 0x187   :  { %v1063_v51 = vpack.c.bf16 %v1054_v45, %v1054_v45  ;;  %1070 = vst.msk [vmem:[%s1629_s4] sm:$0x3] %vm73_vm3, %v1062_v46  ;;  %v1067_v52 = vpack.c.bf16 %v1056_v47, %v1056_v47 }
 0x188   :  { %1074 = vst.msk [vmem:[%s1629_s4 + $0x8] sm:$0x3] %vm73_vm3, %v1066_v48  ;;  %v1039_v53 = vadd.f32 %v1271_v26, %v1031_v49  ;;  %v1041_v54 = vadd.f32 %v1271_v26, %v1033_v50 }
 0x189   :  { %1071 = vst.msk [vmem:[%s1629_s4 + $0x2] sm:$0x3] %vm73_vm3, %v1063_v51 }
 0x18a   :  { %1075 = vst.msk [vmem:[%s1629_s4 + $0xa] sm:$0x3] %vm73_vm3, %v1067_v52  ;;  %v1043_v55 = vmul.f32 0.1, %v1039_v53  ;;  %v1045_v56 = vmul.f32 0.1, %v1041_v54 }
 0x18c   :  { %v1047_v57 = vmax.f32 %v1039_v53, %v1043_v55  ;;  %v1049_v58 = vmax.f32 %v1041_v54, %v1045_v56 }
 0x18e   :  { %v1055_v59 = vrot.slane %v1047_v57, 4  ;;  %v1064_v60 = vpack.c.bf16 %v1047_v57, %v1047_v57  ;;  %v1057_v61 = vrot.slane %v1049_v58, 4  ;;  %v1068_v62 = vpack.c.bf16 %v1049_v58, %v1049_v58 }
 0x190   :  { %v1065_v63 = vpack.c.bf16 %v1055_v59, %v1055_v59  ;;  %1072 = vst.msk [vmem:[%s1629_s4 + $0x4] sm:$0x3] %vm73_vm3, %v1064_v60  ;;  %v1069_v0 = vpack.c.bf16 %v1057_v61, %v1057_v61 }
 0x191   :  { %1076 = vst.msk [vmem:[%s1629_s4 + $0xc] sm:$0x3] %vm73_vm3, %v1068_v62 }
 0x192   :  { %1073 = vst.msk [vmem:[%s1629_s4 + $0x6] sm:$0x3] %vm73_vm3, %v1065_v63 }
 0x193   :  { %1077 = vst.msk [vmem:[%s1629_s4 + $0xe] sm:$0x3] %vm73_vm3, %v1069_v0 }

// kernel: yolo_v1_forward.5
= control target key start
LH: loop header
LB: loop body
LE: loop exit
PB: predicated region body
PF: predicated region fallthrough
CT: control target
= control target key end

     0   :  { %vm18_vm0 = vcmask 523264   ;;  %vm20_vm1 = vcmask 517120   ;;  %v2168_v0 = vmov 0.0   ;;  %s2169_s15 = smov 64   ;;  %vm141_vm2 = vcmask 519168   ;;  %s2881_s0 = inlined_call_operand.vmem [shape: bf16[2,8,8,64], index: 0, kind: input, shape index: {}]   ;;  %s2882_s1 = inlined_call_operand.vmem [shape: bf16[576,64], index: 1, kind: input, shape index: {}]   ;;  %s2883_s2 = inlined_call_operand.vmem [shape: f32[1,64], index: 2, kind: input, shape index: {}]   ;;  %s2884_s3 = inlined_call_operand.vmem [shape: f32[1,64], index: 3, kind: input, shape index: {}]   ;;  %s2885_s4 = inlined_call_operand.vmem [shape: bf16[2,8,8,64], index: 4, kind: output, shape index: {}]  }
   0x1   :  { %40 = vst.msk [vmem:[#allocation2 + $0xa0] sm:$0xff] %vm18_vm0, %v2168_v0  ;;  %v2137_v3 = vld [vmem:[%s2881_s0 + $0x28] sm:$0xff]   ;;  %v2136_v4 = vld [vmem:[%s2881_s0 + $0x20] sm:$0xff]   ;;  %v2138_v6 = vld [vmem:[%s2881_s0 + $0x30] sm:$0xff]   ;;  %vm254_vm3 = vcmask 1043968  }
   0x2   :  { %41 = vst.msk [vmem:[#allocation2 + $0xa8] sm:$0x3] %vm20_vm1, %v2168_v0  ;;  %v2124_v5 = vunpack.c.h.bf16 %v2137_v3  ;;  %v2123_v7 = vunpack.c.l.bf16 %v2137_v3  ;;  %v2133_v8 = vld [vmem:[%s2881_s0 + $0x8] sm:$0xff]   ;;  %v2119_v9 = vunpack.c.l.bf16 %v2136_v4  ;;  %v2127_v10 = vunpack.c.l.bf16 %v2138_v6  ;;  %v2102_v11 = vld [vmem:[%s2881_s0] sm:$0xff]   ;;  %v2134_v13 = vld [vmem:[%s2881_s0 + $0x10] sm:$0xff]  }
   0x3   :  { %19 = vst.msk [vmem:[#allocation2] sm:$0xff] %vm18_vm0, %v2168_v0  ;;  %v2108_v12 = vunpack.c.h.bf16 %v2133_v8  ;;  %v2107_v14 = vunpack.c.l.bf16 %v2133_v8  ;;  %v2103_v15 = vunpack.c.l.bf16 %v2102_v11  ;;  %v2111_v16 = vunpack.c.l.bf16 %v2134_v13  ;;  %v2261_v17 = vld [vmem:[%s2881_s0 + $0x18] sm:$0xff]  }
   0x4   :  { %21 = vst.msk [vmem:[#allocation2 + $0x8] sm:$0x3] %vm20_vm1, %v2168_v0  ;;  %v2128_v18 = vunpack.c.h.bf16 %v2138_v6  ;;  %v2112_v19 = vunpack.c.h.bf16 %v2134_v13  ;;  %v2115_v20 = vunpack.c.l.bf16 %v2261_v17  ;;  %v2120_v22 = vunpack.c.h.bf16 %v2136_v4  ;;  %v2283_v31 = vld [vmem:[%s2881_s0 + $0x38] sm:$0xff]   ;;  %v2069_v13 = vld [vmem:[%s2882_s1 + $0x20] sm:$0xff] }
   0x5   :  { %22 = vst.msk [vmem:[#allocation2 + $0x10] sm:$0xff] %vm18_vm0, %v2168_v0  ;;  %v2104_v28 = vunpack.c.h.bf16 %v2102_v11  ;;  %v2131_v33 = vunpack.c.l.bf16 %v2283_v31  ;;  %v2072_v4 = vld [vmem:[%s2882_s1 + $0x38] sm:$0xff] }
   0x6   :  { %23 = vst.msk [vmem:[#allocation2 + $0x18] sm:$0x3] %vm20_vm1, %v2168_v0  ;;  %2140 = vmatpush.bf16.msra.mxu1 %v2072_v4  ;;  %2141 = vmatpush.bf16.msra.mxu2 %v2072_v4 }
   0x7   :  { %24 = vst.msk [vmem:[#allocation2 + $0x20] sm:$0xff] %vm18_vm0, %v2168_v0  ;;  %2142 = vmatpush.bf16.msra.mxu3 %v2072_v4  ;;  %1360 = vmatpush.bf16.msra.mxu0 %v2072_v4 }
   0x8   :  { %25 = vst.msk [vmem:[#allocation2 + $0x28] sm:$0x3] %vm20_vm1, %v2168_v0 }
   0x9   :  { %v166_v1 = vld [vmem:[#allocation2 + $0xa1] sm:$0xff]  ;;  %26 = vst.msk [vmem:[#allocation2 + $0x30] sm:$0xff] %vm18_vm0, %v2168_v0 }
   0xa   :  { %v182_v2 = vpack.c.bf16 %v166_v1, %v166_v1  ;;  %27 = vst.msk [vmem:[#allocation2 + $0x38] sm:$0x3] %vm20_vm1, %v2168_v0 }
   0xb   :  { %28 = vst.msk [vmem:[#allocation2 + $0x40] sm:$0xff] %vm18_vm0, %v2168_v0  ;;  %v158_v30 = vld [vmem:[#allocation2 + $0x1] sm:$0xff] }
   0xc   :  { %222 = vrot.lane.b32.xlu0 %v182_v2, %s2169_s15  ;;  %29 = vst.msk [vmem:[#allocation2 + $0x48] sm:$0x3] %vm20_vm1, %v2168_v0  ;;  %v174_v35 = vpack.c.bf16 %v158_v30, %v158_v30 }
   0xd   :  { %30 = vst.msk [vmem:[#allocation2 + $0x50] sm:$0xff] %vm18_vm0, %v2168_v0 }
   0xe   :  { %31 = vst.msk [vmem:[#allocation2 + $0x58] sm:$0x3] %vm20_vm1, %v2168_v0 }
   0xf   :  { %32 = vst.msk [vmem:[#allocation2 + $0x60] sm:$0xff] %vm18_vm0, %v2168_v0 }
  0x10   :  { %33 = vst.msk [vmem:[#allocation2 + $0x68] sm:$0x3] %vm20_vm1, %v2168_v0 }
  0x11   :  { %34 = vst.msk [vmem:[#allocation2 + $0x70] sm:$0xff] %vm18_vm0, %v2168_v0 }
  0x12   :  { %35 = vst.msk [vmem:[#allocation2 + $0x78] sm:$0x3] %vm20_vm1, %v2168_v0 }
  0x13   :  { %36 = vst.msk [vmem:[#allocation2 + $0x80] sm:$0xff] %vm18_vm0, %v2168_v0 }
  0x14   :  { %37 = vst.msk [vmem:[#allocation2 + $0x88] sm:$0x3] %vm20_vm1, %v2168_v0 }
  0x15   :  { %38 = vst.msk [vmem:[#allocation2 + $0x90] sm:$0xff] %vm18_vm0, %v2168_v0 }
  0x16   :  { %39 = vst.msk [vmem:[#allocation2 + $0x98] sm:$0x3] %vm20_vm1, %v2168_v0 }
  0x17   :  { %42 = vst.msk [vmem:[#allocation2 + $0xb0] sm:$0xff] %vm18_vm0, %v2168_v0 }
  0x18   :  { %43 = vst.msk [vmem:[#allocation2 + $0xb8] sm:$0x3] %vm20_vm1, %v2168_v0 }
  0x19   :  { %44 = vst.msk [vmem:[#allocation2 + $0xc0] sm:$0xff] %vm18_vm0, %v2168_v0 }
  0x1a   :  { %45 = vst.msk [vmem:[#allocation2 + $0xc8] sm:$0x3] %vm20_vm1, %v2168_v0 }
  0x1b   :  { %46 = vst.msk [vmem:[#allocation2 + $0xd0] sm:$0xff] %vm18_vm0, %v2168_v0 }
  0x1c   :  { %47 = vst.msk [vmem:[#allocation2 + $0xd8] sm:$0x3] %vm20_vm1, %v2168_v0 }
  0x1d   :  { %48 = vst.msk [vmem:[#allocation2 + $0xe0] sm:$0xff] %vm18_vm0, %v2168_v0 }
  0x1e   :  { %49 = vst.msk [vmem:[#allocation2 + $0xe8] sm:$0x3] %vm20_vm1, %v2168_v0 }
  0x1f   :  { %50 = vst.msk [vmem:[#allocation2 + $0xf0] sm:$0xff] %vm18_vm0, %v2168_v0 }
  0x20   :  { %51 = vst.msk [vmem:[#allocation2 + $0xf8] sm:$0x3] %vm20_vm1, %v2168_v0 }
  0x21   :  { %52 = vst.msk [vmem:[#allocation2 + $0x100] sm:$0xff] %vm18_vm0, %v2168_v0 }
  0x22   :  { %53 = vst.msk [vmem:[#allocation2 + $0x108] sm:$0x3] %vm20_vm1, %v2168_v0 }
  0x23   :  { %54 = vst.msk [vmem:[#allocation2 + $0x110] sm:$0xff] %vm18_vm0, %v2168_v0 }
  0x24   :  { %55 = vst.msk [vmem:[#allocation2 + $0x118] sm:$0x3] %vm20_vm1, %v2168_v0 }
  0x25   :  { %56 = vst.msk [vmem:[#allocation2 + $0x120] sm:$0xff] %vm18_vm0, %v2168_v0 }
  0x26   :  { %57 = vst.msk [vmem:[#allocation2 + $0x128] sm:$0x3] %vm20_vm1, %v2168_v0 }
  0x27   :  { %58 = vst.msk [vmem:[#allocation2 + $0x130] sm:$0xff] %vm18_vm0, %v2168_v0 }
  0x28   :  { %59 = vst.msk [vmem:[#allocation2 + $0x138] sm:$0x3] %vm20_vm1, %v2168_v0  ;;  %v2116_v0 = vunpack.c.h.bf16 %v2261_v17 }
  0x29   :  { %104 = vst.msk [vmem:[#allocation2 + $0xe1] sm:$0xff] %vm18_vm0, %v2124_v5  ;;  %v2071_v5 = vld [vmem:[%s2882_s1 + $0x30] sm:$0xff] }
  0x2a   :  { %103 = vst.msk [vmem:[#allocation2 + $0xd1] sm:$0xff] %vm18_vm0, %v2123_v7  ;;  %2143 = vmatpush.bf16.msra.mxu1 %v2071_v5  ;;  %2144 = vmatpush.bf16.msra.mxu2 %v2071_v5 }
  0x2b   :  { %101 = vst.msk [vmem:[#allocation2 + $0xb1] sm:$0xff] %vm18_vm0, %v2119_v9  ;;  %2145 = vmatpush.bf16.msra.mxu3 %v2071_v5  ;;  %1361 = vmatpush.bf16.msra.mxu0 %v2071_v5 }
  0x2c   :  { %105 = vst.msk [vmem:[#allocation2 + $0xf1] sm:$0xff] %vm18_vm0, %v2127_v10  ;;  %v2070_v10 = vld [vmem:[%s2882_s1 + $0x28] sm:$0xff] }
  0x2d   :  { %96 = vst.msk [vmem:[#allocation2 + $0x41] sm:$0xff] %vm18_vm0, %v2108_v12 }
  0x2e   :  { %95 = vst.msk [vmem:[#allocation2 + $0x31] sm:$0xff] %vm18_vm0, %v2107_v14  ;;  %2146 = vmatpush.bf16.msra.mxu1 %v2070_v10  ;;  %2147 = vmatpush.bf16.msra.mxu2 %v2070_v10 }
  0x2f   :  { %93 = vst.msk [vmem:[#allocation2 + $0x11] sm:$0xff] %vm18_vm0, %v2103_v15  ;;  %2148 = vmatpush.bf16.msra.mxu3 %v2070_v10  ;;  %1362 = vmatpush.bf16.msra.mxu0 %v2070_v10 }
  0x30   :  { %v170_v21 = vld [vmem:[#allocation2 + $0xe1] sm:$0xff]  ;;  %97 = vst.msk [vmem:[#allocation2 + $0x51] sm:$0xff] %vm18_vm0, %v2111_v16 }
  0x31   :  { %v2268_v23 = vpack.c.bf16 %v170_v21, %v170_v21  ;;  %106 = vst.msk [vmem:[#allocation2 + $0x101] sm:$0xff] %vm18_vm0, %v2128_v18  ;;  %v169_v38 = vld [vmem:[#allocation2 + $0xd1] sm:$0xff]  ;;  %v117_v21 = vld [vmem:[#allocation2 + $0xa0] sm:$0xff] }
  0x32   :  { %v167_v24 = vld [vmem:[#allocation2 + $0xb1] sm:$0xff]  ;;  %98 = vst.msk [vmem:[#allocation2 + $0x61] sm:$0xff] %vm18_vm0, %v2112_v19  ;;  %v2300_v41 = vpack.c.bf16 %v169_v38, %v169_v38  ;;  %2149 = vmatpush.bf16.msra.mxu1 %v2069_v13  ;;  %2150 = vmatpush.bf16.msra.mxu2 %v2069_v13 }
  0x33   :  { %230 = vrot.lane.b32.xlu1 %v2268_v23, %s2169_s15  ;;  %v183_v25 = vpack.c.bf16 %v167_v24, %v167_v24  ;;  %99 = vst.msk [vmem:[#allocation2 + $0x71] sm:$0xff] %vm18_vm0, %v2115_v20  ;;  %v171_v26 = vld [vmem:[#allocation2 + $0xf1] sm:$0xff]  ;;  %2151 = vmatpush.bf16.msra.mxu3 %v2069_v13 }
  0x34   :  { %v162_v27 = vld [vmem:[#allocation2 + $0x41] sm:$0xff]  ;;  %102 = vst.msk [vmem:[#allocation2 + $0xc1] sm:$0xff] %vm18_vm0, %v2120_v22  ;;  %v2285_v32 = vpack.c.bf16 %v171_v26, %v171_v26  ;;  %v2068_v20 = vld [vmem:[%s2882_s1 + $0x18] sm:$0xff]  ;;  %1363 = vmatpush.bf16.msra.mxu0 %v2069_v13  ;;  %v2067_v22 = vld [vmem:[%s2882_s1 + $0x10] sm:$0xff] }
  0x35   :  { %224 = vrot.lane.b32.xlu0 %v183_v25, %s2169_s15  ;;  %v2277_v29 = vpack.c.bf16 %v162_v27, %v162_v27  ;;  %94 = vst.msk [vmem:[#allocation2 + $0x21] sm:$0xff] %vm18_vm0, %v2104_v28  ;;  %v161_v50 = vld [vmem:[#allocation2 + $0x31] sm:$0xff]  ;;  %v482_v2 = vld [vmem:[#allocation2 + $0x42] sm:$0xff]  ;;  %v133_v25 = vpack.c.bf16 %v117_v21, %v117_v21 }
  0x36   :  { %107 = vst.msk [vmem:[#allocation2 + $0x111] sm:$0xff] %vm18_vm0, %v2131_v33  ;;  %v159_v37 = vld [vmem:[#allocation2 + $0x11] sm:$0xff]  ;;  %v2324_v52 = vpack.c.bf16 %v161_v50, %v161_v50  ;;  %v2357_v3 = vpack.c.bf16 %v482_v2, %v482_v2  ;;  %v322_v6 = vld [vmem:[#allocation2 + $0x40] sm:$0xff]  ;;  %2152 = vmatpush.bf16.msra.mxu1 %v2068_v20  ;;  %2153 = vmatpush.bf16.msra.mxu2 %v2068_v20  ;;  %v2066_v27 = vld [vmem:[%s2882_s1 + $0x8] sm:$0xff] }
  0x37   :  { %214 = vrot.lane.b32.xlu2 %v2277_v29, %s2169_s15  ;;  %v163_v34 = vld [vmem:[#allocation2 + $0x51] sm:$0xff]  ;;  %v2296_v39 = vpack.c.bf16 %v159_v37, %v159_v37  ;;  %100 = vst.msk [vmem:[#allocation2 + $0x81] sm:$0xff] %vm18_vm0, %v2116_v0  ;;  %v2369_v8 = vpack.c.bf16 %v322_v6, %v322_v6  ;;  %2154 = vmatpush.bf16.msra.mxu3 %v2068_v20  ;;  %v121_v28 = vld [vmem:[#allocation2 + $0xe0] sm:$0xff] }
  0x38   :  { %v2293_v36 = vpack.c.bf16 %v163_v34, %v163_v34  ;;  %v172_v43 = vld [vmem:[#allocation2 + $0x101] sm:$0xff]  ;;  %v479_v54 = vld [vmem:[#allocation2 + $0x12] sm:$0xff]  ;;  %1364 = vmatpush.bf16.msra.mxu0 %v2068_v20  ;;  %150 = vst.msk [vmem:[#allocation3 + $0xa0] sm:$0xf] %vm141_vm2, %v133_v25  ;;  %v2427_v34 = vpack.c.bf16 %v121_v28, %v121_v28 }
  0x39   :  { %v164_v44 = vld [vmem:[#allocation2 + $0x61] sm:$0xff]  ;;  %v2308_v45 = vpack.c.bf16 %v172_v43, %v172_v43  ;;  %v2332_v56 = vpack.c.bf16 %v479_v54, %v479_v54  ;;  %v319_v60 = vld [vmem:[#allocation2 + $0x10] sm:$0xff]  ;;  %146 = vst.msk [vmem:[#allocation3 + $0x50] sm:$0xf] %vm141_vm2, %v2369_v8  ;;  %v2080_v13 = vld [vmem:[%s2882_s1 + $0x78] sm:$0xff] }
  0x3a   :  { %v2312_v47 = vpack.c.bf16 %v164_v44, %v164_v44  ;;  %v165_v49 = vld [vmem:[#allocation2 + $0x71] sm:$0xff]  ;;  %v335_v62 = vpack.c.bf16 %v319_v60, %v319_v60  ;;  %v324_v12 = vld [vmem:[#allocation2 + $0x60] sm:$0xff]  ;;  %463 = vst.msk [vmem:[#allocation3 + $0x8] sm:$0xf] %vm141_vm2, %v2296_v39  ;;  %2155 = vmatpush.bf16.msra.mxu1 %v2067_v22  ;;  %2156 = vmatpush.bf16.msra.mxu2 %v2067_v22  ;;  %v2094_v20 = vld [vmem:[%s2882_s1 + $0xe8] sm:$0xff] }
  0x3b   :  { %232 = vrot.lane.b32.xlu1 %v2285_v32, %s2169_s15  ;;  %v168_v40 = vld [vmem:[#allocation2 + $0xc1] sm:$0xff]  ;;  %v2320_v51 = vpack.c.bf16 %v165_v49, %v165_v49  ;;  %v481_v63 = vld [vmem:[#allocation2 + $0x32] sm:$0xff]  ;;  %v2383_v17 = vpack.c.bf16 %v324_v12, %v324_v12  ;;  %2157 = vmatpush.bf16.msra.mxu3 %v2067_v22  ;;  %304 = vst.msk [vmem:[#allocation3 + $0x18] sm:$0xf] %vm141_vm2, %v2332_v56 }
  0x3c   :  { %v2304_v42 = vpack.c.bf16 %v168_v40, %v168_v40  ;;  %v640_v53 = vld [vmem:[#allocation2 + $0x21] sm:$0xff]  ;;  %v2352_v1 = vpack.c.bf16 %v481_v63, %v481_v63  ;;  %v321_v7 = vld [vmem:[#allocation2 + $0x30] sm:$0xff]  ;;  %143 = vst.msk [vmem:[#allocation3 + $0x14] sm:$0xf] %vm141_vm2, %v335_v62  ;;  %1365 = vmatpush.bf16.msra.mxu0 %v2067_v22  ;;  %v2100_v22 = vld [vmem:[%s2882_s1 + $0x118] sm:$0xff] }
  0x3d   :  { %206 = vrot.lane.b32.xlu0 %v174_v35, %s2169_s15  ;;  %v173_v46 = vld [vmem:[#allocation2 + $0x111] sm:$0xff]  ;;  %v2330_v55 = vpack.c.bf16 %v640_v53, %v640_v53  ;;  %v480_v57 = vld [vmem:[#allocation2 + $0x22] sm:$0xff]  ;;  %v337_v9 = vpack.c.bf16 %v321_v7, %v321_v7  ;;  %148 = vst.msk [vmem:[#allocation3 + $0x78] sm:$0xf] %vm141_vm2, %v2383_v17 }
  0x3e   :  { %v2316_v48 = vpack.c.bf16 %v173_v46, %v173_v46  ;;  %v2338_v58 = vpack.c.bf16 %v480_v57, %v480_v57  ;;  %v320_v59 = vld [vmem:[#allocation2 + $0x20] sm:$0xff]  ;;  %v483_v11 = vld [vmem:[#allocation2 + $0x52] sm:$0xff]  ;;  %466 = vst.msk [vmem:[#allocation3 + $0x44] sm:$0xf] %vm141_vm2, %v2277_v29  ;;  %2158 = vmatpush.bf16.msra.mxu1 %v2066_v27  ;;  %2159 = vmatpush.bf16.msra.mxu2 %v2066_v27  ;;  %v2086_v7 = vld [vmem:[%s2882_s1 + $0xa8] sm:$0xff] }
  0x3f   :  { %216 = vrot.lane.b32.xlu2 %v2293_v36, %s2169_s15  ;;  %v2344_v61 = vpack.c.bf16 %v320_v59, %v320_v59  ;;  %v323_v14 = vld [vmem:[#allocation2 + $0x50] sm:$0xff]  ;;  %v499_v16 = vpack.c.bf16 %v483_v11, %v483_v11  ;;  %v484_v18 = vld [vmem:[#allocation2 + $0x62] sm:$0xff]  ;;  %145 = vst.msk [vmem:[#allocation3 + $0x3c] sm:$0xf] %vm141_vm2, %v337_v9  ;;  %2160 = vmatpush.bf16.msra.mxu3 %v2066_v27 }
  0x40   :  { %v339_v15 = vpack.c.bf16 %v323_v14, %v323_v14  ;;  %v500_v19 = vpack.c.bf16 %v484_v18, %v484_v18  ;;  %464 = vst.msk [vmem:[#allocation3 + $0x1c] sm:$0xf] %vm141_vm2, %v2330_v55  ;;  %v485_v26 = vld [vmem:[#allocation2 + $0x72] sm:$0xff]  ;;  %v328_v30 = vld [vmem:[#allocation2 + $0xc0] sm:$0xff]  ;;  %1366 = vmatpush.bf16.msra.mxu0 %v2066_v27  ;;  %v2078_v27 = vld [vmem:[%s2882_s1 + $0x68] sm:$0xff] }
  0x41   :  { %144 = vst.msk [vmem:[#allocation3 + $0x28] sm:$0xf] %vm141_vm2, %v2344_v61  ;;  %v646_v33 = vld [vmem:[#allocation2 + $0x81] sm:$0xff]  ;;  %v501_v35 = vpack.c.bf16 %v485_v26, %v485_v26  ;;  %v118_v37 = vld [vmem:[#allocation2 + $0xb0] sm:$0xff] }
  0x42   :  { %147 = vst.msk [vmem:[#allocation3 + $0x64] sm:$0xf] %vm141_vm2, %v339_v15  ;;  %v486_v38 = vld [vmem:[#allocation2 + $0x82] sm:$0xff]  ;;  %v325_v40 = vld [vmem:[#allocation2 + $0x70] sm:$0xff]  ;;  %v662_v43 = vpack.c.bf16 %v646_v33, %v646_v33 }
  0x43   :  { %208 = vrot.lane.b32.xlu1 %v2296_v39, %s2169_s15  ;;  %624 = vst.msk [vmem:[#allocation3 + $0xc] sm:$0xf] %vm141_vm2, %v2344_v61  ;;  %v2440_v39 = vpack.c.bf16 %v118_v37, %v118_v37  ;;  %v341_v44 = vpack.c.bf16 %v325_v40, %v325_v40  ;;  %v122_v46 = vld [vmem:[#allocation2 + $0xf0] sm:$0xff]  ;;  %v488_v57 = vld [vmem:[#allocation2 + $0xc2] sm:$0xff] }
  0x44   :  { %625 = vst.msk [vmem:[#allocation3 + $0x20] sm:$0xf] %vm141_vm2, %v337_v9  ;;  %v2447_v49 = vpack.c.bf16 %v122_v46, %v122_v46  ;;  %v647_v50 = vld [vmem:[#allocation2 + $0x91] sm:$0xff]  ;;  %v504_v59 = vpack.c.bf16 %v488_v57, %v488_v57  ;;  %v123_v2 = vld [vmem:[#allocation2 + $0x100] sm:$0xff] }
  0x45   :  { %228 = vrot.lane.b32.xlu0 %v2300_v41, %s2169_s15  ;;  %465 = vst.msk [vmem:[#allocation3 + $0x30] sm:$0xf] %vm141_vm2, %v2324_v52  ;;  %v663_v53 = vpack.c.bf16 %v647_v50, %v647_v50  ;;  %v2489_v5 = vpack.c.bf16 %v123_v2, %v123_v2  ;;  %v2085_v14 = vld [vmem:[%s2882_s1 + $0xa0] sm:$0xff]  ;;  %v2079_v21 = vld [vmem:[%s2882_s1 + $0x70] sm:$0xff] }
  0x46   :  { %626 = vst.msk [vmem:[#allocation3 + $0x34] sm:$0xf] %vm141_vm2, %v2369_v8  ;;  %v2083_v28 = vld [vmem:[%s2882_s1 + $0x90] sm:$0xff]  ;;  %v492_v46 = vld [vmem:[#allocation2 + $0x102] sm:$0xff] }
  0x47   :  { %226 = vrot.lane.b32.xlu2 %v2304_v42, %s2169_s15  ;;  %305 = vst.msk [vmem:[#allocation3 + $0x2c] sm:$0xf] %vm141_vm2, %v2338_v58  ;;  %v508_v50 = vpack.c.bf16 %v492_v46, %v492_v46  ;;  %v2091_v57 = vld [vmem:[%s2882_s1 + $0xd0] sm:$0xff] }
  0x48   :  { %627 = vst.msk [vmem:[#allocation3 + $0x48] sm:$0xf] %vm141_vm2, %v339_v15 }
  0x49   :  { %154 = vst.msk [vmem:[#allocation3 + $0xf0] sm:$0xf] %vm141_vm2, %v2427_v34 }
  0x4a   :  { %151 = vst.msk [vmem:[#allocation3 + $0xb4] sm:$0xf] %vm141_vm2, %v2440_v39 }
  0x4b   :  { %234 = vrot.lane.b32.xlu1 %v2308_v45, %s2169_s15  ;;  %149 = vst.msk [vmem:[#allocation3 + $0x8c] sm:$0xf] %vm141_vm2, %v341_v44 }
  0x4c   :  { %784 = vst.msk [vmem:[#allocation3 + $0x10] sm:$0xf] %vm141_vm2, %v2338_v58 }
  0x4d   :  { %218 = vrot.lane.b32.xlu0 %v2312_v47, %s2169_s15  ;;  %155 = vst.msk [vmem:[#allocation3 + $0x104] sm:$0xf] %vm141_vm2, %v2447_v49 }
  0x4e   :  { %785 = vst.msk [vmem:[#allocation3 + $0x24] sm:$0xf] %vm141_vm2, %v2352_v1 }
  0x4f   :  { %236 = vrot.lane.b32.xlu2 %v2316_v48, %s2169_s15  ;;  %306 = vst.msk [vmem:[#allocation3 + $0x40] sm:$0xf] %vm141_vm2, %v2352_v1 }
  0x50   :  { %628 = vst.msk [vmem:[#allocation3 + $0x5c] sm:$0xf] %vm141_vm2, %v2383_v17 }
  0x51   :  { %307 = vst.msk [vmem:[#allocation3 + $0x54] sm:$0xf] %vm141_vm2, %v2357_v3 }
  0x52   :  { %629 = vst.msk [vmem:[#allocation3 + $0x70] sm:$0xf] %vm141_vm2, %v341_v44 }
  0x53   :  { %220 = vrot.lane.b32.xlu1 %v2320_v51, %s2169_s15  ;;  %470 = vst.msk [vmem:[#allocation3 + $0x94] sm:$0xf] %vm141_vm2, %v662_v43 }
  0x54   :  { %313 = vst.msk [vmem:[#allocation3 + $0xcc] sm:$0xf] %vm141_vm2, %v504_v59 }
  0x55   :  { %212 = vrot.lane.b32.xlu0 %v2324_v52, %s2169_s15  ;;  %156 = vst.msk [vmem:[#allocation3 + $0x118] sm:$0xf] %vm141_vm2, %v2489_v5 }
  0x56   :  { %636 = vst.msk [vmem:[#allocation3 + $0xfc] sm:$0xf] %vm141_vm2, %v2489_v5 }
  0x57   :  { %210 = vrot.lane.b32.xlu2 %v2330_v55, %s2169_s15  ;;  %796 = vst.msk [vmem:[#allocation3 + $0x100] sm:$0xf] %vm141_vm2, %v508_v50 }
  0x58   :  { %317 = vst.msk [vmem:[#allocation3 + $0x11c] sm:$0xf] %vm141_vm2, %v508_v50 }
  0x5b   :  { %527 = vrot.lane.b32.xlu1 %v2332_v56, %s2169_s15 }
  0x5d   :  { %688 = vrot.lane.b32.xlu0 %v2330_v55, %s2169_s15 }
  0x5f   :  { %529 = vrot.lane.b32.xlu2 %v2338_v58, %s2169_s15  ;;  %v487_v58 = vld [vmem:[#allocation2 + $0xb2] sm:$0xff] }
  0x60   :  { %v503_v60 = vpack.c.bf16 %v487_v58, %v487_v58 }
  0x63   :  { %690 = vrot.lane.b32.xlu1 %v2324_v52, %s2169_s15  ;;  %v109_v52 = vld [vmem:[#allocation2] sm:$0xff] }
  0x64   :  { %v125_v54 = vpack.c.bf16 %v109_v52, %v109_v52  ;;  %v2081_v52 = vld [vmem:[%s2882_s1 + $0x80] sm:$0xff] }
  0x65   :  { %369 = vrot.lane.b32.xlu0 %v2344_v61, %s2169_s15  ;;  %v2088_v61 = vld [vmem:[%s2882_s1 + $0xb8] sm:$0xff] }
  0x66   :  { %142 = vst.msk [vmem:[#allocation3] sm:$0xf] %vm141_vm2, %v125_v54  ;;  %v491_v54 = vld [vmem:[#allocation2 + $0xf2] sm:$0xff] }
  0x67   :  { %367 = vrot.lane.b32.xlu2 %v335_v62, %s2169_s15  ;;  %v120_v62 = vld [vmem:[#allocation2 + $0xd0] sm:$0xff] }
  0x68   :  { %v2477_v63 = vpack.c.bf16 %v120_v62, %v120_v62  ;;  %v507_v62 = vpack.c.bf16 %v491_v54, %v491_v54 }
  0x6a   :  { %153 = vst.msk [vmem:[#allocation3 + $0xdc] sm:$0xf] %vm141_vm2, %v2477_v63 }
  0x6b   :  { %531 = vrot.lane.b32.xlu1 %v2352_v1, %s2169_s15  ;;  %v124_v1 = vld [vmem:[#allocation2 + $0x110] sm:$0xff]  ;;  %633 = vst.msk [vmem:[#allocation3 + $0xc0] sm:$0xf] %vm141_vm2, %v2477_v63 }
  0x6c   :  { %v2487_v4 = vpack.c.bf16 %v124_v1, %v124_v1  ;;  %v2098_v1 = vld [vmem:[%s2882_s1 + $0x108] sm:$0xff] }
  0x6d   :  { %692 = vrot.lane.b32.xlu0 %v2277_v29, %s2169_s15  ;;  %v2065_v29 = vld [vmem:[%s2882_s1] sm:$0xff] }
  0x6e   :  { %2161 = vmatpush.bf16.msra.mxu1 %v2065_v29  ;;  %2162 = vmatpush.bf16.msra.mxu2 %v2065_v29  ;;  %157 = vst.msk [vmem:[#allocation3 + $0x12c] sm:$0xf] %vm141_vm2, %v2487_v4 }
  0x6f   :  { %533 = vrot.lane.b32.xlu2 %v2357_v3, %s2169_s15  ;;  %2163 = vmatpush.bf16.msra.mxu3 %v2065_v29  ;;  %v2087_v3 = vld [vmem:[%s2882_s1 + $0xb0] sm:$0xff] }
  0x70   :  { %1367 = vmatpush.bf16.msra.mxu0 %v2065_v29 }
  0x72   :  { %1458 = vmatpush.bf16.msrb.mxu2 %v2088_v61  ;;  %1409 = vmatpush.bf16.msrb.mxu1 %v2080_v13 }
  0x73   :  { %694 = vrot.lane.b32.xlu1 %v2293_v36, %s2169_s15  ;;  %v2435_v36 = vpack.c.bf16 %v328_v30, %v328_v30  ;;  %v2093_v30 = vld [vmem:[%s2882_s1 + $0xe0] sm:$0xff] }
  0x74   :  { %1560 = vmatpush.bf16.msrb.mxu0 %v2100_v22  ;;  %v754_v22 = vld [vmem:[#allocation2 + $0x42] sm:$0xff] }
  0x75   :  { %373 = vrot.lane.b32.xlu0 %v2369_v8, %s2169_s15  ;;  %152 = vst.msk [vmem:[#allocation3 + $0xc8] sm:$0xf] %vm141_vm2, %v2435_v36  ;;  %v2096_v8 = vld [vmem:[%s2882_s1 + $0xf8] sm:$0xff] }
  0x76   :  { %632 = vst.msk [vmem:[#allocation3 + $0xac] sm:$0xf] %vm141_vm2, %v2435_v36  ;;  %1459 = vmatpush.bf16.msrb.mxu2 %v2087_v3  ;;  %1507 = vmatpush.bf16.msrb.mxu3 %v2096_v8  ;;  %v2074_v3 = vld [vmem:[%s2882_s1 + $0x48] sm:$0xff] }
  0x77   :  { %371 = vrot.lane.b32.xlu2 %v337_v9, %s2169_s15  ;;  %1410 = vmatpush.bf16.msrb.mxu1 %v2079_v21  ;;  %v435_v21 = vld [vmem:[#allocation2 + $0x51] sm:$0xff] }
  0x7a   :  { %1460 = vmatpush.bf16.msrb.mxu2 %v2086_v7 }
  0x7b   :  { %535 = vrot.lane.b32.xlu1 %v499_v16, %s2169_s15  ;;  %v489_v16 = vld [vmem:[#allocation2 + $0xd2] sm:$0xff]  ;;  %1411 = vmatpush.bf16.msrb.mxu1 %v2078_v27  ;;  %v451_v27 = vpack.c.bf16 %v435_v21, %v435_v21 }
  0x7d   :  { %696 = vrot.lane.b32.xlu0 %v2312_v47, %s2169_s15  ;;  %v502_v47 = vpack.c.bf16 %v486_v38, %v486_v38  ;;  %467 = vst.msk [vmem:[#allocation3 + $0x58] sm:$0xf] %vm141_vm2, %v451_v27 }
  0x7e   :  { %v223_v24 = vpop.permute.xlu0 %222  ;;  %1461 = vmatpush.bf16.msrb.mxu2 %v2085_v14  ;;  %v2097_v14 = vld [vmem:[%s2882_s1 + $0x100] sm:$0xff] }
  0x7f   :  { %537 = vrot.lane.b32.xlu2 %v500_v19, %s2169_s15  ;;  %263 = vst.msk [vmem:[#allocation3 + $0xa0] sm:$0xf] %vm254_vm3, %v223_v24  ;;  %v505_v19 = vpack.c.bf16 %v489_v16, %v489_v16  ;;  %v493_v24 = vld [vmem:[#allocation2 + $0x112] sm:$0xff] }
  0x80   :  { %v2542_v26 = vpack.c.bf16 %v493_v24, %v493_v24 }
  0x82   :  { %797 = vst.msk [vmem:[#allocation3 + $0x114] sm:$0xf] %vm141_vm2, %v2542_v26 }
  0x83   :  { %698 = vrot.lane.b32.xlu1 %v2320_v51, %s2169_s15  ;;  %v326_v51 = vld [vmem:[#allocation2 + $0x80] sm:$0xff]  ;;  %318 = vst.msk [vmem:[#allocation3 + $0x130] sm:$0xf] %vm141_vm2, %v2542_v26 }
  0x84   :  { %v342_v55 = vpack.c.bf16 %v326_v51, %v326_v51  ;;  %v2076_v51 = vld [vmem:[%s2882_s1 + $0x58] sm:$0xff] }
  0x85   :  { %377 = vrot.lane.b32.xlu0 %v2383_v17, %s2169_s15  ;;  %v2132_v17 = vunpack.c.h.bf16 %v2283_v31  ;;  %v2084_v31 = vld [vmem:[%s2882_s1 + $0x98] sm:$0xff] }
  0x86   :  { %630 = vst.msk [vmem:[#allocation3 + $0x84] sm:$0xf] %vm141_vm2, %v342_v55  ;;  %1462 = vmatpush.bf16.msrb.mxu2 %v2084_v31  ;;  %v1795_v29 = vld [vmem:[#allocation3 + $0xa0] sm:$0xf] }
  0x87   :  { %375 = vrot.lane.b32.xlu2 %v339_v15, %s2169_s15  ;;  %v2095_v15 = vld [vmem:[%s2882_s1 + $0xf0] sm:$0xff]  ;;  %108 = vst.msk [vmem:[#allocation2 + $0x121] sm:$0xff] %vm18_vm0, %v2132_v17 }
  0x88   :  { %1508 = vmatpush.bf16.msrb.mxu3 %v2095_v15 }
  0x8a   :  { %1463 = vmatpush.bf16.msrb.mxu2 %v2083_v28  ;;  %v755_v28 = vld [vmem:[#allocation2 + $0x52] sm:$0xff] }
  0x8b   :  { %539 = vrot.lane.b32.xlu1 %v501_v35, %s2169_s15 }
  0x8c   :  { %1509 = vmatpush.bf16.msrb.mxu3 %v2094_v20 }
  0x8d   :  { %700 = vrot.lane.b32.xlu0 %v662_v43, %s2169_s15  ;;  %v2077_v43 = vld [vmem:[%s2882_s1 + $0x60] sm:$0xff] }
  0x8e   :  { %v654_v35 = vld [vmem:[#allocation2 + $0x121] sm:$0xff]  ;;  %1412 = vmatpush.bf16.msrb.mxu1 %v2077_v43 }
  0x8f   :  { %541 = vrot.lane.b32.xlu2 %v502_v47, %s2169_s15  ;;  %v2563_v38 = vpack.c.bf16 %v654_v35, %v654_v35  ;;  %v494_v15 = vld [vmem:[#allocation2 + $0x122] sm:$0xff] }
  0x90   :  { %1510 = vmatpush.bf16.msrb.mxu3 %v2093_v30  ;;  %v510_v17 = vpack.c.bf16 %v494_v15, %v494_v15  ;;  %v770_v30 = vpack.c.bf16 %v754_v22, %v754_v22 }
  0x91   :  { %v215_v56 = vpop.permute.xlu2 %214  ;;  %478 = vst.msk [vmem:[#allocation3 + $0x134] sm:$0xf] %vm141_vm2, %v2563_v38 }
  0x92   :  { %259 = vst.msk [vmem:[#allocation3 + $0x50] sm:$0xf] %vm254_vm3, %v215_v56  ;;  %1413 = vmatpush.bf16.msrb.mxu1 %v2076_v51  ;;  %v437_v51 = vld [vmem:[#allocation2 + $0x71] sm:$0xff] }
  0x93   :  { %702 = vrot.lane.b32.xlu1 %v663_v53, %s2169_s15  ;;  %798 = vst.msk [vmem:[#allocation3 + $0x128] sm:$0xf] %vm141_vm2, %v510_v17 }
  0x94   :  { %786 = vst.msk [vmem:[#allocation3 + $0x38] sm:$0xf] %vm141_vm2, %v770_v30  ;;  %v279_v30 = vld [vmem:[#allocation2 + $0xa2] sm:$0xff] }
  0x95   :  { %381 = vrot.lane.b32.xlu0 %v342_v55, %s2169_s15  ;;  %v271_v55 = vld [vmem:[#allocation2 + $0x2] sm:$0xff] }
  0x96   :  { %v287_v58 = vpack.c.bf16 %v271_v55, %v271_v55  ;;  %v453_v55 = vpack.c.bf16 %v437_v51, %v437_v51 }
  0x97   :  { %379 = vrot.lane.b32.xlu2 %v341_v44, %s2169_s15  ;;  %v2099_v44 = vld [vmem:[%s2882_s1 + $0x110] sm:$0xff] }
  0x98   :  { %1561 = vmatpush.bf16.msrb.mxu0 %v2099_v44  ;;  %303 = vst.msk [vmem:[#allocation3 + $0x4] sm:$0xf] %vm141_vm2, %v287_v58 }
  0x99   :  { %v217_v0 = vpop.permute.xlu2 %216  ;;  %v1755_v6 = vld [vmem:[#allocation3 + $0x50] sm:$0xf]  ;;  %469 = vst.msk [vmem:[#allocation3 + $0x80] sm:$0xf] %vm141_vm2, %v453_v55 }
  0x9a   :  { %260 = vst.msk [vmem:[#allocation3 + $0x64] sm:$0xf] %vm254_vm3, %v217_v0 }
  0x9b   :  { %543 = vrot.lane.b32.xlu1 %v503_v60, %s2169_s15 }
  0x9c   :  { %1562 = vmatpush.bf16.msrb.mxu0 %v2098_v1 }
  0x9d   :  { %704 = vrot.lane.b32.xlu0 %v2304_v42, %s2169_s15  ;;  %v490_v42 = vld [vmem:[#allocation2 + $0xe2] sm:$0xff] }
  0x9e   :  { %v506_v11 = vpack.c.bf16 %v490_v42, %v490_v42 }
  0x9f   :  { %545 = vrot.lane.b32.xlu2 %v504_v59, %s2169_s15  ;;  %v334_v59 = vld [vmem:[#allocation2 + $0x120] sm:$0xff] }
  0xa0   :  { %315 = vst.msk [vmem:[#allocation3 + $0xf4] sm:$0xf] %vm141_vm2, %v506_v11  ;;  %v2600_v0 = vpack.c.bf16 %v334_v59, %v334_v59  ;;  %1563 = vmatpush.bf16.msrb.mxu0 %v2097_v14 }
  0xa1   :  { %v2037_v9 = vld [vmem:[#allocation3 + $0x60] sm:$0xf0]  ;;  %v227_v10 = vpop.permute.xlu2 %226  ;;  %794 = vst.msk [vmem:[#allocation3 + $0xd8] sm:$0xf] %vm141_vm2, %v506_v11 }
  0xa2   :  { %v1756_v12 = vor.u32 %v2037_v9, %v1755_v6  ;;  %265 = vst.msk [vmem:[#allocation3 + $0xc8] sm:$0xf] %vm254_vm3, %v227_v10  ;;  %v2089_v9 = vld [vmem:[%s2882_s1 + $0xc0] sm:$0xff] }
  0xa3   :  { %706 = vrot.lane.b32.xlu1 %v2300_v41, %s2169_s15  ;;  %638 = vst.msk [vmem:[#allocation3 + $0x124] sm:$0xf] %vm141_vm2, %v2600_v0 }
  0xa4   :  { %1378 = vmatmul.bf16.vlgmr.msra.gmra.mxu1 %v1756_v12 }
  0xa5   :  { %v231_v41 = vpop.permute.xlu1 %230  ;;  %385 = vrot.lane.b32.xlu0 %v2435_v36, %s2169_s15 }
  0xa6   :  { %267 = vst.msk [vmem:[#allocation3 + $0xf0] sm:$0xf] %vm254_vm3, %v231_v41 }
  0xa7   :  { %v225_v18 = vpop.permute.xlu0 %224  ;;  %383 = vrot.lane.b32.xlu2 %v2440_v39, %s2169_s15  ;;  %v2082_v39 = vld [vmem:[%s2882_s1 + $0x88] sm:$0xff] }
  0xa8   :  { %264 = vst.msk [vmem:[#allocation3 + $0xb4] sm:$0xf] %vm254_vm3, %v225_v18  ;;  %1464 = vmatpush.bf16.msrb.mxu2 %v2082_v39 }
  0xa9   :  { %v237_v25 = vpop.permute.xlu2 %236  ;;  %v1815_v6 = vld [vmem:[#allocation3 + $0xc8] sm:$0xf] }
  0xaa   :  { %270 = vst.msk [vmem:[#allocation3 + $0x12c] sm:$0xf] %vm254_vm3, %v237_v25 }
  0xab   :  { %547 = vrot.lane.b32.xlu1 %v505_v19, %s2169_s15 }
  0xac   :  { %1465 = vmatpush.bf16.msrb.mxu2 %v2081_v52  ;;  %v277_v52 = vld [vmem:[#allocation2 + $0x62] sm:$0xff] }
  0xad   :  { %v233_v33 = vpop.permute.xlu1 %232  ;;  %708 = vrot.lane.b32.xlu0 %v2268_v23, %s2169_s15  ;;  %v2092_v23 = vld [vmem:[%s2882_s1 + $0xd8] sm:$0xff]  ;;  %v1835_v53 = vld [vmem:[#allocation3 + $0xf0] sm:$0xf] }
  0xae   :  { %268 = vst.msk [vmem:[#allocation3 + $0x104] sm:$0xf] %vm254_vm3, %v233_v33  ;;  %1511 = vmatpush.bf16.msrb.mxu3 %v2092_v23 }
  0xaf   :  { %v207_v36 = vpop.permute.xlu0 %206  ;;  %v2047_v37 = vld [vmem:[#allocation3 + $0xb0] sm:$0xf0]  ;;  %549 = vrot.lane.b32.xlu2 %v506_v11, %s2169_s15 }
  0xb0   :  { %255 = vst.msk [vmem:[#allocation3] sm:$0xf] %vm254_vm3, %v207_v36  ;;  %v1796_v40 = vor.u32 %v2047_v37, %v1795_v29 }
  0xb1   :  { %v211_v47 = vpop.permute.xlu2 %210  ;;  %v2062_v41 = vld [vmem:[#allocation3 + $0x128] sm:$0xf0] }
  0xb2   :  { %1388 = vmatmul.bf16.vlgmr.msra.gmra.mxu2 %v1796_v40  ;;  %257 = vst.msk [vmem:[#allocation3 + $0x28] sm:$0xf] %vm254_vm3, %v211_v47  ;;  %1512 = vmatpush.bf16.msrb.mxu3 %v2091_v57  ;;  %v2029_v57 = vld [vmem:[#allocation3 + $0x20] sm:$0xf0] }
  0xb3   :  { %710 = vrot.lane.b32.xlu1 %v2285_v32, %s2169_s15 }
  0xb5   :  { %v209_v56 = vpop.permute.xlu1 %208  ;;  %v2057_v32 = vld [vmem:[#allocation3 + $0x100] sm:$0xf0]  ;;  %389 = vrot.lane.b32.xlu0 %v2427_v34, %s2169_s15  ;;  %v2075_v34 = vld [vmem:[%s2882_s1 + $0x50] sm:$0xff] }
  0xb6   :  { %256 = vst.msk [vmem:[#allocation3 + $0x14] sm:$0xf] %vm254_vm3, %v209_v56  ;;  %v1836_v60 = vor.u32 %v2057_v32, %v1835_v53  ;;  %1414 = vmatpush.bf16.msrb.mxu1 %v2075_v34  ;;  %v757_v53 = vld [vmem:[#allocation2 + $0x72] sm:$0xff]  ;;  %v293_v56 = vpack.c.bf16 %v277_v52, %v277_v52 }
  0xb7   :  { %v229_v61 = vpop.permute.xlu0 %228  ;;  %387 = vrot.lane.b32.xlu2 %v2477_v63, %s2169_s15  ;;  %v2090_v63 = vld [vmem:[%s2882_s1 + $0xc8] sm:$0xff]  ;;  %v1715_v8 = vld [vmem:[#allocation3] sm:$0xf]  ;;  %v1731_v32 = vld [vmem:[#allocation3 + $0x10] sm:$0xf]  ;;  %v773_v58 = vpack.c.bf16 %v757_v53, %v757_v53 }
  0xb8   :  { %1398 = vmatmul.bf16.vlgmr.msra.gmra.mxu3 %v1836_v60  ;;  %266 = vst.msk [vmem:[#allocation3 + $0xdc] sm:$0xf] %vm254_vm3, %v229_v61 }
  0xb9   :  { %v530_v2 = vpop.permute.xlu2 %529  ;;  %1513 = vmatpush.bf16.msrb.mxu3 %v2090_v63  ;;  %v1735_v33 = vld [vmem:[#allocation3 + $0x28] sm:$0xf]  ;;  %309 = vst.msk [vmem:[#allocation3 + $0x7c] sm:$0xf] %vm141_vm2, %v293_v56 }
  0xba   :  { %576 = vst.msk [vmem:[#allocation3 + $0x1c] sm:$0xf] %vm254_vm3, %v530_v2  ;;  %1415 = vmatpush.bf16.msrb.mxu1 %v2074_v3  ;;  %v599_v3 = vld [vmem:[#allocation2 + $0x90] sm:$0xff] }
  0xbb   :  { %551 = vrot.lane.b32.xlu1 %v507_v62, %s2169_s15  ;;  %788 = vst.msk [vmem:[#allocation3 + $0x60] sm:$0xf] %vm141_vm2, %v293_v56 }
  0xbc   :  { %789 = vst.msk [vmem:[#allocation3 + $0x74] sm:$0xf] %vm141_vm2, %v773_v58 }
  0xbd   :  { %v235_v7 = vpop.permute.xlu1 %234  ;;  %712 = vrot.lane.b32.xlu0 %v2308_v45, %s2169_s15  ;;  %v2027_v42 = vld [vmem:[#allocation3 + $0x10] sm:$0xf0]  ;;  %v2073_v45 = vld [vmem:[%s2882_s1 + $0x40] sm:$0xff]  ;;  %1514 = vmatpush.bf16.msrb.mxu3 %v2089_v9  ;;  %310 = vst.msk [vmem:[#allocation3 + $0x90] sm:$0xf] %vm141_vm2, %v773_v58 }
  0xbe   :  { %269 = vst.msk [vmem:[#allocation3 + $0x118] sm:$0xf] %vm254_vm3, %v235_v7  ;;  %v1716_v10 = vor.u32 %v2027_v42, %v1715_v8  ;;  %1416 = vmatpush.bf16.msrb.mxu1 %v2073_v45  ;;  %v615_v7 = vpack.c.bf16 %v599_v3, %v599_v3 }
  0xbf   :  { %v219_v11 = vpop.permute.xlu0 %218  ;;  %v2052_v12 = vld [vmem:[#allocation3 + $0xd8] sm:$0xf0]  ;;  %553 = vrot.lane.b32.xlu2 %v508_v50, %s2169_s15 }
  0xc0   :  { %1368 = vmatmul.bf16.vlgmr.msra.gmra.mxu0 %v1716_v10  ;;  %261 = vst.msk [vmem:[#allocation3 + $0x78] sm:$0xf] %vm254_vm3, %v219_v11  ;;  %v1816_v13 = vor.u32 %v2052_v12, %v1815_v6  ;;  %v440_v11 = vld [vmem:[#allocation2 + $0xc1] sm:$0xff]  ;;  %v439_v12 = vld [vmem:[#allocation2 + $0xb1] sm:$0xff] }
  0xc1   :  { %v368_v16 = vpop.permute.xlu2 %367  ;;  %631 = vst.msk [vmem:[#allocation3 + $0x98] sm:$0xf] %vm141_vm2, %v615_v7  ;;  %v456_v14 = vpack.c.bf16 %v440_v11, %v440_v11  ;;  %v455_v15 = vpack.c.bf16 %v439_v12, %v439_v12  ;;  %v763_v12 = vld [vmem:[#allocation2 + $0xf2] sm:$0xff] }
  0xc2   :  { %1393 = vmatmul.bf16.gmra.mxu2 %v1816_v13  ;;  %415 = vst.msk [vmem:[#allocation3 + $0x4] sm:$0xf] %vm254_vm3, %v368_v16  ;;  %v758_v13 = vld [vmem:[#allocation2 + $0x82] sm:$0xff]  ;;  %v759_v16 = vld [vmem:[#allocation2 + $0x92] sm:$0xff] }
  0xc3   :  { %714 = vrot.lane.b32.xlu1 %v2316_v48, %s2169_s15  ;;  %v436_v48 = vld [vmem:[#allocation2 + $0x61] sm:$0xff]  ;;  %472 = vst.msk [vmem:[#allocation3 + $0xbc] sm:$0xf] %vm141_vm2, %v456_v14  ;;  %v2039_v51 = vld [vmem:[#allocation3 + $0x70] sm:$0xf0] }
  0xc4   :  { %v452_v25 = vpack.c.bf16 %v436_v48, %v436_v48  ;;  %471 = vst.msk [vmem:[#allocation3 + $0xa8] sm:$0xf] %vm141_vm2, %v455_v15 }
  0xc5   :  { %v221_v18 = vpop.permute.xlu1 %220  ;;  %393 = vrot.lane.b32.xlu0 %v2489_v5, %s2169_s15  ;;  %v1855_v19 = vld [vmem:[#allocation3 + $0x118] sm:$0xf]  ;;  %v771_v5 = vpack.c.bf16 %v755_v28, %v755_v28 }
  0xc6   :  { %262 = vst.msk [vmem:[#allocation3 + $0x8c] sm:$0xf] %vm254_vm3, %v221_v18  ;;  %v1856_v31 = vor.u32 %v2062_v41, %v1855_v19  ;;  %v1751_v41 = vld [vmem:[#allocation3 + $0x38] sm:$0xf]  ;;  %v775_v19 = vpack.c.bf16 %v759_v16, %v759_v16 }
  0xc7   :  { %v213_v20 = vpop.permute.xlu0 %212  ;;  %391 = vrot.lane.b32.xlu2 %v2447_v49, %s2169_s15  ;;  %468 = vst.msk [vmem:[#allocation3 + $0x6c] sm:$0xf] %vm141_vm2, %v452_v25  ;;  %v655_v49 = vld [vmem:[#allocation2 + $0x131] sm:$0xff] }
  0xc8   :  { %1403 = vmatmul.bf16.gmra.mxu3 %v1856_v31  ;;  %258 = vst.msk [vmem:[#allocation3 + $0x3c] sm:$0xf] %vm254_vm3, %v213_v20  ;;  %v1775_v35 = vld [vmem:[#allocation3 + $0x78] sm:$0xf] }
  0xc9   :  { %v534_v24 = vpop.permute.xlu2 %533  ;;  %787 = vst.msk [vmem:[#allocation3 + $0x4c] sm:$0xf] %vm141_vm2, %v771_v5  ;;  %v2025_v59 = vld [vmem:[#allocation3 + $0x4] sm:$0xf] }
  0xca   :  { %578 = vst.msk [vmem:[#allocation3 + $0x44] sm:$0xf] %vm254_vm3, %v534_v24 }
  0xcb   :  { %555 = vrot.lane.b32.xlu1 %v2542_v26, %s2169_s15  ;;  %v671_v26 = vpack.c.bf16 %v655_v49, %v655_v49  ;;  %308 = vst.msk [vmem:[#allocation3 + $0x68] sm:$0xf] %vm141_vm2, %v771_v5  ;;  %v295_v49 = vpack.c.bf16 %v279_v30, %v279_v30 }
  0xcc   :  { %791 = vst.msk [vmem:[#allocation3 + $0x9c] sm:$0xf] %vm141_vm2, %v775_v19 }
  0xcd   :  { %v528_v29 = vpop.permute.xlu1 %527  ;;  %716 = vrot.lane.b32.xlu0 %v2563_v38, %s2169_s15  ;;  %v2042_v36 = vld [vmem:[#allocation3 + $0x88] sm:$0xf0]  ;;  %v2028_v38 = vld [vmem:[#allocation3 + $0x18] sm:$0xf0]  ;;  %311 = vst.msk [vmem:[#allocation3 + $0xa4] sm:$0xf] %vm141_vm2, %v295_v49 }
  0xce   :  { %575 = vst.msk [vmem:[#allocation3 + $0x8] sm:$0xf] %vm254_vm3, %v528_v29  ;;  %v1776_v37 = vor.u32 %v2042_v36, %v1775_v35 }
  0xcf   :  { %v689_v39 = vpop.permute.xlu0 %688  ;;  %v2032_v23 = vld [vmem:[#allocation3 + $0x38] sm:$0xf0]  ;;  %557 = vrot.lane.b32.xlu2 %v510_v17, %s2169_s15  ;;  %v774_v17 = vpack.c.bf16 %v758_v13, %v758_v13  ;;  %v779_v13 = vpack.c.bf16 %v763_v12, %v763_v12 }
  0xd0   :  { %1383 = vmatmul.bf16.gmra.mxu1 %v1776_v37  ;;  %736 = vst.msk [vmem:[#allocation3 + $0xc] sm:$0xf] %vm254_vm3, %v689_v39  ;;  %v1736_v40 = vor.u32 %v2032_v23, %v1735_v33  ;;  %v2034_v18 = vld [vmem:[#allocation3 + $0x48] sm:$0xf0]  ;;  %v280_v39 = vld [vmem:[#allocation2 + $0xb2] sm:$0xff]  ;;  %v442_v23 = vld [vmem:[#allocation2 + $0xe1] sm:$0xff] }
  0xd1   :  { %v372_v43 = vpop.permute.xlu2 %371  ;;  %v2033_v6 = vld [vmem:[#allocation3 + $0x40] sm:$0xf0]  ;;  %790 = vst.msk [vmem:[#allocation3 + $0x88] sm:$0xf] %vm141_vm2, %v774_v17  ;;  %v1752_v24 = vor.u32 %v2034_v18, %v1751_v41 }
  0xd2   :  { %1373 = vmatmul.bf16.gmra.mxu0 %v1736_v40  ;;  %417 = vst.msk [vmem:[#allocation3 + $0x2c] sm:$0xf] %vm254_vm3, %v372_v43  ;;  %v441_v40 = vld [vmem:[#allocation2 + $0xd1] sm:$0xff]  ;;  %v760_v43 = vld [vmem:[#allocation2 + $0xc2] sm:$0xff] }
  0xd3   :  { %718 = vrot.lane.b32.xlu1 %v671_v26, %s2169_s15  ;;  %v296_v26 = vpack.c.bf16 %v280_v39, %v280_v39  ;;  %v776_v52 = vpack.c.bf16 %v760_v43, %v760_v43  ;;  %v2044_v14 = vld [vmem:[#allocation3 + $0x98] sm:$0xf0]  ;;  %795 = vst.msk [vmem:[#allocation3 + $0xec] sm:$0xf] %vm141_vm2, %v779_v13 }
  0xd4   :  { %316 = vst.msk [vmem:[#allocation3 + $0x108] sm:$0xf] %vm141_vm2, %v779_v13  ;;  %v1851_v13 = vld [vmem:[#allocation3 + $0x100] sm:$0xf] }
  0xd5   :  { %v691_v44 = vpop.permute.xlu1 %690  ;;  %397 = vrot.lane.b32.xlu0 %v2600_v0, %s2169_s15  ;;  %v1723_v46 = vld [vmem:[#allocation3 + $0x8] sm:$0xf]  ;;  %v1732_v0 = vor.u32 %v2029_v57, %v1731_v32  ;;  %312 = vst.msk [vmem:[#allocation3 + $0xb8] sm:$0xf] %vm141_vm2, %v296_v26 }
  0xd6   :  { %737 = vst.msk [vmem:[#allocation3 + $0x20] sm:$0xf] %vm254_vm3, %v691_v44  ;;  %v1724_v47 = vor.u32 %v2028_v38, %v1723_v46  ;;  %v458_v44 = vpack.c.bf16 %v442_v23, %v442_v23  ;;  %v457_v46 = vpack.c.bf16 %v441_v40, %v441_v40 }
  0xd7   :  { %v370_v50 = vpop.permute.xlu0 %369  ;;  %395 = vrot.lane.b32.xlu2 %v2487_v4, %s2169_s15  ;;  %v2026_v60 = vld [vmem:[#allocation3 + $0xc] sm:$0xf]  ;;  %792 = vst.msk [vmem:[#allocation3 + $0xb0] sm:$0xf] %vm141_vm2, %v776_v52 }
  0xd8   :  { %1466 = vmatmul.bf16.vlgmr.msrb.gmra.mxu2 %v1724_v47  ;;  %416 = vst.msk [vmem:[#allocation3 + $0x18] sm:$0xf] %vm254_vm3, %v370_v50  ;;  %v761_v47 = vld [vmem:[#allocation2 + $0xd2] sm:$0xff]  ;;  %v1771_v50 = vld [vmem:[#allocation3 + $0x60] sm:$0xf] }
  0xd9   :  { %v538_v54 = vpop.permute.xlu2 %537  ;;  %v2030_v31 = vld [vmem:[#allocation3 + $0x2c] sm:$0xf]  ;;  %474 = vst.msk [vmem:[#allocation3 + $0xe4] sm:$0xf] %vm141_vm2, %v458_v44  ;;  %v777_v32 = vpack.c.bf16 %v761_v47, %v761_v47  ;;  %v1772_v58 = vor.u32 %v2039_v51, %v1771_v50  ;;  %v607_v50 = vld [vmem:[#allocation2 + $0x130] sm:$0xff] }
  0xda   :  { %580 = vst.msk [vmem:[#allocation3 + $0x6c] sm:$0xf] %vm254_vm3, %v538_v54  ;;  %v623_v52 = vpack.c.bf16 %v607_v50, %v607_v50 }
  0xdb   :  { %473 = vst.msk [vmem:[#allocation3 + $0xd0] sm:$0xf] %vm141_vm2, %v457_v46 }
  0xdc   :  { %793 = vst.msk [vmem:[#allocation3 + $0xc4] sm:$0xf] %vm141_vm2, %v777_v32 }
  0xdd   :  { %v532_v4 = vpop.permute.xlu1 %531  ;;  %v1725_v61 = vld [vmem:[#allocation3 + $0x1c] sm:$0xf0]  ;;  %314 = vst.msk [vmem:[#allocation3 + $0xe0] sm:$0xf] %vm141_vm2, %v777_v32  ;;  %v767_v32 = vld [vmem:[#allocation2 + $0x132] sm:$0xff] }
  0xde   :  { %577 = vst.msk [vmem:[#allocation3 + $0x30] sm:$0xf] %vm254_vm3, %v532_v4  ;;  %v1728_v62 = vor.u32 %v2026_v60, %v1725_v61  ;;  %v602_v60 = vld [vmem:[#allocation2 + $0xe0] sm:$0xff] }
  0xdf   :  { %v693_v34 = vpop.permute.xlu0 %692  ;;  %v1717_v1 = vld [vmem:[#allocation3 + $0x14] sm:$0xf0]  ;;  %639 = vst.msk [vmem:[#allocation3 + $0x138] sm:$0xf] %vm141_vm2, %v623_v52 }
  0xe0   :  { %1515 = vmatmul.bf16.vlgmr.msrb.gmra.mxu3 %v1728_v62  ;;  %738 = vst.msk [vmem:[#allocation3 + $0x34] sm:$0xf] %vm254_vm3, %v693_v34  ;;  %v1720_v2 = vor.u32 %v2025_v59, %v1717_v1  ;;  %v618_v62 = vpack.c.bf16 %v602_v60, %v602_v60  ;;  %v603_v34 = vld [vmem:[#allocation2 + $0xf0] sm:$0xff] }
  0xe1   :  { %v376_v63 = vpop.permute.xlu2 %375  ;;  %v2038_v33 = vld [vmem:[#allocation3 + $0x68] sm:$0xf0] }
  0xe2   :  { %1417 = vmatmul.bf16.vlgmr.msrb.gmra.mxu1 %v1720_v2  ;;  %2017 = vmatmul.msk.bf16.vlgmr.msrb.gmra.mxu0 %vm18_vm0, %v1732_v0  ;;  %419 = vst.msk [vmem:[#allocation3 + $0x54] sm:$0xf] %vm254_vm3, %v376_v63  ;;  %v619_v2 = vpack.c.bf16 %v603_v34, %v603_v34 }
  0xe3   :  { %634 = vst.msk [vmem:[#allocation3 + $0xd4] sm:$0xf] %vm141_vm2, %v618_v62 }
  0xe4   :  { %635 = vst.msk [vmem:[#allocation3 + $0xe8] sm:$0xf] %vm141_vm2, %v619_v2 }
  0xe5   :  { %v695_v8 = vpop.permute.xlu1 %694  ;;  %v1743_v42 = vld [vmem:[#allocation3 + $0x30] sm:$0xf] }
  0xe6   :  { %739 = vst.msk [vmem:[#allocation3 + $0x48] sm:$0xf] %vm254_vm3, %v695_v8  ;;  %v1744_v9 = vor.u32 %v2033_v6, %v1743_v42  ;;  %v444_v8 = vld [vmem:[#allocation2 + $0x101] sm:$0xff]  ;;  %v443_v42 = vld [vmem:[#allocation2 + $0xf1] sm:$0xff] }
  0xe7   :  { %v374_v10 = vpop.permute.xlu0 %373  ;;  %v2031_v48 = vld [vmem:[#allocation3 + $0x34] sm:$0xf]  ;;  %v459_v11 = vpack.c.bf16 %v443_v42, %v443_v42 }
  0xe8   :  { %1471 = vmatmul.bf16.gmra.mxu2 %v1744_v9  ;;  %418 = vst.msk [vmem:[#allocation3 + $0x40] sm:$0xf] %vm254_vm3, %v374_v10  ;;  %v460_v10 = vpack.c.bf16 %v444_v8, %v444_v8 }
  0xe9   :  { %v542_v45 = vpop.permute.xlu2 %541  ;;  %v2035_v53 = vld [vmem:[#allocation3 + $0x54] sm:$0xf]  ;;  %475 = vst.msk [vmem:[#allocation3 + $0xf8] sm:$0xf] %vm141_vm2, %v459_v11 }
  0xea   :  { %582 = vst.msk [vmem:[#allocation3 + $0x94] sm:$0xf] %vm254_vm3, %v542_v45  ;;  %v1791_v45 = vld [vmem:[#allocation3 + $0x88] sm:$0xf] }
  0xeb   :  { %476 = vst.msk [vmem:[#allocation3 + $0x10c] sm:$0xf] %vm141_vm2, %v460_v10  ;;  %v1792_v19 = vor.u32 %v2044_v14, %v1791_v45  ;;  %v2059_v45 = vld [vmem:[#allocation3 + $0x110] sm:$0xf0] }
  0xed   :  { %v536_v20 = vpop.permute.xlu1 %535  ;;  %v1745_v21 = vld [vmem:[#allocation3 + $0x44] sm:$0xf0] }
  0xee   :  { %579 = vst.msk [vmem:[#allocation3 + $0x58] sm:$0xf] %vm254_vm3, %v536_v20  ;;  %v1748_v22 = vor.u32 %v2031_v48, %v1745_v21 }
  0xef   :  { %v697_v25 = vpop.permute.xlu0 %696  ;;  %v1737_v27 = vld [vmem:[#allocation3 + $0x3c] sm:$0xf0] }
  0xf0   :  { %1520 = vmatmul.bf16.gmra.mxu3 %v1748_v22  ;;  %740 = vst.msk [vmem:[#allocation3 + $0x5c] sm:$0xf] %vm254_vm3, %v697_v25  ;;  %v1740_v28 = vor.u32 %v2030_v31, %v1737_v27  ;;  %v605_v22 = vld [vmem:[#allocation2 + $0x110] sm:$0xff] }
  0xf1   :  { %v380_v5 = vpop.permute.xlu2 %379  ;;  %v2043_v1 = vld [vmem:[#allocation3 + $0x90] sm:$0xf0]  ;;  %v621_v25 = vpack.c.bf16 %v605_v22, %v605_v22 }
  0xf2   :  { %1422 = vmatmul.bf16.gmra.mxu1 %v1740_v28  ;;  %2018 = vmatmul.msk.bf16.gmra.mxu0 %vm18_vm0, %v1752_v24  ;;  %421 = vst.msk [vmem:[#allocation3 + $0x7c] sm:$0xf] %vm254_vm3, %v380_v5 }
  0xf3   :  { %637 = vst.msk [vmem:[#allocation3 + $0x110] sm:$0xf] %vm141_vm2, %v621_v25 }
  0xf5   :  { %v699_v29 = vpop.permute.xlu1 %698  ;;  %v1763_v35 = vld [vmem:[#allocation3 + $0x58] sm:$0xf] }
  0xf6   :  { %741 = vst.msk [vmem:[#allocation3 + $0x70] sm:$0xf] %vm254_vm3, %v699_v29  ;;  %v1764_v36 = vor.u32 %v2038_v33, %v1763_v35  ;;  %v445_v33 = vld [vmem:[#allocation2 + $0x111] sm:$0xff]  ;;  %v2049_v35 = vld [vmem:[#allocation3 + $0xc0] sm:$0xf0] }
  0xf7   :  { %v378_v37 = vpop.permute.xlu0 %377  ;;  %v2036_v55 = vld [vmem:[#allocation3 + $0x5c] sm:$0xf]  ;;  %v1811_v29 = vld [vmem:[#allocation3 + $0xb0] sm:$0xf] }
  0xf8   :  { %1476 = vmatmul.bf16.gmra.mxu2 %v1764_v36  ;;  %420 = vst.msk [vmem:[#allocation3 + $0x68] sm:$0xf] %vm254_vm3, %v378_v37  ;;  %v461_v36 = vpack.c.bf16 %v445_v33, %v445_v33  ;;  %v1812_v43 = vor.u32 %v2049_v35, %v1811_v29  ;;  %v1871_v35 = vld [vmem:[#allocation3 + $0x128] sm:$0xf] }
  0xf9   :  { %v546_v38 = vpop.permute.xlu2 %545  ;;  %v2040_v15 = vld [vmem:[#allocation3 + $0x7c] sm:$0xf] }
  0xfa   :  { %584 = vst.msk [vmem:[#allocation3 + $0xbc] sm:$0xf] %vm254_vm3, %v546_v38 }
  0xfb   :  { %477 = vst.msk [vmem:[#allocation3 + $0x120] sm:$0xf] %vm141_vm2, %v461_v36 }
  0xfd   :  { %v540_v54 = vpop.permute.xlu1 %539  ;;  %v1765_v56 = vld [vmem:[#allocation3 + $0x6c] sm:$0xf0] }
  0xfe   :  { %581 = vst.msk [vmem:[#allocation3 + $0x80] sm:$0xf] %vm254_vm3, %v540_v54  ;;  %v1768_v57 = vor.u32 %v2036_v55, %v1765_v56 }
  0xff   :  { %v701_v59 = vpop.permute.xlu0 %700  ;;  %v1757_v4 = vld [vmem:[#allocation3 + $0x64] sm:$0xf0] }
 0x100   :  { %1525 = vmatmul.bf16.gmra.mxu3 %v1768_v57  ;;  %742 = vst.msk [vmem:[#allocation3 + $0x84] sm:$0xf] %vm254_vm3, %v701_v59  ;;  %v1760_v61 = vor.u32 %v2035_v53, %v1757_v4  ;;  %v1831_v59 = vld [vmem:[#allocation3 + $0xd8] sm:$0xf]  ;;  %v2054_v4 = vld [vmem:[#allocation3 + $0xe8] sm:$0xf0] }
 0x101   :  { %v384_v0 = vpop.permute.xlu2 %383  ;;  %v2048_v24 = vld [vmem:[#allocation3 + $0xb8] sm:$0xf0] }
 0x102   :  { %1427 = vmatmul.bf16.gmra.mxu1 %v1760_v61  ;;  %2019 = vmatmul.msk.bf16.gmra.mxu0 %vm18_vm0, %v1772_v58  ;;  %423 = vst.msk [vmem:[#allocation3 + $0xa4] sm:$0xf] %vm254_vm3, %v384_v0  ;;  %v783_v58 = vpack.c.bf16 %v767_v32, %v767_v32 }
 0x104   :  { %799 = vst.msk [vmem:[#allocation3 + $0x13c] sm:$0xf] %vm141_vm2, %v783_v58 }
 0x105   :  { %v703_v63 = vpop.permute.xlu1 %702  ;;  %v1783_v3 = vld [vmem:[#allocation3 + $0x80] sm:$0xf] }
 0x106   :  { %743 = vst.msk [vmem:[#allocation3 + $0x98] sm:$0xf] %vm254_vm3, %v703_v63  ;;  %v1784_v6 = vor.u32 %v2043_v1, %v1783_v3  ;;  %v1832_v1 = vor.u32 %v2054_v4, %v1831_v59 }
 0x107   :  { %v382_v7 = vpop.permute.xlu0 %381  ;;  %v2041_v17 = vld [vmem:[#allocation3 + $0x84] sm:$0xf] }
 0x108   :  { %1481 = vmatmul.bf16.gmra.mxu2 %v1784_v6  ;;  %422 = vst.msk [vmem:[#allocation3 + $0x90] sm:$0xf] %vm254_vm3, %v382_v7 }
 0x109   :  { %v550_v9 = vpop.permute.xlu2 %549  ;;  %v2045_v37 = vld [vmem:[#allocation3 + $0xa4] sm:$0xf] }
 0x10a   :  { %586 = vst.msk [vmem:[#allocation3 + $0xe4] sm:$0xf] %vm254_vm3, %v550_v9 }
 0x10b   :  { %v2064_v36 = vld [vmem:[#allocation3 + $0x138] sm:$0xf0] }
 0x10d   :  { %v544_v16 = vpop.permute.xlu1 %543  ;;  %v1785_v41 = vld [vmem:[#allocation3 + $0x94] sm:$0xf0] }
 0x10e   :  { %583 = vst.msk [vmem:[#allocation3 + $0xa8] sm:$0xf] %vm254_vm3, %v544_v16  ;;  %v1788_v18 = vor.u32 %v2041_v17, %v1785_v41 }
 0x10f   :  { %v705_v31 = vpop.permute.xlu0 %704  ;;  %v1777_v20 = vld [vmem:[#allocation3 + $0x8c] sm:$0xf0] }
 0x110   :  { %1530 = vmatmul.bf16.gmra.mxu3 %v1788_v18  ;;  %744 = vst.msk [vmem:[#allocation3 + $0xac] sm:$0xf] %vm254_vm3, %v705_v31  ;;  %v1780_v48 = vor.u32 %v2040_v15, %v1777_v20  ;;  %v1852_v31 = vor.u32 %v2059_v45, %v1851_v13 }
 0x111   :  { %v388_v21 = vpop.permute.xlu2 %387  ;;  %v2053_v51 = vld [vmem:[#allocation3 + $0xe0] sm:$0xf0] }
 0x112   :  { %1432 = vmatmul.bf16.gmra.mxu1 %v1780_v48  ;;  %2020 = vmatmul.msk.bf16.gmra.mxu0 %vm18_vm0, %v1792_v19  ;;  %425 = vst.msk [vmem:[#allocation3 + $0xcc] sm:$0xf] %vm254_vm3, %v388_v21 }
 0x115   :  { %v707_v27 = vpop.permute.xlu1 %706  ;;  %v1803_v28 = vld [vmem:[#allocation3 + $0xa8] sm:$0xf] }
 0x116   :  { %745 = vst.msk [vmem:[#allocation3 + $0xc0] sm:$0xf] %vm254_vm3, %v707_v27  ;;  %v1804_v30 = vor.u32 %v2048_v24, %v1803_v28 }
 0x117   :  { %v386_v5 = vpop.permute.xlu0 %385  ;;  %v2046_v26 = vld [vmem:[#allocation3 + $0xac] sm:$0xf] }
 0x118   :  { %1486 = vmatmul.bf16.gmra.mxu2 %v1804_v30  ;;  %424 = vst.msk [vmem:[#allocation3 + $0xb8] sm:$0xf] %vm254_vm3, %v386_v5 }
 0x119   :  { %v554_v49 = vpop.permute.xlu2 %553  ;;  %v2050_v0 = vld [vmem:[#allocation3 + $0xcc] sm:$0xf] }
 0x11a   :  { %588 = vst.msk [vmem:[#allocation3 + $0x10c] sm:$0xf] %vm254_vm3, %v554_v49 }
 0x11d   :  { %v548_v39 = vpop.permute.xlu1 %547  ;;  %v1805_v23 = vld [vmem:[#allocation3 + $0xbc] sm:$0xf0] }
 0x11e   :  { %585 = vst.msk [vmem:[#allocation3 + $0xd0] sm:$0xf] %vm254_vm3, %v548_v39  ;;  %v1808_v40 = vor.u32 %v2046_v26, %v1805_v23 }
 0x11f   :  { %v709_v38 = vpop.permute.xlu0 %708  ;;  %v1797_v44 = vld [vmem:[#allocation3 + $0xb4] sm:$0xf0] }
 0x120   :  { %1535 = vmatmul.bf16.gmra.mxu3 %v1808_v40  ;;  %746 = vst.msk [vmem:[#allocation3 + $0xd4] sm:$0xf] %vm254_vm3, %v709_v38  ;;  %v1800_v46 = vor.u32 %v2045_v37, %v1797_v44 }
 0x121   :  { %v392_v47 = vpop.permute.xlu2 %391  ;;  %v2058_v7 = vld [vmem:[#allocation3 + $0x108] sm:$0xf0]  ;;  %v2735_v12 = vpop.f32.mrf.mxu1 }
 0x122   :  { %1437 = vmatmul.bf16.gmra.mxu1 %v1800_v46  ;;  %2021 = vmatmul.msk.bf16.gmra.mxu0 %vm18_vm0, %v1812_v43  ;;  %427 = vst.msk [vmem:[#allocation3 + $0xf4] sm:$0xf] %vm254_vm3, %v392_v47  ;;  %v1872_v43 = vor.u32 %v2064_v36, %v1871_v35 }
 0x125   :  { %v711_v53 = vpop.permute.xlu1 %710  ;;  %v1823_v54 = vld [vmem:[#allocation3 + $0xd0] sm:$0xf] }
 0x126   :  { %747 = vst.msk [vmem:[#allocation3 + $0xe8] sm:$0xf] %vm254_vm3, %v711_v53  ;;  %v1824_v55 = vor.u32 %v2053_v51, %v1823_v54 }
 0x127   :  { %v390_v56 = vpop.permute.xlu0 %389  ;;  %v2051_v61 = vld [vmem:[#allocation3 + $0xd4] sm:$0xf] }
 0x128   :  { %1491 = vmatmul.bf16.gmra.mxu2 %v1824_v55  ;;  %426 = vst.msk [vmem:[#allocation3 + $0xe0] sm:$0xf] %vm254_vm3, %v390_v56 }
 0x129   :  { %v558_v57 = vpop.permute.xlu2 %557  ;;  %v2055_v18 = vld [vmem:[#allocation3 + $0xf4] sm:$0xf]  ;;  %v2744_v25 = vpop.f32.mrf.mxu1 }
 0x12a   :  { %590 = vst.msk [vmem:[#allocation3 + $0x134] sm:$0xf] %vm254_vm3, %v558_v57 }
 0x12d   :  { %v552_v60 = vpop.permute.xlu1 %551  ;;  %v1825_v62 = vld [vmem:[#allocation3 + $0xe4] sm:$0xf0] }
 0x12e   :  { %587 = vst.msk [vmem:[#allocation3 + $0xf8] sm:$0xf] %vm254_vm3, %v552_v60  ;;  %v1828_v34 = vor.u32 %v2051_v61, %v1825_v62  ;;  %v2766_v60 = vld [vmem:[%s2883_s2] ss:$0 sm:$0xff] }
 0x12f   :  { %v713_v2 = vpop.permute.xlu0 %712  ;;  %v1817_v63 = vld [vmem:[#allocation3 + $0xdc] sm:$0xf0] }
 0x130   :  { %1540 = vmatmul.bf16.gmra.mxu3 %v1828_v34  ;;  %748 = vst.msk [vmem:[#allocation3 + $0xfc] sm:$0xf] %vm254_vm3, %v713_v2  ;;  %v1820_v3 = vor.u32 %v2050_v0, %v1817_v63  ;;  %v2771_v62 = vld [vmem:[%s2884_s3] ss:$0 sm:$0xff] }
 0x131   :  { %v396_v6 = vpop.permute.xlu2 %395  ;;  %v2063_v24 = vld [vmem:[#allocation3 + $0x130] sm:$0xf0] }
 0x132   :  { %1442 = vmatmul.bf16.gmra.mxu1 %v1820_v3  ;;  %2022 = vmatmul.msk.bf16.gmra.mxu0 %vm18_vm0, %v1832_v1  ;;  %429 = vst.msk [vmem:[#allocation3 + $0x11c] sm:$0xf] %vm254_vm3, %v396_v6 }
 0x135   :  { %v715_v8 = vpop.permute.xlu1 %714  ;;  %v2731_v42 = vpop.f32.mrf.mxu2  ;;  %v1843_v9 = vld [vmem:[#allocation3 + $0xf8] sm:$0xf] }
 0x136   :  { %749 = vst.msk [vmem:[#allocation3 + $0x110] sm:$0xf] %vm254_vm3, %v715_v8  ;;  %v1844_v10 = vor.u32 %v2058_v7, %v1843_v9 }
 0x137   :  { %v394_v11 = vpop.permute.xlu0 %393  ;;  %v2056_v17 = vld [vmem:[#allocation3 + $0xfc] sm:$0xf] }
 0x138   :  { %1496 = vmatmul.bf16.gmra.mxu2 %v1844_v10  ;;  %428 = vst.msk [vmem:[#allocation3 + $0x108] sm:$0xf] %vm254_vm3, %v394_v11 }
 0x139   :  { %v2060_v23 = vld [vmem:[#allocation3 + $0x11c] sm:$0xf] }
 0x13b   :  { %v2737_v14 = vpop.f32.mrf.mxu3 }
 0x13d   :  { %v556_v15 = vpop.permute.xlu1 %555  ;;  %v1369_v16 = vpop.f32.mrf.mxu0  ;;  %v1845_v41 = vld [vmem:[#allocation3 + $0x10c] sm:$0xf0] }
 0x13e   :  { %589 = vst.msk [vmem:[#allocation3 + $0x120] sm:$0xf] %vm254_vm3, %v556_v15  ;;  %v1848_v19 = vor.u32 %v2056_v17, %v1845_v41  ;;  %v2740_v20 = vpop.f32.mrf.mxu2 }
 0x13f   :  { %v717_v48 = vpop.permute.xlu0 %716  ;;  %v1837_v21 = vld [vmem:[#allocation3 + $0x104] sm:$0xf0] }
 0x140   :  { %1545 = vmatmul.bf16.gmra.mxu3 %v1848_v19  ;;  %750 = vst.msk [vmem:[#allocation3 + $0x124] sm:$0xf] %vm254_vm3, %v717_v48  ;;  %v1840_v22 = vor.u32 %v2055_v18, %v1837_v21 }
 0x142   :  { %1447 = vmatmul.bf16.gmra.mxu1 %v1840_v22  ;;  %2023 = vmatmul.msk.bf16.gmra.mxu0 %vm18_vm0, %v1852_v31 }
 0x143   :  { %v2746_v30 = vpop.f32.mrf.mxu3 }
 0x145   :  { %v719_v27 = vpop.permute.xlu1 %718  ;;  %v1863_v28 = vld [vmem:[#allocation3 + $0x120] sm:$0xf]  ;;  %v1371_v49 = vpop.f32.mrf.mxu0 }
 0x146   :  { %751 = vst.msk [vmem:[#allocation3 + $0x138] sm:$0xf] %vm254_vm3, %v719_v27  ;;  %v1864_v5 = vor.u32 %v2063_v24, %v1863_v28  ;;  %v2750_v29 = vpop.f32.mrf.mxu2 }
 0x147   :  { %v398_v33 = vpop.permute.xlu0 %397  ;;  %v2061_v39 = vld [vmem:[#allocation3 + $0x124] sm:$0xf] }
 0x148   :  { %1501 = vmatmul.bf16.gmra.mxu2 %v1864_v5  ;;  %430 = vst.msk [vmem:[#allocation3 + $0x130] sm:$0xf] %vm254_vm3, %v398_v33 }
 0x14b   :  { %v2754_v47 = vpop.f32.mrf.mxu3 }
 0x14d   :  { %v2752_v37 = vpop.f32.mrf.mxu1  ;;  %v1865_v26 = vld [vmem:[#allocation3 + $0x134] sm:$0xf0] }
 0x14e   :  { %v1868_v40 = vor.u32 %v2061_v39, %v1865_v26  ;;  %v2757_v50 = vpop.f32.mrf.mxu2 }
 0x14f   :  { %v1374_v38 = vpop.f32.mrf.mxu0  ;;  %v1857_v44 = vld [vmem:[#allocation3 + $0x12c] sm:$0xf0] }
 0x150   :  { %1550 = vmatmul.bf16.gmra.mxu3 %v1868_v40  ;;  %v1860_v46 = vor.u32 %v2060_v23, %v1857_v44 }
 0x152   :  { %1452 = vmatmul.bf16.gmra.mxu1 %v1860_v46  ;;  %2024 = vmatmul.msk.bf16.gmra.mxu0 %vm18_vm0, %v1872_v43 }
 0x153   :  { %v2761_v53 = vpop.f32.mrf.mxu3 }
 0x155   :  { %v2759_v51 = vpop.f32.mrf.mxu1 }
 0x157   :  { %v1376_v52 = vpop.f32.mrf.mxu0 }
 0x15b   :  { %v1467_v54 = vpop.f32.mrf.mxu2 }
 0x15f   :  { %v1418_v55 = vpop.f32.mrf.mxu1  ;;  %v1565_v56 = vpop.f32.mrf.mxu0 }
 0x160   :  { %v1419_v32 = vadd.f32 %v1418_v55, %v1369_v16 }
 0x162   :  { %v1468_v57 = vadd.f32 %v1467_v54, %v1419_v32 }
 0x163   :  { %v1469_v58 = vpop.f32.mrf.mxu2  ;;  %v1516_v59 = vpop.f32.mrf.mxu3 }
 0x164   :  { %v1517_v4 = vadd.f32 %v1516_v59, %v1468_v57 }
 0x166   :  { %v1566_v61 = vadd.f32 %v1565_v56, %v1517_v4 }
 0x167   :  { %v1420_v0 = vpop.f32.mrf.mxu1  ;;  %v1567_v34 = vpop.f32.mrf.mxu0 }
 0x168   :  { %v1609_v1 = vmul.f32 %v2766_v60, %v1566_v61  ;;  %v1421_v2 = vadd.f32 %v1420_v0, %v1371_v49 }
 0x16a   :  { %v1629_v63 = vadd.f32 %v2771_v62, %v1609_v1  ;;  %v1470_v3 = vadd.f32 %v1469_v58, %v1421_v2 }
 0x16b   :  { %v1472_v6 = vpop.f32.mrf.mxu2  ;;  %v1518_v7 = vpop.f32.mrf.mxu3 }
 0x16c   :  { %v1645_v8 = vmul.f32 0.1, %v1629_v63  ;;  %v1519_v9 = vadd.f32 %v1518_v7, %v1470_v3 }
 0x16e   :  { %v1661_v10 = vmax.f32 %v1629_v63, %v1645_v8  ;;  %v1568_v11 = vadd.f32 %v1567_v34, %v1519_v9 }
 0x16f   :  { %v1423_v13 = vpop.f32.mrf.mxu1  ;;  %v1570_v45 = vpop.f32.mrf.mxu0 }
 0x170   :  { %v1677_v15 = vpack.c.bf16 %v1661_v10, %v1661_v10  ;;  %v1610_v16 = vmul.f32 %v2766_v60, %v1568_v11  ;;  %v1424_v17 = vadd.f32 %v1423_v13, %v1374_v38 }
 0x172   :  { %1693 = vst.msk [vmem:[%s2885_s4] sm:$0xf] %vm141_vm2, %v1677_v15  ;;  %v1630_v41 = vadd.f32 %v2771_v62, %v1610_v16  ;;  %v1473_v18 = vadd.f32 %v1472_v6, %v1424_v17 }
 0x173   :  { %v1474_v19 = vpop.f32.mrf.mxu2  ;;  %v1521_v31 = vpop.f32.mrf.mxu3 }
 0x174   :  { %v1646_v48 = vmul.f32 0.1, %v1630_v41  ;;  %v1522_v21 = vadd.f32 %v1521_v31, %v1473_v18 }
 0x176   :  { %v1662_v22 = vmax.f32 %v1630_v41, %v1646_v48  ;;  %v1571_v24 = vadd.f32 %v1570_v45, %v1522_v21 }
 0x177   :  { %v1425_v27 = vpop.f32.mrf.mxu1  ;;  %v1572_v28 = vpop.f32.mrf.mxu0 }
 0x178   :  { %v1678_v5 = vpack.c.bf16 %v1662_v22, %v1662_v22  ;;  %v1611_v49 = vmul.f32 %v2766_v60, %v1571_v24  ;;  %v1426_v33 = vadd.f32 %v1425_v27, %v1376_v52 }
 0x17a   :  { %1694 = vst.msk [vmem:[%s2885_s4 + $0x4] sm:$0xf] %vm141_vm2, %v1678_v5  ;;  %v1631_v35 = vadd.f32 %v2771_v62, %v1611_v49  ;;  %v1475_v36 = vadd.f32 %v1474_v19, %v1426_v33 }
 0x17b   :  { %v1477_v39 = vpop.f32.mrf.mxu2  ;;  %v1523_v26 = vpop.f32.mrf.mxu3 }
 0x17c   :  { %v1647_v23 = vmul.f32 0.1, %v1631_v35  ;;  %v1524_v40 = vadd.f32 %v1523_v26, %v1475_v36 }
 0x17e   :  { %v1663_v43 = vmax.f32 %v1631_v35, %v1647_v23  ;;  %v1573_v38 = vadd.f32 %v1572_v28, %v1524_v40 }
 0x17f   :  { %v1428_v44 = vpop.f32.mrf.mxu1  ;;  %v1575_v46 = vpop.f32.mrf.mxu0 }
 0x180   :  { %v1679_v54 = vpack.c.bf16 %v1663_v43, %v1663_v43  ;;  %v1612_v55 = vmul.f32 %v2766_v60, %v1573_v38  ;;  %v1429_v52 = vadd.f32 %v1428_v44, %v2735_v12 }
 0x182   :  { %1695 = vst.msk [vmem:[%s2885_s4 + $0x8] sm:$0xf] %vm141_vm2, %v1679_v54  ;;  %v1632_v56 = vadd.f32 %v2771_v62, %v1612_v55  ;;  %v1478_v32 = vadd.f32 %v1477_v39, %v1429_v52 }
 0x183   :  { %v1479_v57 = vpop.f32.mrf.mxu2  ;;  %v1526_v58 = vpop.f32.mrf.mxu3 }
 0x184   :  { %v1648_v59 = vmul.f32 0.1, %v1632_v56  ;;  %v1527_v4 = vadd.f32 %v1526_v58, %v1478_v32 }
 0x186   :  { %v1664_v61 = vmax.f32 %v1632_v56, %v1648_v59  ;;  %v1576_v0 = vadd.f32 %v1575_v46, %v1527_v4 }
 0x187   :  { %v1430_v34 = vpop.f32.mrf.mxu1  ;;  %v1577_v1 = vpop.f32.mrf.mxu0 }
 0x188   :  { %v1680_v2 = vpack.c.bf16 %v1664_v61, %v1664_v61  ;;  %v1613_v63 = vmul.f32 %v2766_v60, %v1576_v0  ;;  %v1431_v12 = vadd.f32 %v1430_v34, %v2744_v25 }
 0x18a   :  { %1696 = vst.msk [vmem:[%s2885_s4 + $0xc] sm:$0xf] %vm141_vm2, %v1680_v2  ;;  %v1633_v3 = vadd.f32 %v2771_v62, %v1613_v63  ;;  %v1480_v6 = vadd.f32 %v1479_v57, %v1431_v12 }
 0x18b   :  { %v1482_v7 = vpop.f32.mrf.mxu2  ;;  %v1528_v8 = vpop.f32.mrf.mxu3 }
 0x18c   :  { %v1649_v9 = vmul.f32 0.1, %v1633_v3  ;;  %v1529_v10 = vadd.f32 %v1528_v8, %v1480_v6 }
 0x18e   :  { %v1665_v11 = vmax.f32 %v1633_v3, %v1649_v9  ;;  %v1578_v13 = vadd.f32 %v1577_v1, %v1529_v10 }
 0x18f   :  { %v1433_v45 = vpop.f32.mrf.mxu1  ;;  %v1580_v15 = vpop.f32.mrf.mxu0 }
 0x190   :  { %v1681_v16 = vpack.c.bf16 %v1665_v11, %v1665_v11  ;;  %v1614_v17 = vmul.f32 %v2766_v60, %v1578_v13  ;;  %v1434_v25 = vadd.f32 %v1433_v45, %v2752_v37 }
 0x192   :  { %1697 = vst.msk [vmem:[%s2885_s4 + $0x10] sm:$0xf] %vm141_vm2, %v1681_v16  ;;  %v1634_v41 = vadd.f32 %v2771_v62, %v1614_v17  ;;  %v1483_v18 = vadd.f32 %v1482_v7, %v1434_v25 }
 0x193   :  { %v1484_v19 = vpop.f32.mrf.mxu2  ;;  %v1531_v31 = vpop.f32.mrf.mxu3 }
 0x194   :  { %v1650_v48 = vmul.f32 0.1, %v1634_v41  ;;  %v1532_v21 = vadd.f32 %v1531_v31, %v1483_v18 }
 0x196   :  { %v1666_v22 = vmax.f32 %v1634_v41, %v1650_v48  ;;  %v1581_v24 = vadd.f32 %v1580_v15, %v1532_v21 }
 0x197   :  { %v1435_v27 = vpop.f32.mrf.mxu1  ;;  %v1582_v28 = vpop.f32.mrf.mxu0 }
 0x198   :  { %v1682_v5 = vpack.c.bf16 %v1666_v22, %v1666_v22  ;;  %v1615_v49 = vmul.f32 %v2766_v60, %v1581_v24  ;;  %v1436_v37 = vadd.f32 %v1435_v27, %v2759_v51 }
 0x19a   :  { %1698 = vst.msk [vmem:[%s2885_s4 + $0x14] sm:$0xf] %vm141_vm2, %v1682_v5  ;;  %v1635_v33 = vadd.f32 %v2771_v62, %v1615_v49  ;;  %v1485_v35 = vadd.f32 %v1484_v19, %v1436_v37 }
 0x19b   :  { %v1487_v36 = vpop.f32.mrf.mxu2  ;;  %v1533_v39 = vpop.f32.mrf.mxu3 }
 0x19c   :  { %v1651_v26 = vmul.f32 0.1, %v1635_v33  ;;  %v1534_v23 = vadd.f32 %v1533_v39, %v1485_v35 }
 0x19e   :  { %v1667_v40 = vmax.f32 %v1635_v33, %v1651_v26  ;;  %v1583_v43 = vadd.f32 %v1582_v28, %v1534_v23 }
 0x19f   :  { %v1438_v38 = vpop.f32.mrf.mxu1  ;;  %v1585_v44 = vpop.f32.mrf.mxu0 }
 0x1a0   :  { %v1683_v46 = vpack.c.bf16 %v1667_v40, %v1667_v40  ;;  %v1616_v54 = vmul.f32 %v2766_v60, %v1583_v43  ;;  %v1439_v51 = vadd.f32 %v1438_v38, %v2731_v42 }
 0x1a2   :  { %1699 = vst.msk [vmem:[%s2885_s4 + $0x18] sm:$0xf] %vm141_vm2, %v1683_v46  ;;  %v1636_v55 = vadd.f32 %v2771_v62, %v1616_v54  ;;  %v1488_v52 = vadd.f32 %v1487_v36, %v1439_v51 }
 0x1a3   :  { %v1489_v56 = vpop.f32.mrf.mxu2  ;;  %v1536_v32 = vpop.f32.mrf.mxu3 }
 0x1a4   :  { %v1652_v57 = vmul.f32 0.1, %v1636_v55  ;;  %v1537_v58 = vadd.f32 %v1536_v32, %v1488_v52 }
 0x1a6   :  { %v1668_v59 = vmax.f32 %v1636_v55, %v1652_v57  ;;  %v1586_v4 = vadd.f32 %v1585_v44, %v1537_v58 }
 0x1a7   :  { %v1440_v61 = vpop.f32.mrf.mxu1  ;;  %v1587_v0 = vpop.f32.mrf.mxu0 }
 0x1a8   :  { %v1684_v34 = vpack.c.bf16 %v1668_v59, %v1668_v59  ;;  %v1617_v1 = vmul.f32 %v2766_v60, %v1586_v4  ;;  %v1441_v42 = vadd.f32 %v1440_v61, %v2740_v20 }
 0x1aa   :  { %1700 = vst.msk [vmem:[%s2885_s4 + $0x1c] sm:$0xf] %vm141_vm2, %v1684_v34  ;;  %v1637_v2 = vadd.f32 %v2771_v62, %v1617_v1  ;;  %v1490_v63 = vadd.f32 %v1489_v56, %v1441_v42 }
 0x1ab   :  { %v1492_v12 = vpop.f32.mrf.mxu2  ;;  %v1538_v3 = vpop.f32.mrf.mxu3 }
 0x1ac   :  { %v1653_v6 = vmul.f32 0.1, %v1637_v2  ;;  %v1539_v7 = vadd.f32 %v1538_v3, %v1490_v63 }
 0x1ae   :  { %v1669_v8 = vmax.f32 %v1637_v2, %v1653_v6  ;;  %v1588_v9 = vadd.f32 %v1587_v0, %v1539_v7 }
 0x1af   :  { %v1443_v10 = vpop.f32.mrf.mxu1  ;;  %v1590_v11 = vpop.f32.mrf.mxu0 }
 0x1b0   :  { %v1685_v13 = vpack.c.bf16 %v1669_v8, %v1669_v8  ;;  %v1618_v45 = vmul.f32 %v2766_v60, %v1588_v9  ;;  %v1444_v20 = vadd.f32 %v1443_v10, %v2750_v29 }
 0x1b2   :  { %1701 = vst.msk [vmem:[%s2885_s4 + $0x20] sm:$0xf] %vm141_vm2, %v1685_v13  ;;  %v1638_v15 = vadd.f32 %v2771_v62, %v1618_v45  ;;  %v1493_v16 = vadd.f32 %v1492_v12, %v1444_v20 }
 0x1b3   :  { %v1494_v17 = vpop.f32.mrf.mxu2  ;;  %v1541_v25 = vpop.f32.mrf.mxu3 }
 0x1b4   :  { %v1654_v41 = vmul.f32 0.1, %v1638_v15  ;;  %v1542_v18 = vadd.f32 %v1541_v25, %v1493_v16 }
 0x1b6   :  { %v1670_v19 = vmax.f32 %v1638_v15, %v1654_v41  ;;  %v1591_v31 = vadd.f32 %v1590_v11, %v1542_v18 }
 0x1b7   :  { %v1445_v48 = vpop.f32.mrf.mxu1  ;;  %v1592_v21 = vpop.f32.mrf.mxu0 }
 0x1b8   :  { %v1686_v22 = vpack.c.bf16 %v1670_v19, %v1670_v19  ;;  %v1619_v24 = vmul.f32 %v2766_v60, %v1591_v31  ;;  %v1446_v29 = vadd.f32 %v1445_v48, %v2757_v50 }
 0x1ba   :  { %1702 = vst.msk [vmem:[%s2885_s4 + $0x24] sm:$0xf] %vm141_vm2, %v1686_v22  ;;  %v1639_v27 = vadd.f32 %v2771_v62, %v1619_v24  ;;  %v1495_v28 = vadd.f32 %v1494_v17, %v1446_v29 }
 0x1bb   :  { %v1497_v5 = vpop.f32.mrf.mxu2  ;;  %v1543_v49 = vpop.f32.mrf.mxu3 }
 0x1bc   :  { %v1655_v37 = vmul.f32 0.1, %v1639_v27  ;;  %v1544_v33 = vadd.f32 %v1543_v49, %v1495_v28 }
 0x1be   :  { %v1671_v35 = vmax.f32 %v1639_v27, %v1655_v37  ;;  %v1593_v36 = vadd.f32 %v1592_v21, %v1544_v33 }
 0x1bf   :  { %v1448_v39 = vpop.f32.mrf.mxu1  ;;  %v1595_v26 = vpop.f32.mrf.mxu0 }
 0x1c0   :  { %v1687_v23 = vpack.c.bf16 %v1671_v35, %v1671_v35  ;;  %v1620_v40 = vmul.f32 %v2766_v60, %v1593_v36  ;;  %v1449_v50 = vadd.f32 %v1448_v39, %v2737_v14 }
 0x1c2   :  { %1703 = vst.msk [vmem:[%s2885_s4 + $0x28] sm:$0xf] %vm141_vm2, %v1687_v23  ;;  %v1640_v43 = vadd.f32 %v2771_v62, %v1620_v40  ;;  %v1498_v38 = vadd.f32 %v1497_v5, %v1449_v50 }
 0x1c3   :  { %v1546_v44 = vpop.f32.mrf.mxu3  ;;  %v1499_v51 = vpop.f32.mrf.mxu2 }
 0x1c4   :  { %v1656_v46 = vmul.f32 0.1, %v1640_v43  ;;  %v1547_v54 = vadd.f32 %v1546_v44, %v1498_v38 }
 0x1c6   :  { %v1672_v55 = vmax.f32 %v1640_v43, %v1656_v46  ;;  %v1596_v52 = vadd.f32 %v1595_v26, %v1547_v54 }
 0x1c7   :  { %v1450_v56 = vpop.f32.mrf.mxu1  ;;  %v1597_v58 = vpop.f32.mrf.mxu0 }
 0x1c8   :  { %v1688_v32 = vpack.c.bf16 %v1672_v55, %v1672_v55  ;;  %v1621_v57 = vmul.f32 %v2766_v60, %v1596_v52  ;;  %v1451_v14 = vadd.f32 %v1450_v56, %v2746_v30 }
 0x1ca   :  { %1704 = vst.msk [vmem:[%s2885_s4 + $0x2c] sm:$0xf] %vm141_vm2, %v1688_v32  ;;  %v1641_v59 = vadd.f32 %v2771_v62, %v1621_v57  ;;  %v1500_v4 = vadd.f32 %v1499_v51, %v1451_v14 }
 0x1cb   :  { %v1548_v61 = vpop.f32.mrf.mxu3  ;;  %v1502_v2 = vpop.f32.mrf.mxu2 }
 0x1cc   :  { %v1657_v0 = vmul.f32 0.1, %v1641_v59  ;;  %v1549_v34 = vadd.f32 %v1548_v61, %v1500_v4 }
 0x1ce   :  { %v1673_v1 = vmax.f32 %v1641_v59, %v1657_v0  ;;  %v1598_v42 = vadd.f32 %v1597_v58, %v1549_v34 }
 0x1cf   :  { %v1453_v63 = vpop.f32.mrf.mxu1  ;;  %v1600_v8 = vpop.f32.mrf.mxu0 }
 0x1d0   :  { %v1689_v12 = vpack.c.bf16 %v1673_v1, %v1673_v1  ;;  %v1622_v3 = vmul.f32 %v2766_v60, %v1598_v42  ;;  %v1454_v30 = vadd.f32 %v1453_v63, %v2754_v47 }
 0x1d2   :  { %1705 = vst.msk [vmem:[%s2885_s4 + $0x30] sm:$0xf] %vm141_vm2, %v1689_v12  ;;  %v1642_v6 = vadd.f32 %v2771_v62, %v1622_v3  ;;  %v1503_v7 = vadd.f32 %v1502_v2, %v1454_v30 }
 0x1d3   :  { %v1551_v9 = vpop.f32.mrf.mxu3  ;;  %v1504_v17 = vpop.f32.mrf.mxu2 }
 0x1d4   :  { %v1658_v10 = vmul.f32 0.1, %v1642_v6  ;;  %v1552_v11 = vadd.f32 %v1551_v9, %v1503_v7 }
 0x1d6   :  { %v1674_v13 = vmax.f32 %v1642_v6, %v1658_v10  ;;  %v1601_v45 = vadd.f32 %v1600_v8, %v1552_v11 }
 0x1d7   :  { %v1455_v20 = vpop.f32.mrf.mxu1  ;;  %v1602_v48 = vpop.f32.mrf.mxu0 }
 0x1d8   :  { %v1690_v15 = vpack.c.bf16 %v1674_v13, %v1674_v13  ;;  %v1623_v16 = vmul.f32 %v2766_v60, %v1601_v45  ;;  %v1456_v47 = vadd.f32 %v1455_v20, %v2761_v53 }
 0x1da   :  { %1706 = vst.msk [vmem:[%s2885_s4 + $0x34] sm:$0xf] %vm141_vm2, %v1690_v15  ;;  %v1643_v25 = vadd.f32 %v2771_v62, %v1623_v16  ;;  %v1505_v41 = vadd.f32 %v1504_v17, %v1456_v47 }
 0x1db   :  { %v1553_v18 = vpop.f32.mrf.mxu3 }
 0x1dc   :  { %v1659_v19 = vmul.f32 0.1, %v1643_v25  ;;  %v1554_v31 = vadd.f32 %v1553_v18, %v1505_v41 }
 0x1de   :  { %v1675_v21 = vmax.f32 %v1643_v25, %v1659_v19  ;;  %v1603_v22 = vadd.f32 %v1602_v48, %v1554_v31 }
 0x1e0   :  { %v1691_v24 = vpack.c.bf16 %v1675_v21, %v1675_v21  ;;  %v1624_v29 = vmul.f32 %v2766_v60, %v1603_v22 }
 0x1e2   :  { %1707 = vst.msk [vmem:[%s2885_s4 + $0x38] sm:$0xf] %vm141_vm2, %v1691_v24  ;;  %v1644_v53 = vadd.f32 %v2771_v62, %v1624_v29 }
 0x1e4   :  { %v1660_v27 = vmul.f32 0.1, %v1644_v53 }
 0x1e6   :  { %v1676_v28 = vmax.f32 %v1644_v53, %v1660_v27 }
 0x1e8   :  { %v1692_v5 = vpack.c.bf16 %v1676_v28, %v1676_v28 }
 0x1ea   :  { %1708 = vst.msk [vmem:[%s2885_s4 + $0x3c] sm:$0xf] %vm141_vm2, %v1692_v5 }

// kernel: yolo_v1_forward.6
= control target key start
LH: loop header
LB: loop body
LE: loop exit
PB: predicated region body
PF: predicated region fallthrough
CT: control target
= control target key end

     0   :  { %vm18_vm0 = vcmask 523264   ;;  %v4857_v0 = vmov 0.0   ;;  %vm222_vm1 = vcmask 1041408   ;;  %s4858_s15 = smov 64   ;;  %vm20_vm2 = vcmask 517120   ;;  %s7275_s0 = inlined_call_operand.vmem [shape: bf16[2,8,8,64], index: 0, kind: input, shape index: {}]   ;;  %s7276_s1 = inlined_call_operand.vmem [shape: bf16[576,64], index: 1, kind: input, shape index: {}]   ;;  %s7277_s2 = inlined_call_operand.vmem [shape: f32[1,64], index: 2, kind: input, shape index: {}]   ;;  %s7278_s3 = inlined_call_operand.vmem [shape: f32[1,64], index: 3, kind: input, shape index: {}]   ;;  %s7279_s4 = inlined_call_operand.vmem [shape: bf16[2,4,4,64], index: 4, kind: output, shape index: {}]  }
   0x1   :  { %40 = vst.msk [vmem:[#allocation2 + $0xa0] sm:$0xff] %vm18_vm0, %v4857_v0  ;;  %v4682_v7 = vld [vmem:[%s7275_s0 + $0x8] sm:$0xff]   ;;  %v4684_v9 = vld [vmem:[%s7275_s0 + $0x18] sm:$0xff]   ;;  %v4685_v22 = vld [vmem:[%s7275_s0 + $0x20] sm:$0xff]   ;;  %vm163_vm3 = vcmask 516096   ;;  %vm606_vm8 = vcmask 1040896  }
   0x2   :  { %19 = vst.msk [vmem:[#allocation2] sm:$0xff] %vm18_vm0, %v4857_v0  ;;  %v4657_v8 = vunpack.c.h.bf16 %v4682_v7  ;;  %v4665_v10 = vunpack.c.h.bf16 %v4684_v9  ;;  %v4688_v11 = vld [vmem:[%s7275_s0 + $0x38] sm:$0xff]   ;;  %v4656_v13 = vunpack.c.l.bf16 %v4682_v7  ;;  %v4669_v24 = vunpack.c.h.bf16 %v4685_v22  ;;  %v4651_v26 = vld [vmem:[%s7275_s0] sm:$0xff]   ;;  %v4683_v30 = vld [vmem:[%s7275_s0 + $0x10] sm:$0xff]  }
   0x3   :  { %22 = vst.msk [vmem:[#allocation2 + $0x10] sm:$0xff] %vm18_vm0, %v4857_v0  ;;  %v4681_v12 = vunpack.c.h.bf16 %v4688_v11  ;;  %v4668_v25 = vunpack.c.l.bf16 %v4685_v22  ;;  %v4664_v27 = vunpack.c.l.bf16 %v4684_v9  ;;  %v4680_v28 = vunpack.c.l.bf16 %v4688_v11  ;;  %v4686_v34 = vld [vmem:[%s7275_s0 + $0x28] sm:$0xff]   ;;  %v4687_v37 = vld [vmem:[%s7275_s0 + $0x30] sm:$0xff]  }
   0x4   :  { %24 = vst.msk [vmem:[#allocation2 + $0x20] sm:$0xff] %vm18_vm0, %v4857_v0  ;;  %v4653_v29 = vunpack.c.h.bf16 %v4651_v26  ;;  %v4652_v31 = vunpack.c.l.bf16 %v4651_v26  ;;  %v4660_v32 = vunpack.c.l.bf16 %v4683_v30  ;;  %v4661_v33 = vunpack.c.h.bf16 %v4683_v30 }
   0x5   :  { %26 = vst.msk [vmem:[#allocation2 + $0x30] sm:$0xff] %vm18_vm0, %v4857_v0  ;;  %v4672_v35 = vunpack.c.l.bf16 %v4686_v34  ;;  %v4673_v36 = vunpack.c.h.bf16 %v4686_v34  ;;  %v4676_v39 = vunpack.c.l.bf16 %v4687_v37  ;;  %v4677_v40 = vunpack.c.h.bf16 %v4687_v37 }
   0x6   :  { %28 = vst.msk [vmem:[#allocation2 + $0x40] sm:$0xff] %vm18_vm0, %v4857_v0  ;;  %vm164_vm4 = vsmask.f32 256  ;;  %vm271_vm6 = vsmask.f32 7938  ;;  %vm377_vm10 = vcmask 517121  }
   0x7   :  { %30 = vst.msk [vmem:[#allocation2 + $0x50] sm:$0xff] %vm18_vm0, %v4857_v0  ;;  %vm5219_vm5 = vmand %vm163_vm3, %vm164_vm4  ;;  %vm378_vm11 = vsmask.f32 1280  ;;  %vm492_vm13 = vsmask.f32 7942 }
   0x8   :  { %v111_v1 = vld [vmem:[#allocation2 + $0xa0] sm:$0xff]  ;;  %32 = vst.msk [vmem:[#allocation2 + $0x60] sm:$0xff] %vm18_vm0, %v4857_v0  ;;  %vm5258_vm7 = vmand %vm163_vm3, %vm271_vm6  ;;  %vm849_vm3 = vcmask 1041921  }
   0x9   :  { %115 = vst.msk [vmem:[#allocation3 + $0x40] sm:$0xff] %vm18_vm0, %v111_v1  ;;  %v109_v6 = vld [vmem:[#allocation2] sm:$0xff]  ;;  %vm5325_vm9 = vmand %vm606_vm8, %vm164_vm4 }
   0xa   :  { %34 = vst.msk [vmem:[#allocation2 + $0x70] sm:$0xff] %vm18_vm0, %v4857_v0  ;;  %vm5478_vm12 = vmand %vm377_vm10, %vm378_vm11 }
   0xb   :  { %36 = vst.msk [vmem:[#allocation2 + $0x80] sm:$0xff] %vm18_vm0, %v4857_v0  ;;  %vm5538_vm14 = vmand %vm377_vm10, %vm492_vm13 }
   0xc   :  { %42 = vst.msk [vmem:[#allocation2 + $0xb0] sm:$0xff] %vm18_vm0, %v4857_v0  ;;  %vm5557_vm15 = vmand %vm606_vm8, %vm271_vm6 }
   0xd   :  { %44 = vst.msk [vmem:[#allocation2 + $0xc0] sm:$0xff] %vm18_vm0, %v4857_v0  ;;  %vm5662_vm4 = vmand %vm849_vm3, %vm378_vm11 }
   0xe   :  { %46 = vst.msk [vmem:[#allocation2 + $0xd0] sm:$0xff] %vm18_vm0, %v4857_v0  ;;  %vm5891_vm6 = vmand %vm849_vm3, %vm492_vm13 }
   0xf   :  { %48 = vst.msk [vmem:[#allocation2 + $0xe0] sm:$0xff] %vm18_vm0, %v4857_v0 }
  0x10   :  { %v522_v2 = vld [vmem:[#allocation3 + $0x41] sm:$0x1]  ;;  %50 = vst.msk [vmem:[#allocation2 + $0xf0] sm:$0xff] %vm18_vm0, %v4857_v0  ;;  %v636_v58 = vld [vmem:[#allocation3 + $0x43] sm:$0x1] }
  0x11   :  { %v530_v3 = vpack.c.bf16 %v522_v2, %v522_v2  ;;  %52 = vst.msk [vmem:[#allocation2 + $0x100] sm:$0xff] %vm18_vm0, %v4857_v0  ;;  %v644_v2 = vpack.c.bf16 %v636_v58, %v636_v58 }
  0x12   :  { %54 = vst.msk [vmem:[#allocation2 + $0x110] sm:$0xff] %vm18_vm0, %v4857_v0 }
  0x13   :  { %v546_v4 = vrot.slane %v530_v3, 2  ;;  %56 = vst.msk [vmem:[#allocation2 + $0x120] sm:$0xff] %vm18_vm0, %v4857_v0 }
  0x14   :  { %113 = vst.msk [vmem:[#allocation3] sm:$0xff] %vm18_vm0, %v109_v6 }
  0x15   :  { %v568_v5 = vsel %vm222_vm1, %v530_v3, %v546_v4  ;;  %27 = vst.msk [vmem:[#allocation2 + $0x38] sm:$0x3] %vm20_vm2, %v4857_v0 }
  0x16   :  { %590 = vrot.lane.b32.xlu2 %v568_v5, %s4858_s15  ;;  %29 = vst.msk [vmem:[#allocation2 + $0x48] sm:$0x3] %vm20_vm2, %v4857_v0 }
  0x17   :  { %37 = vst.msk [vmem:[#allocation2 + $0x88] sm:$0x3] %vm20_vm2, %v4857_v0 }
  0x18   :  { %57 = vst.msk [vmem:[#allocation2 + $0x128] sm:$0x3] %vm20_vm2, %v4857_v0 }
  0x19   :  { %96 = vst.msk [vmem:[#allocation2 + $0x41] sm:$0xff] %vm18_vm0, %v4657_v8 }
  0x1a   :  { %100 = vst.msk [vmem:[#allocation2 + $0x81] sm:$0xff] %vm18_vm0, %v4665_v10 }
  0x1b   :  { %v518_v14 = vld [vmem:[#allocation3 + $0x1] sm:$0x1]  ;;  %108 = vst.msk [vmem:[#allocation2 + $0x121] sm:$0xff] %vm18_vm0, %v4681_v12  ;;  %v632_v42 = vld [vmem:[#allocation3 + $0x3] sm:$0x1]  ;;  %v660_v12 = vrot.slane %v644_v2, 2 }
  0x1c   :  { %v526_v15 = vpack.c.bf16 %v518_v14, %v518_v14  ;;  %95 = vst.msk [vmem:[#allocation2 + $0x31] sm:$0xff] %vm18_vm0, %v4656_v13  ;;  %v640_v46 = vpack.c.bf16 %v632_v42, %v632_v42 }
  0x1d   :  { %21 = vst.msk [vmem:[#allocation2 + $0x8] sm:$0x3] %vm20_vm2, %v4857_v0 }
  0x1e   :  { %v542_v16 = vrot.slane %v526_v15, 2  ;;  %23 = vst.msk [vmem:[#allocation2 + $0x18] sm:$0x3] %vm20_vm2, %v4857_v0  ;;  %v656_v52 = vrot.slane %v640_v46, 2 }
  0x1f   :  { %25 = vst.msk [vmem:[#allocation2 + $0x28] sm:$0x3] %vm20_vm2, %v4857_v0 }
  0x20   :  { %v552_v17 = vsel %vm222_vm1, %v526_v15, %v542_v16  ;;  %v4948_v18 = vld [vmem:[#allocation2 + $0x40] sm:$0xff]  ;;  %31 = vst.msk [vmem:[#allocation2 + $0x58] sm:$0x3] %vm20_vm2, %v4857_v0  ;;  %v666_v60 = vsel %vm222_vm1, %v640_v46, %v656_v52 }
  0x21   :  { %582 = vrot.lane.b32.xlu0 %v552_v17, %s4858_s15  ;;  %133 = vst.msk [vmem:[#allocation3 + $0x20] sm:$0xff] %vm18_vm0, %v4948_v18  ;;  %v688_v3 = vshll.u32 %v666_v60, 16  ;;  %v753_v16 = vld [vmem:[#allocation3 + $0x5] sm:$0x1]  ;;  %v5071_v52 = vld [vmem:[#allocation3 + $0x2] sm:$0x1] }
  0x22   :  { %33 = vst.msk [vmem:[#allocation2 + $0x68] sm:$0x3] %vm20_vm2, %v4857_v0  ;;  %v761_v30 = vpack.c.bf16 %v753_v16, %v753_v16  ;;  %v875_v16 = vld [vmem:[#allocation3 + $0x7] sm:$0x1] }
  0x23   :  { %35 = vst.msk [vmem:[#allocation2 + $0x78] sm:$0x3] %vm20_vm2, %v4857_v0 }
  0x24   :  { %41 = vst.msk [vmem:[#allocation2 + $0xa8] sm:$0x3] %vm20_vm2, %v4857_v0 }
  0x25   :  { %43 = vst.msk [vmem:[#allocation2 + $0xb8] sm:$0x3] %vm20_vm2, %v4857_v0 }
  0x26   :  { %45 = vst.msk [vmem:[#allocation2 + $0xc8] sm:$0x3] %vm20_vm2, %v4857_v0 }
  0x27   :  { %47 = vst.msk [vmem:[#allocation2 + $0xd8] sm:$0x3] %vm20_vm2, %v4857_v0 }
  0x28   :  { %v520_v19 = vld [vmem:[#allocation3 + $0x21] sm:$0x1]  ;;  %49 = vst.msk [vmem:[#allocation2 + $0xe8] sm:$0x3] %vm20_vm2, %v4857_v0  ;;  %v634_v57 = vld [vmem:[#allocation3 + $0x23] sm:$0x1] }
  0x29   :  { %v528_v20 = vpack.c.bf16 %v520_v19, %v520_v19  ;;  %51 = vst.msk [vmem:[#allocation2 + $0xf8] sm:$0x3] %vm20_vm2, %v4857_v0  ;;  %v642_v62 = vpack.c.bf16 %v634_v57, %v634_v57  ;;  %v755_v13 = vld [vmem:[#allocation3 + $0x25] sm:$0x1]  ;;  %v5053_v34 = vld [vmem:[#allocation3 + $0x20] sm:$0x1] }
  0x2a   :  { %53 = vst.msk [vmem:[#allocation2 + $0x108] sm:$0x3] %vm20_vm2, %v4857_v0 }
  0x2b   :  { %v544_v21 = vrot.slane %v528_v20, 2  ;;  %55 = vst.msk [vmem:[#allocation2 + $0x118] sm:$0x3] %vm20_vm2, %v4857_v0  ;;  %v658_v10 = vrot.slane %v642_v62, 2 }
  0x2c   :  { %102 = vst.msk [vmem:[#allocation2 + $0xc1] sm:$0xff] %vm18_vm0, %v4669_v24 }
  0x2d   :  { %v560_v23 = vsel %vm222_vm1, %v528_v20, %v544_v21  ;;  %101 = vst.msk [vmem:[#allocation2 + $0xb1] sm:$0xff] %vm18_vm0, %v4668_v25  ;;  %v5039_v24 = vsel %vm222_vm1, %v642_v62, %v658_v10  ;;  %v5041_v25 = vpack.c.bf16 %v755_v13, %v755_v13 }
  0x2e   :  { %586 = vrot.lane.b32.xlu1 %v560_v23, %s4858_s15  ;;  %99 = vst.msk [vmem:[#allocation2 + $0x71] sm:$0xff] %vm18_vm0, %v4664_v27 }
  0x2f   :  { %107 = vst.msk [vmem:[#allocation2 + $0x111] sm:$0xff] %vm18_vm0, %v4680_v28 }
  0x30   :  { %94 = vst.msk [vmem:[#allocation2 + $0x21] sm:$0xff] %vm18_vm0, %v4653_v29  ;;  %v5045_v29 = vsel %vm222_vm1, %v644_v2, %v660_v12  ;;  %v5096_v12 = vld [vmem:[#allocation3 + $0x27] sm:$0x1] }
  0x31   :  { %93 = vst.msk [vmem:[#allocation2 + $0x11] sm:$0xff] %vm18_vm0, %v4652_v31  ;;  %v5047_v31 = vld [vmem:[#allocation3 + $0x22] sm:$0x1]  ;;  %v696_v58 = vshll.u32 %v5045_v29, 16 }
  0x32   :  { %97 = vst.msk [vmem:[#allocation2 + $0x51] sm:$0xff] %vm18_vm0, %v4660_v32  ;;  %v5049_v32 = vld [vmem:[#allocation3 + $0x24] sm:$0x1] }
  0x33   :  { %v5003_v38 = vld [vmem:[#allocation2 + $0xc0] sm:$0xff]  ;;  %98 = vst.msk [vmem:[#allocation2 + $0x61] sm:$0xff] %vm18_vm0, %v4661_v33 }
  0x34   :  { %7285 = vst [vmem:[#allocation5_spill] sm:$0xff] %v5003_v38  ;;  %v5051_v33 = vld [vmem:[#allocation3 + $0x26] sm:$0x1] }
  0x35   :  { %125 = vst.msk [vmem:[#allocation3 + $0x50] sm:$0xff] %vm18_vm0, %v5003_v38 }
  0x36   :  { %103 = vst.msk [vmem:[#allocation2 + $0xd1] sm:$0xff] %vm18_vm0, %v4672_v35  ;;  %v5055_v35 = vld [vmem:[#allocation3 + $0x22] sm:$0x1] }
  0x37   :  { %104 = vst.msk [vmem:[#allocation2 + $0xe1] sm:$0xff] %vm18_vm0, %v4673_v36  ;;  %v5010_v41 = vld [vmem:[#allocation2 + $0x20] sm:$0xff] }
  0x38   :  { %105 = vst.msk [vmem:[#allocation2 + $0xf1] sm:$0xff] %vm18_vm0, %v4676_v39  ;;  %v5057_v36 = vld [vmem:[#allocation3 + $0x24] sm:$0x1] }
  0x39   :  { %123 = vst.msk [vmem:[#allocation3 + $0x10] sm:$0xff] %vm18_vm0, %v5010_v41 }
  0x3a   :  { %106 = vst.msk [vmem:[#allocation2 + $0x101] sm:$0xff] %vm18_vm0, %v4677_v40  ;;  %v5016_v43 = vld [vmem:[#allocation2 + $0x60] sm:$0xff] }
  0x3b   :  { %143 = vst.msk [vmem:[#allocation3 + $0x30] sm:$0xff] %vm18_vm0, %v5016_v43  ;;  %v5059_v40 = vld [vmem:[#allocation3 + $0x26] sm:$0x1] }
  0x3c   :  { %v523_v44 = vld [vmem:[#allocation3 + $0x51] sm:$0x1]  ;;  %v637_v63 = vld [vmem:[#allocation3 + $0x53] sm:$0x1]  ;;  %7288 = vst [vmem:[#allocation8_spill] sm:$0xff] %v5049_v32 }
  0x3d   :  { %v531_v45 = vpack.c.bf16 %v523_v44, %v523_v44  ;;  %v645_v7 = vpack.c.bf16 %v637_v63, %v637_v63  ;;  %7289 = vst [vmem:[#allocation9_spill] sm:$0xff] %v5051_v33 }
  0x3e   :  { %v5020_v47 = vld [vmem:[#allocation2 + $0xe0] sm:$0xff] }
  0x3f   :  { %7286 = vst [vmem:[#allocation6_spill] sm:$0xff] %v5020_v47  ;;  %v547_v48 = vrot.slane %v531_v45, 2  ;;  %v661_v19 = vrot.slane %v645_v7, 2 }
  0x40   :  { %135 = vst.msk [vmem:[#allocation3 + $0x60] sm:$0xff] %vm18_vm0, %v5020_v47  ;;  %v519_v49 = vld [vmem:[#allocation3 + $0x11] sm:$0x1]  ;;  %v633_v53 = vld [vmem:[#allocation3 + $0x13] sm:$0x1] }
  0x41   :  { %v572_v50 = vsel %vm222_vm1, %v531_v45, %v547_v48  ;;  %v527_v51 = vpack.c.bf16 %v519_v49, %v519_v49  ;;  %v641_v55 = vpack.c.bf16 %v633_v53, %v633_v53  ;;  %v5026_v56 = vld [vmem:[#allocation2 + $0x100] sm:$0xff]  ;;  %v692_v45 = vshll.u32 %v5039_v24, 16  ;;  %v754_v60 = vld [vmem:[#allocation3 + $0x15] sm:$0x1]  ;;  %v5082_v62 = vld [vmem:[#allocation3 + $0x14] sm:$0x1] }
  0x42   :  { %592 = vrot.lane.b32.xlu2 %v572_v50, %s4858_s15  ;;  %7287 = vst [vmem:[#allocation7_spill] sm:$0xff] %v5026_v56  ;;  %v521_v61 = vld [vmem:[#allocation3 + $0x31] sm:$0x1]  ;;  %v635_v28 = vld [vmem:[#allocation3 + $0x33] sm:$0x1]  ;;  %v681_v46 = vsel %vm222_vm1, %v645_v7, %v661_v19 }
  0x43   :  { %v543_v54 = vrot.slane %v527_v51, 2  ;;  %145 = vst.msk [vmem:[#allocation3 + $0x70] sm:$0xff] %vm18_vm0, %v5026_v56  ;;  %v529_v0 = vpack.c.bf16 %v521_v61, %v521_v61  ;;  %v657_v1 = vrot.slane %v641_v55, 2  ;;  %v643_v39 = vpack.c.bf16 %v635_v28, %v635_v28  ;;  %v5063_v48 = vld [vmem:[#allocation3 + $0x2] sm:$0x1]  ;;  %v1382_v7 = vld [vmem:[#allocation2 + $0x50] sm:$0xff] }
  0x44   :  { %7290 = vst [vmem:[#allocation10_spill] sm:$0xff] %v5063_v48  ;;  %v5065_v49 = vld [vmem:[#allocation3 + $0x4] sm:$0x1]  ;;  %v5067_v50 = vld [vmem:[#allocation3 + $0x6] sm:$0x1]  ;;  %v1391_v56 = vld [vmem:[#allocation2 + $0x70] sm:$0xff] }
  0x45   :  { %v556_v59 = vsel %vm222_vm1, %v527_v51, %v543_v54  ;;  %v545_v4 = vrot.slane %v529_v0, 2  ;;  %v669_v5 = vsel %vm222_vm1, %v641_v55, %v657_v1  ;;  %7291 = vst [vmem:[#allocation11_spill] sm:$0xff] %v5065_v49  ;;  %v5069_v51 = vld [vmem:[#allocation3] sm:$0x1]  ;;  %v5073_v53 = vld [vmem:[#allocation3 + $0x4] sm:$0x1] }
  0x46   :  { %584 = vrot.lane.b32.xlu0 %v556_v59, %s4858_s15  ;;  %v690_v8 = vshll.u32 %v669_v5, 16  ;;  %7292 = vst [vmem:[#allocation12_spill] sm:$0xff] %v5067_v50  ;;  %v5075_v54 = vld [vmem:[#allocation3 + $0x6] sm:$0x1]  ;;  %v659_v57 = vrot.slane %v643_v39, 2  ;;  %v779_v59 = vrot.slane %v5041_v25, 2 }
  0x47   :  { %v524_v6 = vld [vmem:[#allocation3 + $0x61] sm:$0x1]  ;;  %v564_v11 = vsel %vm222_vm1, %v529_v0, %v545_v4  ;;  %v638_v22 = vld [vmem:[#allocation3 + $0x63] sm:$0x1]  ;;  %v5080_v61 = vld [vmem:[#allocation3 + $0x12] sm:$0x1] }
  0x48   :  { %v532_v9 = vpack.c.bf16 %v524_v6, %v524_v6  ;;  %588 = vrot.lane.b32.xlu1 %v564_v11, %s4858_s15  ;;  %v4695_v14 = vpack.i.bf16 %v690_v8, %v688_v3  ;;  %v646_v26 = vpack.c.bf16 %v638_v22, %v638_v22  ;;  %7293 = vst [vmem:[#allocation13_spill] sm:$0xff] %v5080_v61  ;;  %v5084_v63 = vld [vmem:[#allocation3 + $0x16] sm:$0x1]  ;;  %v5086_v0 = vld [vmem:[#allocation3 + $0x10] sm:$0x1]  ;;  %v777_v5 = vrot.slane %v761_v30, 2 }
  0x49   :  { %7294 = vst [vmem:[#allocation14_spill] sm:$0xff] %v5082_v62  ;;  %v5088_v1 = vld [vmem:[#allocation3 + $0x12] sm:$0x1]  ;;  %v5090_v2 = vld [vmem:[#allocation3 + $0x14] sm:$0x1]  ;;  %v675_v10 = vsel %vm222_vm1, %v643_v39, %v659_v57  ;;  %v698_v11 = vshll.u32 %v681_v46, 16  ;;  %v795_v28 = vsel %vm222_vm1, %v5041_v25, %v779_v59 }
  0x4a   :  { %v548_v15 = vrot.slane %v532_v9, 2  ;;  %v525_v17 = vld [vmem:[#allocation3 + $0x71] sm:$0x1]  ;;  %4696 = vrot.lane.b32.xlu2 %v4695_v14, %s4858_s15  ;;  %v639_v23 = vld [vmem:[#allocation3 + $0x73] sm:$0x1]  ;;  %v662_v42 = vrot.slane %v646_v26, 2  ;;  %v787_v29 = vsel %vm222_vm1, %v761_v30, %v777_v5 }
  0x4b   :  { %v533_v21 = vpack.c.bf16 %v525_v17, %v525_v17  ;;  %v647_v27 = vpack.c.bf16 %v639_v23, %v639_v23  ;;  %7295 = vst [vmem:[#allocation15_spill] sm:$0xff] %v5084_v63  ;;  %v758_v6 = vld [vmem:[#allocation3 + $0x55] sm:$0x1]  ;;  %v5098_v13 = vld [vmem:[#allocation3 + $0x16] sm:$0x1]  ;;  %v694_v14 = vshll.u32 %v675_v10, 16 }
  0x4c   :  { %v576_v20 = vsel %vm222_vm1, %v532_v9, %v548_v15  ;;  %v684_v3 = vsel %vm222_vm1, %v646_v26, %v662_v42  ;;  %v762_v15 = vpack.c.bf16 %v754_v60, %v754_v60  ;;  %1386 = vst.msk [vmem:[#allocation3 + $0x20] sm:$0xff] %vm18_vm0, %v1382_v7  ;;  %v876_v19 = vld [vmem:[#allocation3 + $0x17] sm:$0x1]  ;;  %v5101_v22 = vld [vmem:[#allocation3 + $0x52] sm:$0x1]  ;;  %v819_v59 = vrot.slane %v795_v28, 7 }
  0x4d   :  { %v549_v37 = vrot.slane %v533_v21, 2  ;;  %v663_v44 = vrot.slane %v647_v27, 2  ;;  %v700_v8 = vshll.u32 %v684_v3, 16  ;;  %7296 = vst [vmem:[#allocation16_spill] sm:$0xff] %v5101_v22  ;;  %v5103_v23 = vld [vmem:[#allocation3 + $0x54] sm:$0x1]  ;;  %v884_v30 = vpack.c.bf16 %v876_v19, %v876_v19 }
  0x4e   :  { %594 = vrot.lane.b32.xlu0 %v576_v20, %s4858_s15  ;;  %v1364_v20 = vld [vmem:[#allocation2 + $0x10] sm:$0xff]  ;;  %7297 = vst [vmem:[#allocation17_spill] sm:$0xff] %v5103_v23  ;;  %v757_v46 = vld [vmem:[#allocation3 + $0x45] sm:$0x1]  ;;  %v778_v25 = vrot.slane %v762_v15, 2  ;;  %v817_v60 = vrot.slane %v787_v29, 7 }
  0x4f   :  { %v580_v55 = vsel %vm222_vm1, %v533_v21, %v549_v37  ;;  %v687_v4 = vsel %vm222_vm1, %v647_v27, %v663_v44  ;;  %v1373_v21 = vld [vmem:[#allocation2 + $0x30] sm:$0xff]  ;;  %v4700_v27 = vpack.i.bf16 %v694_v14, %v692_v45  ;;  %v766_v37 = vpack.c.bf16 %v758_v6, %v758_v6  ;;  %1368 = vst.msk [vmem:[#allocation3] sm:$0xff] %vm18_vm0, %v1364_v20  ;;  %v5140_v19 = vld [vmem:[#allocation3 + $0x42] sm:$0x1]  ;;  %v5142_v20 = vld [vmem:[#allocation3 + $0x44] sm:$0x1] }
  0x50   :  { %596 = vrot.lane.b32.xlu1 %v580_v55, %s4858_s15  ;;  %v702_v9 = vshll.u32 %v687_v4, 16  ;;  %v5105_v24 = vld [vmem:[#allocation3 + $0x56] sm:$0x1]  ;;  %v5107_v26 = vld [vmem:[#allocation3 + $0x50] sm:$0x1]  ;;  %v4705_v44 = vpack.i.bf16 %v698_v11, %v696_v58  ;;  %v883_v55 = vpack.c.bf16 %v875_v16, %v875_v16  ;;  %1377 = vst.msk [vmem:[#allocation3 + $0x10] sm:$0xff] %vm18_vm0, %v1373_v21 }
  0x51   :  { %7298 = vst [vmem:[#allocation18_spill] sm:$0xff] %v5105_v24  ;;  %v756_v39 = vld [vmem:[#allocation3 + $0x35] sm:$0x1]  ;;  %v5113_v42 = vld [vmem:[#allocation3 + $0x52] sm:$0x1] }
  0x52   :  { %v4710_v17 = vpack.i.bf16 %v702_v9, %v700_v8  ;;  %v5117_v57 = vld [vmem:[#allocation3 + $0x54] sm:$0x1]  ;;  %v5119_v45 = vld [vmem:[#allocation3 + $0x56] sm:$0x1]  ;;  %v764_v3 = vpack.c.bf16 %v756_v39, %v756_v39  ;;  %v5122_v4 = vld [vmem:[#allocation3 + $0x30] sm:$0x1]  ;;  %v765_v9 = vpack.c.bf16 %v757_v46, %v757_v46  ;;  %v791_v39 = vsel %vm222_vm1, %v762_v15, %v778_v25 }
  0x53   :  { %v5124_v5 = vld [vmem:[#allocation3 + $0x32] sm:$0x1]  ;;  %v5126_v58 = vld [vmem:[#allocation3 + $0x34] sm:$0x1]  ;;  %v5128_v6 = vld [vmem:[#allocation3 + $0x36] sm:$0x1] }
  0x54   :  { %4711 = vrot.lane.b32.xlu2 %v4710_v17, %s4858_s15  ;;  %v5130_v7 = vld [vmem:[#allocation3 + $0x32] sm:$0x1]  ;;  %v782_v8 = vrot.slane %v766_v37, 2  ;;  %v5132_v10 = vld [vmem:[#allocation3 + $0x57] sm:$0x1]  ;;  %v899_v17 = vrot.slane %v883_v55, 2 }
  0x55   :  { %7299 = vst [vmem:[#allocation19_spill] sm:$0xff] %v5130_v7  ;;  %v1375_v11 = vld [vmem:[#allocation2 + $0xd0] sm:$0xff]  ;;  %v5144_v21 = vld [vmem:[#allocation3 + $0x46] sm:$0x1]  ;;  %v5148_v28 = vld [vmem:[#allocation3 + $0x42] sm:$0x1] }
  0x56   :  { %4701 = vrot.lane.b32.xlu0 %v4700_v27, %s4858_s15  ;;  %v5134_v14 = vld [vmem:[#allocation3 + $0x34] sm:$0x1]  ;;  %v5136_v16 = vld [vmem:[#allocation3 + $0x36] sm:$0x1]  ;;  %1379 = vst.msk [vmem:[#allocation3 + $0x50] sm:$0xff] %vm18_vm0, %v1375_v11  ;;  %v900_v46 = vrot.slane %v884_v30, 2  ;;  %v807_v15 = vsel %vm222_vm1, %v766_v37, %v782_v8  ;;  %v909_v62 = vsel %vm222_vm1, %v883_v55, %v899_v17 }
  0x57   :  { %7300 = vst [vmem:[#allocation20_spill] sm:$0xff] %v5134_v14  ;;  %v5146_v27 = vld [vmem:[#allocation3 + $0x40] sm:$0x1]  ;;  %v5150_v29 = vld [vmem:[#allocation3 + $0x44] sm:$0x1]  ;;  %v780_v11 = vrot.slane %v764_v3, 2 }
  0x58   :  { %7301 = vst [vmem:[#allocation21_spill] sm:$0xff] %v5136_v16  ;;  %4706 = vrot.lane.b32.xlu1 %v4705_v44, %s4858_s15  ;;  %v881_v24 = vld [vmem:[#allocation3 + $0x67] sm:$0x1]  ;;  %v882_v44 = vld [vmem:[#allocation3 + $0x77] sm:$0x1]  ;;  %v781_v25 = vrot.slane %v765_v9, 2 }
  0x59   :  { %7302 = vst [vmem:[#allocation22_spill] sm:$0xff] %v5140_v19  ;;  %v5153_v16 = vld [vmem:[#allocation3 + $0x46] sm:$0x1]  ;;  %v759_v47 = vld [vmem:[#allocation3 + $0x65] sm:$0x1]  ;;  %v818_v14 = vrot.slane %v791_v39, 7  ;;  %v889_v61 = vpack.c.bf16 %v881_v24, %v881_v24  ;;  %v890_v49 = vpack.c.bf16 %v882_v44, %v882_v44 }
  0x5a   :  { %7303 = vst [vmem:[#allocation23_spill] sm:$0xff] %v5142_v20  ;;  %v5155_v63 = vld [vmem:[#allocation3 + $0x60] sm:$0x1]  ;;  %v5157_v50 = vld [vmem:[#allocation3 + $0x62] sm:$0x1]  ;;  %v767_v37 = vpack.c.bf16 %v759_v47, %v759_v47  ;;  %v822_v24 = vrot.slane %v807_v15, 7  ;;  %v803_v55 = vsel %vm222_vm1, %v765_v9, %v781_v25  ;;  %v888_v15 = vpack.c.bf16 %v5132_v10, %v5132_v10 }
  0x5b   :  { %7304 = vst [vmem:[#allocation24_spill] sm:$0xff] %v5144_v21  ;;  %v5159_v21 = vld [vmem:[#allocation3 + $0x64] sm:$0x1]  ;;  %v5161_v38 = vld [vmem:[#allocation3 + $0x66] sm:$0x1]  ;;  %v1384_v17 = vld [vmem:[#allocation2 + $0xf0] sm:$0xff] }
  0x5c   :  { %7305 = vst [vmem:[#allocation25_spill] sm:$0xff] %v5159_v21  ;;  %v5163_v20 = vld [vmem:[#allocation3 + $0x62] sm:$0x1]  ;;  %v878_v33 = vld [vmem:[#allocation3 + $0x37] sm:$0x1]  ;;  %829 = vrot.lane.b32.xlu2 %v819_v59, %s4858_s15  ;;  %v885_v59 = vpack.c.bf16 %v5096_v12, %v5096_v12  ;;  %v905_v44 = vrot.slane %v889_v61, 2  ;;  %v159_v21 = vpack.c.bf16 %v5146_v27, %v5146_v27 }
  0x5d   :  { %7306 = vst [vmem:[#allocation26_spill] sm:$0xff] %v5161_v38  ;;  %v5166_v19 = vld [vmem:[#allocation3 + $0x64] sm:$0x1]  ;;  %v5168_v7 = vld [vmem:[#allocation3 + $0x66] sm:$0x1]  ;;  %v1366_v38 = vld [vmem:[#allocation2 + $0xb0] sm:$0xff]  ;;  %v886_v39 = vpack.c.bf16 %v878_v33, %v878_v33 }
  0x5e   :  { %7307 = vst [vmem:[#allocation27_spill] sm:$0xff] %v5163_v20  ;;  %825 = vrot.lane.b32.xlu0 %v817_v60, %s4858_s15  ;;  %v912_v20 = vsel %vm222_vm1, %v884_v30, %v900_v46  ;;  %v760_v8 = vld [vmem:[#allocation3 + $0x75] sm:$0x1]  ;;  %v879_v48 = vld [vmem:[#allocation3 + $0x47] sm:$0x1]  ;;  %v906_v12 = vrot.slane %v890_v49, 2 }
  0x5f   :  { %7308 = vst [vmem:[#allocation28_spill] sm:$0xff] %v5166_v19  ;;  %v799_v19 = vsel %vm222_vm1, %v764_v3, %v780_v11  ;;  %v5180_v60 = vld [vmem:[#allocation3 + $0x70] sm:$0x1]  ;;  %v5182_v30 = vld [vmem:[#allocation3 + $0x72] sm:$0x1]  ;;  %v934_v3 = vshll.u32 %v912_v20, 16  ;;  %v768_v46 = vpack.c.bf16 %v760_v8, %v760_v8  ;;  %v887_v11 = vpack.c.bf16 %v879_v48, %v879_v48 }
  0x60   :  { %7309 = vst [vmem:[#allocation29_spill] sm:$0xff] %v5168_v7  ;;  %v5184_v47 = vld [vmem:[#allocation3 + $0x74] sm:$0x1]  ;;  %827 = vrot.lane.b32.xlu1 %v818_v14, %s4858_s15  ;;  %v5190_v33 = vld [vmem:[#allocation3 + $0x72] sm:$0x1]  ;;  %v783_v9 = vrot.slane %v767_v37, 2  ;;  %v930_v48 = vsel %vm222_vm1, %v890_v49, %v906_v12 }
  0x61   :  { %1395 = vst.msk [vmem:[#allocation3 + $0x30] sm:$0xff] %vm18_vm0, %v1391_v56  ;;  %v931_v56 = vshll.u32 %v909_v62, 16  ;;  %v820_v62 = vrot.slane %v799_v19, 7  ;;  %v5194_v25 = vld [vmem:[#allocation3 + $0x74] sm:$0x1]  ;;  %v901_v14 = vrot.slane %v885_v59, 2  ;;  %v927_v19 = vsel %vm222_vm1, %v889_v61, %v905_v44 }
  0x62   :  { %1370 = vst.msk [vmem:[#allocation3 + $0x40] sm:$0xff] %vm18_vm0, %v1366_v38  ;;  %v5188_v38 = vld [vmem:[#allocation3 + $0x76] sm:$0x1]  ;;  %v902_v20 = vrot.slane %v886_v39, 2  ;;  %v821_v8 = vrot.slane %v803_v55, 7  ;;  %v811_v10 = vsel %vm222_vm1, %v767_v37, %v783_v9 }
  0x63   :  { %7310 = vst [vmem:[#allocation30_spill] sm:$0xff] %v5184_v47  ;;  %v5196_v7 = vld [vmem:[#allocation3 + $0x76] sm:$0x1]  ;;  %v933_v47 = vrot.slane %v931_v56, 7  ;;  %v915_v55 = vsel %vm222_vm1, %v885_v59, %v901_v14  ;;  %v823_v61 = vrot.slane %v811_v10, 7 }
  0x64   :  { %1388 = vst.msk [vmem:[#allocation3 + $0x60] sm:$0xff] %vm18_vm0, %v1384_v17  ;;  %v1393_v23 = vld [vmem:[#allocation2 + $0x110] sm:$0xff]  ;;  %835 = vrot.lane.b32.xlu2 %v822_v24, %s4858_s15  ;;  %v936_v17 = vrot.slane %v934_v3, 7  ;;  %v918_v56 = vsel %vm222_vm1, %v886_v39, %v902_v20  ;;  %v952_v24 = vshll.u32 %v930_v48, 16  ;;  %v937_v44 = vshll.u32 %v915_v55, 16 }
  0x65   :  { %7311 = vst [vmem:[#allocation31_spill] sm:$0xff] %v5188_v38  ;;  %v784_v38 = vrot.slane %v768_v46, 2  ;;  %v940_v12 = vshll.u32 %v918_v56, 16  ;;  %v1401_v22 = vld [vmem:[#allocation3 + $0x20] sm:$0x1] }
  0x66   :  { %7312 = vst [vmem:[#allocation32_spill] sm:$0xff] %v5190_v33  ;;  %831 = vrot.lane.b32.xlu0 %v820_v62, %s4858_s15  ;;  %v904_v33 = vrot.slane %v888_v15, 2  ;;  %v4715_v3 = vpack.i.bf16 %v936_v17, %v933_v47  ;;  %v1399_v59 = vld [vmem:[#allocation3] sm:$0x1]  ;;  %v939_v47 = vrot.slane %v937_v44, 7 }
  0x67   :  { %7313 = vst [vmem:[#allocation33_spill] sm:$0xff] %v5194_v25  ;;  %v903_v25 = vrot.slane %v887_v11, 2  ;;  %v815_v49 = vsel %vm222_vm1, %v768_v46, %v784_v38  ;;  %v942_v46 = vrot.slane %v940_v12, 7  ;;  %v1404_v38 = vld [vmem:[#allocation3 + $0x50] sm:$0x1] }
  0x68   :  { %7314 = vst [vmem:[#allocation34_spill] sm:$0xff] %v5196_v7  ;;  %v949_v7 = vshll.u32 %v927_v19, 16  ;;  %833 = vrot.lane.b32.xlu1 %v821_v8, %s4858_s15  ;;  %v924_v62 = vsel %vm222_vm1, %v888_v15, %v904_v33  ;;  %v824_v39 = vrot.slane %v815_v49, 7  ;;  %v1400_v8 = vld [vmem:[#allocation3 + $0x10] sm:$0x1]  ;;  %v1409_v19 = vpack.c.bf16 %v1401_v22, %v1401_v22 }
  0x69   :  { %1397 = vst.msk [vmem:[#allocation3 + $0x70] sm:$0xff] %vm18_vm0, %v1393_v23  ;;  %v921_v37 = vsel %vm222_vm1, %v887_v11, %v903_v25  ;;  %v954_v23 = vrot.slane %v952_v24, 7  ;;  %v946_v20 = vshll.u32 %v924_v62, 16  ;;  %v1511_v17 = vld [vmem:[#allocation3 + $0x2] sm:$0x1]  ;;  %v1407_v11 = vpack.c.bf16 %v1399_v59, %v1399_v59 }
  0x6a   :  { %v951_v9 = vrot.slane %v949_v7, 7  ;;  %v943_v14 = vshll.u32 %v921_v37, 16  ;;  %v1512_v25 = vld [vmem:[#allocation3 + $0x12] sm:$0x1]  ;;  %v1408_v7 = vpack.c.bf16 %v1400_v8, %v1400_v8  ;;  %v1402_v15 = vld [vmem:[#allocation3 + $0x30] sm:$0x1]  ;;  %v1412_v55 = vpack.c.bf16 %v1404_v38, %v1404_v38 }
  0x6b   :  { %v948_v10 = vrot.slane %v946_v20, 7  ;;  %v1403_v56 = vld [vmem:[#allocation3 + $0x40] sm:$0x1]  ;;  %v1519_v24 = vpack.c.bf16 %v1511_v17, %v1511_v17  ;;  %v1520_v49 = vpack.c.bf16 %v1512_v25, %v1512_v25  ;;  %v1423_v44 = vrot.slane %v1407_v11, 2  ;;  %v1517_v22 = vld [vmem:[#allocation3 + $0x62] sm:$0x1] }
  0x6c   :  { %4716 = vrot.lane.b32.xlu2 %v4715_v3, %s4858_s15  ;;  %v4730_v33 = vpack.i.bf16 %v954_v23, %v951_v9  ;;  %v945_v48 = vrot.slane %v943_v14, 7  ;;  %v4720_v3 = vpack.i.bf16 %v942_v46, %v939_v47  ;;  %v1410_v12 = vpack.c.bf16 %v1402_v15, %v1402_v15  ;;  %v1405_v8 = vld [vmem:[#allocation3 + $0x60] sm:$0x1]  ;;  %v1513_v25 = vld [vmem:[#allocation3 + $0x22] sm:$0x1] }
  0x6d   :  { %v1424_v37 = vrot.slane %v1408_v7, 2  ;;  %v1411_v62 = vpack.c.bf16 %v1403_v56, %v1403_v56  ;;  %v1428_v23 = vrot.slane %v1412_v55, 2  ;;  %v1535_v59 = vrot.slane %v1519_v24, 2  ;;  %v178_v15 = vld [vmem:[#allocation4 + $0x28] sm:$0x1] }
  0x6e   :  { %837 = vrot.lane.b32.xlu0 %v823_v61, %s4858_s15  ;;  %v1425_v61 = vrot.slane %v1409_v19, 2  ;;  %v4725_v9 = vpack.i.bf16 %v948_v10, %v945_v48  ;;  %v1536_v14 = vrot.slane %v1520_v49, 2  ;;  %v1433_v46 = vsel %vm222_vm1, %v1407_v11, %v1423_v44 }
  0x6f   :  { %v1426_v38 = vrot.slane %v1410_v12, 2  ;;  %v1525_v17 = vpack.c.bf16 %v1517_v22, %v1517_v22  ;;  %v1427_v48 = vrot.slane %v1411_v62, 2  ;;  %v1413_v10 = vpack.c.bf16 %v1405_v8, %v1405_v8  ;;  %v1515_v22 = vld [vmem:[#allocation3 + $0x42] sm:$0x1] }
  0x70   :  { %839 = vrot.lane.b32.xlu1 %v824_v39, %s4858_s15  ;;  %v1751_v39 = vld [vmem:[#allocation3 + $0x6] sm:$0x1]  ;;  %v1406_v20 = vld [vmem:[#allocation3 + $0x70] sm:$0x1]  ;;  %v1441_v47 = vsel %vm222_vm1, %v1409_v19, %v1425_v61  ;;  %v1437_v19 = vsel %vm222_vm1, %v1408_v7, %v1424_v37  ;;  %v5228_v11 = vsel %vm222_vm1, %v1412_v55, %v1428_v23  ;;  %v1545_v61 = vsel %vm222_vm1, %v1519_v24, %v1535_v59  ;;  %v1516_v24 = vld [vmem:[#allocation3 + $0x52] sm:$0x1] }
  0x71   :  { %v1759_v56 = vpack.c.bf16 %v1751_v39, %v1751_v39  ;;  %v202_v44 = vpack.c.bf16 %v5148_v28, %v5148_v28  ;;  %v1548_v8 = vsel %vm222_vm1, %v1520_v49, %v1536_v14  ;;  %v5234_v39 = vpack.c.bf16 %v1406_v20, %v1406_v20 }
  0x72   :  { %v1521_v32 = vpack.c.bf16 %v1513_v25, %v1513_v25  ;;  %v179_v27 = vsel %vm5219_vm5, %v159_v21, %v178_v15  ;;  %v1541_v7 = vrot.slane %v1525_v17, 2  ;;  %v5242_v23 = vsel %vm222_vm1, %v1411_v62, %v1427_v48 }
  0x73   :  { %180 = vst [vmem:[#allocation4 + $0x28] sm:$0x1] %v179_v27  ;;  %v218_v37 = vrot.slane %v202_v44, 2  ;;  %v1429_v28 = vrot.slane %v1413_v10, 2  ;;  %v1775_v59 = vrot.slane %v1759_v56, 2  ;;  %v1523_v49 = vpack.c.bf16 %v1515_v22, %v1515_v22 }
  0x74   :  { %4731 = vrot.lane.b32.xlu2 %v4730_v33, %s4858_s15  ;;  %v1567_v14 = vshll.u32 %v1545_v61, 16  ;;  %v1569_v20 = vshll.u32 %v1548_v8, 16  ;;  %v1537_v25 = vrot.slane %v1521_v32, 2  ;;  %v1524_v15 = vpack.c.bf16 %v1516_v24, %v1516_v24  ;;  %v5272_v24 = vld [vmem:[#allocation3 + $0x3] sm:$0x1] }
  0x75   :  { %v237_v21 = vsel %vm222_vm1, %v202_v44, %v218_v37  ;;  %v160_v62 = vpack.c.bf16 %v5107_v26, %v5107_v26  ;;  %v5251_v48 = vsel %vm222_vm1, %v1525_v17, %v1541_v7  ;;  %v203_v22 = vpack.c.bf16 %v5113_v42, %v5113_v42  ;;  %v1631_v42 = vld [vmem:[#allocation3 + $0x4] sm:$0x1]  ;;  %v5270_v37 = vld [vmem:[#allocation3 + $0x1] sm:$0x1]  ;;  %7320 = vst [vmem:[#allocation36_spill] sm:$0xff] %v5272_v24 }
  0x76   :  { %4721 = vrot.lane.b32.xlu0 %v4720_v3, %s4858_s15  ;;  %v1514_v3 = vld [vmem:[#allocation3 + $0x32] sm:$0x1]  ;;  %v255_v61 = vshll.u32 %v237_v21, 16  ;;  %v1785_v44 = vsel %vm222_vm1, %v1759_v56, %v1775_v59  ;;  %v1539_v8 = vrot.slane %v1523_v49, 2  ;;  %v5265_v17 = vpack.i.bf16 %v1569_v20, %v1567_v14  ;;  %7319 = vst [vmem:[#allocation35_spill] sm:$0xff] %v5270_v37 }
  0x77   :  { %v1522_v55 = vpack.c.bf16 %v1514_v3, %v1514_v3  ;;  %v181_v3 = vld [vmem:[#allocation4 + $0x32] sm:$0x1]  ;;  %v5268_v7 = vsel %vm222_vm1, %v1413_v10, %v1429_v28  ;;  %v219_v56 = vrot.slane %v203_v22, 2  ;;  %v5274_v59 = vld [vmem:[#allocation3 + $0x5] sm:$0x1]  ;;  %v1551_v14 = vsel %vm222_vm1, %v1521_v32, %v1537_v25 }
  0x78   :  { %4726 = vrot.lane.b32.xlu1 %v4725_v9, %s4858_s15  ;;  %v5239_v9 = vsel %vm222_vm1, %v1410_v12, %v1426_v38  ;;  %v1633_v12 = vld [vmem:[#allocation3 + $0x24] sm:$0x1]  ;;  %v182_v26 = vsel %vm5219_vm5, %v160_v62, %v181_v3  ;;  %7321 = vst [vmem:[#allocation37_spill] sm:$0xff] %v5274_v59  ;;  %v5276_v21 = vld [vmem:[#allocation3 + $0x7] sm:$0x1]  ;;  %v1540_v28 = vrot.slane %v1524_v15, 2  ;;  %v155_v3 = vpack.c.bf16 %v5069_v51, %v5069_v51 }
  0x79   :  { %v1641_v27 = vpack.c.bf16 %v1633_v12, %v1633_v12  ;;  %183 = vst [vmem:[#allocation4 + $0x32] sm:$0x1] %v182_v26  ;;  %v5278_v12 = vld [vmem:[#allocation3 + $0x4] sm:$0x1]  ;;  %v166_v20 = vld [vmem:[#allocation4] sm:$0x1]  ;;  %v240_v38 = vsel %vm222_vm1, %v203_v22, %v219_v56  ;;  %v5291_v32 = vsel %vm222_vm1, %v1523_v49, %v1539_v8  ;;  %v1639_v59 = vpack.c.bf16 %v1631_v42, %v1631_v42 }
  0x7a   :  { %7322 = vst [vmem:[#allocation38_spill] sm:$0xff] %v5276_v21  ;;  %v285_v10 = vld [vmem:[#allocation4 + $0x28] sm:$0x1]  ;;  %v1807_v62 = vshll.u32 %v1785_v44, 16  ;;  %v1632_v24 = vld [vmem:[#allocation3 + $0x14] sm:$0x1]  ;;  %v157_v21 = vpack.c.bf16 %v5053_v34, %v5053_v34  ;;  %v167_v22 = vsel %vm5219_vm5, %v155_v3, %v166_v20  ;;  %v198_v44 = vpack.c.bf16 %v5071_v52, %v5071_v52 }
  0x7b   :  { %v286_v26 = vsel %vm5258_vm7, %v255_v61, %v285_v10  ;;  %v172_v37 = vld [vmem:[#allocation4 + $0x14] sm:$0x1]  ;;  %v1657_v25 = vrot.slane %v1641_v27, 2  ;;  %v257_v61 = vshll.u32 %v240_v38, 16  ;;  %v5306_v49 = vpack.c.bf16 %v1632_v24, %v1632_v24  ;;  %168 = vst [vmem:[#allocation4] sm:$0x1] %v167_v22 }
  0x7c   :  { %1467 = vrot.lane.b32.xlu2 %v1441_v47, %s4858_s15  ;;  %v1538_v47 = vrot.slane %v1522_v55, 2  ;;  %287 = vst [vmem:[#allocation4 + $0x28] sm:$0x1] %v286_v26  ;;  %v1634_v51 = vld [vmem:[#allocation3 + $0x34] sm:$0x1]  ;;  %v173_v34 = vsel %vm5219_vm5, %v157_v21, %v172_v37  ;;  %v200_v38 = vpack.c.bf16 %v5055_v35, %v5055_v35  ;;  %v1571_v8 = vshll.u32 %v1551_v14, 16 }
  0x7d   :  { %v5312_v42 = vpack.c.bf16 %v1634_v51, %v1634_v51  ;;  %v1809_v56 = vrot.slane %v1807_v62, 7  ;;  %v1655_v37 = vrot.slane %v1639_v59, 2  ;;  %174 = vst [vmem:[#allocation4 + $0x14] sm:$0x1] %v173_v34  ;;  %v156_v21 = vpack.c.bf16 %v5086_v0, %v5086_v0  ;;  %v169_v10 = vld [vmem:[#allocation4 + $0xa] sm:$0x1] }
  0x7e   :  { %1463 = vrot.lane.b32.xlu0 %v1433_v46, %s4858_s15  ;;  %v1656_v0 = vrot.slane %v5306_v49, 2  ;;  %v5337_v3 = vld [vmem:[#allocation3 + $0x36] sm:$0x1]  ;;  %v5339_v62 = vld [vmem:[#allocation3 + $0x31] sm:$0x1]  ;;  %v7329_v22 = vrot.slane %v5234_v39, 2 }
  0x7f   :  { %v170_v20 = vsel %vm5219_vm5, %v156_v21, %v169_v10  ;;  %7325 = vst [vmem:[#allocation39_spill] sm:$0xff] %v5339_v62  ;;  %v5341_v26 = vld [vmem:[#allocation3 + $0x33] sm:$0x1]  ;;  %v5345_v51 = vld [vmem:[#allocation3 + $0x37] sm:$0x1] }
  0x80   :  { %1465 = vrot.lane.b32.xlu1 %v1437_v19, %s4858_s15  ;;  %v1554_v19 = vsel %vm222_vm1, %v1522_v55, %v1538_v47  ;;  %v5304_v55 = vsel %vm222_vm1, %v1524_v15, %v1540_v28  ;;  %v5308_v47 = vld [vmem:[#allocation3 + $0x2] sm:$0x1]  ;;  %v5317_v15 = vsel %vm222_vm1, %v1641_v27, %v1657_v25  ;;  %v288_v24 = vld [vmem:[#allocation4 + $0x32] sm:$0x1]  ;;  %v216_v28 = vrot.slane %v200_v38, 2  ;;  %7326 = vst [vmem:[#allocation40_spill] sm:$0xff] %v5341_v26 }
  0x81   :  { %v1573_v52 = vshll.u32 %v1554_v19, 16  ;;  %v289_v19 = vsel %vm5258_vm7, %v257_v61, %v288_v24  ;;  %v5343_v25 = vld [vmem:[#allocation3 + $0x35] sm:$0x1]  ;;  %7328 = vst [vmem:[#allocation42_spill] sm:$0xff] %v5345_v51  ;;  %v5347_v61 = vld [vmem:[#allocation3 + $0x34] sm:$0x1]  ;;  %v5360_v27 = vsel %vm222_vm1, %v1639_v59, %v1655_v37  ;;  %v199_v37 = vpack.c.bf16 %v5088_v1, %v5088_v1 }
  0x82   :  { %290 = vst [vmem:[#allocation4 + $0x32] sm:$0x1] %v289_v19  ;;  %v2240_v19 = vld [vmem:[#allocation3 + $0x12] sm:$0x1]  ;;  %v2241_v62 = vld [vmem:[#allocation3 + $0x22] sm:$0x1] }
  0x83   :  { %7327 = vst [vmem:[#allocation41_spill] sm:$0xff] %v5343_v25  ;;  %v5353_v34 = vpack.i.bf16 %v1573_v52, %v1571_v8  ;;  %v620_v24 = vld [vmem:[#allocation4 + $0x28] sm:$0x1]  ;;  %v175_v8 = vld [vmem:[#allocation4 + $0x1e] sm:$0x1]  ;;  %v2744_v52 = vld [vmem:[#allocation2 + $0x80] sm:$0xff] }
  0x84   :  { %1473 = vrot.lane.b32.xlu2 %v5228_v11, %s4858_s15  ;;  %v2471_v11 = vld [vmem:[#allocation3 + $0x6] sm:$0x1]  ;;  %171 = vst [vmem:[#allocation4 + $0xa] sm:$0x1] %v170_v20  ;;  %v5367_v21 = vld [vmem:[#allocation3 + $0x11] sm:$0x1]  ;;  %v201_v20 = vpack.c.bf16 %v5124_v5, %v5124_v5  ;;  %v5403_v5 = vsel %vm222_vm1, %v5306_v49, %v1656_v0 }
  0x85   :  { %2723 = vst.msk [vmem:[#allocation3] sm:$0xff] %vm18_vm0, %v5010_v41  ;;  %v5362_v41 = vpack.c.bf16 %v2471_v11, %v2471_v11  ;;  %v5369_v26 = vld [vmem:[#allocation3 + $0x13] sm:$0x1]  ;;  %v5371_v51 = vld [vmem:[#allocation3 + $0x15] sm:$0x1]  ;;  %v7337_v1 = vshll.u32 %v5251_v48, 16  ;;  %v5416_v48 = vpack.c.bf16 %v5308_v47, %v5308_v47 }
  0x86   :  { %1469 = vrot.lane.b32.xlu0 %v5239_v9, %s4858_s15  ;;  %v214_v9 = vrot.slane %v198_v44, 2  ;;  %7330 = vst [vmem:[#allocation43_spill] sm:$0xff] %v5369_v26  ;;  %v5375_v59 = vld [vmem:[#allocation3 + $0x14] sm:$0x1]  ;;  %v273_v11 = vld [vmem:[#allocation4] sm:$0x1] }
  0x87   :  { %7331 = vst [vmem:[#allocation44_spill] sm:$0xff] %v5371_v51  ;;  %v5389_v51 = vld [vmem:[#allocation3 + $0x23] sm:$0x1]  ;;  %v5391_v25 = vld [vmem:[#allocation3 + $0x25] sm:$0x1]  ;;  %v2495_v0 = vrot.slane %v5362_v41, 2 }
  0x88   :  { %1471 = vrot.lane.b32.xlu1 %v5242_v23, %s4858_s15  ;;  %v225_v14 = vsel %vm222_vm1, %v198_v44, %v214_v9  ;;  %v1461_v44 = vsel %vm222_vm1, %v5234_v39, %v7329_v22  ;;  %v591_v9 = vpop.permute.xlu2 %590  ;;  %v231_v39 = vsel %vm222_vm1, %v200_v38, %v216_v28  ;;  %v5365_v22 = vld [vmem:[#allocation3 + $0x16] sm:$0x1]  ;;  %v158_v28 = vpack.c.bf16 %v5122_v4, %v5122_v4  ;;  %v279_v49 = vld [vmem:[#allocation4 + $0x14] sm:$0x1] }
  0x89   :  { %v247_v23 = vshll.u32 %v225_v14, 16  ;;  %v1658_v14 = vrot.slane %v5312_v42, 2  ;;  %v621_v10 = vsel %vm5325_vm9, %v591_v9, %v620_v24  ;;  %v5373_v9 = vld [vmem:[#allocation3 + $0x17] sm:$0x1]  ;;  %v251_v38 = vshll.u32 %v231_v39, 16  ;;  %7334 = vst [vmem:[#allocation47_spill] sm:$0xff] %v5389_v51 }
  0x8a   :  { %7332 = vst [vmem:[#allocation45_spill] sm:$0xff] %v5373_v9  ;;  %v5385_v24 = vld [vmem:[#allocation3 + $0x26] sm:$0x1]  ;;  %v5387_v9 = vld [vmem:[#allocation3 + $0x21] sm:$0x1]  ;;  %v4750_v4 = vpack.i.bf16 %v1809_v56, %v7337_v1  ;;  %v5405_v39 = vpack.c.bf16 %v2240_v19, %v2240_v19  ;;  %v215_v56 = vrot.slane %v199_v37, 2  ;;  %v5419_v19 = vpack.c.bf16 %v2241_v62, %v2241_v62 }
  0x8b   :  { %622 = vst [vmem:[#allocation4 + $0x28] sm:$0x1] %v621_v10  ;;  %v5395_v10 = vld [vmem:[#allocation3 + $0x24] sm:$0x1]  ;;  %v2474_v51 = vld [vmem:[#allocation3 + $0x36] sm:$0x1] }
  0x8c   :  { %4736 = vrot.lane.b32.xlu2 %v5265_v17, %s4858_s15  ;;  %7333 = vst [vmem:[#allocation46_spill] sm:$0xff] %v5387_v9  ;;  %v5393_v17 = vld [vmem:[#allocation3 + $0x27] sm:$0x1]  ;;  %v274_v9 = vsel %vm5258_vm7, %v247_v23, %v273_v11  ;;  %v280_v23 = vsel %vm5258_vm7, %v251_v38, %v279_v49  ;;  %v2473_v11 = vld [vmem:[#allocation3 + $0x26] sm:$0x1]  ;;  %v217_v1 = vrot.slane %v201_v20, 2  ;;  %v2482_v47 = vpack.c.bf16 %v2474_v51, %v2474_v51 }
  0x8d   :  { %7335 = vst [vmem:[#allocation48_spill] sm:$0xff] %v5391_v25  ;;  %v2242_v25 = vld [vmem:[#allocation3 + $0x32] sm:$0x1]  ;;  %v2264_v62 = vrot.slane %v5405_v39, 2  ;;  %v7338_v38 = vshll.u32 %v5291_v32, 16  ;;  %v7339_v51 = vshll.u32 %v5304_v55, 16 }
  0x8e   :  { %7336 = vst [vmem:[#allocation49_spill] sm:$0xff] %v5393_v17  ;;  %1475 = vrot.lane.b32.xlu0 %v5268_v7, %s4858_s15  ;;  %v2472_v17 = vld [vmem:[#allocation3 + $0x16] sm:$0x1]  ;;  %v5412_v7 = vsel %vm222_vm1, %v5312_v42, %v1658_v14  ;;  %v1696_v42 = vrot.slane %v5403_v5, 7  ;;  %v228_v14 = vsel %vm222_vm1, %v199_v37, %v215_v56  ;;  %v276_v56 = vld [vmem:[#allocation4 + $0xa] sm:$0x1]  ;;  %v234_v32 = vsel %vm222_vm1, %v201_v20, %v217_v1 }
  0x8f   :  { %275 = vst [vmem:[#allocation4] sm:$0x1] %v274_v9  ;;  %v176_v9 = vsel %vm5219_vm5, %v158_v28, %v175_v8  ;;  %v5430_v26 = vpack.c.bf16 %v2472_v17, %v2472_v17  ;;  %v4745_v49 = vpack.i.bf16 %v7339_v51, %v7338_v38  ;;  %v1698_v37 = vrot.slane %v5412_v7, 7  ;;  %v184_v8 = vld [vmem:[#allocation4 + $0x3c] sm:$0x1] }
  0x90   :  { %2748 = vst.msk [vmem:[#allocation3 + $0x30] sm:$0xff] %vm18_vm0, %v2744_v52  ;;  %1477 = vrot.lane.b32.xlu1 %v1461_v44, %s4858_s15  ;;  %v249_v52 = vshll.u32 %v228_v14, 16  ;;  %v161_v44 = vpack.c.bf16 %v5155_v63, %v5155_v63  ;;  %v2263_v28 = vrot.slane %v5416_v48, 2  ;;  %v2265_v55 = vrot.slane %v5419_v19, 2 }
  0x91   :  { %281 = vst [vmem:[#allocation4 + $0x14] sm:$0x1] %v280_v23  ;;  %v2498_v17 = vrot.slane %v2482_v47, 2  ;;  %v204_v23 = vpack.c.bf16 %v5157_v50, %v5157_v50  ;;  %v2496_v14 = vrot.slane %v5430_v26, 2  ;;  %v307_v20 = vpack.c.bf16 %v5057_v36, %v5057_v36 }
  0x92   :  { %2731 = vst.msk [vmem:[#allocation3 + $0x10] sm:$0xff] %vm18_vm0, %v4948_v18  ;;  %v5446_v18 = vsel %vm222_vm1, %v5362_v41, %v2495_v0  ;;  %v277_v63 = vsel %vm5258_vm7, %v249_v52, %v276_v56  ;;  %v185_v1 = vsel %vm5219_vm5, %v161_v44, %v184_v8 }
  0x93   :  { %2739 = vst.msk [vmem:[#allocation3 + $0x20] sm:$0xff] %vm18_vm0, %v5016_v43  ;;  %v2481_v43 = vpack.c.bf16 %v2473_v11, %v2473_v11  ;;  %v583_v41 = vpop.permute.xlu0 %582  ;;  %v623_v11 = vld [vmem:[#allocation4 + $0x32] sm:$0x1]  ;;  %v323_v51 = vrot.slane %v307_v20, 2 }
  0x94   :  { %177 = vst [vmem:[#allocation4 + $0x1e] sm:$0x1] %v176_v9  ;;  %4751 = vrot.lane.b32.xlu2 %v4750_v4, %s4858_s15  ;;  %v414_v4 = vpack.c.bf16 %v5059_v40, %v5059_v40  ;;  %v5466_v9 = vpack.c.bf16 %v2242_v25, %v2242_v25  ;;  %v162_v40 = vpack.c.bf16 %v5180_v60, %v5180_v60 }
  0x95   :  { %278 = vst [vmem:[#allocation4 + $0xa] sm:$0x1] %v277_v63  ;;  %v2497_v8 = vrot.slane %v2481_v43, 2  ;;  %v220_v63 = vrot.slane %v204_v23, 2 }
  0x96   :  { %4741 = vrot.lane.b32.xlu0 %v5353_v34, %s4858_s15  ;;  %v608_v0 = vld [vmem:[#allocation4] sm:$0x1]  ;;  %v253_v34 = vshll.u32 %v234_v32, 16  ;;  %v430_v36 = vrot.slane %v414_v4, 2  ;;  %186 = vst [vmem:[#allocation4 + $0x3c] sm:$0x1] %v185_v1  ;;  %v205_v1 = vpack.c.bf16 %v5182_v30, %v5182_v30  ;;  %v305_v30 = vpack.c.bf16 %v5073_v53, %v5073_v53 }
  0x97   :  { %v609_v50 = vsel %vm5325_vm9, %v583_v41, %v608_v0  ;;  %v187_v32 = vld [vmem:[#allocation4 + $0x46] sm:$0x1]  ;;  %v339_v41 = vsel %vm222_vm1, %v307_v20, %v323_v51  ;;  %v2266_v51 = vrot.slane %v5466_v9, 2 }
  0x98   :  { %610 = vst [vmem:[#allocation4] sm:$0x1] %v609_v50  ;;  %v614_v38 = vld [vmem:[#allocation4 + $0x14] sm:$0x1]  ;;  %4746 = vrot.lane.b32.xlu1 %v4745_v49, %s4858_s15  ;;  %v386_v49 = vld [vmem:[#allocation4 + $0x14] sm:$0x2]  ;;  %v444_v0 = vsel %vm222_vm1, %v414_v4, %v430_v36  ;;  %v188_v4 = vsel %vm5219_vm5, %v162_v40, %v187_v32 }
  0x99   :  { %v2535_v50 = vrot.slane %v5446_v18, 7  ;;  %v466_v36 = vshll.u32 %v444_v0, 16  ;;  %v7343_v40 = vrot.slane %v5360_v27, 7  ;;  %v321_v32 = vrot.slane %v305_v30, 2  ;;  %189 = vst [vmem:[#allocation4 + $0x46] sm:$0x1] %v188_v4 }
  0x9a   :  { %v2273_v27 = vsel %vm222_vm1, %v5416_v48, %v2263_v28  ;;  %v3113_v0 = vld [vmem:[#allocation3 + $0x11] sm:$0x1] }
  0x9b   :  { %v282_v20 = vld [vmem:[#allocation4 + $0x1e] sm:$0x1]  ;;  %v5545_v4 = vpack.c.bf16 %v3113_v0, %v3113_v0 }
  0x9c   :  { %v593_v44 = vpop.permute.xlu2 %592 }
  0x9d   :  { %v624_v25 = vsel %vm5325_vm9, %v593_v44, %v623_v11  ;;  %v5487_v11 = vsel %vm222_vm1, %v2482_v47, %v2498_v17  ;;  %v283_v44 = vsel %vm5258_vm7, %v253_v34, %v282_v20  ;;  %v7342_v47 = vrot.slane %v5317_v15, 7 }
  0x9e   :  { %625 = vst [vmem:[#allocation4 + $0x32] sm:$0x1] %v624_v25  ;;  %v5502_v17 = vsel %vm222_vm1, %v5430_v26, %v2496_v14  ;;  %1703 = vrot.lane.b32.xlu0 %v7343_v40, %s4858_s15  ;;  %v2538_v53 = vrot.slane %v5487_v11, 7  ;;  %v5511_v15 = vsel %vm222_vm1, %v2481_v43, %v2497_v8  ;;  %v2277_v26 = vsel %vm222_vm1, %v5405_v39, %v2264_v62  ;;  %v3345_v25 = vld [vmem:[#allocation3 + $0x15] sm:$0x1] }
  0x9f   :  { %1707 = vrot.lane.b32.xlu2 %v7342_v47, %s4858_s15  ;;  %284 = vst [vmem:[#allocation4 + $0x1e] sm:$0x1] %v283_v44  ;;  %v310_v43 = vpack.c.bf16 %v5117_v57, %v5117_v57  ;;  %v417_v8 = vpack.c.bf16 %v5119_v45, %v5119_v45  ;;  %v2536_v62 = vrot.slane %v5502_v17, 7  ;;  %v2537_v48 = vrot.slane %v5511_v15, 7  ;;  %v110_v57 = vld [vmem:[#allocation2 + $0x8] sm:$0x3] }
  0xa0   :  { %v587_v52 = vpop.permute.xlu1 %586  ;;  %1705 = vrot.lane.b32.xlu1 %v1696_v42, %s4858_s15  ;;  %v3353_v45 = vpack.c.bf16 %v3345_v25, %v3345_v25  ;;  %v3344_v44 = vld [vmem:[#allocation3 + $0x5] sm:$0x1]  ;;  %114 = vst.msk [vmem:[#allocation3 + $0x8] sm:$0x3] %vm20_vm2, %v110_v57  ;;  %v729_v25 = vld [vmem:[#allocation4] sm:$0x1] }
  0xa1   :  { %v615_v56 = vsel %vm5325_vm9, %v587_v52, %v614_v38  ;;  %v363_v52 = vrot.slane %v339_v41, 7  ;;  %v243_v38 = vsel %vm222_vm1, %v204_v23, %v220_v63  ;;  %v221_v63 = vrot.slane %v205_v1, 2  ;;  %v3114_v41 = vld [vmem:[#allocation3 + $0x21] sm:$0x1] }
  0xa2   :  { %616 = vst [vmem:[#allocation4 + $0x14] sm:$0x1] %v615_v56  ;;  %v3112_v56 = vld [vmem:[#allocation3 + $0x1] sm:$0x1]  ;;  %v259_v34 = vshll.u32 %v243_v38, 16  ;;  %v326_v20 = vrot.slane %v310_v43, 2  ;;  %v5542_v42 = vpack.c.bf16 %v3114_v41, %v3114_v41  ;;  %v3352_v40 = vpack.c.bf16 %v3344_v44, %v3344_v44 }
  0xa3   :  { %v387_v23 = vsel %vm5478_vm12, %v363_v52, %v386_v49  ;;  %v5517_v14 = vpack.c.bf16 %v3112_v56, %v3112_v56  ;;  %v291_v49 = vld [vmem:[#allocation4 + $0x3c] sm:$0x1]  ;;  %v246_v39 = vsel %vm222_vm1, %v205_v1, %v221_v63  ;;  %v468_v52 = vrot.slane %v466_v36, 7  ;;  %v395_v36 = vld [vmem:[#allocation4 + $0x32] sm:$0x2] }
  0xa4   :  { %388 = vst [vmem:[#allocation4 + $0x14] sm:$0x2] %v387_v23  ;;  %v292_v28 = vsel %vm5258_vm7, %v259_v34, %v291_v49  ;;  %v433_v38 = vrot.slane %v417_v8, 2  ;;  %v331_v1 = vsel %vm222_vm1, %v305_v30, %v321_v32  ;;  %v261_v47 = vshll.u32 %v246_v39, 16  ;;  %v5553_v63 = vpop.permute.xlu2 %4696 }
  0xa5   :  { %293 = vst [vmem:[#allocation4 + $0x3c] sm:$0x1] %v292_v28  ;;  %v3136_v56 = vrot.slane %v5517_v14, 2  ;;  %v351_v23 = vsel %vm222_vm1, %v310_v43, %v326_v20  ;;  %v306_v30 = vpack.c.bf16 %v5090_v2, %v5090_v2  ;;  %v361_v49 = vrot.slane %v331_v1, 7  ;;  %v294_v28 = vld [vmem:[#allocation4 + $0x46] sm:$0x1] }
  0xa6   :  { %v453_v34 = vsel %vm222_vm1, %v417_v8, %v433_v38  ;;  %v366_v43 = vrot.slane %v351_v23, 7  ;;  %v1760_v8 = vpack.c.bf16 %v5365_v22, %v5365_v22  ;;  %v412_v2 = vpack.c.bf16 %v5075_v54, %v5075_v54  ;;  %1709 = vrot.lane.b32.xlu0 %v1698_v37, %s4858_s15  ;;  %v380_v20 = vld [vmem:[#allocation4] sm:$0x2] }
  0xa7   :  { %2305 = vrot.lane.b32.xlu2 %v2277_v26, %s4858_s15  ;;  %v4698_v26 = vunpack.i.l.bf16 %v5553_v63  ;;  %v475_v39 = vshll.u32 %v453_v34, 16  ;;  %v3369_v57 = vrot.slane %v3353_v45, 2  ;;  %v3138_v22 = vrot.slane %v5542_v42, 2 }
  0xa8   :  { %v396_v38 = vsel %vm5478_vm12, %v366_v43, %v395_v36  ;;  %v3137_v54 = vrot.slane %v5545_v4, 2  ;;  %v295_v7 = vsel %vm5258_vm7, %v261_v47, %v294_v28  ;;  %v3368_v44 = vrot.slane %v3352_v40, 2  ;;  %2303 = vrot.lane.b32.xlu1 %v2273_v27, %s4858_s15 }
  0xa9   :  { %v730_v37 = vsel %vm5557_vm15, %v4698_v26, %v729_v25  ;;  %397 = vst [vmem:[#allocation4 + $0x32] sm:$0x2] %v396_v38  ;;  %v1776_v1 = vrot.slane %v1760_v8, 2  ;;  %v381_v23 = vsel %vm5478_vm12, %v361_v49, %v380_v20  ;;  %v428_v34 = vrot.slane %v412_v2, 2 }
  0xaa   :  { %731 = vst [vmem:[#allocation4] sm:$0x1] %v730_v37  ;;  %v322_v36 = vrot.slane %v306_v30, 2  ;;  %v477_v43 = vrot.slane %v475_v39, 7  ;;  %v5583_v47 = vsel %vm222_vm1, %v3353_v45, %v3369_v57  ;;  %v1761_v25 = vpack.c.bf16 %v5385_v24, %v5385_v24  ;;  %v3346_v45 = vld [vmem:[#allocation3 + $0x25] sm:$0x1] }
  0xab   :  { %v500_v41 = vld [vmem:[#allocation4 + $0x14] sm:$0x2]  ;;  %296 = vst [vmem:[#allocation4 + $0x46] sm:$0x1] %v295_v7  ;;  %v413_v26 = vpack.c.bf16 %v5098_v13, %v5098_v13  ;;  %v2281_v27 = vsel %vm222_vm1, %v5419_v19, %v2265_v55  ;;  %v2285_v49 = vsel %vm222_vm1, %v5466_v9, %v2266_v51  ;;  %v438_v39 = vsel %vm222_vm1, %v412_v2, %v428_v34  ;;  %v5600_v24 = vld [vmem:[#allocation3 + $0x8] sm:$0x1] }
  0xac   :  { %v501_v0 = vsel %vm5538_vm14, %v468_v52, %v500_v41  ;;  %v3115_v52 = vld [vmem:[#allocation3 + $0x31] sm:$0x1]  ;;  %v1365_v41 = vld [vmem:[#allocation2 + $0x18] sm:$0x3]  ;;  %382 = vst [vmem:[#allocation4] sm:$0x2] %v381_v23  ;;  %v1788_v13 = vsel %vm222_vm1, %v1760_v8, %v1776_v1  ;;  %v335_v57 = vsel %vm222_vm1, %v306_v30, %v322_v36  ;;  %v5610_v55 = vsel %vm222_vm1, %v5542_v42, %v3138_v22 }
  0xad   :  { %502 = vst [vmem:[#allocation4 + $0x14] sm:$0x2] %v501_v0  ;;  %v5597_v0 = vpack.c.bf16 %v3115_v52, %v3115_v52  ;;  %v460_v28 = vshll.u32 %v438_v39, 16  ;;  %v429_v20 = vrot.slane %v413_v26, 2  ;;  %v119_v19 = vld [vmem:[#allocation2 + $0x28] sm:$0x3]  ;;  %v5616_v9 = vsel %vm222_vm1, %v5517_v14, %v3136_v56 }
  0xae   :  { %1369 = vst.msk [vmem:[#allocation3 + $0x8] sm:$0x3] %vm20_vm2, %v1365_v41  ;;  %v3409_v51 = vrot.slane %v5583_v47, 7  ;;  %v5620_v30 = vsel %vm222_vm1, %v3352_v40, %v3368_v44  ;;  %v3347_v8 = vld [vmem:[#allocation3 + $0x35] sm:$0x1]  ;;  %2307 = vrot.lane.b32.xlu0 %v2281_v27, %s4858_s15  ;;  %v1777_v18 = vrot.slane %v1761_v25, 2  ;;  %v308_v22 = vpack.c.bf16 %v5126_v58, %v5126_v58  ;;  %v5626_v38 = vpop.permute.xlu2 %4711 }
  0xaf   :  { %2543 = vrot.lane.b32.xlu2 %v2535_v50, %s4858_s15  ;;  %v383_v50 = vld [vmem:[#allocation4 + $0xa] sm:$0x2]  ;;  %v362_v2 = vrot.slane %v335_v57, 7  ;;  %v441_v42 = vsel %vm222_vm1, %v413_v26, %v429_v20  ;;  %v5630_v56 = vsel %vm222_vm1, %v5545_v4, %v3137_v54  ;;  %v1810_v40 = vshll.u32 %v1788_v13, 16  ;;  %124 = vst.msk [vmem:[#allocation3 + $0x18] sm:$0x3] %vm20_vm2, %v119_v19 }
  0xb0   :  { %v509_v14 = vld [vmem:[#allocation4 + $0x32] sm:$0x2]  ;;  %v3354_v7 = vpack.c.bf16 %v3346_v45, %v3346_v45  ;;  %v462_v37 = vrot.slane %v460_v28, 7  ;;  %v3139_v44 = vrot.slane %v5597_v0, 2  ;;  %v3355_v1 = vpack.c.bf16 %v3347_v8, %v3347_v8  ;;  %v129_v23 = vld [vmem:[#allocation2 + $0x48] sm:$0x3]  ;;  %2309 = vrot.lane.b32.xlu1 %v2285_v49, %s4858_s15 }
  0xb1   :  { %v510_v52 = vsel %vm5538_vm14, %v477_v43, %v509_v14  ;;  %v2362_v58 = vpack.c.bf16 %v5347_v61, %v5347_v61  ;;  %v4699_v34 = vunpack.i.h.bf16 %v5553_v63  ;;  %v611_v4 = vld [vmem:[#allocation4 + $0xa] sm:$0x1]  ;;  %v3408_v54 = vrot.slane %v5620_v30, 7  ;;  %134 = vst.msk [vmem:[#allocation3 + $0x28] sm:$0x3] %vm20_vm2, %v129_v23 }
  0xb2   :  { %511 = vst [vmem:[#allocation4 + $0x32] sm:$0x2] %v510_v52  ;;  %v384_v36 = vsel %vm5478_vm12, %v362_v2, %v383_v50  ;;  %v463_v41 = vshll.u32 %v441_v42, 16  ;;  %v1762_v26 = vpack.c.bf16 %v5337_v3, %v5337_v3  ;;  %v2359_v61 = vpack.c.bf16 %v5278_v12, %v5278_v12  ;;  %v1374_v14 = vld [vmem:[#allocation2 + $0x38] sm:$0x3] }
  0xb3   :  { %v494_v43 = vld [vmem:[#allocation4] sm:$0x2]  ;;  %385 = vst [vmem:[#allocation4 + $0xa] sm:$0x2] %v384_v36  ;;  %v324_v27 = vrot.slane %v308_v22, 2  ;;  %v415_v49 = vpack.c.bf16 %v5128_v6, %v5128_v6  ;;  %v1791_v45 = vsel %vm222_vm1, %v1761_v25, %v1777_v18  ;;  %v5650_v39 = vrot.slane %v1810_v40, 7 }
  0xb4   :  { %v3370_v13 = vrot.slane %v3354_v7, 2  ;;  %v495_v28 = vsel %vm5538_vm14, %v462_v37, %v494_v43  ;;  %v857_v20 = vld [vmem:[#allocation4 + $0x14] sm:$0x2]  ;;  %v3371_v3 = vrot.slane %v3355_v1, 2  ;;  %v2378_v19 = vrot.slane %v2362_v58, 2 }
  0xb5   :  { %v2591_v57 = vld [vmem:[#allocation3 + $0x8] sm:$0x1]  ;;  %496 = vst [vmem:[#allocation4] sm:$0x2] %v495_v28  ;;  %v2360_v8 = vpack.c.bf16 %v5375_v59, %v5375_v59  ;;  %v1778_v18 = vrot.slane %v1762_v26, 2  ;;  %v2375_v50 = vrot.slane %v2359_v61, 2  ;;  %v343_v2 = vsel %vm222_vm1, %v308_v22, %v324_v27 }
  0xb6   :  { %v2599_v12 = vpack.c.bf16 %v2591_v57, %v2591_v57  ;;  %v431_v42 = vrot.slane %v415_v49, 2  ;;  %2545 = vrot.lane.b32.xlu0 %v2536_v62, %s4858_s15  ;;  %v465_v11 = vrot.slane %v463_v41, 7  ;;  %v389_v40 = vld [vmem:[#allocation4 + $0x1e] sm:$0x2]  ;;  %v2361_v37 = vpack.c.bf16 %v5395_v10, %v5395_v10  ;;  %v5674_v52 = vld [vmem:[#allocation3 + $0x18] sm:$0x1]  ;;  %v830_v23 = vpop.permute.xlu2 %829 }
  0xb7   :  { %2549 = vrot.lane.b32.xlu2 %v2538_v53, %s4858_s15  ;;  %v1813_v22 = vshll.u32 %v1791_v45, 16  ;;  %v5677_v36 = vsel %vm222_vm1, %v3354_v7, %v3370_v13  ;;  %v364_v43 = vrot.slane %v343_v2, 7  ;;  %v858_v62 = vsel %vm5662_vm4, %v830_v23, %v857_v20  ;;  %1378 = vst.msk [vmem:[#allocation3 + $0x18] sm:$0x3] %vm20_vm2, %v1374_v14  ;;  %v2720_v23 = vld [vmem:[#allocation2 + $0x28] sm:$0x3] }
  0xb8   :  { %v585_v25 = vpop.permute.xlu0 %584  ;;  %v2615_v53 = vrot.slane %v2599_v12, 2  ;;  %v447_v17 = vsel %vm222_vm1, %v415_v49, %v431_v42  ;;  %v5683_v41 = vsel %vm222_vm1, %v3355_v1, %v3371_v3  ;;  %v5686_v10 = vsel %vm222_vm1, %v2362_v58, %v2378_v19  ;;  %859 = vst [vmem:[#allocation4 + $0x14] sm:$0x2] %v858_v62  ;;  %2547 = vrot.lane.b32.xlu1 %v2537_v48, %s4858_s15  ;;  %v626_v58 = vld [vmem:[#allocation4 + $0x3c] sm:$0x1] }
  0xb9   :  { %v612_v59 = vsel %vm5325_vm9, %v585_v25, %v611_v4  ;;  %v617_v4 = vld [vmem:[#allocation4 + $0x1e] sm:$0x1]  ;;  %v2376_v27 = vrot.slane %v2360_v8, 2  ;;  %v1794_v49 = vsel %vm222_vm1, %v1762_v26, %v1778_v18  ;;  %v5694_v45 = vsel %vm222_vm1, %v2359_v61, %v2375_v50  ;;  %v3225_v25 = vld [vmem:[#allocation3 + $0x13] sm:$0x1] }
  0xba   :  { %613 = vst [vmem:[#allocation4 + $0xa] sm:$0x1] %v612_v59  ;;  %v497_v7 = vld [vmem:[#allocation4 + $0xa] sm:$0x2]  ;;  %v390_v1 = vsel %vm5478_vm12, %v364_v43, %v389_v40  ;;  %v469_v13 = vshll.u32 %v447_v17, 16  ;;  %v3410_v28 = vrot.slane %v5677_v36, 7  ;;  %v2625_v20 = vsel %vm222_vm1, %v2599_v12, %v2615_v53  ;;  %v589_v48 = vpop.permute.xlu1 %588 }
  0xbb   :  { %v498_v57 = vsel %vm5538_vm14, %v465_v11, %v497_v7  ;;  %391 = vst [vmem:[#allocation4 + $0x1e] sm:$0x2] %v390_v1  ;;  %v2377_v15 = vrot.slane %v2361_v37, 2  ;;  %v5702_v3 = vrot.slane %v1813_v22, 7  ;;  %v3411_v26 = vrot.slane %v5683_v41, 7  ;;  %v7350_v17 = vld [vmem:[#allocation8_spill] sm:$0xff] }
  0xbc   :  { %499 = vst [vmem:[#allocation4 + $0xa] sm:$0x2] %v498_v57  ;;  %v309_v61 = vpack.c.bf16 %v5150_v29, %v5150_v29  ;;  %v416_v19 = vpack.c.bf16 %v5153_v16, %v5153_v16  ;;  %v618_v18 = vsel %vm5325_vm9, %v589_v48, %v617_v4  ;;  %v866_v50 = vld [vmem:[#allocation4 + $0x32] sm:$0x2]  ;;  %v2413_v12 = vshll.u32 %v5686_v10, 16 }
  0xbd   :  { %v1816_v2 = vshll.u32 %v1794_v49, 16  ;;  %v2407_v42 = vshll.u32 %v5694_v45, 16  ;;  %619 = vst [vmem:[#allocation4 + $0x1e] sm:$0x1] %v618_v18  ;;  %v2647_v14 = vshll.u32 %v2625_v20, 16  ;;  %v471_v59 = vrot.slane %v469_v13, 7 }
  0xbe   :  { %v5716_v29 = vsel %vm222_vm1, %v2360_v8, %v2376_v27  ;;  %v325_v16 = vrot.slane %v309_v61, 2  ;;  %v3226_v11 = vld [vmem:[#allocation3 + $0x23] sm:$0x1]  ;;  %3176 = vrot.lane.b32.xlu0 %v5616_v9, %s4858_s15  ;;  %v1014_v22 = vpack.c.bf16 %v5047_v31, %v5047_v31  ;;  %v1026_v43 = vld [vmem:[#allocation4 + $0x16] sm:$0x1]  ;;  %v2391_v62 = vsel %vm222_vm1, %v2361_v37, %v2377_v15  ;;  %v836_v9 = vpop.permute.xlu2 %835 }
  0xbf   :  { %3180 = vrot.lane.b32.xlu2 %v5610_v55, %s4858_s15  ;;  %v1054_v55 = vpack.c.bf16 %v7350_v17, %v7350_v17  ;;  %v392_v4 = vld [vmem:[#allocation4 + $0x28] sm:$0x2]  ;;  %v5725_v8 = vpack.c.bf16 %v3225_v25, %v3225_v25  ;;  %2724 = vst.msk [vmem:[#allocation3 + $0x8] sm:$0x3] %vm20_vm2, %v2720_v23  ;;  %v432_v49 = vrot.slane %v416_v19, 2  ;;  %v867_v37 = vsel %vm5662_vm4, %v836_v9, %v866_v50 }
  0xc0   :  { %v595_v40 = vpop.permute.xlu0 %594  ;;  %v347_v31 = vsel %vm222_vm1, %v309_v61, %v325_v16  ;;  %v2592_v1 = vld [vmem:[#allocation3 + $0x18] sm:$0x1]  ;;  %v629_v13 = vld [vmem:[#allocation4 + $0x46] sm:$0x1]  ;;  %v1027_v63 = vsel %vm5219_vm5, %v1014_v22, %v1026_v43  ;;  %868 = vst [vmem:[#allocation4 + $0x32] sm:$0x2] %v867_v37  ;;  %3178 = vrot.lane.b32.xlu1 %v5630_v56, %s4858_s15  ;;  %v3234_v16 = vpack.c.bf16 %v3226_v11, %v3226_v11  ;;  %v4714_v43 = vunpack.i.h.bf16 %v5626_v38 }
  0xc1   :  { %v732_v53 = vld [vmem:[#allocation4 + $0xa] sm:$0x1]  ;;  %v627_v7 = vsel %vm5325_vm9, %v595_v40, %v626_v58  ;;  %v1070_v57 = vrot.slane %v1054_v55, 2  ;;  %v3158_v58 = vsel %vm222_vm1, %v5597_v0, %v3139_v44  ;;  %v1818_v20 = vrot.slane %v1816_v2, 7  ;;  %1028 = vst [vmem:[#allocation4 + $0x16] sm:$0x1] %v1027_v63 }
  0xc2   :  { %v733_v27 = vsel %vm5557_vm15, %v4699_v34, %v732_v53  ;;  %v365_v34 = vrot.slane %v347_v31, 7  ;;  %v503_v15 = vld [vmem:[#allocation4 + $0x1e] sm:$0x2]  ;;  %v2409_v48 = vshll.u32 %v5716_v29, 16  ;;  %v2600_v61 = vpack.c.bf16 %v2592_v1, %v2592_v1  ;;  %628 = vst [vmem:[#allocation4 + $0x3c] sm:$0x1] %v627_v7  ;;  %v597_v53 = vpop.permute.xlu1 %596 }
  0xc3   :  { %734 = vst [vmem:[#allocation4 + $0xa] sm:$0x1] %v733_v27  ;;  %v2649_v25 = vrot.slane %v2647_v14, 7  ;;  %v504_v18 = vsel %vm5538_vm14, %v471_v59, %v503_v15  ;;  %v2411_v50 = vshll.u32 %v2391_v62, 16  ;;  %v450_v40 = vsel %vm222_vm1, %v416_v19, %v432_v49  ;;  %v1383_v44 = vld [vmem:[#allocation2 + $0x58] sm:$0x3] }
  0xc4   :  { %v393_v56 = vsel %vm5478_vm12, %v365_v34, %v392_v4  ;;  %v3249_v0 = vrot.slane %v5725_v8, 2  ;;  %v7351_v2 = vld [vmem:[#allocation25_spill] sm:$0xff]  ;;  %v630_v14 = vsel %vm5325_vm9, %v597_v53, %v629_v13  ;;  %v5759_v59 = vsel %vm222_vm1, %v1054_v55, %v1070_v57  ;;  %505 = vst [vmem:[#allocation4 + $0x1e] sm:$0x2] %v504_v18  ;;  %v5761_v11 = vld [vmem:[#allocation3 + $0x28] sm:$0x1] }
  0xc5   :  { %v5754_v29 = vpack.c.bf16 %v7351_v2, %v7351_v2  ;;  %v2616_v23 = vrot.slane %v2600_v61, 2  ;;  %v7352_v22 = vld [vmem:[#allocation16_spill] sm:$0xff]  ;;  %v4713_v17 = vunpack.i.l.bf16 %v5626_v38  ;;  %631 = vst [vmem:[#allocation4 + $0x46] sm:$0x1] %v630_v14  ;;  %v4755_v55 = vpack.i.bf16 %v5702_v3, %v5650_v39  ;;  %v1035_v4 = vld [vmem:[#allocation4 + $0x34] sm:$0x1] }
  0xc6   :  { %v1017_v19 = vpack.c.bf16 %v7352_v22, %v7352_v22  ;;  %v2728_v62 = vld [vmem:[#allocation2 + $0x48] sm:$0x3]  ;;  %v7353_v27 = vld [vmem:[#allocation17_spill] sm:$0xff]  ;;  %3182 = vrot.lane.b32.xlu0 %v3158_v58, %s4858_s15  ;;  %394 = vst [vmem:[#allocation4 + $0x28] sm:$0x2] %v393_v56  ;;  %v472_v7 = vshll.u32 %v450_v40, 16  ;;  %v5783_v39 = vpack.i.bf16 %v2649_v25, %v2413_v12  ;;  %v5787_v3 = vpack.i.bf16 %v2407_v42, %v1818_v20 }
  0xc7   :  { %3418 = vrot.lane.b32.xlu2 %v3409_v51, %s4858_s15  ;;  %v1057_v9 = vpack.c.bf16 %v7353_v27, %v7353_v27  ;;  %v3250_v31 = vrot.slane %v3234_v16, 2  ;;  %v7354_v49 = vld [vmem:[#allocation26_spill] sm:$0xff]  ;;  %v5779_v51 = vpop.permute.xlu2 %4716  ;;  %v1104_v1 = vshll.u32 %v5759_v59, 16  ;;  %v5790_v37 = vpack.i.bf16 %v2411_v50, %v2409_v48  ;;  %1387 = vst.msk [vmem:[#allocation3 + $0x28] sm:$0x3] %vm20_vm2, %v1383_v44 }
  0xc8   :  { %v1036_v38 = vsel %vm5219_vm5, %v1017_v19, %v1035_v4  ;;  %v418_v47 = vpack.c.bf16 %v7354_v49, %v7354_v49  ;;  %v139_v13 = vld [vmem:[#allocation2 + $0x68] sm:$0x3]  ;;  %v735_v63 = vld [vmem:[#allocation4 + $0x14] sm:$0x1]  ;;  %v4702_v57 = vpop.permute.xlu0 %4701  ;;  %v5795_v34 = vsel %vm222_vm1, %v5725_v8, %v3249_v0  ;;  %v5798_v10 = vsel %vm222_vm1, %v2600_v61, %v2616_v23  ;;  %2732 = vst.msk [vmem:[#allocation3 + $0x18] sm:$0x3] %vm20_vm2, %v2728_v62 }
  0xc9   :  { %v1073_v45 = vrot.slane %v1057_v9, 2  ;;  %v327_v12 = vrot.slane %v5754_v29, 2  ;;  %v747_v42 = vld [vmem:[#allocation4 + $0x3c] sm:$0x1]  ;;  %v738_v58 = vld [vmem:[#allocation4 + $0x1e] sm:$0x1]  ;;  %v4704_v20 = vunpack.i.h.bf16 %v4702_v57  ;;  %v4703_v15 = vunpack.i.l.bf16 %v4702_v57  ;;  %3416 = vrot.lane.b32.xlu1 %v3408_v54, %s4858_s15 }
  0xca   :  { %v5807_v8 = vpack.c.bf16 %v5600_v24, %v5600_v24  ;;  %1037 = vst [vmem:[#allocation4 + $0x34] sm:$0x1] %v1036_v38  ;;  %v7355_v48 = vld [vmem:[#allocation30_spill] sm:$0xff]  ;;  %v748_v25 = vsel %vm5557_vm15, %v4713_v17, %v747_v42  ;;  %v1130_v18 = vld [vmem:[#allocation4 + $0x16] sm:$0x1]  ;;  %v5813_v50 = vrot.slane %v472_v7, 7  ;;  %v3264_v53 = vsel %vm222_vm1, %v3234_v16, %v3250_v31  ;;  %v4707_v0 = vpop.permute.xlu1 %4706 }
  0xcb   :  { %v312_v61 = vpack.c.bf16 %v7355_v48, %v7355_v48  ;;  %v434_v56 = vrot.slane %v418_v47, 2  ;;  %144 = vst.msk [vmem:[#allocation3 + $0x38] sm:$0x3] %vm20_vm2, %v139_v13  ;;  %v739_v24 = vsel %vm5557_vm15, %v4704_v20, %v738_v58  ;;  %v736_v30 = vsel %vm5557_vm15, %v4703_v15, %v735_v63  ;;  %v741_v54 = vld [vmem:[#allocation4 + $0x28] sm:$0x1]  ;;  %v7356_v38 = vld [vmem:[#allocation31_spill] sm:$0xff] }
  0xcc   :  { %749 = vst [vmem:[#allocation4 + $0x3c] sm:$0x1] %v748_v25  ;;  %v744_v40 = vld [vmem:[#allocation4 + $0x32] sm:$0x1]  ;;  %v3282_v44 = vshll.u32 %v5795_v34, 16  ;;  %v2650_v2 = vshll.u32 %v5798_v10, 16  ;;  %v4709_v16 = vunpack.i.h.bf16 %v4707_v0  ;;  %v4708_v59 = vunpack.i.l.bf16 %v4707_v0 }
  0xcd   :  { %v750_v14 = vld [vmem:[#allocation4 + $0x46] sm:$0x1]  ;;  %740 = vst [vmem:[#allocation4 + $0x1e] sm:$0x1] %v739_v24  ;;  %v851_v23 = vld [vmem:[#allocation4] sm:$0x2]  ;;  %v1093_v22 = vsel %vm222_vm1, %v1057_v9, %v1073_v45  ;;  %v355_v19 = vsel %vm222_vm1, %v5754_v29, %v327_v12  ;;  %v1131_v4 = vsel %vm5258_vm7, %v1104_v1, %v1130_v18  ;;  %v5832_v7 = vsel %vm222_vm1, %v418_v47, %v434_v56 }
  0xce   :  { %v3224_v17 = vld [vmem:[#allocation3 + $0x3] sm:$0x1]  ;;  %v751_v62 = vsel %vm5557_vm15, %v4714_v43, %v750_v14  ;;  %737 = vst [vmem:[#allocation4 + $0x14] sm:$0x1] %v736_v30  ;;  %v506_v27 = vld [vmem:[#allocation4 + $0x28] sm:$0x2]  ;;  %v745_v9 = vsel %vm5557_vm15, %v4709_v16, %v744_v40  ;;  %v742_v29 = vsel %vm5557_vm15, %v4708_v59, %v741_v54  ;;  %3420 = vrot.lane.b32.xlu0 %v3410_v28, %s4858_s15 }
  0xcf   :  { %4756 = vrot.lane.b32.xlu2 %v4755_v55, %s4858_s15  ;;  %v328_v31 = vrot.slane %v312_v61, 2  ;;  %752 = vst [vmem:[#allocation4 + $0x46] sm:$0x1] %v751_v62  ;;  %v3284_v43 = vshll.u32 %v3264_v53, 16  ;;  %v2593_v55 = vld [vmem:[#allocation3 + $0x28] sm:$0x1]  ;;  %v419_v49 = vpack.c.bf16 %v7356_v38, %v7356_v38  ;;  %v5843_v47 = vpop.permute.xlu2 %4731  ;;  %v507_v28 = vsel %vm5538_vm14, %v5813_v50, %v506_v27 }
  0xd0   :  { %746 = vst [vmem:[#allocation4 + $0x32] sm:$0x1] %v745_v9  ;;  %v854_v1 = vld [vmem:[#allocation4 + $0xa] sm:$0x2]  ;;  %v2601_v13 = vpack.c.bf16 %v2593_v55, %v2593_v55  ;;  %v2736_v63 = vld [vmem:[#allocation2 + $0x68] sm:$0x3]  ;;  %v826_v36 = vpop.permute.xlu0 %825  ;;  %v5851_v42 = vpack.c.bf16 %v5761_v11, %v5761_v11  ;;  %v5855_v58 = vpack.c.bf16 %v5674_v52, %v5674_v52  ;;  %v5857_v15 = vpack.c.bf16 %v3224_v17, %v3224_v17 }
  0xd1   :  { %v1110_v57 = vshll.u32 %v1093_v22, 16  ;;  %v367_v34 = vrot.slane %v355_v19, 7  ;;  %v398_v10 = vld [vmem:[#allocation4 + $0x3c] sm:$0x2]  ;;  %v359_v45 = vsel %vm222_vm1, %v312_v61, %v328_v31  ;;  %v1518_v12 = vld [vmem:[#allocation3 + $0x72] sm:$0x1]  ;;  %v852_v61 = vsel %vm5662_vm4, %v826_v36, %v851_v23  ;;  %3422 = vrot.lane.b32.xlu1 %v3411_v26, %s4858_s15 }
  0xd2   :  { %743 = vst [vmem:[#allocation4 + $0x28] sm:$0x1] %v742_v29  ;;  %v1139_v20 = vld [vmem:[#allocation4 + $0x34] sm:$0x1]  ;;  %v3467_v48 = vld [vmem:[#allocation3 + $0x37] sm:$0x1]  ;;  %v4719_v52 = vunpack.i.h.bf16 %v5779_v51  ;;  %v5868_v50 = vpack.i.bf16 %v3284_v43, %v3282_v44  ;;  %v828_v30 = vpop.permute.xlu1 %827  ;;  %v1526_v0 = vpack.c.bf16 %v1518_v12, %v1518_v12  ;;  %v4718_v19 = vunpack.i.l.bf16 %v5779_v51 }
  0xd3   :  { %1132 = vst [vmem:[#allocation4 + $0x16] sm:$0x1] %v1131_v4  ;;  %v2617_v25 = vrot.slane %v2601_v13, 2  ;;  %v5864_v18 = vrot.slane %v2650_v2, 7  ;;  %v478_v11 = vshll.u32 %v5832_v7, 16  ;;  %v368_v53 = vrot.slane %v359_v45, 7 }
  0xd4   :  { %853 = vst [vmem:[#allocation4] sm:$0x2] %v852_v61  ;;  %v435_v56 = vrot.slane %v419_v49, 2  ;;  %v3227_v24 = vld [vmem:[#allocation3 + $0x33] sm:$0x1]  ;;  %v1140_v41 = vsel %vm5258_vm7, %v1110_v57, %v1139_v20  ;;  %v3475_v2 = vpack.c.bf16 %v3467_v48, %v3467_v48  ;;  %v855_v16 = vsel %vm5662_vm4, %v828_v30, %v854_v1 }
  0xd5   :  { %508 = vst [vmem:[#allocation4 + $0x28] sm:$0x2] %v507_v28  ;;  %v2631_v54 = vsel %vm222_vm1, %v2601_v13, %v2617_v25  ;;  %v1392_v26 = vld [vmem:[#allocation2 + $0x78] sm:$0x3]  ;;  %v401_v40 = vld [vmem:[#allocation4 + $0x46] sm:$0x2]  ;;  %v399_v23 = vsel %vm5478_vm12, %v367_v34, %v398_v10  ;;  %v3235_v27 = vpack.c.bf16 %v3227_v24, %v3227_v24  ;;  %v4734_v57 = vunpack.i.h.bf16 %v5843_v47 }
  0xd6   :  { %v3464_v14 = vld [vmem:[#allocation3 + $0x7] sm:$0x1]  ;;  %v860_v44 = vld [vmem:[#allocation4 + $0x1e] sm:$0x2]  ;;  %v2653_v59 = vshll.u32 %v2631_v54, 16  ;;  %v3248_v22 = vrot.slane %v5857_v15, 2  ;;  %4761 = vrot.lane.b32.xlu0 %v5787_v3, %s4858_s15  ;;  %v402_v31 = vsel %vm5478_vm12, %v368_v53, %v401_v40  ;;  %v459_v9 = vsel %vm222_vm1, %v419_v49, %v435_v56 }
  0xd7   :  { %2740 = vst.msk [vmem:[#allocation3 + $0x28] sm:$0x3] %vm20_vm2, %v2736_v63  ;;  %4771 = vrot.lane.b32.xlu2 %v5783_v39, %s4858_s15  ;;  %v5882_v17 = vld [vmem:[#allocation3 + $0x38] sm:$0x1]  ;;  %v1542_v62 = vrot.slane %v1526_v0, 2  ;;  %v3491_v4 = vrot.slane %v3475_v2, 2  ;;  %v3472_v29 = vpack.c.bf16 %v3464_v14, %v3464_v14  ;;  %v1468_v55 = vpop.permute.xlu2 %1467  ;;  %v4733_v25 = vunpack.i.l.bf16 %v5843_v47 }
  0xd8   :  { %856 = vst [vmem:[#allocation4 + $0xa] sm:$0x2] %v855_v16  ;;  %v2655_v7 = vrot.slane %v2653_v59, 7  ;;  %v3465_v43 = vld [vmem:[#allocation3 + $0x17] sm:$0x1]  ;;  %v480_v38 = vrot.slane %v478_v11, 7  ;;  %v832_v49 = vpop.permute.xlu0 %831 }
  0xd9   :  { %1141 = vst [vmem:[#allocation4 + $0x34] sm:$0x1] %v1140_v41  ;;  %v3507_v3 = vsel %vm222_vm1, %v3475_v2, %v3491_v4  ;;  %v3251_v1 = vrot.slane %v3235_v27, 2  ;;  %v3466_v13 = vld [vmem:[#allocation3 + $0x27] sm:$0x1]  ;;  %v3473_v63 = vpack.c.bf16 %v3465_v43, %v3465_v43  ;;  %v1566_v10 = vsel %vm222_vm1, %v1526_v0, %v1542_v62  ;;  %4766 = vrot.lane.b32.xlu1 %v5790_v37, %s4858_s15  ;;  %v7359_v4 = vld [vmem:[#allocation10_spill] sm:$0xff] }
  0xda   :  { %400 = vst [vmem:[#allocation4 + $0x3c] sm:$0x2] %v399_v23  ;;  %v1493_v34 = vld [vmem:[#allocation4 + $0x16] sm:$0x1]  ;;  %v3529_v45 = vshll.u32 %v3507_v3, 16  ;;  %v3474_v12 = vpack.c.bf16 %v3466_v13, %v3466_v13  ;;  %v861_v20 = vsel %vm5662_vm4, %v832_v49, %v860_v44  ;;  %v481_v48 = vshll.u32 %v459_v9, 16  ;;  %v834_v30 = vpop.permute.xlu1 %833 }
  0xdb   :  { %1396 = vst.msk [vmem:[#allocation3 + $0x38] sm:$0x3] %vm20_vm2, %v1392_v26  ;;  %v980_v36 = vld [vmem:[#allocation4] sm:$0x2]  ;;  %v1494_v28 = vsel %vm5325_vm9, %v1468_v55, %v1493_v34  ;;  %v3488_v61 = vrot.slane %v3472_v29, 2  ;;  %v4775_v56 = vpack.i.bf16 %v2655_v7, %v5864_v18  ;;  %v3267_v24 = vsel %vm222_vm1, %v3235_v27, %v3251_v1  ;;  %v7361_v3 = vld [vmem:[#allocation13_spill] sm:$0xff] }
  0xdc   :  { %403 = vst [vmem:[#allocation4 + $0x46] sm:$0x2] %v402_v31  ;;  %v981_v11 = vsel %vm5891_vm6, %v4718_v19, %v980_v36  ;;  %v863_v53 = vld [vmem:[#allocation4 + $0x28] sm:$0x2]  ;;  %v1581_v54 = vshll.u32 %v1566_v10, 16  ;;  %v3489_v37 = vrot.slane %v3473_v63, 2  ;;  %v5915_v2 = vsel %vm222_vm1, %v5857_v15, %v3248_v22 }
  0xdd   :  { %1495 = vst [vmem:[#allocation4 + $0x16] sm:$0x1] %v1494_v28  ;;  %v3498_v41 = vsel %vm222_vm1, %v3472_v29, %v3488_v61  ;;  %v3490_v26 = vrot.slane %v3474_v12, 2  ;;  %v864_v0 = vsel %vm5662_vm4, %v834_v30, %v863_v53  ;;  %v3531_v14 = vrot.slane %v3529_v45, 7  ;;  %v2745_v59 = vld [vmem:[#allocation2 + $0x88] sm:$0x3] }
  0xde   :  { %982 = vst [vmem:[#allocation4] sm:$0x2] %v981_v11  ;;  %v3520_v18 = vshll.u32 %v3498_v41, 16  ;;  %v483_v23 = vrot.slane %v481_v48, 7  ;;  %v3286_v19 = vshll.u32 %v3267_v24, 16  ;;  %v3501_v62 = vsel %vm222_vm1, %v3473_v63, %v3489_v37  ;;  %4776 = vrot.lane.b32.xlu0 %v4775_v56, %s4858_s15  ;;  %v7360_v27 = vld [vmem:[#allocation11_spill] sm:$0xff] }
  0xdf   :  { %v983_v40 = vld [vmem:[#allocation4 + $0xa] sm:$0x2]  ;;  %862 = vst [vmem:[#allocation4 + $0x1e] sm:$0x2] %v861_v20  ;;  %4786 = vrot.lane.b32.xlu2 %v5868_v50, %s4858_s15  ;;  %v3504_v51 = vsel %vm222_vm1, %v3474_v12, %v3490_v26  ;;  %v1052_v7 = vpack.c.bf16 %v7360_v27, %v7360_v27  ;;  %v1474_v50 = vpop.permute.xlu2 %1473  ;;  %v3280_v29 = vshll.u32 %v5915_v2, 16  ;;  %v3523_v43 = vshll.u32 %v3501_v62, 16 }
  0xe0   :  { %v984_v16 = vsel %vm5891_vm6, %v4719_v52, %v983_v40  ;;  %865 = vst [vmem:[#allocation4 + $0x28] sm:$0x2] %v864_v0  ;;  %v1502_v44 = vld [vmem:[#allocation4 + $0x34] sm:$0x1]  ;;  %v3522_v22 = vrot.slane %v3520_v18, 7  ;;  %v1012_v52 = vpack.c.bf16 %v7359_v4, %v7359_v4  ;;  %v1013_v1 = vpack.c.bf16 %v7361_v3, %v7361_v3  ;;  %v838_v63 = vpop.permute.xlu0 %837  ;;  %v7362_v12 = vld [vmem:[#allocation14_spill] sm:$0xff] }
  0xe1   :  { %985 = vst [vmem:[#allocation4 + $0xa] sm:$0x2] %v984_v16  ;;  %v512_v15 = vld [vmem:[#allocation4 + $0x3c] sm:$0x2]  ;;  %v1637_v55 = vld [vmem:[#allocation3 + $0x64] sm:$0x1]  ;;  %v1503_v13 = vsel %vm5325_vm9, %v1474_v50, %v1502_v44  ;;  %v4800_v10 = vpack.i.bf16 %v1581_v54, %v3531_v14  ;;  %v5946_v54 = vpack.c.bf16 %v5882_v17, %v5882_v17 }
  0xe2   :  { %v513_v31 = vsel %vm5538_vm14, %v480_v38, %v512_v15  ;;  %v2594_v9 = vld [vmem:[#allocation3 + $0x38] sm:$0x1]  ;;  %v1635_v45 = vld [vmem:[#allocation3 + $0x44] sm:$0x1]  ;;  %v1053_v38 = vpack.c.bf16 %v7362_v12, %v7362_v12  ;;  %1504 = vst [vmem:[#allocation4 + $0x34] sm:$0x1] %v1503_v13  ;;  %v4790_v28 = vpack.i.bf16 %v3522_v22, %v3286_v19  ;;  %v1645_v48 = vpack.c.bf16 %v1637_v55, %v1637_v55  ;;  %v840_v41 = vpop.permute.xlu1 %839 }
  0xe3   :  { %514 = vst [vmem:[#allocation4 + $0x3c] sm:$0x2] %v513_v31  ;;  %v2602_v34 = vpack.c.bf16 %v2594_v9, %v2594_v9  ;;  %v515_v49 = vld [vmem:[#allocation4 + $0x46] sm:$0x2]  ;;  %v3526_v20 = vshll.u32 %v3504_v51, 16  ;;  %v1643_v53 = vpack.c.bf16 %v1635_v45, %v1635_v45  ;;  %v1068_v24 = vrot.slane %v1052_v7, 2 }
  0xe4   :  { %v516_v36 = vsel %vm5538_vm14, %v483_v23, %v515_v49  ;;  %v1020_v61 = vld [vmem:[#allocation4 + $0x2] sm:$0x1]  ;;  %2749 = vst.msk [vmem:[#allocation3 + $0x38] sm:$0x3] %vm20_vm2, %v2745_v59  ;;  %v1636_v30 = vld [vmem:[#allocation3 + $0x54] sm:$0x1] }
  0xe5   :  { %v2618_v11 = vrot.slane %v2602_v34, 2  ;;  %v1021_v56 = vsel %vm5219_vm5, %v1012_v52, %v1020_v61  ;;  %517 = vst [vmem:[#allocation4 + $0x46] sm:$0x2] %v516_v36  ;;  %v1661_v37 = vrot.slane %v1645_v48, 2  ;;  %v1644_v26 = vpack.c.bf16 %v1636_v30, %v1636_v30  ;;  %v7363_v40 = vld [vmem:[#allocation20_spill] sm:$0xff]  ;;  %v7364_v16 = vld [vmem:[#allocation19_spill] sm:$0xff] }
  0xe6   :  { %v5950_v0 = vpack.c.bf16 %v7363_v40, %v7363_v40  ;;  %v1659_v14 = vrot.slane %v1643_v53, 2  ;;  %1022 = vst [vmem:[#allocation4 + $0x2] sm:$0x1] %v1021_v56  ;;  %v1069_v18 = vrot.slane %v1053_v38, 2  ;;  %v1015_v44 = vpack.c.bf16 %v7364_v16, %v7364_v16  ;;  %v1023_v62 = vld [vmem:[#allocation4 + $0xc] sm:$0x1]  ;;  %4791 = vrot.lane.b32.xlu0 %v4790_v28, %s4858_s15 }
  0xe7   :  { %v2634_v2 = vsel %vm222_vm1, %v2602_v34, %v2618_v11  ;;  %4801 = vrot.lane.b32.xlu2 %v4800_v10, %s4858_s15  ;;  %v1689_v17 = vsel %vm222_vm1, %v1645_v48, %v1661_v37  ;;  %v5958_v23 = vsel %vm222_vm1, %v1052_v7, %v1068_v24  ;;  %v1660_v19 = vrot.slane %v1644_v26, 2  ;;  %v2244_v4 = vld [vmem:[#allocation3 + $0x52] sm:$0x1]  ;;  %v1638_v52 = vld [vmem:[#allocation3 + $0x74] sm:$0x1]  ;;  %v7365_v27 = vld [vmem:[#allocation22_spill] sm:$0xff]  ;;  %v5969_v7 = vpop.permute.xlu2 %4736 }
  0xe8   :  { %v2656_v59 = vshll.u32 %v2634_v2, 16  ;;  %v5961_v15 = vrot.slane %v3523_v43, 7  ;;  %v5963_v22 = vrot.slane %v3526_v20, 7  ;;  %v1024_v51 = vsel %vm5219_vm5, %v1013_v1, %v1023_v62  ;;  %v4722_v13 = vpop.permute.xlu0 %4721  ;;  %v986_v12 = vld [vmem:[#allocation4 + $0x14] sm:$0x2] }
  0xe9   :  { %v1016_v50 = vpack.c.bf16 %v7365_v27, %v7365_v27  ;;  %v1681_v55 = vsel %vm222_vm1, %v1643_v53, %v1659_v14  ;;  %v5973_v3 = vsel %vm222_vm1, %v1644_v26, %v1660_v19  ;;  %1025 = vst [vmem:[#allocation4 + $0xc] sm:$0x1] %v1024_v51  ;;  %v1071_v43 = vrot.slane %v5950_v0, 2  ;;  %v989_v61 = vld [vmem:[#allocation4 + $0x1e] sm:$0x2]  ;;  %v7366_v24 = vld [vmem:[#allocation9_spill] sm:$0xff] }
  0xea   :  { %v869_v31 = vld [vmem:[#allocation4 + $0x3c] sm:$0x2]  ;;  %v2658_v9 = vrot.slane %v2656_v59, 7  ;;  %v1701_v34 = vrot.slane %v1689_v17, 7  ;;  %v1100_v49 = vshll.u32 %v5958_v23, 16  ;;  %v2252_v10 = vpack.c.bf16 %v2244_v4, %v2244_v4  ;;  %v4727_v26 = vpop.permute.xlu1 %4726 }
  0xeb   :  { %v870_v1 = vsel %vm5662_vm4, %v838_v63, %v869_v31  ;;  %v4724_v36 = vunpack.i.h.bf16 %v4722_v13  ;;  %v4723_v28 = vunpack.i.l.bf16 %v4722_v13  ;;  %v1081_v20 = vsel %vm222_vm1, %v1053_v38, %v1069_v18  ;;  %v992_v37 = vld [vmem:[#allocation4 + $0x28] sm:$0x2]  ;;  %v995_v40 = vld [vmem:[#allocation4 + $0x32] sm:$0x2]  ;;  %v1029_v18 = vld [vmem:[#allocation4 + $0x20] sm:$0x1] }
  0xec   :  { %871 = vst [vmem:[#allocation4 + $0x3c] sm:$0x2] %v870_v1  ;;  %v4780_v45 = vpack.i.bf16 %v3280_v29, %v2658_v9  ;;  %v872_v48 = vld [vmem:[#allocation4 + $0x46] sm:$0x2]  ;;  %v1699_v11 = vrot.slane %v1681_v55, 7  ;;  %v1700_v53 = vrot.slane %v5973_v3, 7  ;;  %v1646_v56 = vpack.c.bf16 %v1638_v52, %v1638_v52 }
  0xed   :  { %v1158_v63 = vpack.c.bf16 %v7366_v24, %v7366_v24  ;;  %v873_v30 = vsel %vm5662_vm4, %v840_v41, %v872_v48  ;;  %v990_v29 = vsel %vm5891_vm6, %v4724_v36, %v989_v61  ;;  %v987_v38 = vsel %vm5891_vm6, %v4723_v28, %v986_v12  ;;  %v1124_v2 = vld [vmem:[#allocation4 + $0x2] sm:$0x1]  ;;  %v1234_v52 = vld [vmem:[#allocation4 + $0x16] sm:$0x2]  ;;  %v1032_v9 = vld [vmem:[#allocation4 + $0x2a] sm:$0x1] }
  0xee   :  { %4781 = vrot.lane.b32.xlu1 %v4780_v45, %s4858_s15  ;;  %v1278_v14 = vrot.slane %v5851_v42, 2  ;;  %874 = vst [vmem:[#allocation4 + $0x46] sm:$0x2] %v873_v30  ;;  %v4729_v59 = vunpack.i.h.bf16 %v4727_v26  ;;  %v4728_v17 = vunpack.i.l.bf16 %v4727_v26  ;;  %v1102_v23 = vshll.u32 %v1081_v20, 16  ;;  %v2243_v62 = vld [vmem:[#allocation3 + $0x42] sm:$0x1]  ;;  %1711 = vrot.lane.b32.xlu0 %v1699_v11, %s4858_s15 }
  0xef   :  { %v2268_v19 = vrot.slane %v2252_v10, 2  ;;  %991 = vst [vmem:[#allocation4 + $0x1e] sm:$0x2] %v990_v29  ;;  %v4795_v41 = vpack.i.bf16 %v5963_v22, %v5961_v15  ;;  %1715 = vrot.lane.b32.xlu2 %v1701_v34, %s4858_s15  ;;  %v1662_v51 = vrot.slane %v1646_v56, 2  ;;  %v1174_v4 = vrot.slane %v1158_v63, 2 }
  0xf0   :  { %v1292_v31 = vsel %vm222_vm1, %v5851_v42, %v1278_v14  ;;  %988 = vst [vmem:[#allocation4 + $0x14] sm:$0x2] %v987_v38  ;;  %v993_v55 = vsel %vm5891_vm6, %v4728_v17, %v992_v37  ;;  %v996_v1 = vsel %vm5891_vm6, %v4729_v59, %v995_v40  ;;  %v1125_v15 = vsel %vm5258_vm7, %v1100_v49, %v1124_v2  ;;  %v1127_v22 = vld [vmem:[#allocation4 + $0xc] sm:$0x1]  ;;  %v6005_v42 = vpop.permute.xlu2 %4751  ;;  %v2475_v28 = vld [vmem:[#allocation3 + $0x46] sm:$0x1]  ;;  %v6009_v61 = vpop.permute.xlu0 %1463 }
  0xf1   :  { %v1314_v13 = vshll.u32 %v1292_v31, 16  ;;  %v4739_v34 = vunpack.i.h.bf16 %v5969_v7  ;;  %v4738_v45 = vunpack.i.l.bf16 %v5969_v7  ;;  %994 = vst [vmem:[#allocation4 + $0x28] sm:$0x2] %v993_v55  ;;  %v1693_v12 = vsel %vm222_vm1, %v1646_v56, %v1662_v51  ;;  %v2245_v20 = vld [vmem:[#allocation3 + $0x62] sm:$0x1] }
  0xf2   :  { %v1190_v36 = vsel %vm222_vm1, %v1158_v63, %v1174_v4  ;;  %997 = vst [vmem:[#allocation4 + $0x32] sm:$0x2] %v996_v1  ;;  %v1128_v49 = vsel %vm5258_vm7, %v1102_v23, %v1127_v22  ;;  %v2293_v11 = vsel %vm222_vm1, %v2252_v10, %v2268_v19  ;;  %v1030_v56 = vsel %vm5219_vm5, %v1015_v44, %v1029_v18  ;;  %v7367_v44 = vld [vmem:[#allocation23_spill] sm:$0xff]  ;;  %v1898_v26 = vld [vmem:[#allocation4 + $0xe] sm:$0x1] }
  0xf3   :  { %v998_v48 = vld [vmem:[#allocation4 + $0x3c] sm:$0x2]  ;;  %v1214_v24 = vrot.slane %v1190_v36, 7  ;;  %1126 = vst [vmem:[#allocation4 + $0x2] sm:$0x1] %v1125_v15  ;;  %v1702_v30 = vrot.slane %v1693_v12, 7  ;;  %v2251_v38 = vpack.c.bf16 %v2243_v62, %v2243_v62  ;;  %v6031_v16 = vsel %vm222_vm1, %v5950_v0, %v1071_v43 }
  0xf4   :  { %v999_v63 = vsel %vm5891_vm6, %v4733_v25, %v998_v48  ;;  %v6023_v29 = vrot.slane %v1314_v13, 7  ;;  %v1033_v25 = vsel %vm5219_vm5, %v1016_v50, %v1032_v9  ;;  %v1056_v37 = vpack.c.bf16 %v7367_v44, %v7367_v44  ;;  %v1038_v40 = vld [vmem:[#allocation4 + $0x3e] sm:$0x1]  ;;  %v6040_v2 = vld [vmem:[#allocation3 + $0x46] sm:$0x1]  ;;  %v6053_v50 = vpop.permute.xlu1 %1465  ;;  %v7370_v12 = vld [vmem:[#allocation28_spill] sm:$0xff] }
  0xf5   :  { %1000 = vst [vmem:[#allocation4 + $0x3c] sm:$0x2] %v999_v63  ;;  %v1235_v10 = vsel %vm5478_vm12, %v1214_v24, %v1234_v52  ;;  %v6042_v14 = vld [vmem:[#allocation3 + $0x41] sm:$0x1]  ;;  %v6044_v18 = vld [vmem:[#allocation3 + $0x43] sm:$0x1]  ;;  %v2483_v23 = vpack.c.bf16 %v2475_v28, %v2475_v28  ;;  %v2253_v19 = vpack.c.bf16 %v2245_v20, %v2245_v20  ;;  %v1888_v62 = vpack.c.bf16 %v5367_v21, %v5367_v21 }
  0xf6   :  { %v6046_v59 = vld [vmem:[#allocation3 + $0x45] sm:$0x1]  ;;  %v6048_v0 = vld [vmem:[#allocation3 + $0x47] sm:$0x1]  ;;  %v6050_v43 = vld [vmem:[#allocation3 + $0x44] sm:$0x1]  ;;  %4796 = vrot.lane.b32.xlu1 %v4795_v41, %s4858_s15  ;;  %1717 = vrot.lane.b32.xlu0 %v1702_v30, %s4858_s15  ;;  %v1058_v36 = vpack.c.bf16 %v7370_v12, %v7370_v12 }
  0xf7   :  { %v1001_v27 = vld [vmem:[#allocation4 + $0x46] sm:$0x2]  ;;  %1129 = vst [vmem:[#allocation4 + $0xc] sm:$0x1] %v1128_v49  ;;  %v2267_v17 = vrot.slane %v2251_v38, 2  ;;  %v1072_v4 = vrot.slane %v1056_v37, 2  ;;  %2313 = vrot.lane.b32.xlu2 %v2293_v11, %s4858_s15  ;;  %v1899_v22 = vsel %vm5219_vm5, %v1888_v62, %v1898_v26 }
  0xf8   :  { %v1002_v51 = vsel %vm5891_vm6, %v4734_v57, %v1001_v27  ;;  %1236 = vst [vmem:[#allocation4 + $0x16] sm:$0x2] %v1235_v10  ;;  %v7368_v52 = vld [vmem:[#allocation43_spill] sm:$0xff]  ;;  %v2246_v55 = vld [vmem:[#allocation3 + $0x72] sm:$0x1]  ;;  %v1106_v1 = vshll.u32 %v6031_v16, 16 }
  0xf9   :  { %v1928_v31 = vpack.c.bf16 %v7368_v52, %v7368_v52  ;;  %v7369_v41 = vld [vmem:[#allocation27_spill] sm:$0xff]  ;;  %1003 = vst [vmem:[#allocation4 + $0x46] sm:$0x2] %v1002_v51  ;;  %v6068_v21 = vsel %vm222_vm1, %v2251_v38, %v2267_v17  ;;  %v2499_v47 = vrot.slane %v2483_v23, 2  ;;  %v2269_v15 = vrot.slane %v2253_v19, 2  ;;  %v6078_v48 = vpop.permute.xlu2 %1707  ;;  %v6084_v38 = vpop.permute.xlu0 %1469  ;;  %v7371_v44 = vld [vmem:[#allocation5_spill] sm:$0xff] }
  0xfa   :  { %v1018_v9 = vpack.c.bf16 %v7369_v41, %v7369_v41  ;;  %1031 = vst [vmem:[#allocation4 + $0x20] sm:$0x1] %v1030_v56  ;;  %v6072_v57 = vsel %vm222_vm1, %v1056_v37, %v1072_v4  ;;  %v1041_v28 = vld [vmem:[#allocation4 + $0x48] sm:$0x1]  ;;  %v2478_v20 = vld [vmem:[#allocation3 + $0x76] sm:$0x1]  ;;  %v2254_v56 = vpack.c.bf16 %v2246_v55, %v2246_v55 }
  0xfb   :  { %v1944_v13 = vrot.slane %v1928_v31, 2  ;;  %1034 = vst [vmem:[#allocation4 + $0x2a] sm:$0x1] %v1033_v25  ;;  %v1108_v49 = vshll.u32 %v6072_v57, 16  ;;  %v2521_v11 = vsel %vm222_vm1, %v2483_v23, %v2499_v47  ;;  %v2476_v63 = vld [vmem:[#allocation3 + $0x56] sm:$0x1]  ;;  %v2297_v52 = vsel %vm222_vm1, %v2253_v19, %v2269_v15 }
  0xfc   :  { %v1039_v24 = vsel %vm5219_vm5, %v1018_v9, %v1038_v40  ;;  %v1487_v30 = vld [vmem:[#allocation4 + $0x2] sm:$0x1]  ;;  %v2539_v10 = vrot.slane %v2521_v11, 7  ;;  %2725 = vst.msk [vmem:[#allocation3 + $0x40] sm:$0xff] %vm18_vm0, %v7371_v44  ;;  %v1074_v25 = vrot.slane %v1058_v36, 2  ;;  %v7372_v26 = vld [vmem:[#allocation32_spill] sm:$0xff]  ;;  %v2486_v41 = vpack.c.bf16 %v2478_v20, %v2478_v20  ;;  %v6109_v57 = vpop.permute.xlu1 %1471 }
  0xfd   :  { %v6089_v37 = vsel %vm222_vm1, %v1928_v31, %v1944_v13  ;;  %v1019_v27 = vpack.c.bf16 %v7372_v26, %v7372_v26  ;;  %v1488_v40 = vsel %vm5325_vm9, %v6009_v61, %v1487_v30  ;;  %1900 = vst [vmem:[#allocation4 + $0xe] sm:$0x1] %v1899_v22  ;;  %v2270_v23 = vrot.slane %v2254_v56, 2  ;;  %v7373_v62 = vld [vmem:[#allocation33_spill] sm:$0xff]  ;;  %v2477_v55 = vld [vmem:[#allocation3 + $0x66] sm:$0x1] }
  0xfe   :  { %v1977_v17 = vshll.u32 %v6089_v37, 16  ;;  %v1059_v51 = vpack.c.bf16 %v7373_v62, %v7373_v62  ;;  %1489 = vst [vmem:[#allocation4 + $0x2] sm:$0x1] %v1488_v40  ;;  %v1490_v4 = vld [vmem:[#allocation4 + $0xc] sm:$0x1]  ;;  %v6101_v31 = vsel %vm222_vm1, %v1058_v36, %v1074_v25  ;;  %v2484_v9 = vpack.c.bf16 %v2476_v63, %v2476_v63  ;;  %1713 = vrot.lane.b32.xlu1 %v1700_v53, %s4858_s15  ;;  %v7376_v37 = vld [vmem:[#allocation38_spill] sm:$0xff] }
  0xff   :  { %v1491_v61 = vsel %vm5325_vm9, %v6053_v50, %v1490_v4  ;;  %v1346_v47 = vld [vmem:[#allocation4 + $0x16] sm:$0x2]  ;;  %1040 = vst [vmem:[#allocation4 + $0x3e] sm:$0x1] %v1039_v24  ;;  %v6112_v19 = vsel %vm222_vm1, %v2254_v56, %v2270_v23  ;;  %v1042_v15 = vsel %vm5219_vm5, %v1019_v27, %v1041_v28  ;;  %v6116_v13 = vld [vmem:[#allocation3 + $0x76] sm:$0x1]  ;;  %2551 = vrot.lane.b32.xlu2 %v2539_v10, %s4858_s15 }
 0x100   :  { %v1075_v22 = vrot.slane %v1059_v51, 2  ;;  %v6118_v12 = vld [vmem:[#allocation3 + $0x71] sm:$0x1]  ;;  %v6120_v3 = vld [vmem:[#allocation3 + $0x73] sm:$0x1]  ;;  %v1347_v20 = vsel %vm5538_vm14, %v6023_v29, %v1346_v47  ;;  %v2502_v11 = vrot.slane %v2486_v41, 2  ;;  %v2135_v25 = vpack.c.bf16 %v7376_v37, %v7376_v37  ;;  %2315 = vrot.lane.b32.xlu0 %v2297_v52, %s4858_s15 }
 0x101   :  { %7374 = vst [vmem:[#allocation8_spill] sm:$0xff] %v6118_v12  ;;  %v6122_v53 = vld [vmem:[#allocation3 + $0x75] sm:$0x1]  ;;  %v6124_v50 = vld [vmem:[#allocation3 + $0x77] sm:$0x1]  ;;  %v2500_v28 = vrot.slane %v2484_v9, 2  ;;  %v2485_v26 = vpack.c.bf16 %v2477_v55, %v2477_v55  ;;  %v6150_v4 = vpop.permute.xlu2 %2305  ;;  %v6153_v52 = vpop.permute.xlu0 %1475 }
 0x102   :  { %v6126_v36 = vld [vmem:[#allocation3 + $0x74] sm:$0x1]  ;;  %1492 = vst [vmem:[#allocation4 + $0xc] sm:$0x1] %v1491_v61  ;;  %v1133_v63 = vld [vmem:[#allocation4 + $0x20] sm:$0x1]  ;;  %v6136_v44 = vsel %vm222_vm1, %v1059_v51, %v1075_v22  ;;  %v2533_v10 = vsel %vm222_vm1, %v2486_v41, %v2502_v11 }
 0x103   :  { %v7375_v24 = vld [vmem:[#allocation37_spill] sm:$0xff]  ;;  %1348 = vst [vmem:[#allocation4 + $0x16] sm:$0x2] %v1347_v20  ;;  %v1112_v30 = vshll.u32 %v6101_v31, 16  ;;  %v2746_v27 = vld [vmem:[#allocation2 + $0x120] sm:$0xff]  ;;  %v1134_v29 = vsel %vm5258_vm7, %v1106_v1, %v1133_v63  ;;  %v2525_v23 = vsel %vm222_vm1, %v2484_v9, %v2500_v28  ;;  %v1276_v62 = vrot.slane %v5807_v8, 2 }
 0x104   :  { %v2031_v56 = vpack.c.bf16 %v7375_v24, %v7375_v24  ;;  %v1136_v40 = vld [vmem:[#allocation4 + $0x2a] sm:$0x1]  ;;  %1043 = vst [vmem:[#allocation4 + $0x48] sm:$0x1] %v1042_v15  ;;  %v1114_v16 = vshll.u32 %v6136_v44, 16  ;;  %v2542_v31 = vrot.slane %v2533_v10, 7 }
 0x105   :  { %1135 = vst [vmem:[#allocation4 + $0x20] sm:$0x1] %v1134_v29  ;;  %v1137_v51 = vsel %vm5258_vm7, %v1108_v49, %v1136_v40  ;;  %v2002_v55 = vld [vmem:[#allocation4 + $0xe] sm:$0x1]  ;;  %v2151_v61 = vrot.slane %v2135_v25, 2  ;;  %v2501_v41 = vrot.slane %v2485_v26, 2 }
 0x106   :  { %v2047_v1 = vrot.slane %v2031_v56, 2  ;;  %1138 = vst [vmem:[#allocation4 + $0x2a] sm:$0x1] %v1137_v51  ;;  %v7377_v47 = vld [vmem:[#allocation41_spill] sm:$0xff]  ;;  %v7378_v15 = vld [vmem:[#allocation42_spill] sm:$0xff]  ;;  %v2003_v49 = vsel %vm5258_vm7, %v1977_v17, %v2002_v55  ;;  %v2540_v11 = vrot.slane %v2525_v23, 7  ;;  %2311 = vrot.lane.b32.xlu1 %v6068_v21, %s4858_s15  ;;  %v6179_v51 = vpop.permute.xlu1 %1477  ;;  %v6188_v21 = vsel %vm222_vm1, %v5807_v8, %v1276_v62 }
 0x107   :  { %v2034_v9 = vpack.c.bf16 %v7377_v47, %v7377_v47  ;;  %v2138_v22 = vpack.c.bf16 %v7378_v15, %v7378_v15  ;;  %v1607_v20 = vld [vmem:[#allocation4 + $0x2] sm:$0x1]  ;;  %2750 = vst.msk [vmem:[#allocation3 + $0x70] sm:$0xff] %vm18_vm0, %v2746_v27  ;;  %v3116_v24 = vld [vmem:[#allocation3 + $0x41] sm:$0x1]  ;;  %v7379_v63 = vld [vmem:[#allocation12_spill] sm:$0xff]  ;;  %v2161_v17 = vsel %vm222_vm1, %v2135_v25, %v2151_v61  ;;  %v6173_v27 = vsel %vm222_vm1, %v2485_v26, %v2501_v41 }
 0x108   :  { %v2057_v28 = vsel %vm222_vm1, %v2031_v56, %v2047_v1  ;;  %v6165_v44 = vpack.c.bf16 %v7379_v63, %v7379_v63  ;;  %v1608_v37 = vsel %vm5557_vm15, %v4738_v45, %v1607_v20  ;;  %2004 = vst [vmem:[#allocation4 + $0xe] sm:$0x1] %v2003_v49  ;;  %v1142_v29 = vld [vmem:[#allocation4 + $0x3e] sm:$0x1]  ;;  %v2103_v10 = vld [vmem:[#allocation4 + $0x4] sm:$0x2]  ;;  %v3124_v55 = vpack.c.bf16 %v3116_v24, %v3116_v24 }
 0x109   :  { %v2087_v40 = vrot.slane %v2057_v28, 7  ;;  %1609 = vst [vmem:[#allocation4 + $0x2] sm:$0x1] %v1608_v37  ;;  %v1610_v56 = vld [vmem:[#allocation4 + $0xc] sm:$0x1]  ;;  %v1143_v23 = vsel %vm5258_vm7, %v1112_v30, %v1142_v29  ;;  %v2183_v45 = vshll.u32 %v2161_v17, 16  ;;  %2557 = vrot.lane.b32.xlu2 %v2542_v31, %s4858_s15  ;;  %2553 = vrot.lane.b32.xlu0 %v2540_v11, %s4858_s15 }
 0x10a   :  { %v1611_v25 = vsel %vm5557_vm15, %v4739_v34, %v1610_v56  ;;  %v1733_v26 = vld [vmem:[#allocation4 + $0x16] sm:$0x2]  ;;  %1144 = vst [vmem:[#allocation4 + $0x3e] sm:$0x1] %v1143_v23  ;;  %v2050_v61 = vrot.slane %v2034_v9, 2  ;;  %v2154_v41 = vrot.slane %v2138_v22, 2 }
 0x10b   :  { %v6190_v30 = vld [vmem:[#allocation3 + $0x56] sm:$0x1]  ;;  %v6192_v47 = vld [vmem:[#allocation3 + $0x51] sm:$0x1]  ;;  %v6194_v15 = vld [vmem:[#allocation3 + $0x53] sm:$0x1]  ;;  %v1734_v34 = vsel %vm5662_vm4, %v6078_v48, %v1733_v26  ;;  %v6221_v26 = vpop.permute.xlu2 %2543 }
 0x10c   :  { %v6196_v20 = vld [vmem:[#allocation3 + $0x55] sm:$0x1]  ;;  %v6198_v7 = vld [vmem:[#allocation3 + $0x57] sm:$0x1]  ;;  %v6200_v49 = vld [vmem:[#allocation3 + $0x54] sm:$0x1]  ;;  %v2069_v48 = vsel %vm222_vm1, %v2034_v9, %v2050_v61  ;;  %v2170_v31 = vsel %vm222_vm1, %v2138_v22, %v2154_v41  ;;  %v4742_v22 = vpop.permute.xlu0 %4741 }
 0x10d   :  { %1612 = vst [vmem:[#allocation4 + $0xc] sm:$0x1] %v1611_v25  ;;  %v1145_v28 = vld [vmem:[#allocation4 + $0x48] sm:$0x1]  ;;  %v6206_v8 = vrot.slane %v2183_v45, 7  ;;  %v3140_v62 = vrot.slane %v3124_v55, 2  ;;  %v2104_v25 = vsel %vm5478_vm12, %v2087_v40, %v2103_v10  ;;  %v4743_v40 = vunpack.i.l.bf16 %v4742_v22 }
 0x10e   :  { %v7380_v24 = vld [vmem:[#allocation15_spill] sm:$0xff]  ;;  %1735 = vst [vmem:[#allocation4 + $0x16] sm:$0x2] %v1734_v34  ;;  %v1146_v17 = vsel %vm5258_vm7, %v1114_v16, %v1145_v28  ;;  %v1499_v45 = vld [vmem:[#allocation4 + $0x2a] sm:$0x1]  ;;  %v2090_v34 = vrot.slane %v2069_v48, 7  ;;  %2317 = vrot.lane.b32.xlu1 %v6112_v19, %s4858_s15 }
 0x10f   :  { %v1157_v63 = vpack.c.bf16 %v7380_v24, %v7380_v24  ;;  %v1496_v29 = vld [vmem:[#allocation4 + $0x20] sm:$0x1]  ;;  %v2112_v56 = vld [vmem:[#allocation4 + $0x22] sm:$0x2]  ;;  %1147 = vst [vmem:[#allocation4 + $0x48] sm:$0x1] %v1146_v17  ;;  %v1500_v9 = vsel %vm5325_vm9, %v6109_v57, %v1499_v45  ;;  %v4744_v24 = vunpack.i.h.bf16 %v4742_v22  ;;  %v3162_v10 = vsel %vm222_vm1, %v3124_v55, %v3140_v62 }
 0x110   :  { %v1497_v23 = vsel %vm5325_vm9, %v6084_v38, %v1496_v29  ;;  %v2192_v16 = vshll.u32 %v2170_v31, 16  ;;  %v1613_v11 = vld [vmem:[#allocation4 + $0x16] sm:$0x1]  ;;  %v1172_v61 = vrot.slane %v6165_v44, 2  ;;  %v1308_v38 = vshll.u32 %v6188_v21, 16  ;;  %v7382_v62 = vld [vmem:[#allocation6_spill] sm:$0xff] }
 0x111   :  { %1498 = vst [vmem:[#allocation4 + $0x20] sm:$0x1] %v1497_v23  ;;  %v1173_v41 = vrot.slane %v1157_v63, 2  ;;  %v2330_v28 = vld [vmem:[#allocation4 + $0xe] sm:$0x1]  ;;  %v6231_v29 = vsel %vm5478_vm12, %v2090_v34, %v2112_v56  ;;  %3184 = vrot.lane.b32.xlu0 %v3162_v10, %s4858_s15 }
 0x112   :  { %1501 = vst [vmem:[#allocation4 + $0x2a] sm:$0x1] %v1500_v9  ;;  %v1228_v17 = vld [vmem:[#allocation4 + $0x2] sm:$0x2]  ;;  %v6233_v48 = vld [vmem:[#allocation3 + $0x66] sm:$0x1]  ;;  %v2331_v55 = vsel %vm5325_vm9, %v6150_v4, %v2330_v28  ;;  %v1182_v34 = vsel %vm222_vm1, %v6165_v44, %v1172_v61  ;;  %v1614_v4 = vsel %vm5557_vm15, %v4743_v40, %v1613_v11  ;;  %v4747_v28 = vpop.permute.xlu1 %4746 }
 0x113   :  { %v6235_v57 = vld [vmem:[#allocation3 + $0x61] sm:$0x1]  ;;  %v6237_v31 = vld [vmem:[#allocation3 + $0x63] sm:$0x1]  ;;  %v6239_v23 = vld [vmem:[#allocation3 + $0x65] sm:$0x1]  ;;  %v1186_v9 = vsel %vm222_vm1, %v1157_v63, %v1173_v41  ;;  %v4749_v61 = vunpack.i.h.bf16 %v4747_v28  ;;  %v4748_v19 = vunpack.i.l.bf16 %v4747_v28 }
 0x114   :  { %v6241_v21 = vld [vmem:[#allocation3 + $0x67] sm:$0x1]  ;;  %v6243_v45 = vld [vmem:[#allocation3 + $0x64] sm:$0x1]  ;;  %2733 = vst.msk [vmem:[#allocation3 + $0x50] sm:$0xff] %vm18_vm0, %v7382_v62  ;;  %v6250_v56 = vrot.slane %v2192_v16, 7 }
 0x115   :  { %7381 = vst [vmem:[#allocation25_spill] sm:$0xff] %v6241_v21  ;;  %v1231_v22 = vld [vmem:[#allocation4 + $0xc] sm:$0x2]  ;;  %v3119_v37 = vld [vmem:[#allocation3 + $0x71] sm:$0x1]  ;;  %v1212_v21 = vrot.slane %v1182_v34, 7 }
 0x116   :  { %2332 = vst [vmem:[#allocation4 + $0xe] sm:$0x1] %v2331_v55  ;;  %v1505_v1 = vld [vmem:[#allocation4 + $0x3e] sm:$0x1]  ;;  %v1213_v62 = vrot.slane %v1186_v9, 7  ;;  %v3127_v16 = vpack.c.bf16 %v3119_v37, %v3119_v37  ;;  %v6262_v41 = vrot.slane %v1308_v38, 7 }
 0x117   :  { %v1506_v44 = vsel %vm5325_vm9, %v6153_v52, %v1505_v1  ;;  %2105 = vst [vmem:[#allocation4 + $0x4] sm:$0x2] %v2104_v25  ;;  %v1622_v63 = vld [vmem:[#allocation4 + $0x34] sm:$0x1]  ;;  %v1277_v55 = vrot.slane %v5855_v58, 2  ;;  %v6267_v11 = vsel %vm5478_vm12, %v1212_v21, %v1228_v17  ;;  %v1279_v25 = vrot.slane %v5946_v54, 2 }
 0x118   :  { %1507 = vst [vmem:[#allocation4 + $0x3e] sm:$0x1] %v1506_v44  ;;  %v3143_v40 = vrot.slane %v3127_v16, 2  ;;  %v7383_v34 = vld [vmem:[#allocation21_spill] sm:$0xff]  ;;  %v3348_v9 = vld [vmem:[#allocation3 + $0x45] sm:$0x1]  ;;  %v6274_v52 = vsel %vm5478_vm12, %v1213_v62, %v1231_v22  ;;  %v1623_v10 = vsel %vm5557_vm15, %v4749_v61, %v1622_v63 }
 0x119   :  { %v1159_v37 = vpack.c.bf16 %v7383_v34, %v7383_v34  ;;  %v1508_v12 = vld [vmem:[#allocation4 + $0x48] sm:$0x1]  ;;  %1615 = vst [vmem:[#allocation4 + $0x16] sm:$0x1] %v1614_v4  ;;  %v1289_v1 = vsel %vm222_vm1, %v5855_v58, %v1277_v55  ;;  %v3356_v38 = vpack.c.bf16 %v3348_v9, %v3348_v9  ;;  %v1616_v21 = vld [vmem:[#allocation4 + $0x20] sm:$0x1]  ;;  %v6286_v4 = vpop.permute.xlu2 %2549 }
 0x11a   :  { %v1509_v17 = vsel %vm5325_vm9, %v6179_v51, %v1508_v12  ;;  %v7384_v28 = vld [vmem:[#allocation7_spill] sm:$0xff]  ;;  %v1311_v22 = vshll.u32 %v1289_v1, 16  ;;  %v1617_v58 = vsel %vm5557_vm15, %v4744_v24, %v1616_v21  ;;  %v1619_v44 = vld [vmem:[#allocation4 + $0x2a] sm:$0x1]  ;;  %v3174_v55 = vsel %vm222_vm1, %v3127_v16, %v3143_v40  ;;  %1624 = vst [vmem:[#allocation4 + $0x34] sm:$0x1] %v1623_v10 }
 0x11b   :  { %2741 = vst.msk [vmem:[#allocation3 + $0x60] sm:$0xff] %vm18_vm0, %v7384_v28  ;;  %v1175_v62 = vrot.slane %v1159_v37, 2  ;;  %v1295_v12 = vsel %vm222_vm1, %v5946_v54, %v1279_v25  ;;  %v3372_v51 = vrot.slane %v3356_v38, 2  ;;  %v1620_v34 = vsel %vm5557_vm15, %v4748_v19, %v1619_v44  ;;  %v3117_v63 = vld [vmem:[#allocation3 + $0x51] sm:$0x1]  ;;  %v7385_v54 = vld [vmem:[#allocation35_spill] sm:$0xff]  ;;  %3190 = vrot.lane.b32.xlu0 %v3174_v55, %s4858_s15 }
 0x11c   :  { %1510 = vst [vmem:[#allocation4 + $0x48] sm:$0x1] %v1509_v17  ;;  %v6295_v61 = vrot.slane %v1311_v22, 7  ;;  %v1237_v1 = vld [vmem:[#allocation4 + $0x20] sm:$0x2]  ;;  %v1317_v17 = vshll.u32 %v1295_v12, 16  ;;  %v3125_v24 = vpack.c.bf16 %v3117_v63, %v3117_v63  ;;  %v1887_v40 = vpack.c.bf16 %v7385_v54, %v7385_v54 }
 0x11d   :  { %1618 = vst [vmem:[#allocation4 + $0x20] sm:$0x1] %v1617_v58  ;;  %v1194_v9 = vsel %vm222_vm1, %v1159_v37, %v1175_v62  ;;  %v3349_v21 = vld [vmem:[#allocation3 + $0x55] sm:$0x1]  ;;  %v2754_v28 = vld [vmem:[#allocation3 + $0x20] sm:$0x1]  ;;  %v6299_v16 = vsel %vm222_vm1, %v3356_v38, %v3372_v51  ;;  %v1763_v44 = vpack.c.bf16 %v6040_v2, %v6040_v2 }
 0x11e   :  { %v7386_v25 = vld [vmem:[#allocation36_spill] sm:$0xff]  ;;  %v2215_v58 = vld [vmem:[#allocation4 + $0x4] sm:$0x2]  ;;  %v7387_v22 = vrot.slane %v6173_v27, 7  ;;  %1621 = vst [vmem:[#allocation4 + $0x2a] sm:$0x1] %v1620_v34  ;;  %v3357_v37 = vpack.c.bf16 %v3349_v21, %v3349_v21  ;;  %v2762_v10 = vpack.c.bf16 %v2754_v28, %v2754_v28  ;;  %v1764_v27 = vpack.c.bf16 %v6190_v30, %v6190_v30 }
 0x11f   :  { %v1927_v19 = vpack.c.bf16 %v7386_v25, %v7386_v25  ;;  %v2774_v62 = vld [vmem:[#allocation4 + $0x1a] sm:$0x1]  ;;  %v1625_v38 = vld [vmem:[#allocation4 + $0x3e] sm:$0x1]  ;;  %v2216_v12 = vsel %vm5538_vm14, %v6206_v8, %v2215_v58  ;;  %2114 = vst [vmem:[#allocation4 + $0x22] sm:$0x2] %v6231_v29  ;;  %v7388_v34 = vunpack.i.l.bf16 %v6005_v42  ;;  %v4754_v58 = vunpack.i.h.bf16 %v6005_v42 }
 0x120   :  { %2555 = vrot.lane.b32.xlu1 %v7387_v22, %s4858_s15  ;;  %v3141_v51 = vrot.slane %v3125_v24, 2  ;;  %v1215_v63 = vrot.slane %v1194_v9, 7  ;;  %2217 = vst [vmem:[#allocation4 + $0x4] sm:$0x2] %v2216_v12  ;;  %v3373_v28 = vrot.slane %v3357_v37, 2  ;;  %v2775_v2 = vsel %vm5219_vm5, %v2762_v10, %v2774_v62 }
 0x121   :  { %v1626_v21 = vsel %vm5557_vm15, %v7388_v34, %v1625_v38  ;;  %v2794_v54 = vld [vmem:[#allocation3 + $0x22] sm:$0x1]  ;;  %v6322_v25 = vrot.slane %v1317_v17, 7  ;;  %1230 = vst [vmem:[#allocation4 + $0x2] sm:$0x2] %v6267_v11  ;;  %v6333_v17 = vpop.permute.xlu2 %3180  ;;  %v1943_v38 = vrot.slane %v1927_v19, 2 }
 0x122   :  { %1627 = vst [vmem:[#allocation4 + $0x3e] sm:$0x1] %v1626_v21  ;;  %v3118_v8 = vld [vmem:[#allocation3 + $0x61] sm:$0x1]  ;;  %v3166_v29 = vsel %vm222_vm1, %v3125_v24, %v3141_v51  ;;  %v2802_v30 = vpack.c.bf16 %v2794_v54, %v2794_v54  ;;  %v1238_v9 = vsel %vm5478_vm12, %v1215_v63, %v1237_v1  ;;  %v6331_v10 = vsel %vm222_vm1, %v3357_v37, %v3373_v28  ;;  %v1895_v62 = vld [vmem:[#allocation4 + $0x4] sm:$0x1] }
 0x123   :  { %v3126_v22 = vpack.c.bf16 %v3118_v8, %v3118_v8  ;;  %v1779_v12 = vrot.slane %v1763_v44, 2  ;;  %1233 = vst [vmem:[#allocation4 + $0xc] sm:$0x2] %v6274_v52  ;;  %v1896_v1 = vsel %vm5219_vm5, %v1887_v40, %v1895_v62  ;;  %v1780_v51 = vrot.slane %v1764_v27, 2  ;;  %v3350_v34 = vld [vmem:[#allocation3 + $0x65] sm:$0x1] }
 0x124   :  { %v2818_v24 = vrot.slane %v2802_v30, 2  ;;  %2776 = vst [vmem:[#allocation4 + $0x1a] sm:$0x1] %v2775_v2  ;;  %v6340_v11 = vsel %vm222_vm1, %v1927_v19, %v1943_v38  ;;  %v7389_v21 = vld [vmem:[#allocation47_spill] sm:$0xff]  ;;  %v2897_v62 = vld [vmem:[#allocation3 + $0x14] sm:$0x1]  ;;  %v3358_v38 = vpack.c.bf16 %v3350_v34, %v3350_v34 }
 0x125   :  { %v3142_v63 = vrot.slane %v3126_v22, 2  ;;  %v1797_v37 = vsel %vm222_vm1, %v1763_v44, %v1779_v12  ;;  %v1929_v28 = vpack.c.bf16 %v7389_v21, %v7389_v21  ;;  %1239 = vst [vmem:[#allocation4 + $0x20] sm:$0x2] %v1238_v9  ;;  %v1975_v54 = vshll.u32 %v6340_v11, 16  ;;  %v2109_v42 = vld [vmem:[#allocation4 + $0x18] sm:$0x2] }
 0x126   :  { %v2832_v52 = vsel %vm222_vm1, %v2802_v30, %v2818_v24  ;;  %v1800_v8 = vsel %vm222_vm1, %v1764_v27, %v1780_v51  ;;  %v1819_v40 = vshll.u32 %v1797_v37, 16  ;;  %v2224_v55 = vld [vmem:[#allocation4 + $0x22] sm:$0x2]  ;;  %1897 = vst [vmem:[#allocation4 + $0x4] sm:$0x1] %v1896_v1  ;;  %v2905_v27 = vpack.c.bf16 %v2897_v62, %v2897_v62  ;;  %v6371_v62 = vpop.permute.xlu1 %1705 }
 0x127   :  { %v3170_v2 = vsel %vm222_vm1, %v3126_v22, %v3142_v63  ;;  %v2852_v19 = vshll.u32 %v2832_v52, 16  ;;  %v1822_v44 = vshll.u32 %v1800_v8, 16  ;;  %v2567_v12 = vld [vmem:[#allocation4 + $0x4] sm:$0x2]  ;;  %v2225_v30 = vsel %vm5538_vm14, %v6250_v56, %v2224_v55  ;;  %v3001_v51 = vld [vmem:[#allocation3 + $0x16] sm:$0x1] }
 0x128   :  { %3186 = vrot.lane.b32.xlu1 %v3166_v29, %s4858_s15  ;;  %3188 = vrot.lane.b32.xlu2 %v3170_v2, %s4858_s15  ;;  %v6354_v9 = vrot.slane %v1819_v40, 7  ;;  %v1945_v24 = vrot.slane %v1929_v28, 2  ;;  %v2568_v22 = vsel %vm5662_vm4, %v6221_v26, %v2567_v12  ;;  %2226 = vst [vmem:[#allocation4 + $0x22] sm:$0x2] %v2225_v30  ;;  %v3374_v1 = vrot.slane %v3358_v38, 2  ;;  %v7390_v63 = vld [vmem:[#allocation46_spill] sm:$0xff] }
 0x129   :  { %v6359_v29 = vrot.slane %v1822_v44, 7  ;;  %v1889_v11 = vpack.c.bf16 %v7390_v63, %v7390_v63  ;;  %2569 = vst [vmem:[#allocation4 + $0x4] sm:$0x2] %v2568_v22  ;;  %v1340_v37 = vld [vmem:[#allocation4 + $0x2] sm:$0x2]  ;;  %v2921_v34 = vrot.slane %v2905_v27, 2  ;;  %v3009_v55 = vpack.c.bf16 %v3001_v51, %v3001_v51  ;;  %v6374_v44 = vpop.permute.xlu2 %3418 }
 0x12a   :  { %v2979_v56 = vld [vmem:[#allocation4 + $0x10] sm:$0x2]  ;;  %v6364_v21 = vsel %vm222_vm1, %v1929_v28, %v1945_v24  ;;  %v7391_v52 = vld [vmem:[#allocation40_spill] sm:$0xff]  ;;  %v1341_v26 = vsel %vm5538_vm14, %v6262_v41, %v1340_v37  ;;  %v3402_v2 = vsel %vm222_vm1, %v3358_v38, %v3374_v1  ;;  %v1901_v12 = vld [vmem:[#allocation4 + $0x18] sm:$0x1]  ;;  %v1704_v24 = vpop.permute.xlu0 %1703 }
 0x12b   :  { %v1930_v8 = vpack.c.bf16 %v7391_v52, %v7391_v52  ;;  %v1343_v40 = vld [vmem:[#allocation4 + $0xc] sm:$0x2]  ;;  %v7392_v22 = vld [vmem:[#allocation39_spill] sm:$0xff]  ;;  %1342 = vst [vmem:[#allocation4 + $0x2] sm:$0x2] %v1341_v26  ;;  %v3414_v63 = vrot.slane %v3402_v2, 7  ;;  %v2934_v37 = vsel %vm222_vm1, %v2905_v27, %v2921_v34  ;;  %v4805_v30 = vpack.i.bf16 %v6359_v29, %v6354_v9 }
 0x12c   :  { %v1890_v28 = vpack.c.bf16 %v7392_v22, %v7392_v22  ;;  %v1344_v51 = vsel %vm5538_vm14, %v6295_v61, %v1343_v40  ;;  %v2878_v41 = vld [vmem:[#allocation4 + $0x1a] sm:$0x1]  ;;  %v3025_v52 = vrot.slane %v3009_v55, 2  ;;  %v1349_v1 = vld [vmem:[#allocation4 + $0x20] sm:$0x2]  ;;  %v2961_v22 = vrot.slane %v2934_v37, 7 }
 0x12d   :  { %1345 = vst [vmem:[#allocation4 + $0xc] sm:$0x2] %v1344_v51  ;;  %v2879_v38 = vsel %vm5258_vm7, %v2852_v19, %v2878_v41  ;;  %v1946_v26 = vrot.slane %v1930_v8, 2  ;;  %v1350_v61 = vsel %vm5538_vm14, %v6322_v25, %v1349_v1  ;;  %v1999_v40 = vld [vmem:[#allocation4 + $0x4] sm:$0x1]  ;;  %3428 = vrot.lane.b32.xlu0 %v3414_v63, %s4858_s15  ;;  %v2365_v19 = vpack.c.bf16 %v6243_v45, %v6243_v45 }
 0x12e   :  { %2880 = vst [vmem:[#allocation4 + $0x1a] sm:$0x1] %v2879_v38  ;;  %v3037_v27 = vsel %vm222_vm1, %v3009_v55, %v3025_v52  ;;  %v3351_v34 = vld [vmem:[#allocation3 + $0x75] sm:$0x1]  ;;  %v7393_v2 = vrot.slane %v6299_v16, 7  ;;  %v2000_v51 = vsel %vm5258_vm7, %v1975_v54, %v1999_v40  ;;  %v2980_v25 = vsel %vm5478_vm12, %v2961_v22, %v2979_v56 }
 0x12f   :  { %1351 = vst [vmem:[#allocation4 + $0x20] sm:$0x2] %v1350_v61  ;;  %v3059_v41 = vshll.u32 %v3037_v27, 16  ;;  %v3359_v37 = vpack.c.bf16 %v3351_v34, %v3351_v34  ;;  %v1904_v63 = vld [vmem:[#allocation4 + $0x22] sm:$0x1]  ;;  %v7394_v55 = vrot.slane %v6331_v10, 7  ;;  %v1902_v45 = vsel %vm5219_vm5, %v1889_v11, %v1901_v12 }
 0x130   :  { %3424 = vrot.lane.b32.xlu1 %v7393_v2, %s4858_s15  ;;  %v2576_v38 = vld [vmem:[#allocation4 + $0x22] sm:$0x2]  ;;  %2001 = vst [vmem:[#allocation4 + $0x4] sm:$0x1] %v2000_v51  ;;  %v6408_v16 = vsel %vm222_vm1, %v1930_v8, %v1946_v26  ;;  %v2366_v54 = vpack.c.bf16 %v6126_v36, %v6126_v36  ;;  %v2381_v52 = vrot.slane %v2365_v19, 2  ;;  %v1905_v10 = vsel %vm5219_vm5, %v1890_v28, %v1904_v63  ;;  %v7395_v28 = vld [vmem:[#allocation44_spill] sm:$0xff] }
 0x131   :  { %3426 = vrot.lane.b32.xlu2 %v7394_v55, %s4858_s15  ;;  %v2577_v56 = vsel %vm5662_vm4, %v6286_v4, %v2576_v38  ;;  %2981 = vst [vmem:[#allocation4 + $0x10] sm:$0x2] %v2980_v25  ;;  %v3061_v1 = vrot.slane %v3059_v41, 7  ;;  %v3375_v22 = vrot.slane %v3359_v37, 2  ;;  %v1765_v8 = vpack.c.bf16 %v6233_v48, %v6233_v48  ;;  %v6424_v27 = vpop.permute.xlu2 %4756  ;;  %v1861_v38 = vld [vmem:[#allocation4 + $0x16] sm:$0x2] }
 0x132   :  { %2578 = vst [vmem:[#allocation4 + $0x22] sm:$0x2] %v2577_v56  ;;  %v2382_v61 = vrot.slane %v2366_v54, 2  ;;  %v2403_v11 = vsel %vm222_vm1, %v2365_v19, %v2381_v52  ;;  %v1766_v36 = vpack.c.bf16 %v6116_v13, %v6116_v13  ;;  %v1727_v12 = vld [vmem:[#allocation4 + $0x2] sm:$0x2]  ;;  %v1981_v26 = vshll.u32 %v6408_v16, 16  ;;  %v1710_v52 = vpop.permute.xlu0 %1709 }
 0x133   :  { %1903 = vst [vmem:[#allocation4 + $0x18] sm:$0x1] %v1902_v45  ;;  %v3406_v4 = vsel %vm222_vm1, %v3359_v37, %v3375_v22  ;;  %v2419_v40 = vshll.u32 %v2403_v11, 16  ;;  %v2032_v34 = vpack.c.bf16 %v7395_v28, %v7395_v28  ;;  %v1728_v19 = vsel %vm5662_vm4, %v1704_v24, %v1727_v12  ;;  %v2304_v37 = vpop.permute.xlu1 %2303  ;;  %v7396_v45 = vld [vmem:[#allocation45_spill] sm:$0xff]  ;;  %v3596_v32 = vld [vmem:[#allocation3 + $0x42] sm:$0x1] }
 0x134   :  { %v1730_v2 = vld [vmem:[#allocation4 + $0xc] sm:$0x2]  ;;  %v3415_v48 = vrot.slane %v3406_v4, 7  ;;  %1906 = vst [vmem:[#allocation4 + $0x22] sm:$0x1] %v1905_v10  ;;  %v2406_v13 = vsel %vm222_vm1, %v2366_v54, %v2382_v61  ;;  %v1781_v51 = vrot.slane %v1765_v8, 2  ;;  %v4759_v55 = vunpack.i.h.bf16 %v6424_v27 }
 0x135   :  { %1729 = vst [vmem:[#allocation4 + $0x2] sm:$0x2] %v1728_v19  ;;  %v1731_v25 = vsel %vm5662_vm4, %v6371_v62, %v1730_v2  ;;  %v3206_v41 = vld [vmem:[#allocation4 + $0x1a] sm:$0x1]  ;;  %v1782_v63 = vrot.slane %v1766_v36, 2  ;;  %v2136_v24 = vpack.c.bf16 %v7396_v45, %v7396_v45  ;;  %v2421_v56 = vshll.u32 %v2406_v13, 16 }
 0x136   :  { %1732 = vst [vmem:[#allocation4 + $0xc] sm:$0x2] %v1731_v25  ;;  %v3207_v16 = vsel %vm5325_vm9, %v6333_v17, %v3206_v41  ;;  %v1736_v54 = vld [vmem:[#allocation4 + $0x20] sm:$0x2]  ;;  %v1803_v22 = vsel %vm222_vm1, %v1765_v8, %v1781_v51  ;;  %v2048_v62 = vrot.slane %v2032_v34, 2  ;;  %v4758_v4 = vunpack.i.l.bf16 %v6424_v27  ;;  %v7397_v41 = vld [vmem:[#allocation48_spill] sm:$0xff] }
 0x137   :  { %3208 = vst [vmem:[#allocation4 + $0x1a] sm:$0x1] %v3207_v16  ;;  %v1737_v10 = vsel %vm5662_vm4, %v1710_v52, %v1736_v54  ;;  %v2327_v61 = vld [vmem:[#allocation4 + $0x4] sm:$0x1]  ;;  %v1806_v11 = vsel %vm222_vm1, %v1766_v36, %v1782_v63  ;;  %v1825_v12 = vshll.u32 %v1803_v22, 16  ;;  %v1862_v19 = vsel %vm5891_vm6, %v4759_v55, %v1861_v38 }
 0x138   :  { %3430 = vrot.lane.b32.xlu1 %v3415_v48, %s4858_s15  ;;  %1738 = vst [vmem:[#allocation4 + $0x20] sm:$0x2] %v1737_v10  ;;  %v2328_v17 = vsel %vm5325_vm9, %v2304_v37, %v2327_v61  ;;  %v3091_v8 = vld [vmem:[#allocation4 + $0x10] sm:$0x2]  ;;  %v1828_v28 = vshll.u32 %v1806_v11, 16  ;;  %v2061_v2 = vsel %vm222_vm1, %v2032_v34, %v2048_v62  ;;  %v2363_v51 = vpack.c.bf16 %v6050_v43, %v6050_v43 }
 0x139   :  { %4806 = vrot.lane.b32.xlu2 %v4805_v30, %s4858_s15  ;;  %2329 = vst [vmem:[#allocation4 + $0x4] sm:$0x1] %v2328_v17  ;;  %v3092_v36 = vsel %vm5538_vm14, %v3061_v1, %v3091_v8  ;;  %v1827_v27 = vrot.slane %v1825_v12, 7  ;;  %v2088_v48 = vrot.slane %v2061_v2, 7  ;;  %v2106_v13 = vld [vmem:[#allocation4 + $0xe] sm:$0x2]  ;;  %v2364_v25 = vpack.c.bf16 %v6200_v49, %v6200_v49 }
 0x13a   :  { %3093 = vst [vmem:[#allocation4 + $0x10] sm:$0x2] %v3092_v36  ;;  %v2005_v9 = vld [vmem:[#allocation4 + $0x18] sm:$0x1]  ;;  %v1830_v29 = vrot.slane %v1828_v28, 7  ;;  %v2152_v30 = vrot.slane %v2136_v24, 2  ;;  %v2033_v34 = vpack.c.bf16 %v7397_v41, %v7397_v41  ;;  %v4820_v38 = vpack.i.bf16 %v2421_v56, %v2419_v40  ;;  %v6485_v36 = vpop.permute.xlu2 %4771 }
 0x13b   :  { %v7398_v37 = vshll.u32 %v6364_v21, 16  ;;  %v2008_v63 = vld [vmem:[#allocation4 + $0x22] sm:$0x1]  ;;  %1863 = vst [vmem:[#allocation4 + $0x16] sm:$0x2] %v1862_v19  ;;  %v2379_v55 = vrot.slane %v2363_v51, 2  ;;  %v2107_v52 = vsel %vm5478_vm12, %v2088_v48, %v2106_v13 }
 0x13c   :  { %v7399_v43 = vld [vmem:[#allocation49_spill] sm:$0xff]  ;;  %v1855_v16 = vld [vmem:[#allocation4 + $0x2] sm:$0x2]  ;;  %v2009_v49 = vsel %vm5258_vm7, %v1981_v26, %v2008_v63  ;;  %v4810_v54 = vpack.i.bf16 %v1830_v29, %v1827_v27  ;;  %v2380_v21 = vrot.slane %v2364_v25, 2  ;;  %v2164_v22 = vsel %vm222_vm1, %v2136_v24, %v2152_v30  ;;  %v112_v8 = vld [vmem:[#allocation2 + $0xa8] sm:$0x3]  ;;  %v2308_v24 = vpop.permute.xlu0 %2307  ;;  %v2310_v27 = vpop.permute.xlu1 %2309 }
 0x13d   :  { %v2006_v1 = vsel %vm5258_vm7, %v7398_v37, %v2005_v9  ;;  %v2137_v45 = vpack.c.bf16 %v7399_v43, %v7399_v43  ;;  %v1856_v40 = vsel %vm5891_vm6, %v4754_v58, %v1855_v16  ;;  %2010 = vst [vmem:[#allocation4 + $0x22] sm:$0x1] %v2009_v49  ;;  %v1858_v56 = vld [vmem:[#allocation4 + $0xc] sm:$0x2]  ;;  %v2397_v62 = vsel %vm222_vm1, %v2363_v51, %v2379_v55  ;;  %v121_v2 = vld [vmem:[#allocation2 + $0xc8] sm:$0x3] }
 0x13e   :  { %2007 = vst [vmem:[#allocation4 + $0x18] sm:$0x1] %v2006_v1  ;;  %v2049_v10 = vrot.slane %v2033_v34, 2  ;;  %4811 = vrot.lane.b32.xlu0 %v4810_v54, %s4858_s15  ;;  %v1859_v26 = vsel %vm5891_vm6, %v4758_v4, %v1858_v56  ;;  %v2400_v61 = vsel %vm222_vm1, %v2364_v25, %v2380_v21  ;;  %v2415_v11 = vshll.u32 %v2397_v62, 16  ;;  %v1367_v1 = vld [vmem:[#allocation2 + $0xb8] sm:$0x3] }
 0x13f   :  { %1857 = vst [vmem:[#allocation4 + $0x2] sm:$0x2] %v1856_v40  ;;  %v2153_v12 = vrot.slane %v2137_v45, 2  ;;  %v2417_v58 = vshll.u32 %v2400_v61, 16  ;;  %v2186_v28 = vshll.u32 %v2164_v22, 16  ;;  %v4774_v30 = vunpack.i.h.bf16 %v6485_v36 }
 0x140   :  { %1860 = vst [vmem:[#allocation4 + $0xc] sm:$0x2] %v1859_v26  ;;  %v2065_v17 = vsel %vm222_vm1, %v2033_v34, %v2049_v10  ;;  %v3228_v63 = vld [vmem:[#allocation3 + $0x43] sm:$0x1]  ;;  %v3229_v55 = vld [vmem:[#allocation3 + $0x53] sm:$0x1] }
 0x141   :  { %4821 = vrot.lane.b32.xlu2 %v4820_v38, %s4858_s15  ;;  %2108 = vst [vmem:[#allocation4 + $0xe] sm:$0x2] %v2107_v52  ;;  %v2089_v19 = vrot.slane %v2065_v17, 7  ;;  %v3443_v4 = vld [vmem:[#allocation4 + $0x10] sm:$0x2]  ;;  %v4815_v48 = vpack.i.bf16 %v2417_v58, %v2415_v11  ;;  %v2167_v13 = vsel %vm222_vm1, %v2137_v45, %v2153_v12  ;;  %v2188_v34 = vrot.slane %v2186_v28, 7 }
 0x142   :  { %116 = vst.msk [vmem:[#allocation3 + $0x48] sm:$0x3] %vm20_vm2, %v112_v8  ;;  %v3444_v51 = vsel %vm5662_vm4, %v6374_v44, %v3443_v4  ;;  %v2189_v37 = vshll.u32 %v2167_v13, 16  ;;  %v1376_v38 = vld [vmem:[#allocation2 + $0xd8] sm:$0x3]  ;;  %v3236_v43 = vpack.c.bf16 %v3228_v63, %v3228_v63  ;;  %v3237_v49 = vpack.c.bf16 %v3229_v55, %v3229_v55 }
 0x143   :  { %v2110_v9 = vsel %vm5478_vm12, %v2089_v19, %v2109_v42  ;;  %126 = vst.msk [vmem:[#allocation3 + $0x58] sm:$0x3] %vm20_vm2, %v121_v2  ;;  %4816 = vrot.lane.b32.xlu1 %v4815_v48, %s4858_s15  ;;  %v2695_v45 = vld [vmem:[#allocation4 + $0x4] sm:$0x2]  ;;  %v2752_v52 = vld [vmem:[#allocation3] sm:$0x1]  ;;  %v4773_v12 = vunpack.i.l.bf16 %v6485_v36 }
 0x144   :  { %3445 = vst [vmem:[#allocation4 + $0x10] sm:$0x2] %v3444_v51  ;;  %v2336_v41 = vld [vmem:[#allocation4 + $0x22] sm:$0x1]  ;;  %v2696_v54 = vsel %vm5891_vm6, %v4774_v30, %v2695_v45  ;;  %v2768_v21 = vld [vmem:[#allocation4 + $0x6] sm:$0x1]  ;;  %v2760_v10 = vpack.c.bf16 %v2752_v52, %v2752_v52  ;;  %v2546_v11 = vpop.permute.xlu0 %2545  ;;  %v2548_v28 = vpop.permute.xlu1 %2547 }
 0x145   :  { %v2333_v29 = vld [vmem:[#allocation4 + $0x18] sm:$0x1]  ;;  %2111 = vst [vmem:[#allocation4 + $0x18] sm:$0x2] %v2110_v9  ;;  %v2337_v44 = vsel %vm5325_vm9, %v2310_v27, %v2336_v41  ;;  %v2191_v56 = vrot.slane %v2189_v37, 7  ;;  %v3252_v62 = vrot.slane %v3236_v43, 2 }
 0x146   :  { %v2334_v25 = vsel %vm5325_vm9, %v2308_v24, %v2333_v29  ;;  %2338 = vst [vmem:[#allocation4 + $0x22] sm:$0x1] %v2337_v44  ;;  %v3253_v61 = vrot.slane %v3237_v49, 2  ;;  %v2769_v58 = vsel %vm5219_vm5, %v2760_v10, %v2768_v21  ;;  %v2792_v17 = vld [vmem:[#allocation3 + $0x2] sm:$0x1] }
 0x147   :  { %2335 = vst [vmem:[#allocation4 + $0x18] sm:$0x1] %v2334_v25  ;;  %v3270_v42 = vsel %vm222_vm1, %v3236_v43, %v3252_v62  ;;  %v131_v8 = vld [vmem:[#allocation2 + $0xe8] sm:$0x3]  ;;  %v2800_v4 = vpack.c.bf16 %v2792_v17, %v2792_v17  ;;  %v2753_v63 = vld [vmem:[#allocation3 + $0x10] sm:$0x1] }
 0x148   :  { %v2218_v16 = vld [vmem:[#allocation4 + $0xe] sm:$0x2]  ;;  %2697 = vst [vmem:[#allocation4 + $0x4] sm:$0x2] %v2696_v54  ;;  %v3273_v19 = vsel %vm222_vm1, %v3237_v49, %v3253_v61  ;;  %v3288_v2 = vshll.u32 %v3270_v42, 16 }
 0x149   :  { %v2219_v40 = vsel %vm5538_vm14, %v2188_v34, %v2218_v16  ;;  %v6505_v22 = vld [vmem:[#allocation3 + $0x48] sm:$0x1]  ;;  %v3290_v48 = vshll.u32 %v3273_v19, 16  ;;  %2770 = vst [vmem:[#allocation4 + $0x6] sm:$0x1] %v2769_v58  ;;  %v2816_v51 = vrot.slane %v2800_v4, 2  ;;  %v2761_v16 = vpack.c.bf16 %v2753_v63, %v2753_v63 }
 0x14a   :  { %2220 = vst [vmem:[#allocation4 + $0xe] sm:$0x2] %v2219_v40  ;;  %v6507_v26 = vld [vmem:[#allocation3 + $0x58] sm:$0x1]  ;;  %v141_v13 = vld [vmem:[#allocation2 + $0x108] sm:$0x3] }
 0x14b   :  { %1371 = vst.msk [vmem:[#allocation3 + $0x48] sm:$0x3] %vm20_vm2, %v1367_v1  ;;  %v4835_v9 = vpack.i.bf16 %v3290_v48, %v3288_v2  ;;  %v2722_v30 = vld [vmem:[#allocation2 + $0xc8] sm:$0x3]  ;;  %v2826_v41 = vsel %vm222_vm1, %v2800_v4, %v2816_v51  ;;  %v1385_v45 = vld [vmem:[#allocation2 + $0xf8] sm:$0x3] }
 0x14c   :  { %v2221_v24 = vld [vmem:[#allocation4 + $0x18] sm:$0x2]  ;;  %1380 = vst.msk [vmem:[#allocation3 + $0x58] sm:$0x3] %vm20_vm2, %v1376_v38  ;;  %v2730_v25 = vld [vmem:[#allocation2 + $0xe8] sm:$0x3] }
 0x14d   :  { %v2222_v27 = vsel %vm5538_vm14, %v2191_v56, %v2221_v24  ;;  %v2456_v36 = vld [vmem:[#allocation4 + $0x22] sm:$0x1]  ;;  %136 = vst.msk [vmem:[#allocation3 + $0x68] sm:$0x3] %vm20_vm2, %v131_v8  ;;  %4836 = vrot.lane.b32.xlu2 %v4835_v9, %s4858_s15  ;;  %v2848_v37 = vshll.u32 %v2826_v41, 16  ;;  %v6536_v24 = vpop.permute.xlu1 %3178 }
 0x14e   :  { %2223 = vst [vmem:[#allocation4 + $0x18] sm:$0x2] %v2222_v27  ;;  %v2457_v29 = vsel %vm5557_vm15, %v4773_v12, %v2456_v36  ;;  %v2771_v38 = vld [vmem:[#allocation4 + $0x10] sm:$0x1]  ;;  %v2793_v49 = vld [vmem:[#allocation3 + $0x12] sm:$0x1]  ;;  %v6530_v12 = vpop.permute.xlu2 %4786 }
 0x14f   :  { %2458 = vst [vmem:[#allocation4 + $0x22] sm:$0x1] %v2457_v29  ;;  %v1394_v21 = vld [vmem:[#allocation2 + $0x118] sm:$0x3]  ;;  %v2801_v40 = vpack.c.bf16 %v2793_v49, %v2793_v49  ;;  %v3230_v56 = vld [vmem:[#allocation3 + $0x63] sm:$0x1]  ;;  %v4789_v19 = vunpack.i.h.bf16 %v6530_v12  ;;  %v2772_v4 = vsel %vm5219_vm5, %v2761_v16, %v2771_v38 }
 0x150   :  { %146 = vst.msk [vmem:[#allocation3 + $0x78] sm:$0x3] %vm20_vm2, %v141_v13  ;;  %v2872_v52 = vld [vmem:[#allocation4 + $0x6] sm:$0x1]  ;;  %v3238_v42 = vpack.c.bf16 %v3230_v56, %v3230_v56  ;;  %v3231_v48 = vld [vmem:[#allocation3 + $0x73] sm:$0x1] }
 0x151   :  { %v2570_v34 = vld [vmem:[#allocation4 + $0xe] sm:$0x2]  ;;  %v2873_v61 = vsel %vm5258_vm7, %v2848_v37, %v2872_v52  ;;  %v2817_v27 = vrot.slane %v2801_v40, 2  ;;  %v3239_v51 = vpack.c.bf16 %v3231_v48, %v3231_v48  ;;  %2773 = vst [vmem:[#allocation4 + $0x10] sm:$0x1] %v2772_v4 }
 0x152   :  { %v2571_v44 = vsel %vm5662_vm4, %v2546_v11, %v2570_v34  ;;  %v2595_v1 = vld [vmem:[#allocation3 + $0x48] sm:$0x1]  ;;  %v3177_v11 = vpop.permute.xlu0 %3176  ;;  %2874 = vst [vmem:[#allocation4 + $0x6] sm:$0x1] %v2873_v61  ;;  %v3254_v9 = vrot.slane %v3238_v42, 2 }
 0x153   :  { %2572 = vst [vmem:[#allocation4 + $0xe] sm:$0x2] %v2571_v44  ;;  %v2596_v55 = vld [vmem:[#allocation3 + $0x58] sm:$0x1]  ;;  %v2603_v43 = vpack.c.bf16 %v2595_v1, %v2595_v1  ;;  %v3255_v41 = vrot.slane %v3239_v51, 2  ;;  %v2829_v44 = vsel %vm222_vm1, %v2801_v40, %v2817_v27 }
 0x154   :  { %v2604_v54 = vpack.c.bf16 %v2596_v55, %v2596_v55  ;;  %2726 = vst.msk [vmem:[#allocation3 + $0x48] sm:$0x3] %vm20_vm2, %v2722_v30  ;;  %v6534_v8 = vld [vmem:[#allocation3 + $0x68] sm:$0x1]  ;;  %v3326_v30 = vld [vmem:[#allocation4 + $0x1a] sm:$0x1]  ;;  %v3276_v63 = vsel %vm222_vm1, %v3238_v42, %v3254_v9 }
 0x155   :  { %v2573_v62 = vld [vmem:[#allocation4 + $0x18] sm:$0x2]  ;;  %v2619_v10 = vrot.slane %v2603_v43, 2  ;;  %2734 = vst.msk [vmem:[#allocation3 + $0x58] sm:$0x3] %vm20_vm2, %v2730_v25  ;;  %v3327_v34 = vsel %vm5557_vm15, %v4789_v19, %v3326_v30  ;;  %v3279_v38 = vsel %vm222_vm1, %v3239_v51, %v3255_v41  ;;  %v2850_v56 = vshll.u32 %v2829_v44, 16 }
 0x156   :  { %v2574_v58 = vsel %vm5662_vm4, %v2548_v28, %v2573_v62  ;;  %v2620_v17 = vrot.slane %v2604_v54, 2  ;;  %1389 = vst.msk [vmem:[#allocation3 + $0x68] sm:$0x3] %vm20_vm2, %v1385_v45  ;;  %v2738_v1 = vld [vmem:[#allocation2 + $0x108] sm:$0x3]  ;;  %v3292_v42 = vshll.u32 %v3276_v63, 16 }
 0x157   :  { %2575 = vst [vmem:[#allocation4 + $0x18] sm:$0x2] %v2574_v58  ;;  %v2637_v2 = vsel %vm222_vm1, %v2603_v43, %v2619_v10  ;;  %v6543_v28 = vld [vmem:[#allocation3 + $0x78] sm:$0x1]  ;;  %v2755_v55 = vld [vmem:[#allocation3 + $0x30] sm:$0x1] }
 0x158   :  { %v2640_v13 = vsel %vm222_vm1, %v2604_v54, %v2620_v17  ;;  %v2659_v36 = vshll.u32 %v2637_v2, 16  ;;  %1398 = vst.msk [vmem:[#allocation3 + $0x78] sm:$0x3] %vm20_vm2, %v1394_v21  ;;  %v2777_v43 = vld [vmem:[#allocation4 + $0x24] sm:$0x1]  ;;  %v2763_v54 = vpack.c.bf16 %v2755_v55, %v2755_v55  ;;  %v3294_v58 = vshll.u32 %v3279_v38, 16 }
 0x159   :  { %v2662_v29 = vshll.u32 %v2640_v13, 16  ;;  %3328 = vst [vmem:[#allocation4 + $0x1a] sm:$0x1] %v3327_v34  ;;  %v3200_v16 = vld [vmem:[#allocation4 + $0x6] sm:$0x1]  ;;  %v6560_v13 = vpop.permute.xlu1 %3416 }
 0x15a   :  { %v2661_v25 = vrot.slane %v2659_v36, 7  ;;  %v2747_v49 = vld [vmem:[#allocation2 + $0x128] sm:$0x3]  ;;  %v2795_v52 = vld [vmem:[#allocation3 + $0x32] sm:$0x1]  ;;  %v3201_v21 = vsel %vm5325_vm9, %v3177_v11, %v3200_v16  ;;  %v2778_v17 = vsel %vm5219_vm5, %v2763_v54, %v2777_v43  ;;  %v6557_v19 = vpop.permute.xlu0 %3182  ;;  %v4840_v34 = vpack.i.bf16 %v3294_v58, %v3292_v42 }
 0x15b   :  { %v2664_v37 = vrot.slane %v2662_v29, 7  ;;  %v2803_v62 = vpack.c.bf16 %v2795_v52, %v2795_v52  ;;  %v3468_v10 = vld [vmem:[#allocation3 + $0x47] sm:$0x1]  ;;  %v3469_v40 = vld [vmem:[#allocation3 + $0x57] sm:$0x1] }
 0x15c   :  { %3202 = vst [vmem:[#allocation4 + $0x6] sm:$0x1] %v3201_v21  ;;  %v3476_v2 = vpack.c.bf16 %v3468_v10, %v3468_v10  ;;  %v3477_v48 = vpack.c.bf16 %v3469_v40, %v3469_v40  ;;  %v2875_v51 = vld [vmem:[#allocation4 + $0x10] sm:$0x1]  ;;  %v3000_v43 = vld [vmem:[#allocation3 + $0x6] sm:$0x1] }
 0x15d   :  { %v4825_v45 = vpack.i.bf16 %v2664_v37, %v2661_v25  ;;  %v2597_v61 = vld [vmem:[#allocation3 + $0x68] sm:$0x1]  ;;  %v2819_v11 = vrot.slane %v2803_v62, 2  ;;  %v2876_v30 = vsel %vm5258_vm7, %v2850_v56, %v2875_v51  ;;  %2779 = vst [vmem:[#allocation4 + $0x24] sm:$0x1] %v2778_v17  ;;  %v3008_v52 = vpack.c.bf16 %v3000_v43, %v3000_v43  ;;  %v6570_v56 = vpop.permute.xlu2 %4801 }
 0x15e   :  { %v2605_v27 = vpack.c.bf16 %v2597_v61, %v2597_v61  ;;  %2742 = vst.msk [vmem:[#allocation3 + $0x68] sm:$0x3] %vm20_vm2, %v2738_v1  ;;  %v3492_v9 = vrot.slane %v3476_v2, 2  ;;  %v3493_v25 = vrot.slane %v3477_v48, 2  ;;  %v2896_v1 = vld [vmem:[#allocation3 + $0x4] sm:$0x1] }
 0x15f   :  { %4826 = vrot.lane.b32.xlu0 %v4825_v45, %s4858_s15  ;;  %v2598_v4 = vld [vmem:[#allocation3 + $0x78] sm:$0x1]  ;;  %2877 = vst [vmem:[#allocation4 + $0x10] sm:$0x1] %v2876_v30  ;;  %v2835_v37 = vsel %vm222_vm1, %v2803_v62, %v2819_v11  ;;  %v2904_v55 = vpack.c.bf16 %v2896_v1, %v2896_v1  ;;  %v3470_v45 = vld [vmem:[#allocation3 + $0x67] sm:$0x1] }
 0x160   :  { %v2606_v36 = vpack.c.bf16 %v2598_v4, %v2598_v4  ;;  %2751 = vst.msk [vmem:[#allocation3 + $0x78] sm:$0x3] %vm20_vm2, %v2747_v49  ;;  %v2621_v29 = vrot.slane %v2605_v27, 2  ;;  %v3510_v44 = vsel %vm222_vm1, %v3476_v2, %v3492_v9  ;;  %v3513_v38 = vsel %vm222_vm1, %v3477_v48, %v3493_v25  ;;  %v3471_v21 = vld [vmem:[#allocation3 + $0x77] sm:$0x1] }
 0x161   :  { %v3532_v54 = vshll.u32 %v3510_v44, 16  ;;  %v2854_v62 = vshll.u32 %v2835_v37, 16  ;;  %v2920_v40 = vrot.slane %v2904_v55, 2  ;;  %v3478_v61 = vpack.c.bf16 %v3470_v45, %v3470_v45  ;;  %v1628_v30 = vld [vmem:[#allocation4 + $0x48] sm:$0x1] }
 0x162   :  { %v2622_v41 = vrot.slane %v2606_v36, 2  ;;  %v2643_v63 = vsel %vm222_vm1, %v2605_v27, %v2621_v29  ;;  %v3535_v58 = vshll.u32 %v3513_v38, 16  ;;  %v3024_v17 = vrot.slane %v3008_v52, 2  ;;  %v2976_v27 = vld [vmem:[#allocation4 + $0x6] sm:$0x2]  ;;  %v6575_v25 = vpop.permute.xlu0 %3420  ;;  %v6580_v38 = vpop.permute.xlu1 %3422 }
 0x163   :  { %v2665_v49 = vshll.u32 %v2643_v63, 16  ;;  %v3479_v2 = vpack.c.bf16 %v3471_v21, %v3471_v21  ;;  %v2930_v11 = vsel %vm222_vm1, %v2904_v55, %v2920_v40  ;;  %v3494_v48 = vrot.slane %v3478_v61, 2  ;;  %v2898_v1 = vld [vmem:[#allocation3 + $0x24] sm:$0x1]  ;;  %v3002_v63 = vld [vmem:[#allocation3 + $0x26] sm:$0x1] }
 0x164   :  { %v2646_v16 = vsel %vm222_vm1, %v2606_v36, %v2622_v41  ;;  %v4804_v36 = vunpack.i.h.bf16 %v6570_v56  ;;  %v2881_v51 = vld [vmem:[#allocation4 + $0x24] sm:$0x1]  ;;  %v3534_v9 = vrot.slane %v3532_v54, 7  ;;  %v2960_v29 = vrot.slane %v2930_v11, 7  ;;  %v3597_v6 = vld [vmem:[#allocation3 + $0x52] sm:$0x1] }
 0x165   :  { %v2668_v10 = vshll.u32 %v2646_v16, 16  ;;  %v2667_v42 = vrot.slane %v2665_v49, 7  ;;  %v3034_v44 = vsel %vm222_vm1, %v3008_v52, %v3024_v17  ;;  %v3537_v43 = vrot.slane %v3535_v58, 7  ;;  %v2899_v49 = vld [vmem:[#allocation3 + $0x34] sm:$0x1] }
 0x166   :  { %v3203_v37 = vld [vmem:[#allocation4 + $0x10] sm:$0x1]  ;;  %v2977_v45 = vsel %vm5478_vm12, %v2960_v29, %v2976_v27  ;;  %v3495_v16 = vrot.slane %v3479_v2, 2  ;;  %v4788_v54 = vunpack.i.l.bf16 %v6530_v12  ;;  %v3516_v52 = vsel %vm222_vm1, %v3478_v61, %v3494_v48 }
 0x167   :  { %4841 = vrot.lane.b32.xlu0 %v4840_v34, %s4858_s15  ;;  %v2670_v4 = vrot.slane %v2668_v10, 7  ;;  %v2882_v34 = vsel %vm5258_vm7, %v2854_v62, %v2881_v51  ;;  %v3204_v55 = vsel %vm5325_vm9, %v6536_v24, %v3203_v37  ;;  %v1629_v21 = vsel %vm5557_vm15, %v4804_v36, %v1628_v30  ;;  %v3003_v10 = vld [vmem:[#allocation3 + $0x36] sm:$0x1]  ;;  %2978 = vst [vmem:[#allocation4 + $0x6] sm:$0x2] %v2977_v45 }
 0x168   :  { %2883 = vst [vmem:[#allocation4 + $0x24] sm:$0x1] %v2882_v34  ;;  %v3056_v24 = vshll.u32 %v3034_v44, 16  ;;  %v3519_v62 = vsel %vm222_vm1, %v3479_v2, %v3495_v16  ;;  %v3538_v40 = vshll.u32 %v3516_v52, 16  ;;  %v3010_v17 = vpack.c.bf16 %v3002_v63, %v3002_v63  ;;  %v2982_v37 = vld [vmem:[#allocation4 + $0x1a] sm:$0x2] }
 0x169   :  { %v4830_v41 = vpack.i.bf16 %v2670_v4, %v2667_v42  ;;  %3205 = vst [vmem:[#allocation4 + $0x10] sm:$0x1] %v3204_v55  ;;  %v2906_v42 = vpack.c.bf16 %v2898_v1, %v2898_v1  ;;  %v3541_v58 = vshll.u32 %v3519_v62, 16  ;;  %v2907_v4 = vpack.c.bf16 %v2899_v49, %v2899_v49  ;;  %v2985_v55 = vld [vmem:[#allocation4 + $0x24] sm:$0x2]  ;;  %v6602_v49 = vpop.permute.xlu2 %1715 }
 0x16a   :  { %1630 = vst [vmem:[#allocation4 + $0x48] sm:$0x1] %v1629_v21  ;;  %v3011_v27 = vpack.c.bf16 %v3003_v10, %v3003_v10  ;;  %v1266_v12 = vpack.c.bf16 %v6534_v8, %v6534_v8  ;;  %v4845_v11 = vpack.i.bf16 %v3537_v43, %v3534_v9  ;;  %v3540_v61 = vrot.slane %v3538_v40, 7  ;;  %v4762_v52 = vpop.permute.xlu0 %4761  ;;  %v4767_v62 = vpop.permute.xlu1 %4766 }
 0x16b   :  { %4831 = vrot.lane.b32.xlu1 %v4830_v41, %s4858_s15  ;;  %v2922_v48 = vrot.slane %v2906_v42, 2  ;;  %v3543_v51 = vrot.slane %v3541_v58, 7  ;;  %v3026_v36 = vrot.slane %v3010_v17, 2  ;;  %v2923_v29 = vrot.slane %v2907_v4, 2  ;;  %v7400_v58 = vld [vmem:[#allocation29_spill] sm:$0xff] }
 0x16c   :  { %v3027_v30 = vrot.slane %v3011_v27, 2  ;;  %v3058_v41 = vrot.slane %v3056_v24, 7  ;;  %v1282_v24 = vrot.slane %v1266_v12, 2 }
 0x16d   :  { %v2938_v2 = vsel %vm222_vm1, %v2906_v42, %v2922_v48  ;;  %v4850_v44 = vpack.i.bf16 %v3543_v51, %v3540_v61  ;;  %v2942_v63 = vsel %vm222_vm1, %v2907_v4, %v2923_v29  ;;  %v3040_v9 = vsel %vm222_vm1, %v3010_v17, %v3026_v36  ;;  %v1864_v17 = vld [vmem:[#allocation4 + $0x20] sm:$0x2]  ;;  %v2447_v4 = vld [vmem:[#allocation4 + $0x4] sm:$0x1]  ;;  %v4637_v61 = vld [vmem:[%s7276_s1 + $0xb8] sm:$0xff] }
 0x16e   :  { %v2962_v1 = vrot.slane %v2938_v2, 7  ;;  %v2963_v43 = vrot.slane %v2942_v63, 7  ;;  %v3043_v16 = vsel %vm222_vm1, %v3011_v27, %v3027_v30  ;;  %v3088_v10 = vld [vmem:[#allocation4 + $0x6] sm:$0x2]  ;;  %v4621_v27 = vld [vmem:[%s7276_s1 + $0x38] sm:$0xff]  ;;  %v3062_v48 = vshll.u32 %v3040_v9, 16  ;;  %4355 = vmatpush.bf16.msra.mxu2 %v4637_v61 }
 0x16f   :  { %v3209_v34 = vld [vmem:[#allocation4 + $0x24] sm:$0x1]  ;;  %4851 = vrot.lane.b32.xlu2 %v4850_v44, %s4858_s15  ;;  %v3089_v40 = vsel %vm5538_vm14, %v3058_v41, %v3088_v10  ;;  %v3065_v51 = vshll.u32 %v3043_v16, 16  ;;  %v4764_v36 = vunpack.i.h.bf16 %v4762_v52  ;;  %v4763_v29 = vunpack.i.l.bf16 %v4762_v52  ;;  %v2450_v30 = vld [vmem:[#allocation4 + $0xe] sm:$0x1]  ;;  %v4645_v2 = vld [vmem:[%s7276_s1 + $0xf8] sm:$0xff]  ;;  %4317 = vmatpush.bf16.msra.mxu0 %v4621_v27 }
 0x170   :  { %v3323_v45 = vld [vmem:[#allocation4 + $0x10] sm:$0x1]  ;;  %v3210_v8 = vsel %vm5325_vm9, %v6557_v19, %v3209_v34  ;;  %v2983_v19 = vsel %vm5478_vm12, %v2962_v1, %v2982_v37  ;;  %v2986_v42 = vsel %vm5478_vm12, %v2963_v43, %v2985_v55  ;;  %3090 = vst [vmem:[#allocation4 + $0x6] sm:$0x2] %v3089_v40  ;;  %v2453_v41 = vld [vmem:[#allocation4 + $0x18] sm:$0x1]  ;;  %v6629_v34 = vsel %vm222_vm1, %v1266_v12, %v1282_v24 }
 0x171   :  { %v3324_v21 = vsel %vm5557_vm15, %v4788_v54, %v3323_v45  ;;  %3211 = vst [vmem:[#allocation4 + $0x24] sm:$0x1] %v3210_v8  ;;  %v1162_v54 = vpack.c.bf16 %v7400_v58, %v7400_v58  ;;  %v4769_v44 = vunpack.i.h.bf16 %v4767_v62  ;;  %v4768_v1 = vunpack.i.l.bf16 %v4767_v62  ;;  %v1910_v63 = vld [vmem:[#allocation4 + $0x36] sm:$0x1]  ;;  %4374 = vmatpush.bf16.msra.mxu3 %v4645_v2  ;;  %v4620_v12 = vld [vmem:[%s7276_s1 + $0x30] sm:$0xff]  ;;  %v4619_v27 = vld [vmem:[%s7276_s1 + $0x28] sm:$0xff] }
 0x172   :  { %3325 = vst [vmem:[#allocation4 + $0x10] sm:$0x1] %v3324_v21  ;;  %v2448_v55 = vsel %vm5557_vm15, %v4764_v36, %v2447_v4  ;;  %v1865_v45 = vsel %vm5891_vm6, %v4763_v29, %v1864_v17  ;;  %v1892_v8 = vpack.c.bf16 %v6192_v47, %v6192_v47  ;;  %v4628_v9 = vld [vmem:[%s7276_s1 + $0x70] sm:$0xff]  ;;  %v1246_v52 = vld [vmem:[#allocation4 + $0x3e] sm:$0x2]  ;;  %v1932_v62 = vpack.c.bf16 %v6194_v15, %v6194_v15  ;;  %v6661_v17 = vpop.permute.xlu2 %2313  ;;  %v4777_v4 = vpop.permute.xlu0 %4776  ;;  %v4627_v29 = vld [vmem:[%s7276_s1 + $0x68] sm:$0xff] }
 0x173   :  { %4846 = vrot.lane.b32.xlu1 %v4845_v11, %s4858_s15  ;;  %v4629_v11 = vld [vmem:[%s7276_s1 + $0x78] sm:$0xff]  ;;  %2984 = vst [vmem:[#allocation4 + $0x1a] sm:$0x2] %v2983_v19  ;;  %v1178_v37 = vrot.slane %v1162_v54, 2  ;;  %v4636_v43 = vld [vmem:[%s7276_s1 + $0xb0] sm:$0xff]  ;;  %v2451_v21 = vsel %vm5557_vm15, %v4768_v1, %v2450_v30  ;;  %v2454_v47 = vsel %vm5557_vm15, %v4769_v44, %v2453_v41  ;;  %v3064_v19 = vrot.slane %v3062_v48, 7  ;;  %4318 = vmatpush.bf16.msra.mxu0 %v4620_v12  ;;  %v4782_v36 = vpop.permute.xlu1 %4781 }
 0x174   :  { %4336 = vmatpush.bf16.msra.mxu1 %v4629_v11  ;;  %2987 = vst [vmem:[#allocation4 + $0x24] sm:$0x2] %v2986_v42  ;;  %v4644_v10 = vld [vmem:[%s7276_s1 + $0xf0] sm:$0xff]  ;;  %v2035_v40 = vpack.c.bf16 %v6046_v59, %v6046_v59  ;;  %v3067_v42 = vrot.slane %v3065_v51, 7  ;;  %v1326_v58 = vshll.u32 %v6629_v34, 16  ;;  %v2139_v15 = vpack.c.bf16 %v6048_v0, %v6048_v0  ;;  %4356 = vmatpush.bf16.msra.mxu2 %v4636_v43  ;;  %v4635_v30 = vld [vmem:[%s7276_s1 + $0xa8] sm:$0xff] }
 0x175   :  { %v1206_v16 = vsel %vm222_vm1, %v1162_v54, %v1178_v37  ;;  %2449 = vst [vmem:[#allocation4 + $0x4] sm:$0x1] %v2448_v55  ;;  %v1911_v54 = vsel %vm5219_vm5, %v1892_v8, %v1910_v63  ;;  %v1948_v11 = vrot.slane %v1932_v62, 2  ;;  %v2701_v61 = vld [vmem:[#allocation4 + $0x18] sm:$0x2]  ;;  %v4779_v48 = vunpack.i.h.bf16 %v4777_v4  ;;  %4375 = vmatpush.bf16.msra.mxu3 %v4644_v10  ;;  %v4643_v0 = vld [vmem:[%s7276_s1 + $0xe8] sm:$0xff] }
 0x176   :  { %v1218_v24 = vrot.slane %v1206_v16, 7  ;;  %1866 = vst [vmem:[#allocation4 + $0x20] sm:$0x2] %v1865_v45  ;;  %v4778_v51 = vunpack.i.l.bf16 %v4777_v4  ;;  %v2698_v2 = vld [vmem:[#allocation4 + $0xe] sm:$0x2]  ;;  %v4783_v37 = vunpack.i.l.bf16 %v4782_v36  ;;  %v2051_v34 = vrot.slane %v2035_v40, 2 }
 0x177   :  { %2452 = vst [vmem:[#allocation4 + $0xe] sm:$0x1] %v2451_v21  ;;  %v3440_v41 = vld [vmem:[#allocation4 + $0x6] sm:$0x2]  ;;  %v2155_v44 = vrot.slane %v2139_v15, 2  ;;  %v2038_v1 = vpack.c.bf16 %v6122_v53, %v6122_v53  ;;  %v4784_v8 = vunpack.i.h.bf16 %v4782_v36  ;;  %v2142_v12 = vpack.c.bf16 %v6124_v50, %v6124_v50  ;;  %4319 = vmatpush.bf16.msra.mxu0 %v4619_v27 }
 0x178   :  { %4337 = vmatpush.bf16.msra.mxu1 %v4628_v9  ;;  %v1247_v59 = vsel %vm5478_vm12, %v1218_v24, %v1246_v52  ;;  %2455 = vst [vmem:[#allocation4 + $0x18] sm:$0x1] %v2454_v47  ;;  %v3441_v63 = vsel %vm5662_vm4, %v6560_v13, %v3440_v41  ;;  %v2704_v45 = vld [vmem:[#allocation4 + $0x22] sm:$0x2]  ;;  %v1328_v16 = vrot.slane %v1326_v58, 7  ;;  %v1968_v52 = vsel %vm222_vm1, %v1932_v62, %v1948_v11  ;;  %v4618_v13 = vld [vmem:[%s7276_s1 + $0x20] sm:$0xff] }
 0x179   :  { %1248 = vst [vmem:[#allocation4 + $0x3e] sm:$0x2] %v1247_v59  ;;  %v2702_v53 = vsel %vm5891_vm6, %v4779_v48, %v2701_v61  ;;  %v2699_v21 = vsel %vm5891_vm6, %v4778_v51, %v2698_v2  ;;  %v3320_v47 = vld [vmem:[#allocation4 + $0x6] sm:$0x1]  ;;  %4357 = vmatpush.bf16.msra.mxu2 %v4635_v30  ;;  %v2073_v10 = vsel %vm222_vm1, %v2035_v40, %v2051_v34  ;;  %v4634_v24 = vld [vmem:[%s7276_s1 + $0xa0] sm:$0xff]  ;;  %v1985_v4 = vshll.u32 %v1968_v52, 16 }
 0x17a   :  { %v3094_v55 = vld [vmem:[#allocation4 + $0x1a] sm:$0x2]  ;;  %1912 = vst [vmem:[#allocation4 + $0x36] sm:$0x1] %v1911_v54  ;;  %v2705_v62 = vsel %vm5891_vm6, %v4783_v37, %v2704_v45  ;;  %4376 = vmatpush.bf16.msra.mxu3 %v4643_v0  ;;  %v6708_v58 = vsel %vm222_vm1, %v2139_v15, %v2155_v44  ;;  %v2054_v54 = vrot.slane %v2038_v1, 2  ;;  %v3321_v27 = vsel %vm5557_vm15, %v4784_v8, %v3320_v47  ;;  %v7401_v61 = vld [vmem:[#allocation24_spill] sm:$0xff]  ;;  %v6721_v15 = vpop.permute.xlu2 %2551  ;;  %v4792_v36 = vpop.permute.xlu0 %4791 }
 0x17b   :  { %3442 = vst [vmem:[#allocation4 + $0x6] sm:$0x2] %v3441_v63  ;;  %v3095_v9 = vsel %vm5538_vm14, %v3064_v19, %v3094_v55  ;;  %v3097_v43 = vld [vmem:[#allocation4 + $0x24] sm:$0x2]  ;;  %v4626_v19 = vld [vmem:[%s7276_s1 + $0x60] sm:$0xff]  ;;  %v2158_v11 = vrot.slane %v2142_v12, 2  ;;  %v1160_v48 = vpack.c.bf16 %v7401_v61, %v7401_v61  ;;  %v6719_v51 = vpack.c.bf16 %v6505_v22, %v6505_v22  ;;  %4320 = vmatpush.bf16.msra.mxu0 %v4618_v13  ;;  %v6731_v37 = vpop.permute.xlu1 %4796 }
 0x17c   :  { %3096 = vst [vmem:[#allocation4 + $0x1a] sm:$0x2] %v3095_v9  ;;  %v3098_v50 = vsel %vm5538_vm14, %v3067_v42, %v3097_v43  ;;  %4338 = vmatpush.bf16.msra.mxu1 %v4627_v29  ;;  %v2091_v42 = vrot.slane %v2073_v10, 7  ;;  %v4642_v40 = vld [vmem:[%s7276_s1 + $0xe0] sm:$0xff]  ;;  %v2115_v59 = vld [vmem:[#allocation4 + $0x2c] sm:$0x2]  ;;  %v2085_v0 = vsel %vm222_vm1, %v2038_v1, %v2054_v54  ;;  %v4794_v2 = vunpack.i.h.bf16 %v4792_v36 }
 0x17d   :  { %3099 = vst [vmem:[#allocation4 + $0x24] sm:$0x2] %v3098_v50  ;;  %v4617_v29 = vld [vmem:[%s7276_s1 + $0x18] sm:$0xff]  ;;  %v2195_v22 = vshll.u32 %v6708_v58, 16  ;;  %4358 = vmatpush.bf16.msra.mxu2 %v4634_v24  ;;  %v4793_v55 = vunpack.i.l.bf16 %v4792_v36  ;;  %v1176_v8 = vrot.slane %v1160_v48, 2  ;;  %v2182_v13 = vsel %vm222_vm1, %v2142_v12, %v2158_v11  ;;  %v4616_v24 = vld [vmem:[%s7276_s1 + $0x10] sm:$0xff] }
 0x17e   :  { %2703 = vst [vmem:[#allocation4 + $0x18] sm:$0x2] %v2702_v53  ;;  %v4625_v30 = vld [vmem:[%s7276_s1 + $0x58] sm:$0xff]  ;;  %v2116_v1 = vsel %vm5478_vm12, %v2091_v42, %v2115_v59  ;;  %4377 = vmatpush.bf16.msra.mxu3 %v4642_v40  ;;  %v3329_v43 = vld [vmem:[#allocation4 + $0x24] sm:$0x1]  ;;  %v2094_v53 = vrot.slane %v2085_v0, 7  ;;  %v6749_v50 = vpack.c.bf16 %v6507_v26, %v6507_v26 }
 0x17f   :  { %2700 = vst [vmem:[#allocation4 + $0xe] sm:$0x2] %v2699_v21  ;;  %v4633_v34 = vld [vmem:[%s7276_s1 + $0x98] sm:$0xff]  ;;  %4321 = vmatpush.bf16.msra.mxu0 %v4617_v29  ;;  %v2124_v26 = vld [vmem:[#allocation4 + $0x4a] sm:$0x2]  ;;  %v1198_v42 = vsel %vm222_vm1, %v1160_v48, %v1176_v8  ;;  %v7402_v58 = vld [vmem:[#allocation18_spill] sm:$0xff] }
 0x180   :  { %v1358_v41 = vld [vmem:[#allocation4 + $0x3e] sm:$0x2]  ;;  %2706 = vst [vmem:[#allocation4 + $0x22] sm:$0x2] %v2705_v62  ;;  %4339 = vmatpush.bf16.msra.mxu1 %v4626_v19  ;;  %v4641_v45 = vld [vmem:[%s7276_s1 + $0xd8] sm:$0xff]  ;;  %v1280_v19 = vrot.slane %v6719_v51, 2  ;;  %v1161_v40 = vpack.c.bf16 %v7402_v58, %v7402_v58  ;;  %v2125_v0 = vsel %vm5478_vm12, %v2094_v53, %v2124_v26  ;;  %v4799_v53 = vunpack.i.h.bf16 %v6731_v37 }
 0x181   :  { %v1359_v44 = vsel %vm5538_vm14, %v1328_v16, %v1358_v41  ;;  %v2014_v63 = vld [vmem:[#allocation4 + $0x36] sm:$0x1]  ;;  %3322 = vst [vmem:[#allocation4 + $0x6] sm:$0x1] %v3321_v27  ;;  %v4798_v16 = vunpack.i.l.bf16 %v6731_v37  ;;  %v3571_v10 = vld [vmem:[#allocation4 + $0x10] sm:$0x2]  ;;  %4359 = vmatpush.bf16.msra.mxu2 %v4633_v34 }
 0x182   :  { %1360 = vst [vmem:[#allocation4 + $0x3e] sm:$0x2] %v1359_v44  ;;  %v2015_v9 = vsel %vm5258_vm7, %v1985_v4, %v2014_v63  ;;  %v3568_v52 = vld [vmem:[#allocation4 + $0x6] sm:$0x2]  ;;  %v3330_v4 = vsel %vm5557_vm15, %v4793_v55, %v3329_v43  ;;  %4378 = vmatpush.bf16.msra.mxu3 %v4641_v45  ;;  %v4624_v27 = vld [vmem:[%s7276_s1 + $0x50] sm:$0xff]  ;;  %v7403_v11 = vld [vmem:[#allocation34_spill] sm:$0xff]  ;;  %v6783_v41 = vpop.permute.xlu2 %2557  ;;  %v6787_v34 = vsel %vm222_vm1, %v6719_v51, %v1280_v19 }
 0x183   :  { %v3446_v21 = vld [vmem:[#allocation4 + $0x1a] sm:$0x2]  ;;  %2016 = vst [vmem:[#allocation4 + $0x36] sm:$0x1] %v2015_v9  ;;  %v3569_v47 = vsel %vm5891_vm6, %v4794_v2, %v3568_v52  ;;  %v4632_v59 = vld [vmem:[%s7276_s1 + $0x90] sm:$0xff]  ;;  %v1163_v61 = vpack.c.bf16 %v7403_v11, %v7403_v11  ;;  %v2197_v48 = vrot.slane %v2195_v22, 7  ;;  %v6789_v22 = vpop.permute.xlu0 %1711  ;;  %4322 = vmatpush.bf16.msra.mxu0 %v4616_v24  ;;  %v6799_v45 = vpop.permute.xlu1 %1713  ;;  %v1267_v43 = vpack.c.bf16 %v6543_v28, %v6543_v28 }
 0x184   :  { %v3447_v12 = vsel %vm5662_vm4, %v6575_v25, %v3446_v21  ;;  %v3449_v62 = vld [vmem:[#allocation4 + $0x24] sm:$0x2]  ;;  %2117 = vst [vmem:[#allocation4 + $0x2c] sm:$0x2] %v2116_v1  ;;  %4340 = vmatpush.bf16.msra.mxu1 %v4625_v30  ;;  %v2204_v25 = vshll.u32 %v2182_v13, 16  ;;  %v1177_v29 = vrot.slane %v1161_v40, 2  ;;  %v4803_v52 = vunpack.i.l.bf16 %v6570_v56 }
 0x185   :  { %3448 = vst [vmem:[#allocation4 + $0x1a] sm:$0x2] %v3447_v12  ;;  %v3450_v54 = vsel %vm5662_vm4, %v6580_v38, %v3449_v62  ;;  %v3572_v38 = vsel %vm5891_vm6, %v4798_v16, %v3571_v10  ;;  %v1240_v36 = vld [vmem:[#allocation4 + $0x2a] sm:$0x2]  ;;  %v1216_v2 = vrot.slane %v1198_v42, 7  ;;  %v1281_v44 = vrot.slane %v6749_v50, 2  ;;  %4360 = vmatpush.bf16.msra.mxu2 %v4632_v59 }
 0x186   :  { %3451 = vst [vmem:[#allocation4 + $0x24] sm:$0x2] %v3450_v54  ;;  %v4640_v30 = vld [vmem:[%s7276_s1 + $0xd0] sm:$0xff]  ;;  %v4615_v63 = vld [vmem:[%s7276_s1 + $0x8] sm:$0xff]  ;;  %v1202_v55 = vsel %vm222_vm1, %v1161_v40, %v1177_v29  ;;  %v1179_v9 = vrot.slane %v1163_v61, 2  ;;  %v6808_v13 = vrot.slane %v2204_v25, 7  ;;  %v1891_v11 = vpack.c.bf16 %v6042_v14, %v6042_v14 }
 0x187   :  { %3570 = vst [vmem:[#allocation4 + $0x6] sm:$0x2] %v3569_v47  ;;  %v4623_v1 = vld [vmem:[%s7276_s1 + $0x48] sm:$0xff]  ;;  %v1243_v21 = vld [vmem:[#allocation4 + $0x34] sm:$0x2]  ;;  %4379 = vmatpush.bf16.msra.mxu3 %v4640_v30  ;;  %v1320_v28 = vshll.u32 %v6787_v34, 16  ;;  %v1241_v62 = vsel %vm5478_vm12, %v1216_v2, %v1240_v36  ;;  %4323 = vmatpush.bf16.msra.mxu0 %v4615_v63  ;;  %v1301_v40 = vsel %vm222_vm1, %v6749_v50, %v1281_v44 }
 0x188   :  { %3331 = vst [vmem:[#allocation4 + $0x24] sm:$0x1] %v3330_v4  ;;  %4341 = vmatpush.bf16.msra.mxu1 %v4624_v27  ;;  %v4631_v51 = vld [vmem:[%s7276_s1 + $0x88] sm:$0xff]  ;;  %v1217_v56 = vrot.slane %v1202_v55, 7  ;;  %v1210_v37 = vsel %vm222_vm1, %v1163_v61, %v1179_v9  ;;  %v1283_v59 = vrot.slane %v1267_v43, 2  ;;  %v1931_v36 = vpack.c.bf16 %v6044_v18, %v6044_v18  ;;  %v4614_v29 = vld [vmem:[%s7276_s1] sm:$0xff] }
 0x189   :  { %v2758_v8 = vld [vmem:[#allocation3 + $0x60] sm:$0x1]  ;;  %v1745_v16 = vld [vmem:[#allocation4 + $0x3e] sm:$0x2]  ;;  %3573 = vst [vmem:[#allocation4 + $0x10] sm:$0x2] %v3572_v38  ;;  %4361 = vmatpush.bf16.msra.mxu2 %v4631_v51 }
 0x18a   :  { %v4639_v47 = vld [vmem:[%s7276_s1 + $0xc8] sm:$0xff]  ;;  %v1746_v10 = vsel %vm5662_vm4, %v6602_v49, %v1745_v16  ;;  %v2342_v19 = vld [vmem:[#allocation4 + $0x36] sm:$0x1]  ;;  %2126 = vst [vmem:[#allocation4 + $0x4a] sm:$0x2] %v2125_v0  ;;  %v2766_v26 = vpack.c.bf16 %v2758_v8, %v2758_v8  ;;  %v1219_v27 = vrot.slane %v1210_v37, 7  ;;  %v1244_v50 = vsel %vm5478_vm12, %v1217_v56, %v1243_v21  ;;  %v6850_v18 = vpop.permute.xlu2 %3188 }
 0x18b   :  { %1747 = vst [vmem:[#allocation4 + $0x3e] sm:$0x2] %v1746_v10  ;;  %v2343_v24 = vsel %vm5325_vm9, %v6661_v17, %v2342_v19  ;;  %v2227_v12 = vld [vmem:[#allocation4 + $0x2c] sm:$0x2]  ;;  %v2798_v42 = vld [vmem:[#allocation3 + $0x62] sm:$0x1]  ;;  %4380 = vmatpush.bf16.msra.mxu3 %v4639_v47  ;;  %v6842_v30 = vpop.permute.xlu0 %1717  ;;  %v6852_v44 = vpop.permute.xlu1 %2311  ;;  %4324 = vmatpush.bf16.msra.mxu0 %v4614_v29  ;;  %v1307_v8 = vsel %vm222_vm1, %v1267_v43, %v1283_v59 }
 0x18c   :  { %2344 = vst [vmem:[#allocation4 + $0x36] sm:$0x1] %v2343_v24  ;;  %v2228_v49 = vsel %vm5538_vm14, %v2197_v48, %v2227_v12  ;;  %v3574_v58 = vld [vmem:[#allocation4 + $0x1a] sm:$0x2]  ;;  %4342 = vmatpush.bf16.msra.mxu1 %v4623_v1  ;;  %v2786_v54 = vld [vmem:[#allocation4 + $0x42] sm:$0x1]  ;;  %v2806_v4 = vpack.c.bf16 %v2798_v42, %v2798_v42  ;;  %v1933_v59 = vpack.c.bf16 %v6237_v31, %v6237_v31 }
 0x18d   :  { %v3577_v17 = vld [vmem:[#allocation4 + $0x24] sm:$0x2]  ;;  %2229 = vst [vmem:[#allocation4 + $0x2c] sm:$0x2] %v2228_v49  ;;  %v3575_v25 = vsel %vm5891_vm6, %v4799_v53, %v3574_v58  ;;  %v1249_v38 = vld [vmem:[#allocation4 + $0x48] sm:$0x2]  ;;  %v2787_v14 = vsel %vm5219_vm5, %v2766_v26, %v2786_v54 }
 0x18e   :  { %v3578_v61 = vsel %vm5891_vm6, %v4803_v52, %v3577_v17  ;;  %3576 = vst [vmem:[#allocation4 + $0x1a] sm:$0x2] %v3575_v25  ;;  %v2822_v48 = vrot.slane %v2806_v4, 2  ;;  %v1907_v0 = vld [vmem:[#allocation4 + $0x2c] sm:$0x1]  ;;  %v4622_v2 = vld [vmem:[%s7276_s1 + $0x40] sm:$0xff]  ;;  %v1250_v51 = vsel %vm5478_vm12, %v1219_v27, %v1249_v38 }
 0x18f   :  { %3579 = vst [vmem:[#allocation4 + $0x24] sm:$0x2] %v3578_v61  ;;  %v4630_v34 = vld [vmem:[%s7276_s1 + $0x80] sm:$0xff]  ;;  %v1323_v55 = vshll.u32 %v1301_v40, 16  ;;  %v1908_v52 = vsel %vm5219_vm5, %v1891_v11, %v1907_v0  ;;  %v1947_v16 = vrot.slane %v1931_v36, 2  ;;  %v1322_v21 = vrot.slane %v1320_v28, 7 }
 0x190   :  { %1242 = vst [vmem:[#allocation4 + $0x2a] sm:$0x2] %v1241_v62  ;;  %v4638_v63 = vld [vmem:[%s7276_s1 + $0xc0] sm:$0xff]  ;;  %4343 = vmatpush.bf16.msra.mxu1 %v4622_v2  ;;  %4362 = vmatpush.bf16.msra.mxu2 %v4630_v34  ;;  %v2901_v53 = vld [vmem:[#allocation3 + $0x54] sm:$0x1]  ;;  %v2844_v47 = vsel %vm222_vm1, %v2806_v4, %v2822_v48  ;;  %v1329_v56 = vshll.u32 %v1307_v8, 16  ;;  %v2036_v2 = vpack.c.bf16 %v6196_v20, %v6196_v20 }
 0x191   :  { %v2236_v1 = vld [vmem:[#allocation4 + $0x4a] sm:$0x2]  ;;  %1245 = vst [vmem:[#allocation4 + $0x34] sm:$0x2] %v1244_v50  ;;  %4381 = vmatpush.bf16.msra.mxu3 %v4638_v63  ;;  %v2909_v10 = vpack.c.bf16 %v2901_v53, %v2901_v53  ;;  %v3005_v19 = vld [vmem:[#allocation3 + $0x56] sm:$0x1]  ;;  %v1965_v28 = vsel %vm222_vm1, %v1931_v36, %v1947_v16  ;;  %v1934_v36 = vpack.c.bf16 %v6120_v3, %v6120_v3 }
 0x192   :  { %v2237_v9 = vsel %vm5538_vm14, %v6808_v13, %v2236_v1  ;;  %2788 = vst [vmem:[#allocation4 + $0x42] sm:$0x1] %v2787_v14  ;;  %v3952_v37 = vld [vmem:[#allocation4] sm:$0xff]  ;;  %v1325_v24 = vrot.slane %v1323_v55, 7  ;;  %v3954_v12 = vld [vmem:[#allocation4 + $0xa] sm:$0xff]  ;;  %v2860_v26 = vshll.u32 %v2844_v47, 16  ;;  %v3013_v42 = vpack.c.bf16 %v3005_v19, %v3005_v19  ;;  %v6881_v38 = vpop.permute.xlu2 %3426 }
 0x193   :  { %2238 = vst [vmem:[#allocation4 + $0x4a] sm:$0x2] %v2237_v9  ;;  %v2925_v62 = vrot.slane %v2909_v10, 2  ;;  %v6871_v40 = vpop.permute.xlu0 %2315  ;;  %v1983_v27 = vshll.u32 %v1965_v28, 16  ;;  %v6885_v29 = vpop.permute.xlu1 %2317  ;;  %v2991_v0 = vld [vmem:[#allocation4 + $0x38] sm:$0x2]  ;;  %v2037_v34 = vpack.c.bf16 %v6239_v23, %v6239_v23  ;;  %v2140_v55 = vpack.c.bf16 %v6198_v7, %v6198_v7 }
 0x194   :  { %v2579_v43 = vld [vmem:[#allocation4 + $0x2c] sm:$0x2]  ;;  %1251 = vst [vmem:[#allocation4 + $0x48] sm:$0x2] %v1250_v51  ;;  %v3029_v48 = vrot.slane %v3013_v42, 2  ;;  %v1949_v8 = vrot.slane %v1933_v59, 2  ;;  %v1893_v9 = vpack.c.bf16 %v6235_v57, %v6235_v57 }
 0x195   :  { %v2580_v13 = vsel %vm5662_vm4, %v6721_v15, %v2579_v43  ;;  %1909 = vst [vmem:[#allocation4 + $0x2c] sm:$0x1] %v1908_v52  ;;  %v2950_v58 = vsel %vm222_vm1, %v2909_v10, %v2925_v62  ;;  %v1331_v15 = vrot.slane %v1329_v56, 7  ;;  %v3956_v1 = vld [vmem:[#allocation4 + $0x14] sm:$0xff]  ;;  %v1950_v52 = vrot.slane %v1934_v36, 2 }
 0x196   :  { %2581 = vst [vmem:[#allocation4 + $0x2c] sm:$0x2] %v2580_v13  ;;  %v2965_v50 = vrot.slane %v2950_v58, 7  ;;  %v3958_v51 = vld [vmem:[#allocation4 + $0x1e] sm:$0xff]  ;;  %v3049_v23 = vsel %vm222_vm1, %v3013_v42, %v3029_v48  ;;  %v2052_v53 = vrot.slane %v2036_v2, 2  ;;  %v2156_v10 = vrot.slane %v2140_v55, 2 }
 0x197   :  { %v1352_v49 = vld [vmem:[#allocation4 + $0x2a] sm:$0x2]  ;;  %4041 = vst [vmem:[#allocation1] ss:$4 sm:$0xff] %v3952_v37  ;;  %v1913_v16 = vld [vmem:[#allocation4 + $0x40] sm:$0x1]  ;;  %v6911_v37 = vsel %vm222_vm1, %v1933_v59, %v1949_v8 }
 0x198   :  { %v1353_v54 = vsel %vm5538_vm14, %v1322_v21, %v1352_v49  ;;  %v1355_v4 = vld [vmem:[#allocation4 + $0x34] sm:$0x2]  ;;  %4044 = vst [vmem:[#allocation1 + $0x1] ss:$4 sm:$0xff] %v3954_v12  ;;  %v2992_v20 = vsel %vm5478_vm12, %v2965_v50, %v2991_v0  ;;  %v2053_v21 = vrot.slane %v2037_v34, 2  ;;  %v3071_v56 = vshll.u32 %v3049_v23, 16 }
 0x199   :  { %1354 = vst [vmem:[#allocation4 + $0x2a] sm:$0x2] %v1353_v54  ;;  %v1356_v17 = vsel %vm5538_vm14, %v1325_v24, %v1355_v4  ;;  %v2890_v25 = vld [vmem:[#allocation4 + $0x42] sm:$0x1]  ;;  %v1914_v24 = vsel %vm5219_vm5, %v1893_v9, %v1913_v16  ;;  %v6919_v12 = vsel %vm222_vm1, %v1934_v36, %v1950_v52  ;;  %v1916_v42 = vld [vmem:[#allocation4 + $0x4a] sm:$0x1] }
 0x19a   :  { %v2588_v11 = vld [vmem:[#allocation4 + $0x4a] sm:$0x2]  ;;  %1357 = vst [vmem:[#allocation4 + $0x34] sm:$0x2] %v1356_v17  ;;  %v2891_v61 = vsel %vm5258_vm7, %v2860_v26, %v2890_v25  ;;  %v2081_v49 = vsel %vm222_vm1, %v2037_v34, %v2053_v21  ;;  %v1987_v54 = vshll.u32 %v6911_v37, 16  ;;  %v4807_v4 = vpop.permute.xlu2 %4806  ;;  %v3073_v25 = vrot.slane %v3071_v56, 7 }
 0x19b   :  { %v2589_v14 = vsel %vm5662_vm4, %v6783_v41, %v2588_v11  ;;  %2892 = vst [vmem:[#allocation4 + $0x42] sm:$0x1] %v2891_v61  ;;  %v1361_v31 = vld [vmem:[#allocation4 + $0x48] sm:$0x2]  ;;  %v6905_v7 = vpop.permute.xlu0 %2553  ;;  %v6921_v62 = vpop.permute.xlu1 %2555  ;;  %v7405_v59 = vld [vmem:[#allocation25_spill] sm:$0xff]  ;;  %v2093_v48 = vrot.slane %v2081_v49, 7  ;;  %v4808_v0 = vunpack.i.l.bf16 %v4807_v4 }
 0x19c   :  { %2590 = vst [vmem:[#allocation4 + $0x4a] sm:$0x2] %v2589_v14  ;;  %v1362_v63 = vsel %vm5538_vm14, %v1331_v15, %v1361_v31  ;;  %v2011_v3 = vld [vmem:[#allocation4 + $0x2c] sm:$0x1]  ;;  %v6932_v15 = vsel %vm222_vm1, %v2140_v55, %v2156_v10  ;;  %v2141_v11 = vpack.c.bf16 %v7405_v59, %v7405_v59  ;;  %v2756_v36 = vld [vmem:[#allocation3 + $0x40] sm:$0x1]  ;;  %v4809_v31 = vunpack.i.h.bf16 %v4807_v4 }
 0x19d   :  { %1363 = vst [vmem:[#allocation4 + $0x48] sm:$0x2] %v1362_v63  ;;  %v2012_v41 = vsel %vm5258_vm7, %v1983_v27, %v2011_v3  ;;  %v7404_v26 = vld [vmem:[#allocation8_spill] sm:$0xff]  ;;  %v1989_v27 = vshll.u32 %v6919_v12, 16  ;;  %v2198_v34 = vshll.u32 %v6932_v15, 16  ;;  %v2764_v52 = vpack.c.bf16 %v2756_v36, %v2756_v36 }
 0x19e   :  { %2013 = vst [vmem:[#allocation4 + $0x2c] sm:$0x1] %v2012_v41  ;;  %v1894_v28 = vpack.c.bf16 %v7404_v26, %v7404_v26  ;;  %v2121_v55 = vld [vmem:[#allocation4 + $0x40] sm:$0x2]  ;;  %v2780_v8 = vld [vmem:[#allocation4 + $0x2e] sm:$0x1] }
 0x19f   :  { %4047 = vst [vmem:[#allocation1 + $0x2] ss:$4 sm:$0xff] %v3956_v1  ;;  %v2757_v10 = vld [vmem:[#allocation3 + $0x50] sm:$0x1]  ;;  %v2797_v26 = vld [vmem:[#allocation3 + $0x52] sm:$0x1] }
 0x1a0   :  { %v1739_v47 = vld [vmem:[#allocation4 + $0x2a] sm:$0x2]  ;;  %4050 = vst [vmem:[#allocation1 + $0x3] ss:$4 sm:$0xff] %v3958_v51  ;;  %v2157_v51 = vrot.slane %v2141_v11, 2  ;;  %v2765_v37 = vpack.c.bf16 %v2757_v10, %v2757_v10  ;;  %v2805_v49 = vpack.c.bf16 %v2797_v26, %v2797_v26  ;;  %v2200_v12 = vrot.slane %v2198_v34, 7 }
 0x1a1   :  { %v1740_v19 = vsel %vm5662_vm4, %v6789_v22, %v1739_v47  ;;  %v1742_v43 = vld [vmem:[#allocation4 + $0x34] sm:$0x2]  ;;  %2993 = vst [vmem:[#allocation4 + $0x38] sm:$0x2] %v2992_v20  ;;  %v2796_v47 = vld [vmem:[#allocation3 + $0x42] sm:$0x1] }
 0x1a2   :  { %1741 = vst [vmem:[#allocation4 + $0x2a] sm:$0x2] %v1740_v19  ;;  %v1743_v57 = vsel %vm5662_vm4, %v6799_v45, %v1742_v43  ;;  %v3218_v13 = vld [vmem:[#allocation4 + $0x42] sm:$0x1]  ;;  %v2077_v45 = vsel %vm222_vm1, %v2036_v2, %v2052_v53  ;;  %v2118_v2 = vld [vmem:[#allocation4 + $0x36] sm:$0x2]  ;;  %v2804_v56 = vpack.c.bf16 %v2796_v47, %v2796_v47 }
 0x1a3   :  { %1744 = vst [vmem:[#allocation4 + $0x34] sm:$0x2] %v1743_v57  ;;  %v3219_v22 = vsel %vm5325_vm9, %v6850_v18, %v3218_v13  ;;  %v2092_v50 = vrot.slane %v2077_v45, 7  ;;  %v6946_v63 = vpop.permute.xlu0 %3184  ;;  %v6950_v16 = vpop.permute.xlu1 %3186  ;;  %v2783_v57 = vld [vmem:[#allocation4 + $0x38] sm:$0x1] }
 0x1a4   :  { %3220 = vst [vmem:[#allocation4 + $0x42] sm:$0x1] %v3219_v22  ;;  %v1748_v58 = vld [vmem:[#allocation4 + $0x48] sm:$0x2]  ;;  %v2179_v22 = vsel %vm222_vm1, %v2141_v11, %v2157_v51  ;;  %v2820_v45 = vrot.slane %v2804_v56, 2  ;;  %v2821_v11 = vrot.slane %v2805_v49, 2 }
 0x1a5   :  { %v1749_v18 = vsel %vm5662_vm4, %v6842_v30, %v1748_v58  ;;  %v2339_v17 = vld [vmem:[#allocation4 + $0x2c] sm:$0x1]  ;;  %1915 = vst [vmem:[#allocation4 + $0x40] sm:$0x1] %v1914_v24  ;;  %v1917_v30 = vsel %vm5219_vm5, %v1894_v28, %v1916_v42  ;;  %v2119_v43 = vsel %vm5478_vm12, %v2092_v50, %v2118_v2  ;;  %v2122_v24 = vsel %vm5478_vm12, %v2093_v48, %v2121_v55  ;;  %v2759_v28 = vld [vmem:[#allocation3 + $0x70] sm:$0x1] }
 0x1a6   :  { %1750 = vst [vmem:[#allocation4 + $0x48] sm:$0x2] %v1749_v18  ;;  %v2340_v61 = vsel %vm5325_vm9, %v6852_v44, %v2339_v17  ;;  %v2781_v42 = vsel %vm5219_vm5, %v2764_v52, %v2780_v8  ;;  %v2767_v58 = vpack.c.bf16 %v2759_v28, %v2759_v28  ;;  %v2789_v4 = vld [vmem:[#allocation4 + $0x4c] sm:$0x1]  ;;  %v2799_v18 = vld [vmem:[#allocation3 + $0x72] sm:$0x1]  ;;  %v2838_v48 = vsel %vm222_vm1, %v2804_v56, %v2820_v45 }
 0x1a7   :  { %2341 = vst [vmem:[#allocation4 + $0x2c] sm:$0x1] %v2340_v61  ;;  %v4063_v14 = vld.sshfl [vmem:[#allocation1] sm:$0xff pattern:$0x73625140]  ;;  %v2201_v59 = vshll.u32 %v2179_v22, 16  ;;  %v2807_v61 = vpack.c.bf16 %v2799_v18, %v2799_v18 }
 0x1a8   :  { %4325 = vmatmul.bf16.vlgmr.msra.gmra.mxu0 %v4063_v14  ;;  %v4064_v3 = vld.sshfl [vmem:[#allocation1 + $0x8] sm:$0xff pattern:$0x73625140]  ;;  %v4065_v1 = vld.sshfl [vmem:[#allocation1 + $0x10] sm:$0xff pattern:$0x73625140] }
 0x1a9   :  { %4344 = vmatmul.bf16.vlgmr.msra.gmra.mxu1 %v4064_v3  ;;  %4363 = vmatmul.bf16.vlgmr.msra.gmra.mxu2 %v4065_v1  ;;  %v4066_v44 = vld.sshfl [vmem:[#allocation1 + $0x18] sm:$0xff pattern:$0x73625140]  ;;  %v3103_v41 = vld [vmem:[#allocation4 + $0x38] sm:$0x2]  ;;  %v2823_v2 = vrot.slane %v2807_v61, 2 }
 0x1aa   :  { %4382 = vmatmul.bf16.vlgmr.msra.gmra.mxu3 %v4066_v44  ;;  %v3104_v20 = vsel %vm5538_vm14, %v3073_v25, %v3103_v41  ;;  %1918 = vst [vmem:[#allocation4 + $0x4a] sm:$0x1] %v1917_v30  ;;  %v1867_v23 = vld [vmem:[#allocation4 + $0x2a] sm:$0x2]  ;;  %v1870_v9 = vld [vmem:[#allocation4 + $0x34] sm:$0x2] }
 0x1ab   :  { %3105 = vst [vmem:[#allocation4 + $0x38] sm:$0x2] %v3104_v20  ;;  %v1868_v53 = vsel %vm5891_vm6, %v4808_v0, %v1867_v23  ;;  %v1871_v21 = vsel %vm5891_vm6, %v4809_v31, %v1870_v9  ;;  %v6967_v17 = vpop.permute.xlu0 %3190  ;;  %v2900_v25 = vld [vmem:[#allocation3 + $0x44] sm:$0x1]  ;;  %v2841_v31 = vsel %vm222_vm1, %v2805_v49, %v2821_v11  ;;  %v2790_v0 = vsel %vm5219_vm5, %v2767_v58, %v2789_v4  ;;  %v6977_v3 = vpop.permute.xlu1 %3424  ;;  %v3004_v44 = vld [vmem:[#allocation3 + $0x46] sm:$0x1] }
 0x1ac   :  { %v2017_v19 = vld [vmem:[#allocation4 + $0x40] sm:$0x1]  ;;  %1869 = vst [vmem:[#allocation4 + $0x2a] sm:$0x2] %v1868_v53  ;;  %v2908_v36 = vpack.c.bf16 %v2900_v25, %v2900_v25  ;;  %v2847_v41 = vsel %vm222_vm1, %v2807_v61, %v2823_v2  ;;  %v3012_v51 = vpack.c.bf16 %v3004_v44, %v3004_v44  ;;  %v2902_v8 = vld [vmem:[#allocation3 + $0x64] sm:$0x1] }
 0x1ad   :  { %v2018_v13 = vsel %vm5258_vm7, %v1987_v54, %v2017_v19  ;;  %1872 = vst [vmem:[#allocation4 + $0x34] sm:$0x2] %v1871_v21  ;;  %v2784_v54 = vsel %vm5219_vm5, %v2765_v37, %v2783_v57  ;;  %v2856_v23 = vshll.u32 %v2838_v48, 16  ;;  %v2858_v9 = vshll.u32 %v2841_v31, 16  ;;  %v2988_v53 = vld [vmem:[#allocation4 + $0x2e] sm:$0x2] }
 0x1ae   :  { %2019 = vst [vmem:[#allocation4 + $0x40] sm:$0x1] %v2018_v13  ;;  %v2924_v55 = vrot.slane %v2908_v36, 2  ;;  %v3028_v47 = vrot.slane %v3012_v51, 2  ;;  %v3006_v10 = vld [vmem:[#allocation3 + $0x66] sm:$0x1] }
 0x1af   :  { %2120 = vst [vmem:[#allocation4 + $0x36] sm:$0x2] %v2119_v43  ;;  %v2862_v56 = vshll.u32 %v2847_v41, 16  ;;  %v2994_v57 = vld [vmem:[#allocation4 + $0x42] sm:$0x2]  ;;  %v3014_v13 = vpack.c.bf16 %v3006_v10, %v3006_v10 }
 0x1b0   :  { %2123 = vst [vmem:[#allocation4 + $0x40] sm:$0x2] %v2122_v24  ;;  %v2946_v52 = vsel %vm222_vm1, %v2908_v36, %v2924_v55  ;;  %v2903_v28 = vld [vmem:[#allocation3 + $0x74] sm:$0x1]  ;;  %v3046_v49 = vsel %vm222_vm1, %v3012_v51, %v3028_v47 }
 0x1b1   :  { %v2020_v50 = vld [vmem:[#allocation4 + $0x4a] sm:$0x1]  ;;  %2782 = vst [vmem:[#allocation4 + $0x2e] sm:$0x1] %v2781_v42  ;;  %v2964_v21 = vrot.slane %v2946_v52, 7  ;;  %v3030_v4 = vrot.slane %v3014_v13, 2  ;;  %v2911_v11 = vpack.c.bf16 %v2903_v28, %v2903_v28 }
 0x1b2   :  { %v3455_v14 = vld [vmem:[#allocation4 + $0x38] sm:$0x2]  ;;  %v2021_v30 = vsel %vm5258_vm7, %v1989_v27, %v2020_v50  ;;  %2785 = vst [vmem:[#allocation4 + $0x38] sm:$0x1] %v2784_v54  ;;  %v2203_v27 = vrot.slane %v2201_v59, 7 }
 0x1b3   :  { %v3456_v1 = vsel %vm5662_vm4, %v6881_v38, %v3455_v14  ;;  %2022 = vst [vmem:[#allocation4 + $0x4a] sm:$0x1] %v2021_v30  ;;  %v2910_v38 = vpack.c.bf16 %v2902_v8, %v2902_v8  ;;  %v6991_v24 = vpop.permute.xlu0 %3428  ;;  %v2989_v25 = vsel %vm5478_vm12, %v2964_v21, %v2988_v53  ;;  %v7003_v61 = vpop.permute.xlu1 %3430  ;;  %v3068_v14 = vshll.u32 %v3046_v49, 16 }
 0x1b4   :  { %3457 = vst [vmem:[#allocation4 + $0x38] sm:$0x2] %v3456_v1  ;;  %v3052_v31 = vsel %vm222_vm1, %v3014_v13, %v3030_v4  ;;  %v3007_v1 = vld [vmem:[#allocation3 + $0x76] sm:$0x1] }
 0x1b5   :  { %v2345_v20 = vld [vmem:[#allocation4 + $0x40] sm:$0x1]  ;;  %2791 = vst [vmem:[#allocation4 + $0x4c] sm:$0x1] %v2790_v0  ;;  %v2926_v37 = vrot.slane %v2910_v38, 2  ;;  %v2927_v0 = vrot.slane %v2911_v11, 2  ;;  %v3015_v55 = vpack.c.bf16 %v3007_v1, %v3007_v1 }
 0x1b6   :  { %v2346_v15 = vsel %vm5325_vm9, %v6871_v40, %v2345_v20  ;;  %v2230_v34 = vld [vmem:[#allocation4 + $0x36] sm:$0x2]  ;;  %v4822_v40 = vpop.permute.xlu2 %4821  ;;  %2990 = vst [vmem:[#allocation4 + $0x2e] sm:$0x2] %v2989_v25  ;;  %v3841_v1 = vld [vmem:[#allocation3 + $0x18] sm:$0x1] }
 0x1b7   :  { %2347 = vst [vmem:[#allocation4 + $0x40] sm:$0x1] %v2346_v15  ;;  %v2231_v19 = vsel %vm5538_vm14, %v2200_v12, %v2230_v34  ;;  %v2233_v43 = vld [vmem:[#allocation4 + $0x40] sm:$0x2]  ;;  %v2954_v58 = vsel %vm222_vm1, %v2910_v38, %v2926_v37  ;;  %v4823_v48 = vunpack.i.l.bf16 %v4822_v40  ;;  %v2958_v41 = vsel %vm222_vm1, %v2911_v11, %v2927_v0  ;;  %v2997_v38 = vld [vmem:[#allocation4 + $0x4c] sm:$0x2] }
 0x1b8   :  { %2232 = vst [vmem:[#allocation4 + $0x36] sm:$0x2] %v2231_v19  ;;  %v2234_v22 = vsel %vm5538_vm14, %v2203_v27, %v2233_v43  ;;  %v2884_v26 = vld [vmem:[#allocation4 + $0x2e] sm:$0x1]  ;;  %v2966_v59 = vrot.slane %v2954_v58, 7  ;;  %v3074_v27 = vshll.u32 %v3052_v31, 16  ;;  %v4824_v20 = vunpack.i.h.bf16 %v4822_v40 }
 0x1b9   :  { %2235 = vst [vmem:[#allocation4 + $0x40] sm:$0x2] %v2234_v22  ;;  %v2885_v42 = vsel %vm5258_vm7, %v2856_v23, %v2884_v26  ;;  %v2887_v45 = vld [vmem:[#allocation4 + $0x38] sm:$0x1]  ;;  %v3070_v23 = vrot.slane %v3068_v14, 7  ;;  %v2967_v21 = vrot.slane %v2958_v41, 7 }
 0x1ba   :  { %v2348_v54 = vld [vmem:[#allocation4 + $0x4a] sm:$0x1]  ;;  %2886 = vst [vmem:[#allocation4 + $0x2e] sm:$0x1] %v2885_v42  ;;  %v2888_v18 = vsel %vm5258_vm7, %v2858_v9, %v2887_v45  ;;  %v2995_v30 = vsel %vm5478_vm12, %v2966_v59, %v2994_v57  ;;  %v3076_v19 = vrot.slane %v3074_v27, 7 }
 0x1bb   :  { %v2349_v50 = vsel %vm5325_vm9, %v6885_v29, %v2348_v54  ;;  %2889 = vst [vmem:[#allocation4 + $0x38] sm:$0x1] %v2888_v18  ;;  %v4812_v9 = vpop.permute.xlu0 %4811  ;;  %v4817_v13 = vpop.permute.xlu1 %4816  ;;  %v2998_v26 = vsel %vm5478_vm12, %v2967_v21, %v2997_v38  ;;  %v1876_v42 = vld [vmem:[#allocation4 + $0x48] sm:$0x2]  ;;  %v1873_v58 = vld [vmem:[#allocation4 + $0x3e] sm:$0x2] }
 0x1bc   :  { %2350 = vst [vmem:[#allocation4 + $0x4a] sm:$0x1] %v2349_v50  ;;  %v2893_v36 = vld [vmem:[#allocation4 + $0x4c] sm:$0x1]  ;;  %v4814_v43 = vunpack.i.h.bf16 %v4812_v9  ;;  %v4813_v57 = vunpack.i.l.bf16 %v4812_v9  ;;  %v4819_v54 = vunpack.i.h.bf16 %v4817_v13  ;;  %v4649_v18 = vld [vmem:[%s7276_s1 + $0x118] sm:$0xff]  ;;  %v4818_v11 = vunpack.i.l.bf16 %v4817_v13 }
 0x1bd   :  { %v2894_v2 = vsel %vm5258_vm7, %v2862_v56, %v2893_v36  ;;  %2996 = vst [vmem:[#allocation4 + $0x42] sm:$0x2] %v2995_v30  ;;  %v3100_v37 = vld [vmem:[#allocation4 + $0x2e] sm:$0x2]  ;;  %v2462_v59 = vld [vmem:[#allocation4 + $0x36] sm:$0x1]  ;;  %4397 = vmatpush.bf16.msrb.mxu0 %v4649_v18  ;;  %4689 = vmatpush.bf16.msrb.mxu1 %v4649_v18 }
 0x1be   :  { %v2465_v12 = vld [vmem:[#allocation4 + $0x40] sm:$0x1]  ;;  %2895 = vst [vmem:[#allocation4 + $0x4c] sm:$0x1] %v2894_v2  ;;  %v4837_v56 = vpop.permute.xlu2 %4836  ;;  %v3101_v22 = vsel %vm5538_vm14, %v3070_v23, %v3100_v37  ;;  %v1877_v4 = vsel %vm5891_vm6, %v4814_v43, %v1876_v42  ;;  %v2463_v30 = vsel %vm5557_vm15, %v4819_v54, %v2462_v59  ;;  %v3840_v31 = vld [vmem:[#allocation3 + $0x8] sm:$0x1] }
 0x1bf   :  { %v2582_v29 = vld [vmem:[#allocation4 + $0x36] sm:$0x2]  ;;  %v2466_v44 = vsel %vm5557_vm15, %v4823_v48, %v2465_v12  ;;  %3102 = vst [vmem:[#allocation4 + $0x2e] sm:$0x2] %v3101_v22  ;;  %v4838_v45 = vunpack.i.l.bf16 %v4837_v56  ;;  %v4839_v35 = vunpack.i.h.bf16 %v4837_v56  ;;  %v4648_v48 = vld [vmem:[%s7276_s1 + $0x110] sm:$0xff]  ;;  %v7066_v21 = vpack.c.bf16 %v3840_v31, %v3840_v31  ;;  %v4647_v18 = vld [vmem:[%s7276_s1 + $0x108] sm:$0xff] }
 0x1c0   :  { %v2583_v51 = vsel %vm5662_vm4, %v6905_v7, %v2582_v29  ;;  %v2585_v8 = vld [vmem:[#allocation4 + $0x40] sm:$0x2]  ;;  %2467 = vst [vmem:[#allocation4 + $0x40] sm:$0x1] %v2466_v44  ;;  %v3031_v7 = vrot.slane %v3015_v55, 2 }
 0x1c1   :  { %2584 = vst [vmem:[#allocation4 + $0x36] sm:$0x2] %v2583_v51  ;;  %v2586_v52 = vsel %vm5662_vm4, %v6921_v62, %v2585_v8  ;;  %v3212_v53 = vld [vmem:[#allocation4 + $0x2e] sm:$0x1]  ;;  %v2459_v2 = vld [vmem:[#allocation4 + $0x2c] sm:$0x1]  ;;  %4398 = vmatpush.bf16.msrb.mxu0 %v4648_v48  ;;  %4690 = vmatpush.bf16.msrb.mxu1 %v4648_v48 }
 0x1c2   :  { %2587 = vst [vmem:[#allocation4 + $0x40] sm:$0x2] %v2586_v52  ;;  %v3213_v15 = vsel %vm5325_vm9, %v6946_v63, %v3212_v53  ;;  %v3215_v34 = vld [vmem:[#allocation4 + $0x38] sm:$0x1]  ;;  %v3055_v28 = vsel %vm222_vm1, %v3015_v55, %v3031_v7  ;;  %v3842_v12 = vld [vmem:[#allocation3 + $0x28] sm:$0x1]  ;;  %v2460_v44 = vsel %vm5557_vm15, %v4818_v11, %v2459_v2 }
 0x1c3   :  { %v2468_v47 = vld [vmem:[#allocation4 + $0x4a] sm:$0x1]  ;;  %3214 = vst [vmem:[#allocation4 + $0x2e] sm:$0x1] %v3213_v15  ;;  %v3216_v10 = vsel %vm5325_vm9, %v6950_v16, %v3215_v34  ;;  %v3077_v25 = vshll.u32 %v3055_v28, 16  ;;  %v3864_v13 = vrot.slane %v7066_v21, 2 }
 0x1c4   :  { %v2469_v62 = vsel %vm5557_vm15, %v4824_v20, %v2468_v47  ;;  %3217 = vst [vmem:[#allocation4 + $0x38] sm:$0x1] %v3216_v10  ;;  %v3106_v16 = vld [vmem:[#allocation4 + $0x42] sm:$0x2]  ;;  %v3843_v41 = vld [vmem:[#allocation3 + $0x38] sm:$0x1] }
 0x1c5   :  { %2470 = vst [vmem:[#allocation4 + $0x4a] sm:$0x1] %v2469_v62  ;;  %v3221_v63 = vld [vmem:[#allocation4 + $0x4c] sm:$0x1]  ;;  %v3107_v49 = vsel %vm5538_vm14, %v3076_v19, %v3106_v16  ;;  %v3079_v29 = vrot.slane %v3077_v25, 7  ;;  %v7072_v19 = vpack.c.bf16 %v3841_v1, %v3841_v1  ;;  %v7078_v62 = vpack.c.bf16 %v3843_v41, %v3843_v41  ;;  %v4646_v25 = vld [vmem:[%s7276_s1 + $0x100] sm:$0xff]  ;;  %4399 = vmatpush.bf16.msrb.mxu0 %v4647_v18 }
 0x1c6   :  { %v3222_v40 = vsel %vm5325_vm9, %v6967_v17, %v3221_v63  ;;  %3108 = vst [vmem:[#allocation4 + $0x42] sm:$0x2] %v3107_v49  ;;  %v1874_v17 = vsel %vm5891_vm6, %v4813_v57, %v1873_v58  ;;  %v3452_v55 = vld [vmem:[#allocation4 + $0x2e] sm:$0x2]  ;;  %v3844_v51 = vld [vmem:[#allocation3 + $0x48] sm:$0x1]  ;;  %4691 = vmatpush.bf16.msrb.mxu1 %v4647_v18  ;;  %v3874_v46 = vsel %vm222_vm1, %v7066_v21, %v3864_v13 }
 0x1c7   :  { %3223 = vst [vmem:[#allocation4 + $0x4c] sm:$0x1] %v3222_v40  ;;  %v3453_v8 = vsel %vm5662_vm4, %v6977_v3, %v3452_v55  ;;  %v2707_v15 = vld [vmem:[#allocation4 + $0x2c] sm:$0x2]  ;;  %v3845_v3 = vld [vmem:[#allocation3 + $0x58] sm:$0x1]  ;;  %v7080_v56 = vpack.c.bf16 %v3844_v51, %v3844_v51 }
 0x1c8   :  { %2999 = vst [vmem:[#allocation4 + $0x4c] sm:$0x2] %v2998_v26  ;;  %v2710_v52 = vld [vmem:[#allocation4 + $0x36] sm:$0x2]  ;;  %v3846_v7 = vld [vmem:[#allocation3 + $0x68] sm:$0x1]  ;;  %v7082_v37 = vpack.c.bf16 %v3845_v3, %v3845_v3 }
 0x1c9   :  { %1878 = vst [vmem:[#allocation4 + $0x48] sm:$0x2] %v1877_v4  ;;  %v7076_v43 = vpop.permute.xlu2 %4851  ;;  %v7084_v57 = vpack.c.bf16 %v3846_v7, %v3846_v7  ;;  %v3865_v40 = vrot.slane %v7072_v19, 2  ;;  %v3867_v42 = vrot.slane %v7078_v62, 2  ;;  %v3338_v49 = vld [vmem:[#allocation4 + $0x42] sm:$0x1]  ;;  %4400 = vmatpush.bf16.msrb.mxu0 %v4646_v25 }
 0x1ca   :  { %v3332_v50 = vld [vmem:[#allocation4 + $0x2e] sm:$0x1]  ;;  %1875 = vst [vmem:[#allocation4 + $0x3e] sm:$0x2] %v1874_v17  ;;  %v4853_v63 = vunpack.i.l.bf16 %v7076_v43  ;;  %v3869_v4 = vrot.slane %v7082_v37, 2  ;;  %4692 = vmatpush.bf16.msrb.mxu1 %v4646_v25 }
 0x1cb   :  { %v3333_v36 = vsel %vm5557_vm15, %v4838_v45, %v3332_v50  ;;  %v3335_v14 = vld [vmem:[#allocation4 + $0x38] sm:$0x1]  ;;  %2464 = vst [vmem:[#allocation4 + $0x36] sm:$0x1] %v2463_v30  ;;  %v3868_v45 = vrot.slane %v7080_v56, 2  ;;  %v3870_v54 = vrot.slane %v7084_v57, 2 }
 0x1cc   :  { %3334 = vst [vmem:[#allocation4 + $0x2e] sm:$0x1] %v3333_v36  ;;  %v3336_v0 = vsel %vm5557_vm15, %v4839_v35, %v3335_v14  ;;  %v3592_v48 = vld [vmem:[#allocation3 + $0x2] sm:$0x1]  ;;  %v2713_v14 = vld [vmem:[#allocation4 + $0x40] sm:$0x2] }
 0x1cd   :  { %3337 = vst [vmem:[#allocation4 + $0x38] sm:$0x1] %v3336_v0  ;;  %v3458_v9 = vld [vmem:[#allocation4 + $0x42] sm:$0x2]  ;;  %v2716_v30 = vld [vmem:[#allocation4 + $0x4a] sm:$0x2]  ;;  %v3600_v1 = vpack.c.bf16 %v3592_v48, %v3592_v48 }
 0x1ce   :  { %3454 = vst [vmem:[#allocation4 + $0x2e] sm:$0x2] %v3453_v8  ;;  %v3459_v53 = vsel %vm5662_vm4, %v6991_v24, %v3458_v9  ;;  %v7074_v24 = vpack.c.bf16 %v3842_v12, %v3842_v12  ;;  %v3341_v58 = vld [vmem:[#allocation4 + $0x4c] sm:$0x1]  ;;  %v3593_v0 = vld [vmem:[#allocation3 + $0x12] sm:$0x1]  ;;  %v3604_v9 = vpack.c.bf16 %v3596_v32, %v3596_v32 }
 0x1cf   :  { %v3109_v38 = vld [vmem:[#allocation4 + $0x4c] sm:$0x2]  ;;  %2461 = vst [vmem:[#allocation4 + $0x2c] sm:$0x1] %v2460_v44  ;;  %v3594_v2 = vld [vmem:[#allocation3 + $0x22] sm:$0x1]  ;;  %v3601_v44 = vpack.c.bf16 %v3593_v0, %v3593_v0 }
 0x1d0   :  { %3460 = vst [vmem:[#allocation4 + $0x42] sm:$0x2] %v3459_v53  ;;  %v3110_v47 = vsel %vm5538_vm14, %v3079_v29, %v3109_v38  ;;  %v3866_v16 = vrot.slane %v7074_v24, 2  ;;  %v3595_v29 = vld [vmem:[#allocation3 + $0x32] sm:$0x1]  ;;  %v3605_v38 = vpack.c.bf16 %v3597_v6, %v3597_v6 }
 0x1d1   :  { %v4827_v27 = vpop.permute.xlu0 %4826  ;;  %3111 = vst [vmem:[#allocation4 + $0x4c] sm:$0x2] %v3110_v47  ;;  %v3847_v41 = vld [vmem:[#allocation3 + $0x78] sm:$0x1]  ;;  %v3603_v51 = vpack.c.bf16 %v3595_v29, %v3595_v29  ;;  %v3611_v53 = vld [vmem:[#allocation4 + $0x12] sm:$0x1]  ;;  %v4854_v47 = vunpack.i.h.bf16 %v7076_v43 }
 0x1d2   :  { %v4829_v20 = vunpack.i.h.bf16 %v4827_v27  ;;  %v4828_v23 = vunpack.i.l.bf16 %v4827_v27  ;;  %v3602_v27 = vpack.c.bf16 %v3594_v2, %v3594_v2  ;;  %v3614_v3 = vld [vmem:[#allocation4 + $0x1c] sm:$0x1]  ;;  %v3617_v7 = vld [vmem:[#allocation4 + $0x26] sm:$0x1]  ;;  %v3632_v18 = vld [vmem:[#allocation3 + $0x4] sm:$0x1] }
 0x1d3   :  { %v3633_v25 = vld [vmem:[#allocation3 + $0x14] sm:$0x1] }
 0x1d4   :  { %v2711_v34 = vsel %vm5891_vm6, %v4829_v20, %v2710_v52  ;;  %v2708_v10 = vsel %vm5891_vm6, %v4828_v23, %v2707_v15  ;;  %v3599_v23 = vld [vmem:[#allocation3 + $0x72] sm:$0x1]  ;;  %v3608_v52 = vld [vmem:[#allocation4 + $0x8] sm:$0x1] }
 0x1d5   :  { %2712 = vst [vmem:[#allocation4 + $0x36] sm:$0x2] %v2711_v34  ;;  %v3609_v15 = vsel %vm5219_vm5, %v3600_v1, %v3608_v52  ;;  %v3612_v34 = vsel %vm5219_vm5, %v3601_v44, %v3611_v53 }
 0x1d6   :  { %2709 = vst [vmem:[#allocation4 + $0x2c] sm:$0x2] %v2708_v10  ;;  %v3615_v10 = vsel %vm5219_vm5, %v3602_v27, %v3614_v3  ;;  %v3637_v27 = vld [vmem:[#allocation3 + $0x54] sm:$0x1] }
 0x1d7   :  { %v3586_v35 = vld [vmem:[#allocation4 + $0x42] sm:$0x2]  ;;  %3610 = vst [vmem:[#allocation4 + $0x8] sm:$0x1] %v3609_v15 }
 0x1d8   :  { %v3461_v59 = vld [vmem:[#allocation4 + $0x4c] sm:$0x2]  ;;  %v3587_v11 = vsel %vm5891_vm6, %v4853_v63, %v3586_v35  ;;  %v3620_v63 = vld [vmem:[#allocation4 + $0x30] sm:$0x1]  ;;  %v3629_v35 = vld [vmem:[#allocation4 + $0x4e] sm:$0x1] }
 0x1d9   :  { %v4842_v22 = vpop.permute.xlu0 %4841  ;;  %v3462_v36 = vsel %vm5662_vm4, %v7003_v61, %v3461_v59  ;;  %3588 = vst [vmem:[#allocation4 + $0x42] sm:$0x2] %v3587_v11  ;;  %v3598_v61 = vld [vmem:[#allocation3 + $0x62] sm:$0x1]  ;;  %v3580_v59 = vld [vmem:[#allocation4 + $0x2e] sm:$0x2]  ;;  %v3621_v48 = vsel %vm5219_vm5, %v3604_v9, %v3620_v63 }
 0x1da   :  { %v4844_v26 = vunpack.i.h.bf16 %v4842_v22  ;;  %v4843_v28 = vunpack.i.l.bf16 %v4842_v22  ;;  %3463 = vst [vmem:[#allocation4 + $0x4c] sm:$0x2] %v3462_v36  ;;  %v3623_v22 = vld [vmem:[#allocation4 + $0x3a] sm:$0x1]  ;;  %v3583_v11 = vld [vmem:[#allocation4 + $0x38] sm:$0x2] }
 0x1db   :  { %3613 = vst [vmem:[#allocation4 + $0x12] sm:$0x1] %v3612_v34  ;;  %v3624_v36 = vsel %vm5219_vm5, %v3605_v38, %v3623_v22  ;;  %v3736_v34 = vld [vmem:[#allocation3 + $0x6] sm:$0x1] }
 0x1dc   :  { %v3342_v17 = vsel %vm5557_vm15, %v4844_v26, %v3341_v58  ;;  %v3339_v50 = vsel %vm5557_vm15, %v4843_v28, %v3338_v49  ;;  %v3606_v26 = vpack.c.bf16 %v3598_v61, %v3598_v61  ;;  %v3607_v28 = vpack.c.bf16 %v3599_v23, %v3599_v23  ;;  %v3626_v58 = vld [vmem:[#allocation4 + $0x44] sm:$0x1]  ;;  %3616 = vst [vmem:[#allocation4 + $0x1c] sm:$0x1] %v3615_v10 }
 0x1dd   :  { %3343 = vst [vmem:[#allocation4 + $0x4c] sm:$0x1] %v3342_v17  ;;  %v4832_v31 = vpop.permute.xlu1 %4831  ;;  %v3618_v49 = vsel %vm5219_vm5, %v3603_v51, %v3617_v7  ;;  %v7122_v17 = vpack.c.bf16 %v3847_v41, %v3847_v41  ;;  %v3638_v41 = vld [vmem:[#allocation3 + $0x64] sm:$0x1]  ;;  %v3645_v23 = vpack.c.bf16 %v3637_v27, %v3637_v27 }
 0x1de   :  { %v4834_v12 = vunpack.i.h.bf16 %v4832_v31  ;;  %v4833_v55 = vunpack.i.l.bf16 %v4832_v31  ;;  %3340 = vst [vmem:[#allocation4 + $0x42] sm:$0x1] %v3339_v50  ;;  %v3641_v31 = vpack.c.bf16 %v3633_v25, %v3633_v25  ;;  %v3627_v32 = vsel %vm5219_vm5, %v3606_v26, %v3626_v58 }
 0x1df   :  { %3619 = vst [vmem:[#allocation4 + $0x26] sm:$0x1] %v3618_v49  ;;  %v3630_v44 = vsel %vm5219_vm5, %v3607_v28, %v3629_v35  ;;  %v3646_v9 = vpack.c.bf16 %v3638_v41, %v3638_v41  ;;  %v3712_v28 = vld [vmem:[#allocation4 + $0x8] sm:$0x1] }
 0x1e0   :  { %v2717_v8 = vsel %vm5891_vm6, %v4834_v12, %v2716_v30  ;;  %v2714_v20 = vsel %vm5891_vm6, %v4833_v55, %v2713_v14  ;;  %v3634_v14 = vld [vmem:[#allocation3 + $0x24] sm:$0x1]  ;;  %v3640_v30 = vpack.c.bf16 %v3632_v18, %v3632_v18  ;;  %v3635_v12 = vld [vmem:[#allocation3 + $0x34] sm:$0x1]  ;;  %3622 = vst [vmem:[#allocation4 + $0x30] sm:$0x1] %v3621_v48 }
 0x1e1   :  { %2718 = vst [vmem:[#allocation4 + $0x4a] sm:$0x2] %v2717_v8  ;;  %v3589_v43 = vld [vmem:[#allocation4 + $0x4c] sm:$0x2]  ;;  %v3636_v55 = vld [vmem:[#allocation3 + $0x44] sm:$0x1]  ;;  %v3642_v29 = vpack.c.bf16 %v3634_v14, %v3634_v14  ;;  %v3643_v6 = vpack.c.bf16 %v3635_v12, %v3635_v12 }
 0x1e2   :  { %2715 = vst [vmem:[#allocation4 + $0x40] sm:$0x2] %v2714_v20  ;;  %v3590_v0 = vsel %vm5891_vm6, %v4854_v47, %v3589_v43  ;;  %v3644_v61 = vpack.c.bf16 %v3636_v55, %v3636_v55  ;;  %v3639_v20 = vld [vmem:[#allocation3 + $0x74] sm:$0x1]  ;;  %v3656_v38 = vrot.slane %v3640_v30, 2  ;;  %v3657_v33 = vrot.slane %v3641_v31, 2 }
 0x1e3   :  { %3591 = vst [vmem:[#allocation4 + $0x4c] sm:$0x2] %v3590_v0  ;;  %v3647_v53 = vpack.c.bf16 %v3639_v20, %v3639_v20  ;;  %v3658_v15 = vrot.slane %v3642_v29, 2  ;;  %v3659_v3 = vrot.slane %v3643_v6, 2  ;;  %v3661_v47 = vrot.slane %v3645_v23, 2 }
 0x1e4   :  { %v3660_v7 = vrot.slane %v3644_v61, 2  ;;  %v3662_v10 = vrot.slane %v3646_v9, 2  ;;  %v3666_v39 = vsel %vm222_vm1, %v3640_v30, %v3656_v38  ;;  %v3669_v22 = vsel %vm222_vm1, %v3641_v31, %v3657_v33  ;;  %3625 = vst [vmem:[#allocation4 + $0x3a] sm:$0x1] %v3624_v36  ;;  %v3715_v25 = vld [vmem:[#allocation4 + $0x12] sm:$0x1] }
 0x1e5   :  { %v4847_v50 = vpop.permute.xlu1 %4846  ;;  %v3663_v63 = vrot.slane %v3647_v53, 2  ;;  %v3672_v26 = vsel %vm222_vm1, %v3642_v29, %v3658_v15  ;;  %v3675_v49 = vsel %vm222_vm1, %v3643_v6, %v3659_v3  ;;  %v3681_v35 = vsel %vm222_vm1, %v3645_v23, %v3661_v47  ;;  %v3718_v43 = vld [vmem:[#allocation4 + $0x1c] sm:$0x1]  ;;  %3628 = vst [vmem:[#allocation4 + $0x44] sm:$0x1] %v3627_v32 }
 0x1e6   :  { %v4849_v2 = vunpack.i.h.bf16 %v4847_v50  ;;  %v4848_v1 = vunpack.i.l.bf16 %v4847_v50  ;;  %v3678_v58 = vsel %vm222_vm1, %v3644_v61, %v3660_v7  ;;  %v3684_v18 = vsel %vm222_vm1, %v3646_v9, %v3662_v10  ;;  %3631 = vst [vmem:[#allocation4 + $0x4e] sm:$0x1] %v3630_v44  ;;  %v3721_v55 = vld [vmem:[#allocation4 + $0x26] sm:$0x1]  ;;  %v3737_v61 = vld [vmem:[#allocation3 + $0x16] sm:$0x1] }
 0x1e7   :  { %v3690_v50 = vshll.u32 %v3669_v22, 16  ;;  %v3692_v48 = vshll.u32 %v3672_v26, 16  ;;  %v3871_v14 = vrot.slane %v7122_v17, 2  ;;  %v3694_v36 = vshll.u32 %v3675_v49, 16  ;;  %v3724_v41 = vld [vmem:[#allocation4 + $0x30] sm:$0x1] }
 0x1e8   :  { %v3584_v51 = vsel %vm5891_vm6, %v4849_v2, %v3583_v11  ;;  %v3581_v8 = vsel %vm5891_vm6, %v4848_v1, %v3580_v59  ;;  %v3687_v59 = vsel %vm222_vm1, %v3647_v53, %v3663_v63  ;;  %v3688_v11 = vshll.u32 %v3666_v39, 16  ;;  %v3738_v20 = vld [vmem:[#allocation3 + $0x26] sm:$0x1]  ;;  %v3739_v23 = vld [vmem:[#allocation3 + $0x36] sm:$0x1] }
 0x1e9   :  { %3585 = vst [vmem:[#allocation4 + $0x38] sm:$0x2] %v3584_v51  ;;  %v3964_v52 = vld [vmem:[#allocation4 + $0x3c] sm:$0xff]  ;;  %v3696_v31 = vshll.u32 %v3678_v58, 16  ;;  %v3744_v0 = vpack.c.bf16 %v3736_v34, %v3736_v34  ;;  %v3698_v2 = vshll.u32 %v3681_v35, 16  ;;  %v3700_v1 = vshll.u32 %v3684_v18, 16 }
 0x1ea   :  { %3582 = vst [vmem:[#allocation4 + $0x2e] sm:$0x2] %v3581_v8  ;;  %v3966_v30 = vld [vmem:[#allocation4 + $0x46] sm:$0xff]  ;;  %v3713_v12 = vsel %vm5258_vm7, %v3688_v11, %v3712_v28  ;;  %v3702_v32 = vshll.u32 %v3687_v59, 16  ;;  %v3716_v27 = vsel %vm5258_vm7, %v3690_v50, %v3715_v25  ;;  %v3719_v44 = vsel %vm5258_vm7, %v3692_v48, %v3718_v43  ;;  %v3741_v7 = vld [vmem:[#allocation3 + $0x56] sm:$0x1] }
 0x1eb   :  { %4073 = vst [vmem:[#allocation1 + $0x2] ss:$4 sm:$0xff] %v3964_v52  ;;  %v3760_v51 = vrot.slane %v3744_v0, 2  ;;  %v3722_v8 = vsel %vm5258_vm7, %v3694_v36, %v3721_v55  ;;  %v3745_v9 = vpack.c.bf16 %v3737_v61, %v3737_v61  ;;  %v3725_v52 = vsel %vm5258_vm7, %v3696_v31, %v3724_v41  ;;  %v3727_v53 = vld [vmem:[#allocation4 + $0x3a] sm:$0x1] }
 0x1ec   :  { %4075 = vst [vmem:[#allocation1 + $0x3] ss:$4 sm:$0xff] %v3966_v30  ;;  %v3740_v38 = vld [vmem:[#allocation3 + $0x46] sm:$0x1]  ;;  %v3746_v33 = vpack.c.bf16 %v3738_v20, %v3738_v20  ;;  %v3747_v15 = vpack.c.bf16 %v3739_v23, %v3739_v23  ;;  %v3728_v34 = vsel %vm5258_vm7, %v3698_v2, %v3727_v53  ;;  %v3730_v3 = vld [vmem:[#allocation4 + $0x44] sm:$0x1]  ;;  %v3749_v22 = vpack.c.bf16 %v3741_v7, %v3741_v7 }
 0x1ed   :  { %3714 = vst [vmem:[#allocation4 + $0x8] sm:$0x1] %v3713_v12  ;;  %v3748_v47 = vpack.c.bf16 %v3740_v38, %v3740_v38  ;;  %v3731_v10 = vsel %vm5258_vm7, %v3700_v1, %v3730_v3  ;;  %v3733_v63 = vld [vmem:[#allocation4 + $0x4e] sm:$0x1]  ;;  %v3742_v39 = vld [vmem:[#allocation3 + $0x66] sm:$0x1]  ;;  %v3770_v26 = vsel %vm222_vm1, %v3744_v0, %v3760_v51  ;;  %v3877_v23 = vsel %vm222_vm1, %v7072_v19, %v3865_v40 }
 0x1ee   :  { %3717 = vst [vmem:[#allocation4 + $0x12] sm:$0x1] %v3716_v27  ;;  %v3734_v28 = vsel %vm5258_vm7, %v3702_v32, %v3733_v63  ;;  %v3743_v49 = vld [vmem:[#allocation3 + $0x76] sm:$0x1]  ;;  %v3750_v58 = vpack.c.bf16 %v3742_v39, %v3742_v39  ;;  %v3761_v35 = vrot.slane %v3745_v9, 2  ;;  %v3762_v18 = vrot.slane %v3746_v33, 2 }
 0x1ef   :  { %3720 = vst [vmem:[#allocation4 + $0x1c] sm:$0x1] %v3719_v44  ;;  %v3751_v25 = vpack.c.bf16 %v3743_v49, %v3743_v49  ;;  %v3763_v43 = vrot.slane %v3747_v15, 2  ;;  %v3764_v59 = vrot.slane %v3748_v47, 2  ;;  %v3765_v11 = vrot.slane %v3749_v22, 2 }
 0x1f0   :  { %v3962_v29 = vld [vmem:[#allocation4 + $0x32] sm:$0xff]  ;;  %3723 = vst [vmem:[#allocation4 + $0x26] sm:$0x1] %v3722_v8  ;;  %v3766_v50 = vrot.slane %v3750_v58, 2  ;;  %v3774_v48 = vsel %vm222_vm1, %v3745_v9, %v3761_v35  ;;  %v3778_v30 = vsel %vm222_vm1, %v3746_v33, %v3762_v18  ;;  %v3800_v36 = vrot.slane %v3770_v26, 7 }
 0x1f1   :  { %v3960_v6 = vld [vmem:[#allocation4 + $0x28] sm:$0xff]  ;;  %4071 = vst [vmem:[#allocation1 + $0x1] ss:$4 sm:$0xff] %v3962_v29  ;;  %v3782_v1 = vsel %vm222_vm1, %v3747_v15, %v3763_v43  ;;  %v3786_v12 = vsel %vm222_vm1, %v3748_v47, %v3764_v59  ;;  %v3790_v55 = vsel %vm222_vm1, %v3749_v22, %v3765_v11  ;;  %v3767_v21 = vrot.slane %v3751_v25, 2  ;;  %v3819_v38 = vld [vmem:[#allocation4 + $0x12] sm:$0x2] }
 0x1f2   :  { %4069 = vst [vmem:[#allocation1] ss:$4 sm:$0xff] %v3960_v6  ;;  %v3816_v31 = vld [vmem:[#allocation4 + $0x8] sm:$0x2]  ;;  %v3794_v27 = vsel %vm222_vm1, %v3750_v58, %v3766_v50  ;;  %v3801_v13 = vrot.slane %v3774_v48, 7  ;;  %v3802_v6 = vrot.slane %v3778_v30, 7  ;;  %v3880_v9 = vsel %vm222_vm1, %v7074_v24, %v3866_v16 }
 0x1f3   :  { %3726 = vst [vmem:[#allocation4 + $0x30] sm:$0x1] %v3725_v52  ;;  %v3817_v41 = vsel %vm5478_vm12, %v3800_v36, %v3816_v31  ;;  %v3803_v44 = vrot.slane %v3782_v1, 7  ;;  %v3804_v61 = vrot.slane %v3786_v12, 7  ;;  %v3805_v51 = vrot.slane %v3790_v55, 7 }
 0x1f4   :  { %3729 = vst [vmem:[#allocation4 + $0x3a] sm:$0x1] %v3728_v34  ;;  %v3806_v8 = vrot.slane %v3794_v27, 7  ;;  %v3896_v20 = vshll.u32 %v3874_v46, 16  ;;  %v3883_v52 = vsel %vm222_vm1, %v7078_v62, %v3867_v42  ;;  %v3798_v53 = vsel %vm222_vm1, %v3751_v25, %v3767_v21  ;;  %v3822_v33 = vld [vmem:[#allocation4 + $0x1c] sm:$0x2] }
 0x1f5   :  { %3732 = vst [vmem:[#allocation4 + $0x44] sm:$0x1] %v3731_v10  ;;  %v3825_v15 = vld [vmem:[#allocation4 + $0x26] sm:$0x2]  ;;  %v3807_v34 = vrot.slane %v3798_v53, 7  ;;  %v3820_v3 = vsel %vm5478_vm12, %v3801_v13, %v3819_v38  ;;  %v3823_v19 = vsel %vm5478_vm12, %v3802_v6, %v3822_v33  ;;  %v3886_v62 = vsel %vm222_vm1, %v7080_v56, %v3868_v45 }
 0x1f6   :  { %3735 = vst [vmem:[#allocation4 + $0x4e] sm:$0x1] %v3734_v28  ;;  %v3826_v24 = vsel %vm5478_vm12, %v3803_v44, %v3825_v15  ;;  %v3828_v40 = vld [vmem:[#allocation4 + $0x30] sm:$0x2]  ;;  %v3831_v16 = vld [vmem:[#allocation4 + $0x3a] sm:$0x2]  ;;  %v3889_v10 = vsel %vm222_vm1, %v7082_v37, %v3869_v4  ;;  %v3892_v56 = vsel %vm222_vm1, %v7084_v57, %v3870_v54  ;;  %v3895_v37 = vsel %vm222_vm1, %v7122_v17, %v3871_v14 }
 0x1f7   :  { %3818 = vst [vmem:[#allocation4 + $0x8] sm:$0x2] %v3817_v41  ;;  %v3829_v42 = vsel %vm5478_vm12, %v3804_v61, %v3828_v40  ;;  %v3834_v7 = vld [vmem:[#allocation4 + $0x44] sm:$0x2]  ;;  %v3837_v47 = vld [vmem:[#allocation4 + $0x4e] sm:$0x2]  ;;  %v3832_v63 = vsel %vm5478_vm12, %v3805_v51, %v3831_v16 }
 0x1f8   :  { %3821 = vst [vmem:[#allocation4 + $0x12] sm:$0x2] %v3820_v3  ;;  %v3899_v39 = vshll.u32 %v3877_v23, 16  ;;  %v3902_v22 = vshll.u32 %v3880_v9, 16  ;;  %v3835_v45 = vsel %vm5478_vm12, %v3806_v8, %v3834_v7  ;;  %v3898_v26 = vrot.slane %v3896_v20, 7 }
 0x1f9   :  { %v4084_v0 = vld.sshfl [vmem:[#allocation1] sm:$0xff pattern:$0x73625140]  ;;  %v4085_v2 = vld.sshfl [vmem:[#allocation1 + $0x8] sm:$0xff pattern:$0x73625140]  ;;  %v3838_v4 = vsel %vm5478_vm12, %v3807_v34, %v3837_v47 }
 0x1fa   :  { %4330 = vmatmul.bf16.gmra.mxu0 %v4084_v0  ;;  %4349 = vmatmul.bf16.gmra.mxu1 %v4085_v2  ;;  %v4086_v29 = vld.sshfl [vmem:[#allocation1 + $0x10] sm:$0xff pattern:$0x73625140]  ;;  %v4087_v32 = vld.sshfl [vmem:[#allocation1 + $0x18] sm:$0xff pattern:$0x73625140] }
 0x1fb   :  { %4368 = vmatmul.bf16.gmra.mxu2 %v4086_v29  ;;  %4387 = vmatmul.bf16.gmra.mxu3 %v4087_v32  ;;  %3824 = vst [vmem:[#allocation4 + $0x1c] sm:$0x2] %v3823_v19  ;;  %v3905_v28 = vshll.u32 %v3883_v52, 16  ;;  %v3908_v49 = vshll.u32 %v3886_v62, 16  ;;  %v3901_v58 = vrot.slane %v3899_v39, 7  ;;  %v3911_v35 = vshll.u32 %v3889_v10, 16 }
 0x1fc   :  { %3827 = vst [vmem:[#allocation4 + $0x26] sm:$0x2] %v3826_v24  ;;  %v3904_v57 = vrot.slane %v3902_v22, 7  ;;  %v3914_v54 = vshll.u32 %v3892_v56, 16  ;;  %v3917_v43 = vshll.u32 %v3895_v37, 16 }
 0x1fd   :  { %3830 = vst [vmem:[#allocation4 + $0x30] sm:$0x2] %v3829_v42  ;;  %v3907_v25 = vrot.slane %v3905_v28, 7  ;;  %v3910_v11 = vrot.slane %v3908_v49, 7  ;;  %v3913_v14 = vrot.slane %v3911_v35, 7 }
 0x1fe   :  { %3833 = vst [vmem:[#allocation4 + $0x3a] sm:$0x2] %v3832_v63  ;;  %v3928_v18 = vld [vmem:[#allocation4 + $0x8] sm:$0x2]  ;;  %v3916_v48 = vrot.slane %v3914_v54, 7  ;;  %v3919_v31 = vrot.slane %v3917_v43, 7 }
 0x1ff   :  { %3836 = vst [vmem:[#allocation4 + $0x44] sm:$0x2] %v3835_v45  ;;  %v3929_v59 = vsel %vm5538_vm14, %v3898_v26, %v3928_v18  ;;  %v3931_v17 = vld [vmem:[#allocation4 + $0x12] sm:$0x2]  ;;  %v4855_v42 = vld [vmem:[%s7277_s2] ss:$0 sm:$0xff] }
 0x200   :  { %3839 = vst [vmem:[#allocation4 + $0x4e] sm:$0x2] %v3838_v4  ;;  %v3932_v60 = vsel %vm5538_vm14, %v3901_v58, %v3931_v17  ;;  %v4856_v22 = vld [vmem:[%s7278_s3] ss:$0 sm:$0xff] }
 0x201   :  { %3930 = vst [vmem:[#allocation4 + $0x8] sm:$0x2] %v3929_v59 }
 0x202   :  { %v3934_v50 = vld [vmem:[#allocation4 + $0x1c] sm:$0x2]  ;;  %3933 = vst [vmem:[#allocation4 + $0x12] sm:$0x2] %v3932_v60 }
 0x203   :  { %v3935_v30 = vsel %vm5538_vm14, %v3904_v57, %v3934_v50  ;;  %v3937_v36 = vld [vmem:[#allocation4 + $0x26] sm:$0x2] }
 0x204   :  { %3936 = vst [vmem:[#allocation4 + $0x1c] sm:$0x2] %v3935_v30  ;;  %v3938_v46 = vsel %vm5538_vm14, %v3907_v25, %v3937_v36  ;;  %v3940_v0 = vld [vmem:[#allocation4 + $0x30] sm:$0x2] }
 0x205   :  { %3939 = vst [vmem:[#allocation4 + $0x26] sm:$0x2] %v3938_v46  ;;  %v3941_v2 = vsel %vm5538_vm14, %v3910_v11, %v3940_v0  ;;  %v3943_v1 = vld [vmem:[#allocation4 + $0x3a] sm:$0x2] }
 0x206   :  { %3942 = vst [vmem:[#allocation4 + $0x30] sm:$0x2] %v3941_v2  ;;  %v3944_v12 = vsel %vm5538_vm14, %v3913_v14, %v3943_v1  ;;  %v3946_v55 = vld [vmem:[#allocation4 + $0x44] sm:$0x2] }
 0x207   :  { %3945 = vst [vmem:[#allocation4 + $0x3a] sm:$0x2] %v3944_v12  ;;  %v3947_v29 = vsel %vm5538_vm14, %v3916_v48, %v3946_v55  ;;  %v3949_v32 = vld [vmem:[#allocation4 + $0x4e] sm:$0x2] }
 0x208   :  { %3948 = vst [vmem:[#allocation4 + $0x44] sm:$0x2] %v3947_v29  ;;  %v3950_v27 = vsel %vm5538_vm14, %v3919_v31, %v3949_v32  ;;  %v3953_v41 = vld [vmem:[#allocation4 + $0x8] sm:$0x3] }
 0x209   :  { %3951 = vst [vmem:[#allocation4 + $0x4e] sm:$0x2] %v3950_v27  ;;  %v3955_v21 = vld [vmem:[#allocation4 + $0x12] sm:$0x3] }
 0x20a   :  { %4053 = vst [vmem:[#allocation1 + $0x20] ss:$4 sm:$0xff] %v3953_v41 }
 0x20b   :  { %v3957_v13 = vld [vmem:[#allocation4 + $0x1c] sm:$0x3]  ;;  %4056 = vst [vmem:[#allocation1 + $0x21] ss:$4 sm:$0xff] %v3955_v21 }
 0x20c   :  { %v3959_v6 = vld [vmem:[#allocation4 + $0x26] sm:$0x3]  ;;  %4059 = vst [vmem:[#allocation1 + $0x22] ss:$4 sm:$0xff] %v3957_v13 }
 0x20d   :  { %4062 = vst [vmem:[#allocation1 + $0x23] ss:$4 sm:$0xff] %v3959_v6  ;;  %v3961_v44 = vld [vmem:[#allocation4 + $0x30] sm:$0x3] }
 0x20e   :  { %v3963_v61 = vld [vmem:[#allocation4 + $0x3a] sm:$0x3] }
 0x20f   :  { %v3965_v51 = vld [vmem:[#allocation4 + $0x44] sm:$0x3] }
 0x210   :  { %v3967_v20 = vld [vmem:[#allocation4 + $0x4e] sm:$0x3] }
 0x214   :  { %v4067_v8 = vld.sshfl [vmem:[#allocation1 + $0x20] sm:$0xff pattern:$0x73625140] }
 0x215   :  { %4077 = vst [vmem:[#allocation1 + $0x20] ss:$4 sm:$0xff] %v3961_v44  ;;  %4612 = vmatmul.msk.bf16.vlgmr.msrb.gmra.mxu0 %vm18_vm0, %v4067_v8 }
 0x216   :  { %4079 = vst [vmem:[#allocation1 + $0x21] ss:$4 sm:$0xff] %v3963_v61 }
 0x217   :  { %4081 = vst [vmem:[#allocation1 + $0x22] ss:$4 sm:$0xff] %v3965_v51 }
 0x218   :  { %4083 = vst [vmem:[#allocation1 + $0x23] ss:$4 sm:$0xff] %v3967_v20 }
 0x21f   :  { %v4088_v5 = vld.sshfl [vmem:[#allocation1 + $0x20] sm:$0xff pattern:$0x73625140] }
 0x220   :  { %4613 = vmatmul.msk.bf16.vlgmr.msrb.gmra.mxu1 %vm18_vm0, %v4088_v5 }
 0x225   :  { %v4326_v23 = vpop.f32.mrf.mxu0 }
 0x226   :  { %v4345_v52 = vpop.f32.mrf.mxu1 }
 0x227   :  { %v4346_v19 = vadd.f32 %v4345_v52, %v4326_v23 }
 0x22c   :  { %v4364_v38 = vpop.f32.mrf.mxu2 }
 0x22d   :  { %v4328_v9 = vpop.f32.mrf.mxu0  ;;  %v4383_v15 = vpop.f32.mrf.mxu3  ;;  %v4365_v40 = vadd.f32 %v4364_v38, %v4346_v19 }
 0x22e   :  { %v4347_v33 = vpop.f32.mrf.mxu1 }
 0x22f   :  { %v4384_v16 = vadd.f32 %v4383_v15, %v4365_v40  ;;  %v4348_v47 = vadd.f32 %v4347_v33, %v4328_v9 }
 0x234   :  { %v4366_v24 = vpop.f32.mrf.mxu2 }
 0x235   :  { %v4385_v62 = vpop.f32.mrf.mxu3  ;;  %v4367_v56 = vadd.f32 %v4366_v24, %v4348_v47 }
 0x237   :  { %v4386_v4 = vadd.f32 %v4385_v62, %v4367_v56 }
 0x277   :  { %v4331_v53 = vpop.f32.mrf.mxu0  ;;  %v4350_v3 = vpop.f32.mrf.mxu1 }
 0x278   :  { %v4351_v26 = vadd.f32 %v4350_v3, %v4331_v53 }
 0x27e   :  { %v4369_v10 = vpop.f32.mrf.mxu2  ;;  %v4388_v49 = vpop.f32.mrf.mxu3 }
 0x27f   :  { %v4333_v34 = vpop.f32.mrf.mxu0  ;;  %v4352_v63 = vpop.f32.mrf.mxu1  ;;  %v4370_v37 = vadd.f32 %v4369_v10, %v4351_v26 }
 0x280   :  { %v4353_v14 = vadd.f32 %v4352_v63, %v4333_v34 }
 0x281   :  { %v4389_v18 = vadd.f32 %v4388_v49, %v4370_v37 }
 0x286   :  { %v4371_v25 = vpop.f32.mrf.mxu2  ;;  %v4390_v0 = vpop.f32.mrf.mxu3 }
 0x287   :  { %v4372_v30 = vadd.f32 %v4371_v25, %v4353_v14 }
 0x289   :  { %v4391_v1 = vadd.f32 %v4390_v0, %v4372_v30 }
 0x292   :  { %v4402_v7 = vpop.f32.mrf.mxu0 }
 0x293   :  { %v4403_v39 = vadd.f32 %v4402_v7, %v4384_v16 }
 0x295   :  { %v4416_v45 = vmul.f32 %v4855_v42, %v4403_v39 }
 0x297   :  { %v4424_v28 = vadd.f32 %v4856_v22, %v4416_v45 }
 0x299   :  { %v4428_v58 = vmul.f32 0.1, %v4424_v28 }
 0x29a   :  { %v4404_v35 = vpop.f32.mrf.mxu0 }
 0x29b   :  { %v4432_v57 = vmax.f32 %v4424_v28, %v4428_v58  ;;  %v4405_v54 = vadd.f32 %v4404_v35, %v4386_v4 }
 0x29d   :  { %v4440_v43 = vrot.slane %v4432_v57, 4  ;;  %v4448_v59 = vpack.c.bf16 %v4432_v57, %v4432_v57  ;;  %v4407_v11 = vpop.f32.mrf.mxu1  ;;  %v4417_v17 = vmul.f32 %v4855_v42, %v4405_v54 }
 0x29e   :  { %v4408_v60 = vadd.f32 %v4407_v11, %v4389_v18 }
 0x29f   :  { %v4449_v50 = vpack.c.bf16 %v4440_v43, %v4440_v43  ;;  %4456 = vst.msk [vmem:[%s7279_s4] sm:$0x3] %vm20_vm2, %v4448_v59  ;;  %v4425_v48 = vadd.f32 %v4856_v22, %v4417_v17 }
 0x2a0   :  { %v4418_v36 = vmul.f32 %v4855_v42, %v4408_v60 }
 0x2a1   :  { %4457 = vst.msk [vmem:[%s7279_s4 + $0x2] sm:$0x3] %vm20_vm2, %v4449_v50  ;;  %v4429_v31 = vmul.f32 0.1, %v4425_v48 }
 0x2a2   :  { %v4426_v46 = vadd.f32 %v4856_v22, %v4418_v36 }
 0x2a3   :  { %v4433_v2 = vmax.f32 %v4425_v48, %v4429_v31 }
 0x2a4   :  { %v4430_v12 = vmul.f32 0.1, %v4426_v46 }
 0x2a5   :  { %v4441_v55 = vrot.slane %v4433_v2, 4  ;;  %v4450_v29 = vpack.c.bf16 %v4433_v2, %v4433_v2  ;;  %v4409_v32 = vpop.f32.mrf.mxu1 }
 0x2a6   :  { %v4434_v27 = vmax.f32 %v4426_v46, %v4430_v12  ;;  %v4410_v41 = vadd.f32 %v4409_v32, %v4391_v1 }
 0x2a7   :  { %v4451_v21 = vpack.c.bf16 %v4441_v55, %v4441_v55  ;;  %4458 = vst.msk [vmem:[%s7279_s4 + $0x4] sm:$0x3] %vm20_vm2, %v4450_v29 }
 0x2a8   :  { %v4442_v13 = vrot.slane %v4434_v27, 4  ;;  %v4452_v6 = vpack.c.bf16 %v4434_v27, %v4434_v27  ;;  %v4419_v44 = vmul.f32 %v4855_v42, %v4410_v41 }
 0x2a9   :  { %4459 = vst.msk [vmem:[%s7279_s4 + $0x6] sm:$0x3] %vm20_vm2, %v4451_v21 }
 0x2aa   :  { %v4453_v61 = vpack.c.bf16 %v4442_v13, %v4442_v13  ;;  %4460 = vst.msk [vmem:[%s7279_s4 + $0x8] sm:$0x3] %vm20_vm2, %v4452_v6  ;;  %v4427_v51 = vadd.f32 %v4856_v22, %v4419_v44 }
 0x2ac   :  { %4461 = vst.msk [vmem:[%s7279_s4 + $0xa] sm:$0x3] %vm20_vm2, %v4453_v61  ;;  %v4431_v8 = vmul.f32 0.1, %v4427_v51 }
 0x2ae   :  { %v4435_v20 = vmax.f32 %v4427_v51, %v4431_v8 }
 0x2b0   :  { %v4443_v5 = vrot.slane %v4435_v20, 4  ;;  %v4454_v23 = vpack.c.bf16 %v4435_v20, %v4435_v20 }
 0x2b2   :  { %v4455_v9 = vpack.c.bf16 %v4443_v5, %v4443_v5  ;;  %4462 = vst.msk [vmem:[%s7279_s4 + $0xc] sm:$0x3] %vm20_vm2, %v4454_v23 }
 0x2b4   :  { %4463 = vst.msk [vmem:[%s7279_s4 + $0xe] sm:$0x3] %vm20_vm2, %v4455_v9 }

</bundles_post_ra>
